<compile_context>
chip_gen: v7x
topology: tpu7x:2x2x1
jax: 0.10.0
libtpu: 0.0.40
codegen_flags: <defaults>
</compile_context>

<pallas_src>
import functools
import math

import numpy as np
import jax
import jax.numpy as jnp
from jax import lax
from jax.experimental import pallas as pl
from jax.experimental.pallas import tpu as pltpu

# contract the last dim of both operands: Q (S, dk) x K (S, dk) -> Q @ K^T (S, S)
_TRANS_B_DIMS = (((1,), (1,)), ((), ()))


def _mha_kernel(q_ref, k_ref, v_ref, mask_ref,
                wq_ref, bq_ref, wk_ref, bk_ref,
                wv_ref, bv_ref, wx_ref, bx_ref,
                x_ref, p_ref,
                *, num_heads, key_dim, value_dim):
    """One grid step == one batch element.

    q/k/v_ref : VMEM f32 [1, S, D]
    mask_ref  : VMEM f32 [1, 1, S]        (key-padding mask; 0 => masked)
    wq/wk_ref : VMEM f32 [h, D, dk]   bq/bk_ref : [h, 1, dk]
    wv_ref    : VMEM f32 [h, D, dv]   bv_ref    : [h, 1, dv]
    wx_ref    : VMEM f32 [h, dv, D]   bx_ref    : [1, D]
    x_ref     : VMEM f32 [1, S, D]
    p_ref     : VMEM f32 [1, h, S, S]
    """
    q = q_ref[0]          # (S, D)
    k = k_ref[0]          # (S, D)
    v = v_ref[0]          # (S, D)
    mask_row = mask_ref[0]  # (1, S), broadcasts over query positions and heads

    seq_len, d_model = q.shape
    inv_sqrt_dk = jnp.float32(1.0 / math.sqrt(key_dim))
    neg_big = jnp.float32(-1e9)

    # Accumulate the output projection head-by-head: x = sum_h (p_h @ V_h) @ Wx_h + bx
    x_acc = jnp.zeros((seq_len, d_model), jnp.float32)

    for hd in range(num_heads):  # static unroll (h = 8)
        qh = jnp.dot(q, wq_ref[hd], preferred_element_type=jnp.float32) + bq_ref[hd]
        kh = jnp.dot(k, wk_ref[hd], preferred_element_type=jnp.float32) + bk_ref[hd]
        vh = jnp.dot(v, wv_ref[hd], preferred_element_type=jnp.float32) + bv_ref[hd]

        scores = lax.dot_general(qh, kh, _TRANS_B_DIMS,
                                 preferred_element_type=jnp.float32) * inv_sqrt_dk
        scores = jnp.where(mask_row == 0.0, neg_big, scores)      # (S, S)

        m = jnp.max(scores, axis=-1, keepdims=True)
        e = jnp.exp(scores - m)
        p = e / jnp.sum(e, axis=-1, keepdims=True)                # softmax over keys
        p_ref[0, hd] = p.astype(p_ref.dtype)

        ctx = jnp.dot(p, vh, preferred_element_type=jnp.float32)  # (S, dv)
        x_acc = x_acc + jnp.dot(ctx, wx_ref[hd],
                                preferred_element_type=jnp.float32)

    x_ref[0] = (x_acc + bx_ref[...]).astype(x_ref.dtype)


def _const_spec(arr):
    nd = arr.ndim
    return pl.BlockSpec(arr.shape, lambda *_: (0,) * nd)


def multi_head_attention(q, k, v, mask, params, *, num_heads, key_dim, value_dim):
    """q, k, v: (B, S, d_model); mask: (B, 1, S) with 0 = masked key, or None.

    params = (wq, bq, wk, bk, wv, bv, wx, bx) in math layout:
      wq, wk: (d_model, h*dk)   bq, bk: (h*dk,)
      wv    : (d_model, h*dv)   bv    : (h*dv,)
      wx    : (h*dv, d_model)   bx    : (d_model,)
    """
    B, S, D = q.shape
    wq, bq, wk, bk, wv, bv, wx, bx = params

    if mask is None:
        mask = jnp.ones((B, 1, S), jnp.float32)

    # Restructure weights per head so the kernel only indexes the leading axis.
    wq3 = wq.reshape(D, num_heads, key_dim).transpose(1, 0, 2)      # (h, D, dk)
    wk3 = wk.reshape(D, num_heads, key_dim).transpose(1, 0, 2)      # (h, D, dk)
    wv3 = wv.reshape(D, num_heads, value_dim).transpose(1, 0, 2)    # (h, D, dv)
    bq3 = bq.reshape(num_heads, 1, key_dim)
    bk3 = bk.reshape(num_heads, 1, key_dim)
    bv3 = bv.reshape(num_heads, 1, value_dim)
    wx3 = wx.reshape(num_heads, value_dim, D)                       # (h, dv, D)
    bx2 = bx.reshape(1, D)

    kernel = functools.partial(_mha_kernel, num_heads=num_heads,
                               key_dim=key_dim, value_dim=value_dim)

    out_shape = (
        jax.ShapeDtypeStruct((B, S, D), q.dtype),                    # x
        jax.ShapeDtypeStruct((B, num_heads, S, S), jnp.float32),     # p_attn
    )

    x, p_attn = pl.pallas_call(
        kernel,
        out_shape=out_shape,
        grid=(B,),
        in_specs=[
            pl.BlockSpec((1, S, D), lambda b: (b, 0, 0)),   # q
            pl.BlockSpec((1, S, D), lambda b: (b, 0, 0)),   # k
            pl.BlockSpec((1, S, D), lambda b: (b, 0, 0)),   # v
            pl.BlockSpec((1, 1, S), lambda b: (b, 0, 0)),   # mask
            _const_spec(wq3), _const_spec(bq3),
            _const_spec(wk3), _const_spec(bk3),
            _const_spec(wv3), _const_spec(bv3),
            _const_spec(wx3), _const_spec(bx2),
        ],
        out_specs=(
            pl.BlockSpec((1, S, D), lambda b: (b, 0, 0)),
            pl.BlockSpec((1, num_heads, S, S), lambda b: (b, 0, 0, 0)),
        ),
        compiler_params=pltpu.CompilerParams(
            dimension_semantics=("parallel",)),
    )(q, k, v, mask, wq3, bq3, wk3, bk3, wv3, bv3, wx3, bx2)
    return x, p_attn


def reference_forward(q, k, v, mask, params, num_heads, key_dim, value_dim):
    """Pure-numpy (float64) mirror of the PyTorch forward (eval mode)."""
    q, k, v, mask = [np.asarray(t, np.float64) for t in (q, k, v, mask)]
    wq, bq, wk, bk, wv, bv, wx, bx = [np.asarray(t, np.float64) for t in params]
    B, S, D = q.shape

    Q = (q @ wq + bq).reshape(B, S, num_heads, key_dim).transpose(0, 2, 1, 3)
    K = (k @ wk + bk).reshape(B, S, num_heads, key_dim).transpose(0, 2, 1, 3)
    V = (v @ wv + bv).reshape(B, S, num_heads, value_dim).transpose(0, 2, 1, 3)

    scores = Q @ (K.transpose(0, 1, 3, 2) / math.sqrt(key_dim))     # (B, h, S, S)
    mask4 = mask[:, None, :, :]                                     # (B, 1, 1, S)
    scores = np.where(mask4 == 0, -1e9, scores)
    scores = scores - scores.max(-1, keepdims=True)
    e = np.exp(scores)
    p = e / e.sum(-1, keepdims=True)

    ctx = p @ V                                                     # (B, h, S, dv)
    ctx = ctx.transpose(0, 2, 1, 3).reshape(B, S, num_heads * value_dim)
    x = ctx @ wx + bx
    return x, p


if __name__ == "__main__":
    # Small, lane-friendly shapes consistent with the module (model_dim % num_heads == 0,
    # key_dim = 12, value_dim = 32 as hardcoded in the PyTorch module).
    batch, seq_len = 2, 128
    d_model, num_heads = 128, 8
    key_dim, value_dim = 12, 32

    key = jax.random.PRNGKey(0)
    ks = jax.random.split(key, 11)
    wscale = jnp.float32(0.05)

    q = jax.random.normal(ks[0], (batch, seq_len, d_model), jnp.float32)
    k = jax.random.normal(ks[1], (batch, seq_len, d_model), jnp.float32)
    v = jax.random.normal(ks[2], (batch, seq_len, d_model), jnp.float32)

    wq = jax.random.normal(ks[3], (d_model, num_heads * key_dim), jnp.float32) * wscale
    bq = jax.random.normal(ks[4], (num_heads * key_dim,), jnp.float32) * wscale
    wk = jax.random.normal(ks[5], (d_model, num_heads * key_dim), jnp.float32) * wscale
    bk = jax.random.normal(ks[6], (num_heads * key_dim,), jnp.float32) * wscale
    wv = jax.random.normal(ks[7], (d_model, num_heads * value_dim), jnp.float32) * wscale
    bv = jax.random.normal(ks[8], (num_heads * value_dim,), jnp.float32) * wscale
    wx = jax.random.normal(ks[9], (num_heads * value_dim, d_model), jnp.float32) * wscale
    bx = jax.random.normal(ks[10], (d_model,), jnp.float32) * wscale
    params = (wq, bq, wk, bk, wv, bv, wx, bx)

    # key-padding mask (B, 1, S): batch 0 attends to all keys, batch 1 to the first half.
    lengths = np.array([seq_len, seq_len // 2], dtype=np.int32)
    mask_np = (np.arange(seq_len)[None, None, :] < lengths[:, None, None]).astype(np.float32)
    mask = jnp.asarray(mask_np)

    x, p_attn = multi_head_attention(q, k, v, mask, params,
                                     num_heads=num_heads,
                                     key_dim=key_dim, value_dim=value_dim)
    x, p_attn = jax.block_until_ready((x, p_attn))

    x_ref, p_ref = reference_forward(np.asarray(q), np.asarray(k), np.asarray(v),
                                     mask_np, [np.asarray(t) for t in params],
                                     num_heads, key_dim, value_dim)

    np.testing.assert_allclose(np.asarray(x), x_ref, rtol=1e-2, atol=1e-2)
    np.testing.assert_allclose(np.asarray(p_attn), p_ref, rtol=1e-2, atol=1e-2)

    print("KERNEL_OK")
</pallas_src>

<mosaic_0001>
module attributes {stable_mosaic.version = 11 : i64} {
  func.func @_mha_kernel(%arg0: i32, %arg1: memref<1x128x128xf32, #tpu.memory_space<vmem>>, %arg2: memref<1x128x128xf32, #tpu.memory_space<vmem>>, %arg3: memref<1x128x128xf32, #tpu.memory_space<vmem>>, %arg4: memref<1x1x128xf32, #tpu.memory_space<vmem>>, %arg5: memref<8x128x12xf32, #tpu.memory_space<vmem>>, %arg6: memref<8x1x12xf32, #tpu.memory_space<vmem>>, %arg7: memref<8x128x12xf32, #tpu.memory_space<vmem>>, %arg8: memref<8x1x12xf32, #tpu.memory_space<vmem>>, %arg9: memref<8x128x32xf32, #tpu.memory_space<vmem>>, %arg10: memref<8x1x32xf32, #tpu.memory_space<vmem>>, %arg11: memref<8x32x128xf32, #tpu.memory_space<vmem>>, %arg12: memref<1x128xf32, #tpu.memory_space<vmem>>, %arg13: memref<1x128x128xf32, #tpu.memory_space<vmem>>, %arg14: memref<1x8x128x128xf32, #tpu.memory_space<vmem>>) attributes {dimension_semantics = [#tpu.dimension_semantics<parallel>], iteration_bounds = array<i64: 2>, scalar_prefetch = 0 : i64, scratch_operands = 0 : i64, tpu.core_type = #tpu.core_type<tc>, window_params = [{transform_indices = @transform_0, window_bounds = array<i64: 1, 128, 128>}, {transform_indices = @transform_1, window_bounds = array<i64: 1, 128, 128>}, {transform_indices = @transform_2, window_bounds = array<i64: 1, 128, 128>}, {transform_indices = @transform_3, window_bounds = array<i64: 1, 1, 128>}, {pipeline_mode = #tpu.pipeline_mode<synchronous>, transform_indices = @transform_4, window_bounds = array<i64: 8, 128, 12>}, {pipeline_mode = #tpu.pipeline_mode<synchronous>, transform_indices = @transform_5, window_bounds = array<i64: 8, 1, 12>}, {pipeline_mode = #tpu.pipeline_mode<synchronous>, transform_indices = @transform_6, window_bounds = array<i64: 8, 128, 12>}, {pipeline_mode = #tpu.pipeline_mode<synchronous>, transform_indices = @transform_7, window_bounds = array<i64: 8, 1, 12>}, {pipeline_mode = #tpu.pipeline_mode<synchronous>, transform_indices = @transform_8, window_bounds = array<i64: 8, 128, 32>}, {pipeline_mode = #tpu.pipeline_mode<synchronous>, transform_indices = @transform_9, window_bounds = array<i64: 8, 1, 32>}, {pipeline_mode = #tpu.pipeline_mode<synchronous>, transform_indices = @transform_10, window_bounds = array<i64: 8, 32, 128>}, {pipeline_mode = #tpu.pipeline_mode<synchronous>, transform_indices = @transform_11, window_bounds = array<i64: 1, 128>}, {transform_indices = @transform_12, window_bounds = array<i64: 1, 128, 128>}, {transform_indices = @transform_13, window_bounds = array<i64: 1, 8, 128, 128>}]} {
    %c0 = arith.constant 0 : index
    %c0_0 = arith.constant 0 : index
    %c0_1 = arith.constant 0 : index
    %0 = vector.load %arg1[%c0, %c0_0, %c0_1] : memref<1x128x128xf32, #tpu.memory_space<vmem>>, vector<1x128x128xf32>
    %1 = vector.shape_cast %0 : vector<1x128x128xf32> to vector<128x128xf32>
    %c0_2 = arith.constant 0 : index
    %c0_3 = arith.constant 0 : index
    %c0_4 = arith.constant 0 : index
    %2 = vector.load %arg2[%c0_2, %c0_3, %c0_4] : memref<1x128x128xf32, #tpu.memory_space<vmem>>, vector<1x128x128xf32>
    %3 = vector.shape_cast %2 : vector<1x128x128xf32> to vector<128x128xf32>
    %c0_5 = arith.constant 0 : index
    %c0_6 = arith.constant 0 : index
    %c0_7 = arith.constant 0 : index
    %4 = vector.load %arg3[%c0_5, %c0_6, %c0_7] : memref<1x128x128xf32, #tpu.memory_space<vmem>>, vector<1x128x128xf32>
    %5 = vector.shape_cast %4 : vector<1x128x128xf32> to vector<128x128xf32>
    %c0_8 = arith.constant 0 : index
    %c0_9 = arith.constant 0 : index
    %c0_10 = arith.constant 0 : index
    %6 = vector.load %arg4[%c0_8, %c0_9, %c0_10] : memref<1x1x128xf32, #tpu.memory_space<vmem>>, vector<1x1x128xf32>
    %7 = vector.shape_cast %6 : vector<1x1x128xf32> to vector<1x128xf32>
    %cst = arith.constant 0.000000e+00 : f32
    %8 = vector.broadcast %cst : f32 to vector<128x128xf32>
    %c0_11 = arith.constant 0 : index
    %c0_12 = arith.constant 0 : index
    %c0_13 = arith.constant 0 : index
    %9 = vector.load %arg5[%c0_11, %c0_12, %c0_13] : memref<8x128x12xf32, #tpu.memory_space<vmem>>, vector<1x128x12xf32>
    %10 = vector.shape_cast %9 : vector<1x128x12xf32> to vector<128x12xf32>
    %cst_14 = arith.constant dense<0.000000e+00> : vector<128x12xf32>
    %11 = tpu.matmul %1, %10, %cst_14 {dimension_numbers = #tpu.dot_dimension_numbers<[1], [0], [0], [1], [0, 0, 1, 1], [], []>} : vector<128x128xf32>, vector<128x12xf32>, vector<128x12xf32> -> vector<128x12xf32>
    %c0_15 = arith.constant 0 : index
    %c0_16 = arith.constant 0 : index
    %c0_17 = arith.constant 0 : index
    %12 = vector.load %arg6[%c0_15, %c0_16, %c0_17] : memref<8x1x12xf32, #tpu.memory_space<vmem>>, vector<1x1x12xf32>
    %13 = vector.shape_cast %12 : vector<1x1x12xf32> to vector<1x12xf32>
    %14 = vector.broadcast %13 : vector<1x12xf32> to vector<128x12xf32>
    %15 = arith.addf %11, %14 : vector<128x12xf32>
    %c0_18 = arith.constant 0 : index
    %c0_19 = arith.constant 0 : index
    %c0_20 = arith.constant 0 : index
    %16 = vector.load %arg7[%c0_18, %c0_19, %c0_20] : memref<8x128x12xf32, #tpu.memory_space<vmem>>, vector<1x128x12xf32>
    %17 = vector.shape_cast %16 : vector<1x128x12xf32> to vector<128x12xf32>
    %cst_21 = arith.constant dense<0.000000e+00> : vector<128x12xf32>
    %18 = tpu.matmul %3, %17, %cst_21 {dimension_numbers = #tpu.dot_dimension_numbers<[1], [0], [0], [1], [0, 0, 1, 1], [], []>} : vector<128x128xf32>, vector<128x12xf32>, vector<128x12xf32> -> vector<128x12xf32>
    %c0_22 = arith.constant 0 : index
    %c0_23 = arith.constant 0 : index
    %c0_24 = arith.constant 0 : index
    %19 = vector.load %arg8[%c0_22, %c0_23, %c0_24] : memref<8x1x12xf32, #tpu.memory_space<vmem>>, vector<1x1x12xf32>
    %20 = vector.shape_cast %19 : vector<1x1x12xf32> to vector<1x12xf32>
    %21 = vector.broadcast %20 : vector<1x12xf32> to vector<128x12xf32>
    %22 = arith.addf %18, %21 : vector<128x12xf32>
    %c0_25 = arith.constant 0 : index
    %c0_26 = arith.constant 0 : index
    %c0_27 = arith.constant 0 : index
    %23 = vector.load %arg9[%c0_25, %c0_26, %c0_27] : memref<8x128x32xf32, #tpu.memory_space<vmem>>, vector<1x128x32xf32>
    %24 = vector.shape_cast %23 : vector<1x128x32xf32> to vector<128x32xf32>
    %cst_28 = arith.constant dense<0.000000e+00> : vector<128x32xf32>
    %25 = tpu.matmul %5, %24, %cst_28 {dimension_numbers = #tpu.dot_dimension_numbers<[1], [0], [0], [1], [0, 0, 1, 1], [], []>} : vector<128x128xf32>, vector<128x32xf32>, vector<128x32xf32> -> vector<128x32xf32>
    %c0_29 = arith.constant 0 : index
    %c0_30 = arith.constant 0 : index
    %c0_31 = arith.constant 0 : index
    %26 = vector.load %arg10[%c0_29, %c0_30, %c0_31] : memref<8x1x32xf32, #tpu.memory_space<vmem>>, vector<1x1x32xf32>
    %27 = vector.shape_cast %26 : vector<1x1x32xf32> to vector<1x32xf32>
    %28 = vector.broadcast %27 : vector<1x32xf32> to vector<128x32xf32>
    %29 = arith.addf %25, %28 : vector<128x32xf32>
    %cst_32 = arith.constant dense<0.000000e+00> : vector<128x128xf32>
    %30 = tpu.matmul %15, %22, %cst_32 {dimension_numbers = #tpu.dot_dimension_numbers<[1], [1], [0], [0], [0, 0, 1, 0], [], []>} : vector<128x12xf32>, vector<128x12xf32>, vector<128x128xf32> -> vector<128x128xf32>
    %cst_33 = arith.constant 0.288675129 : f32
    %31 = vector.broadcast %cst_33 : f32 to vector<128x128xf32>
    %32 = arith.mulf %30, %31 : vector<128x128xf32>
    %cst_34 = arith.constant 0.000000e+00 : f32
    %33 = vector.broadcast %cst_34 : f32 to vector<1x128xf32>
    %34 = arith.cmpf oeq, %7, %33 : vector<1x128xf32>
    %cst_35 = arith.constant -1.000000e+09 : f32
    %35 = vector.shape_cast %34 : vector<1x128xi1> to vector<1x128xi1>
    %36 = vector.broadcast %35 : vector<1x128xi1> to vector<128x128xi1>
    %37 = vector.broadcast %cst_35 : f32 to vector<128x128xf32>
    %38 = arith.select %36, %37, %32 : vector<128x128xi1>, vector<128x128xf32>
    %cst_36 = arith.constant dense<0xFF800000> : vector<128xf32>
    %39 = vector.multi_reduction <maximumf>, %38, %cst_36 [1] : vector<128x128xf32> to vector<128xf32>
    %40 = vector.shape_cast %39 : vector<128xf32> to vector<128x1xf32>
    %41 = vector.broadcast %40 : vector<128x1xf32> to vector<128x128xf32>
    %42 = arith.subf %38, %41 : vector<128x128xf32>
    %43 = math.exp %42 : vector<128x128xf32>
    %cst_37 = arith.constant dense<0.000000e+00> : vector<128xf32>
    %44 = vector.multi_reduction <add>, %43, %cst_37 [1] : vector<128x128xf32> to vector<128xf32>
    %45 = vector.shape_cast %44 : vector<128xf32> to vector<128x1xf32>
    %46 = vector.broadcast %45 : vector<128x1xf32> to vector<128x128xf32>
    %47 = arith.divf %43, %46 : vector<128x128xf32>
    %c0_38 = arith.constant 0 : index
    %c0_39 = arith.constant 0 : index
    %c0_40 = arith.constant 0 : index
    %c0_41 = arith.constant 0 : index
    %48 = vector.load %arg14[%c0_38, %c0_39, %c0_40, %c0_41] : memref<1x8x128x128xf32, #tpu.memory_space<vmem>>, vector<1x1x128x128xf32>
    %49 = vector.shape_cast %48 : vector<1x1x128x128xf32> to vector<128x128xf32>
    %50 = vector.shape_cast %47 : vector<128x128xf32> to vector<1x1x128x128xf32>
    tpu.vector_store %arg14[%c0_38, %c0_39, %c0_40, %c0_41], %50 {strides = array<i32>} : memref<1x8x128x128xf32, #tpu.memory_space<vmem>>, vector<1x1x128x128xf32>,
    %cst_42 = arith.constant dense<0.000000e+00> : vector<128x32xf32>
    %51 = tpu.matmul %47, %29, %cst_42 {dimension_numbers = #tpu.dot_dimension_numbers<[1], [0], [0], [1], [0, 0, 1, 1], [], []>} : vector<128x128xf32>, vector<128x32xf32>, vector<128x32xf32> -> vector<128x32xf32>
    %c0_43 = arith.constant 0 : index
    %c0_44 = arith.constant 0 : index
    %c0_45 = arith.constant 0 : index
    %52 = vector.load %arg11[%c0_43, %c0_44, %c0_45] : memref<8x32x128xf32, #tpu.memory_space<vmem>>, vector<1x32x128xf32>
    %53 = vector.shape_cast %52 : vector<1x32x128xf32> to vector<32x128xf32>
    %cst_46 = arith.constant dense<0.000000e+00> : vector<128x128xf32>
    %54 = tpu.matmul %51, %53, %cst_46 {dimension_numbers = #tpu.dot_dimension_numbers<[1], [0], [0], [1], [0, 0, 1, 1], [], []>} : vector<128x32xf32>, vector<32x128xf32>, vector<128x128xf32> -> vector<128x128xf32>
    %55 = arith.addf %8, %54 : vector<128x128xf32>
    %c1 = arith.constant 1 : index
    %c0_47 = arith.constant 0 : index
    %c0_48 = arith.constant 0 : index
    %56 = vector.load %arg5[%c1, %c0_47, %c0_48] : memref<8x128x12xf32, #tpu.memory_space<vmem>>, vector<1x128x12xf32>
    %57 = vector.shape_cast %56 : vector<1x128x12xf32> to vector<128x12xf32>
    %cst_49 = arith.constant dense<0.000000e+00> : vector<128x12xf32>
    %58 = tpu.matmul %1, %57, %cst_49 {dimension_numbers = #tpu.dot_dimension_numbers<[1], [0], [0], [1], [0, 0, 1, 1], [], []>} : vector<128x128xf32>, vector<128x12xf32>, vector<128x12xf32> -> vector<128x12xf32>
    %c1_50 = arith.constant 1 : index
    %c0_51 = arith.constant 0 : index
    %c0_52 = arith.constant 0 : index
    %59 = vector.load %arg6[%c1_50, %c0_51, %c0_52] : memref<8x1x12xf32, #tpu.memory_space<vmem>>, vector<1x1x12xf32>
    %60 = vector.shape_cast %59 : vector<1x1x12xf32> to vector<1x12xf32>
    %61 = vector.broadcast %60 : vector<1x12xf32> to vector<128x12xf32>
    %62 = arith.addf %58, %61 : vector<128x12xf32>
    %c1_53 = arith.constant 1 : index
    %c0_54 = arith.constant 0 : index
    %c0_55 = arith.constant 0 : index
    %63 = vector.load %arg7[%c1_53, %c0_54, %c0_55] : memref<8x128x12xf32, #tpu.memory_space<vmem>>, vector<1x128x12xf32>
    %64 = vector.shape_cast %63 : vector<1x128x12xf32> to vector<128x12xf32>
    %cst_56 = arith.constant dense<0.000000e+00> : vector<128x12xf32>
    %65 = tpu.matmul %3, %64, %cst_56 {dimension_numbers = #tpu.dot_dimension_numbers<[1], [0], [0], [1], [0, 0, 1, 1], [], []>} : vector<128x128xf32>, vector<128x12xf32>, vector<128x12xf32> -> vector<128x12xf32>
    %c1_57 = arith.constant 1 : index
    %c0_58 = arith.constant 0 : index
    %c0_59 = arith.constant 0 : index
    %66 = vector.load %arg8[%c1_57, %c0_58, %c0_59] : memref<8x1x12xf32, #tpu.memory_space<vmem>>, vector<1x1x12xf32>
    %67 = vector.shape_cast %66 : vector<1x1x12xf32> to vector<1x12xf32>
    %68 = vector.broadcast %67 : vector<1x12xf32> to vector<128x12xf32>
    %69 = arith.addf %65, %68 : vector<128x12xf32>
    %c1_60 = arith.constant 1 : index
    %c0_61 = arith.constant 0 : index
    %c0_62 = arith.constant 0 : index
    %70 = vector.load %arg9[%c1_60, %c0_61, %c0_62] : memref<8x128x32xf32, #tpu.memory_space<vmem>>, vector<1x128x32xf32>
    %71 = vector.shape_cast %70 : vector<1x128x32xf32> to vector<128x32xf32>
    %cst_63 = arith.constant dense<0.000000e+00> : vector<128x32xf32>
    %72 = tpu.matmul %5, %71, %cst_63 {dimension_numbers = #tpu.dot_dimension_numbers<[1], [0], [0], [1], [0, 0, 1, 1], [], []>} : vector<128x128xf32>, vector<128x32xf32>, vector<128x32xf32> -> vector<128x32xf32>
    %c1_64 = arith.constant 1 : index
    %c0_65 = arith.constant 0 : index
    %c0_66 = arith.constant 0 : index
    %73 = vector.load %arg10[%c1_64, %c0_65, %c0_66] : memref<8x1x32xf32, #tpu.memory_space<vmem>>, vector<1x1x32xf32>
    %74 = vector.shape_cast %73 : vector<1x1x32xf32> to vector<1x32xf32>
    %75 = vector.broadcast %74 : vector<1x32xf32> to vector<128x32xf32>
    %76 = arith.addf %72, %75 : vector<128x32xf32>
    %cst_67 = arith.constant dense<0.000000e+00> : vector<128x128xf32>
    %77 = tpu.matmul %62, %69, %cst_67 {dimension_numbers = #tpu.dot_dimension_numbers<[1], [1], [0], [0], [0, 0, 1, 0], [], []>} : vector<128x12xf32>, vector<128x12xf32>, vector<128x128xf32> -> vector<128x128xf32>
    %cst_68 = arith.constant 0.288675129 : f32
    %78 = vector.broadcast %cst_68 : f32 to vector<128x128xf32>
    %79 = arith.mulf %77, %78 : vector<128x128xf32>
    %cst_69 = arith.constant 0.000000e+00 : f32
    %80 = vector.broadcast %cst_69 : f32 to vector<1x128xf32>
    %81 = arith.cmpf oeq, %7, %80 : vector<1x128xf32>
    %cst_70 = arith.constant -1.000000e+09 : f32
    %82 = vector.shape_cast %81 : vector<1x128xi1> to vector<1x128xi1>
    %83 = vector.broadcast %82 : vector<1x128xi1> to vector<128x128xi1>
    %84 = vector.broadcast %cst_70 : f32 to vector<128x128xf32>
    %85 = arith.select %83, %84, %79 : vector<128x128xi1>, vector<128x128xf32>
    %cst_71 = arith.constant dense<0xFF800000> : vector<128xf32>
    %86 = vector.multi_reduction <maximumf>, %85, %cst_71 [1] : vector<128x128xf32> to vector<128xf32>
    %87 = vector.shape_cast %86 : vector<128xf32> to vector<128x1xf32>
    %88 = vector.broadcast %87 : vector<128x1xf32> to vector<128x128xf32>
    %89 = arith.subf %85, %88 : vector<128x128xf32>
    %90 = math.exp %89 : vector<128x128xf32>
    %cst_72 = arith.constant dense<0.000000e+00> : vector<128xf32>
    %91 = vector.multi_reduction <add>, %90, %cst_72 [1] : vector<128x128xf32> to vector<128xf32>
    %92 = vector.shape_cast %91 : vector<128xf32> to vector<128x1xf32>
    %93 = vector.broadcast %92 : vector<128x1xf32> to vector<128x128xf32>
    %94 = arith.divf %90, %93 : vector<128x128xf32>
    %c0_73 = arith.constant 0 : index
    %c1_74 = arith.constant 1 : index
    %c0_75 = arith.constant 0 : index
    %c0_76 = arith.constant 0 : index
    %95 = vector.load %arg14[%c0_73, %c1_74, %c0_75, %c0_76] : memref<1x8x128x128xf32, #tpu.memory_space<vmem>>, vector<1x1x128x128xf32>
    %96 = vector.shape_cast %95 : vector<1x1x128x128xf32> to vector<128x128xf32>
    %97 = vector.shape_cast %94 : vector<128x128xf32> to vector<1x1x128x128xf32>
    tpu.vector_store %arg14[%c0_73, %c1_74, %c0_75, %c0_76], %97 {strides = array<i32>} : memref<1x8x128x128xf32, #tpu.memory_space<vmem>>, vector<1x1x128x128xf32>,
    %cst_77 = arith.constant dense<0.000000e+00> : vector<128x32xf32>
    %98 = tpu.matmul %94, %76, %cst_77 {dimension_numbers = #tpu.dot_dimension_numbers<[1], [0], [0], [1], [0, 0, 1, 1], [], []>} : vector<128x128xf32>, vector<128x32xf32>, vector<128x32xf32> -> vector<128x32xf32>
    %c1_78 = arith.constant 1 : index
    %c0_79 = arith.constant 0 : index
    %c0_80 = arith.constant 0 : index
    %99 = vector.load %arg11[%c1_78, %c0_79, %c0_80] : memref<8x32x128xf32, #tpu.memory_space<vmem>>, vector<1x32x128xf32>
    %100 = vector.shape_cast %99 : vector<1x32x128xf32> to vector<32x128xf32>
    %cst_81 = arith.constant dense<0.000000e+00> : vector<128x128xf32>
    %101 = tpu.matmul %98, %100, %cst_81 {dimension_numbers = #tpu.dot_dimension_numbers<[1], [0], [0], [1], [0, 0, 1, 1], [], []>} : vector<128x32xf32>, vector<32x128xf32>, vector<128x128xf32> -> vector<128x128xf32>
    %102 = arith.addf %55, %101 : vector<128x128xf32>
    %c2 = arith.constant 2 : index
    %c0_82 = arith.constant 0 : index
    %c0_83 = arith.constant 0 : index
    %103 = vector.load %arg5[%c2, %c0_82, %c0_83] : memref<8x128x12xf32, #tpu.memory_space<vmem>>, vector<1x128x12xf32>
    %104 = vector.shape_cast %103 : vector<1x128x12xf32> to vector<128x12xf32>
    %cst_84 = arith.constant dense<0.000000e+00> : vector<128x12xf32>
    %105 = tpu.matmul %1, %104, %cst_84 {dimension_numbers = #tpu.dot_dimension_numbers<[1], [0], [0], [1], [0, 0, 1, 1], [], []>} : vector<128x128xf32>, vector<128x12xf32>, vector<128x12xf32> -> vector<128x12xf32>
    %c2_85 = arith.constant 2 : index
    %c0_86 = arith.constant 0 : index
    %c0_87 = arith.constant 0 : index
    %106 = vector.load %arg6[%c2_85, %c0_86, %c0_87] : memref<8x1x12xf32, #tpu.memory_space<vmem>>, vector<1x1x12xf32>
    %107 = vector.shape_cast %106 : vector<1x1x12xf32> to vector<1x12xf32>
    %108 = vector.broadcast %107 : vector<1x12xf32> to vector<128x12xf32>
    %109 = arith.addf %105, %108 : vector<128x12xf32>
    %c2_88 = arith.constant 2 : index
    %c0_89 = arith.constant 0 : index
    %c0_90 = arith.constant 0 : index
    %110 = vector.load %arg7[%c2_88, %c0_89, %c0_90] : memref<8x128x12xf32, #tpu.memory_space<vmem>>, vector<1x128x12xf32>
    %111 = vector.shape_cast %110 : vector<1x128x12xf32> to vector<128x12xf32>
    %cst_91 = arith.constant dense<0.000000e+00> : vector<128x12xf32>
    %112 = tpu.matmul %3, %111, %cst_91 {dimension_numbers = #tpu.dot_dimension_numbers<[1], [0], [0], [1], [0, 0, 1, 1], [], []>} : vector<128x128xf32>, vector<128x12xf32>, vector<128x12xf32> -> vector<128x12xf32>
    %c2_92 = arith.constant 2 : index
    %c0_93 = arith.constant 0 : index
    %c0_94 = arith.constant 0 : index
    %113 = vector.load %arg8[%c2_92, %c0_93, %c0_94] : memref<8x1x12xf32, #tpu.memory_space<vmem>>, vector<1x1x12xf32>
    %114 = vector.shape_cast %113 : vector<1x1x12xf32> to vector<1x12xf32>
    %115 = vector.broadcast %114 : vector<1x12xf32> to vector<128x12xf32>
    %116 = arith.addf %112, %115 : vector<128x12xf32>
    %c2_95 = arith.constant 2 : index
    %c0_96 = arith.constant 0 : index
    %c0_97 = arith.constant 0 : index
    %117 = vector.load %arg9[%c2_95, %c0_96, %c0_97] : memref<8x128x32xf32, #tpu.memory_space<vmem>>, vector<1x128x32xf32>
    %118 = vector.shape_cast %117 : vector<1x128x32xf32> to vector<128x32xf32>
    %cst_98 = arith.constant dense<0.000000e+00> : vector<128x32xf32>
    %119 = tpu.matmul %5, %118, %cst_98 {dimension_numbers = #tpu.dot_dimension_numbers<[1], [0], [0], [1], [0, 0, 1, 1], [], []>} : vector<128x128xf32>, vector<128x32xf32>, vector<128x32xf32> -> vector<128x32xf32>
    %c2_99 = arith.constant 2 : index
    %c0_100 = arith.constant 0 : index
    %c0_101 = arith.constant 0 : index
    %120 = vector.load %arg10[%c2_99, %c0_100, %c0_101] : memref<8x1x32xf32, #tpu.memory_space<vmem>>, vector<1x1x32xf32>
    %121 = vector.shape_cast %120 : vector<1x1x32xf32> to vector<1x32xf32>
    %122 = vector.broadcast %121 : vector<1x32xf32> to vector<128x32xf32>
    %123 = arith.addf %119, %122 : vector<128x32xf32>
    %cst_102 = arith.constant dense<0.000000e+00> : vector<128x128xf32>
    %124 = tpu.matmul %109, %116, %cst_102 {dimension_numbers = #tpu.dot_dimension_numbers<[1], [1], [0], [0], [0, 0, 1, 0], [], []>} : vector<128x12xf32>, vector<128x12xf32>, vector<128x128xf32> -> vector<128x128xf32>
    %cst_103 = arith.constant 0.288675129 : f32
    %125 = vector.broadcast %cst_103 : f32 to vector<128x128xf32>
    %126 = arith.mulf %124, %125 : vector<128x128xf32>
    %cst_104 = arith.constant 0.000000e+00 : f32
    %127 = vector.broadcast %cst_104 : f32 to vector<1x128xf32>
    %128 = arith.cmpf oeq, %7, %127 : vector<1x128xf32>
    %cst_105 = arith.constant -1.000000e+09 : f32
    %129 = vector.shape_cast %128 : vector<1x128xi1> to vector<1x128xi1>
    %130 = vector.broadcast %129 : vector<1x128xi1> to vector<128x128xi1>
    %131 = vector.broadcast %cst_105 : f32 to vector<128x128xf32>
    %132 = arith.select %130, %131, %126 : vector<128x128xi1>, vector<128x128xf32>
    %cst_106 = arith.constant dense<0xFF800000> : vector<128xf32>
    %133 = vector.multi_reduction <maximumf>, %132, %cst_106 [1] : vector<128x128xf32> to vector<128xf32>
    %134 = vector.shape_cast %133 : vector<128xf32> to vector<128x1xf32>
    %135 = vector.broadcast %134 : vector<128x1xf32> to vector<128x128xf32>
    %136 = arith.subf %132, %135 : vector<128x128xf32>
    %137 = math.exp %136 : vector<128x128xf32>
    %cst_107 = arith.constant dense<0.000000e+00> : vector<128xf32>
    %138 = vector.multi_reduction <add>, %137, %cst_107 [1] : vector<128x128xf32> to vector<128xf32>
    %139 = vector.shape_cast %138 : vector<128xf32> to vector<128x1xf32>
    %140 = vector.broadcast %139 : vector<128x1xf32> to vector<128x128xf32>
    %141 = arith.divf %137, %140 : vector<128x128xf32>
    %c0_108 = arith.constant 0 : index
    %c2_109 = arith.constant 2 : index
    %c0_110 = arith.constant 0 : index
    %c0_111 = arith.constant 0 : index
    %142 = vector.load %arg14[%c0_108, %c2_109, %c0_110, %c0_111] : memref<1x8x128x128xf32, #tpu.memory_space<vmem>>, vector<1x1x128x128xf32>
    %143 = vector.shape_cast %142 : vector<1x1x128x128xf32> to vector<128x128xf32>
    %144 = vector.shape_cast %141 : vector<128x128xf32> to vector<1x1x128x128xf32>
    tpu.vector_store %arg14[%c0_108, %c2_109, %c0_110, %c0_111], %144 {strides = array<i32>} : memref<1x8x128x128xf32, #tpu.memory_space<vmem>>, vector<1x1x128x128xf32>,
    %cst_112 = arith.constant dense<0.000000e+00> : vector<128x32xf32>
    %145 = tpu.matmul %141, %123, %cst_112 {dimension_numbers = #tpu.dot_dimension_numbers<[1], [0], [0], [1], [0, 0, 1, 1], [], []>} : vector<128x128xf32>, vector<128x32xf32>, vector<128x32xf32> -> vector<128x32xf32>
    %c2_113 = arith.constant 2 : index
    %c0_114 = arith.constant 0 : index
    %c0_115 = arith.constant 0 : index
    %146 = vector.load %arg11[%c2_113, %c0_114, %c0_115] : memref<8x32x128xf32, #tpu.memory_space<vmem>>, vector<1x32x128xf32>
    %147 = vector.shape_cast %146 : vector<1x32x128xf32> to vector<32x128xf32>
    %cst_116 = arith.constant dense<0.000000e+00> : vector<128x128xf32>
    %148 = tpu.matmul %145, %147, %cst_116 {dimension_numbers = #tpu.dot_dimension_numbers<[1], [0], [0], [1], [0, 0, 1, 1], [], []>} : vector<128x32xf32>, vector<32x128xf32>, vector<128x128xf32> -> vector<128x128xf32>
    %149 = arith.addf %102, %148 : vector<128x128xf32>
    %c3 = arith.constant 3 : index
    %c0_117 = arith.constant 0 : index
    %c0_118 = arith.constant 0 : index
    %150 = vector.load %arg5[%c3, %c0_117, %c0_118] : memref<8x128x12xf32, #tpu.memory_space<vmem>>, vector<1x128x12xf32>
    %151 = vector.shape_cast %150 : vector<1x128x12xf32> to vector<128x12xf32>
    %cst_119 = arith.constant dense<0.000000e+00> : vector<128x12xf32>
    %152 = tpu.matmul %1, %151, %cst_119 {dimension_numbers = #tpu.dot_dimension_numbers<[1], [0], [0], [1], [0, 0, 1, 1], [], []>} : vector<128x128xf32>, vector<128x12xf32>, vector<128x12xf32> -> vector<128x12xf32>
    %c3_120 = arith.constant 3 : index
    %c0_121 = arith.constant 0 : index
    %c0_122 = arith.constant 0 : index
    %153 = vector.load %arg6[%c3_120, %c0_121, %c0_122] : memref<8x1x12xf32, #tpu.memory_space<vmem>>, vector<1x1x12xf32>
    %154 = vector.shape_cast %153 : vector<1x1x12xf32> to vector<1x12xf32>
    %155 = vector.broadcast %154 : vector<1x12xf32> to vector<128x12xf32>
    %156 = arith.addf %152, %155 : vector<128x12xf32>
    %c3_123 = arith.constant 3 : index
    %c0_124 = arith.constant 0 : index
    %c0_125 = arith.constant 0 : index
    %157 = vector.load %arg7[%c3_123, %c0_124, %c0_125] : memref<8x128x12xf32, #tpu.memory_space<vmem>>, vector<1x128x12xf32>
    %158 = vector.shape_cast %157 : vector<1x128x12xf32> to vector<128x12xf32>
    %cst_126 = arith.constant dense<0.000000e+00> : vector<128x12xf32>
    %159 = tpu.matmul %3, %158, %cst_126 {dimension_numbers = #tpu.dot_dimension_numbers<[1], [0], [0], [1], [0, 0, 1, 1], [], []>} : vector<128x128xf32>, vector<128x12xf32>, vector<128x12xf32> -> vector<128x12xf32>
    %c3_127 = arith.constant 3 : index
    %c0_128 = arith.constant 0 : index
    %c0_129 = arith.constant 0 : index
    %160 = vector.load %arg8[%c3_127, %c0_128, %c0_129] : memref<8x1x12xf32, #tpu.memory_space<vmem>>, vector<1x1x12xf32>
    %161 = vector.shape_cast %160 : vector<1x1x12xf32> to vector<1x12xf32>
    %162 = vector.broadcast %161 : vector<1x12xf32> to vector<128x12xf32>
    %163 = arith.addf %159, %162 : vector<128x12xf32>
    %c3_130 = arith.constant 3 : index
    %c0_131 = arith.constant 0 : index
    %c0_132 = arith.constant 0 : index
    %164 = vector.load %arg9[%c3_130, %c0_131, %c0_132] : memref<8x128x32xf32, #tpu.memory_space<vmem>>, vector<1x128x32xf32>
    %165 = vector.shape_cast %164 : vector<1x128x32xf32> to vector<128x32xf32>
    %cst_133 = arith.constant dense<0.000000e+00> : vector<128x32xf32>
    %166 = tpu.matmul %5, %165, %cst_133 {dimension_numbers = #tpu.dot_dimension_numbers<[1], [0], [0], [1], [0, 0, 1, 1], [], []>} : vector<128x128xf32>, vector<128x32xf32>, vector<128x32xf32> -> vector<128x32xf32>
    %c3_134 = arith.constant 3 : index
    %c0_135 = arith.constant 0 : index
    %c0_136 = arith.constant 0 : index
    %167 = vector.load %arg10[%c3_134, %c0_135, %c0_136] : memref<8x1x32xf32, #tpu.memory_space<vmem>>, vector<1x1x32xf32>
    %168 = vector.shape_cast %167 : vector<1x1x32xf32> to vector<1x32xf32>
    %169 = vector.broadcast %168 : vector<1x32xf32> to vector<128x32xf32>
    %170 = arith.addf %166, %169 : vector<128x32xf32>
    %cst_137 = arith.constant dense<0.000000e+00> : vector<128x128xf32>
    %171 = tpu.matmul %156, %163, %cst_137 {dimension_numbers = #tpu.dot_dimension_numbers<[1], [1], [0], [0], [0, 0, 1, 0], [], []>} : vector<128x12xf32>, vector<128x12xf32>, vector<128x128xf32> -> vector<128x128xf32>
    %cst_138 = arith.constant 0.288675129 : f32
    %172 = vector.broadcast %cst_138 : f32 to vector<128x128xf32>
    %173 = arith.mulf %171, %172 : vector<128x128xf32>
    %cst_139 = arith.constant 0.000000e+00 : f32
    %174 = vector.broadcast %cst_139 : f32 to vector<1x128xf32>
    %175 = arith.cmpf oeq, %7, %174 : vector<1x128xf32>
    %cst_140 = arith.constant -1.000000e+09 : f32
    %176 = vector.shape_cast %175 : vector<1x128xi1> to vector<1x128xi1>
    %177 = vector.broadcast %176 : vector<1x128xi1> to vector<128x128xi1>
    %178 = vector.broadcast %cst_140 : f32 to vector<128x128xf32>
    %179 = arith.select %177, %178, %173 : vector<128x128xi1>, vector<128x128xf32>
    %cst_141 = arith.constant dense<0xFF800000> : vector<128xf32>
    %180 = vector.multi_reduction <maximumf>, %179, %cst_141 [1] : vector<128x128xf32> to vector<128xf32>
    %181 = vector.shape_cast %180 : vector<128xf32> to vector<128x1xf32>
    %182 = vector.broadcast %181 : vector<128x1xf32> to vector<128x128xf32>
    %183 = arith.subf %179, %182 : vector<128x128xf32>
    %184 = math.exp %183 : vector<128x128xf32>
    %cst_142 = arith.constant dense<0.000000e+00> : vector<128xf32>
    %185 = vector.multi_reduction <add>, %184, %cst_142 [1] : vector<128x128xf32> to vector<128xf32>
    %186 = vector.shape_cast %185 : vector<128xf32> to vector<128x1xf32>
    %187 = vector.broadcast %186 : vector<128x1xf32> to vector<128x128xf32>
    %188 = arith.divf %184, %187 : vector<128x128xf32>
    %c0_143 = arith.constant 0 : index
    %c3_144 = arith.constant 3 : index
    %c0_145 = arith.constant 0 : index
    %c0_146 = arith.constant 0 : index
    %189 = vector.load %arg14[%c0_143, %c3_144, %c0_145, %c0_146] : memref<1x8x128x128xf32, #tpu.memory_space<vmem>>, vector<1x1x128x128xf32>
    %190 = vector.shape_cast %189 : vector<1x1x128x128xf32> to vector<128x128xf32>
    %191 = vector.shape_cast %188 : vector<128x128xf32> to vector<1x1x128x128xf32>
    tpu.vector_store %arg14[%c0_143, %c3_144, %c0_145, %c0_146], %191 {strides = array<i32>} : memref<1x8x128x128xf32, #tpu.memory_space<vmem>>, vector<1x1x128x128xf32>,
    %cst_147 = arith.constant dense<0.000000e+00> : vector<128x32xf32>
    %192 = tpu.matmul %188, %170, %cst_147 {dimension_numbers = #tpu.dot_dimension_numbers<[1], [0], [0], [1], [0, 0, 1, 1], [], []>} : vector<128x128xf32>, vector<128x32xf32>, vector<128x32xf32> -> vector<128x32xf32>
    %c3_148 = arith.constant 3 : index
    %c0_149 = arith.constant 0 : index
    %c0_150 = arith.constant 0 : index
    %193 = vector.load %arg11[%c3_148, %c0_149, %c0_150] : memref<8x32x128xf32, #tpu.memory_space<vmem>>, vector<1x32x128xf32>
    %194 = vector.shape_cast %193 : vector<1x32x128xf32> to vector<32x128xf32>
    %cst_151 = arith.constant dense<0.000000e+00> : vector<128x128xf32>
    %195 = tpu.matmul %192, %194, %cst_151 {dimension_numbers = #tpu.dot_dimension_numbers<[1], [0], [0], [1], [0, 0, 1, 1], [], []>} : vector<128x32xf32>, vector<32x128xf32>, vector<128x128xf32> -> vector<128x128xf32>
    %196 = arith.addf %149, %195 : vector<128x128xf32>
    %c4 = arith.constant 4 : index
    %c0_152 = arith.constant 0 : index
    %c0_153 = arith.constant 0 : index
    %197 = vector.load %arg5[%c4, %c0_152, %c0_153] : memref<8x128x12xf32, #tpu.memory_space<vmem>>, vector<1x128x12xf32>
    %198 = vector.shape_cast %197 : vector<1x128x12xf32> to vector<128x12xf32>
    %cst_154 = arith.constant dense<0.000000e+00> : vector<128x12xf32>
    %199 = tpu.matmul %1, %198, %cst_154 {dimension_numbers = #tpu.dot_dimension_numbers<[1], [0], [0], [1], [0, 0, 1, 1], [], []>} : vector<128x128xf32>, vector<128x12xf32>, vector<128x12xf32> -> vector<128x12xf32>
    %c4_155 = arith.constant 4 : index
    %c0_156 = arith.constant 0 : index
    %c0_157 = arith.constant 0 : index
    %200 = vector.load %arg6[%c4_155, %c0_156, %c0_157] : memref<8x1x12xf32, #tpu.memory_space<vmem>>, vector<1x1x12xf32>
    %201 = vector.shape_cast %200 : vector<1x1x12xf32> to vector<1x12xf32>
    %202 = vector.broadcast %201 : vector<1x12xf32> to vector<128x12xf32>
    %203 = arith.addf %199, %202 : vector<128x12xf32>
    %c4_158 = arith.constant 4 : index
    %c0_159 = arith.constant 0 : index
    %c0_160 = arith.constant 0 : index
    %204 = vector.load %arg7[%c4_158, %c0_159, %c0_160] : memref<8x128x12xf32, #tpu.memory_space<vmem>>, vector<1x128x12xf32>
    %205 = vector.shape_cast %204 : vector<1x128x12xf32> to vector<128x12xf32>
    %cst_161 = arith.constant dense<0.000000e+00> : vector<128x12xf32>
    %206 = tpu.matmul %3, %205, %cst_161 {dimension_numbers = #tpu.dot_dimension_numbers<[1], [0], [0], [1], [0, 0, 1, 1], [], []>} : vector<128x128xf32>, vector<128x12xf32>, vector<128x12xf32> -> vector<128x12xf32>
    %c4_162 = arith.constant 4 : index
    %c0_163 = arith.constant 0 : index
    %c0_164 = arith.constant 0 : index
    %207 = vector.load %arg8[%c4_162, %c0_163, %c0_164] : memref<8x1x12xf32, #tpu.memory_space<vmem>>, vector<1x1x12xf32>
    %208 = vector.shape_cast %207 : vector<1x1x12xf32> to vector<1x12xf32>
    %209 = vector.broadcast %208 : vector<1x12xf32> to vector<128x12xf32>
    %210 = arith.addf %206, %209 : vector<128x12xf32>
    %c4_165 = arith.constant 4 : index
    %c0_166 = arith.constant 0 : index
    %c0_167 = arith.constant 0 : index
    %211 = vector.load %arg9[%c4_165, %c0_166, %c0_167] : memref<8x128x32xf32, #tpu.memory_space<vmem>>, vector<1x128x32xf32>
    %212 = vector.shape_cast %211 : vector<1x128x32xf32> to vector<128x32xf32>
    %cst_168 = arith.constant dense<0.000000e+00> : vector<128x32xf32>
    %213 = tpu.matmul %5, %212, %cst_168 {dimension_numbers = #tpu.dot_dimension_numbers<[1], [0], [0], [1], [0, 0, 1, 1], [], []>} : vector<128x128xf32>, vector<128x32xf32>, vector<128x32xf32> -> vector<128x32xf32>
    %c4_169 = arith.constant 4 : index
    %c0_170 = arith.constant 0 : index
    %c0_171 = arith.constant 0 : index
    %214 = vector.load %arg10[%c4_169, %c0_170, %c0_171] : memref<8x1x32xf32, #tpu.memory_space<vmem>>, vector<1x1x32xf32>
    %215 = vector.shape_cast %214 : vector<1x1x32xf32> to vector<1x32xf32>
    %216 = vector.broadcast %215 : vector<1x32xf32> to vector<128x32xf32>
    %217 = arith.addf %213, %216 : vector<128x32xf32>
    %cst_172 = arith.constant dense<0.000000e+00> : vector<128x128xf32>
    %218 = tpu.matmul %203, %210, %cst_172 {dimension_numbers = #tpu.dot_dimension_numbers<[1], [1], [0], [0], [0, 0, 1, 0], [], []>} : vector<128x12xf32>, vector<128x12xf32>, vector<128x128xf32> -> vector<128x128xf32>
    %cst_173 = arith.constant 0.288675129 : f32
    %219 = vector.broadcast %cst_173 : f32 to vector<128x128xf32>
    %220 = arith.mulf %218, %219 : vector<128x128xf32>
    %cst_174 = arith.constant 0.000000e+00 : f32
    %221 = vector.broadcast %cst_174 : f32 to vector<1x128xf32>
    %222 = arith.cmpf oeq, %7, %221 : vector<1x128xf32>
    %cst_175 = arith.constant -1.000000e+09 : f32
    %223 = vector.shape_cast %222 : vector<1x128xi1> to vector<1x128xi1>
    %224 = vector.broadcast %223 : vector<1x128xi1> to vector<128x128xi1>
    %225 = vector.broadcast %cst_175 : f32 to vector<128x128xf32>
    %226 = arith.select %224, %225, %220 : vector<128x128xi1>, vector<128x128xf32>
    %cst_176 = arith.constant dense<0xFF800000> : vector<128xf32>
    %227 = vector.multi_reduction <maximumf>, %226, %cst_176 [1] : vector<128x128xf32> to vector<128xf32>
    %228 = vector.shape_cast %227 : vector<128xf32> to vector<128x1xf32>
    %229 = vector.broadcast %228 : vector<128x1xf32> to vector<128x128xf32>
    %230 = arith.subf %226, %229 : vector<128x128xf32>
    %231 = math.exp %230 : vector<128x128xf32>
    %cst_177 = arith.constant dense<0.000000e+00> : vector<128xf32>
    %232 = vector.multi_reduction <add>, %231, %cst_177 [1] : vector<128x128xf32> to vector<128xf32>
    %233 = vector.shape_cast %232 : vector<128xf32> to vector<128x1xf32>
    %234 = vector.broadcast %233 : vector<128x1xf32> to vector<128x128xf32>
    %235 = arith.divf %231, %234 : vector<128x128xf32>
    %c0_178 = arith.constant 0 : index
    %c4_179 = arith.constant 4 : index
    %c0_180 = arith.constant 0 : index
    %c0_181 = arith.constant 0 : index
    %236 = vector.load %arg14[%c0_178, %c4_179, %c0_180, %c0_181] : memref<1x8x128x128xf32, #tpu.memory_space<vmem>>, vector<1x1x128x128xf32>
    %237 = vector.shape_cast %236 : vector<1x1x128x128xf32> to vector<128x128xf32>
    %238 = vector.shape_cast %235 : vector<128x128xf32> to vector<1x1x128x128xf32>
    tpu.vector_store %arg14[%c0_178, %c4_179, %c0_180, %c0_181], %238 {strides = array<i32>} : memref<1x8x128x128xf32, #tpu.memory_space<vmem>>, vector<1x1x128x128xf32>,
    %cst_182 = arith.constant dense<0.000000e+00> : vector<128x32xf32>
    %239 = tpu.matmul %235, %217, %cst_182 {dimension_numbers = #tpu.dot_dimension_numbers<[1], [0], [0], [1], [0, 0, 1, 1], [], []>} : vector<128x128xf32>, vector<128x32xf32>, vector<128x32xf32> -> vector<128x32xf32>
    %c4_183 = arith.constant 4 : index
    %c0_184 = arith.constant 0 : index
    %c0_185 = arith.constant 0 : index
    %240 = vector.load %arg11[%c4_183, %c0_184, %c0_185] : memref<8x32x128xf32, #tpu.memory_space<vmem>>, vector<1x32x128xf32>
    %241 = vector.shape_cast %240 : vector<1x32x128xf32> to vector<32x128xf32>
    %cst_186 = arith.constant dense<0.000000e+00> : vector<128x128xf32>
    %242 = tpu.matmul %239, %241, %cst_186 {dimension_numbers = #tpu.dot_dimension_numbers<[1], [0], [0], [1], [0, 0, 1, 1], [], []>} : vector<128x32xf32>, vector<32x128xf32>, vector<128x128xf32> -> vector<128x128xf32>
    %243 = arith.addf %196, %242 : vector<128x128xf32>
    %c5 = arith.constant 5 : index
    %c0_187 = arith.constant 0 : index
    %c0_188 = arith.constant 0 : index
    %244 = vector.load %arg5[%c5, %c0_187, %c0_188] : memref<8x128x12xf32, #tpu.memory_space<vmem>>, vector<1x128x12xf32>
    %245 = vector.shape_cast %244 : vector<1x128x12xf32> to vector<128x12xf32>
    %cst_189 = arith.constant dense<0.000000e+00> : vector<128x12xf32>
    %246 = tpu.matmul %1, %245, %cst_189 {dimension_numbers = #tpu.dot_dimension_numbers<[1], [0], [0], [1], [0, 0, 1, 1], [], []>} : vector<128x128xf32>, vector<128x12xf32>, vector<128x12xf32> -> vector<128x12xf32>
    %c5_190 = arith.constant 5 : index
    %c0_191 = arith.constant 0 : index
    %c0_192 = arith.constant 0 : index
    %247 = vector.load %arg6[%c5_190, %c0_191, %c0_192] : memref<8x1x12xf32, #tpu.memory_space<vmem>>, vector<1x1x12xf32>
    %248 = vector.shape_cast %247 : vector<1x1x12xf32> to vector<1x12xf32>
    %249 = vector.broadcast %248 : vector<1x12xf32> to vector<128x12xf32>
    %250 = arith.addf %246, %249 : vector<128x12xf32>
    %c5_193 = arith.constant 5 : index
    %c0_194 = arith.constant 0 : index
    %c0_195 = arith.constant 0 : index
    %251 = vector.load %arg7[%c5_193, %c0_194, %c0_195] : memref<8x128x12xf32, #tpu.memory_space<vmem>>, vector<1x128x12xf32>
    %252 = vector.shape_cast %251 : vector<1x128x12xf32> to vector<128x12xf32>
    %cst_196 = arith.constant dense<0.000000e+00> : vector<128x12xf32>
    %253 = tpu.matmul %3, %252, %cst_196 {dimension_numbers = #tpu.dot_dimension_numbers<[1], [0], [0], [1], [0, 0, 1, 1], [], []>} : vector<128x128xf32>, vector<128x12xf32>, vector<128x12xf32> -> vector<128x12xf32>
    %c5_197 = arith.constant 5 : index
    %c0_198 = arith.constant 0 : index
    %c0_199 = arith.constant 0 : index
    %254 = vector.load %arg8[%c5_197, %c0_198, %c0_199] : memref<8x1x12xf32, #tpu.memory_space<vmem>>, vector<1x1x12xf32>
    %255 = vector.shape_cast %254 : vector<1x1x12xf32> to vector<1x12xf32>
    %256 = vector.broadcast %255 : vector<1x12xf32> to vector<128x12xf32>
    %257 = arith.addf %253, %256 : vector<128x12xf32>
    %c5_200 = arith.constant 5 : index
    %c0_201 = arith.constant 0 : index
    %c0_202 = arith.constant 0 : index
    %258 = vector.load %arg9[%c5_200, %c0_201, %c0_202] : memref<8x128x32xf32, #tpu.memory_space<vmem>>, vector<1x128x32xf32>
    %259 = vector.shape_cast %258 : vector<1x128x32xf32> to vector<128x32xf32>
    %cst_203 = arith.constant dense<0.000000e+00> : vector<128x32xf32>
    %260 = tpu.matmul %5, %259, %cst_203 {dimension_numbers = #tpu.dot_dimension_numbers<[1], [0], [0], [1], [0, 0, 1, 1], [], []>} : vector<128x128xf32>, vector<128x32xf32>, vector<128x32xf32> -> vector<128x32xf32>
    %c5_204 = arith.constant 5 : index
    %c0_205 = arith.constant 0 : index
    %c0_206 = arith.constant 0 : index
    %261 = vector.load %arg10[%c5_204, %c0_205, %c0_206] : memref<8x1x32xf32, #tpu.memory_space<vmem>>, vector<1x1x32xf32>
    %262 = vector.shape_cast %261 : vector<1x1x32xf32> to vector<1x32xf32>
    %263 = vector.broadcast %262 : vector<1x32xf32> to vector<128x32xf32>
    %264 = arith.addf %260, %263 : vector<128x32xf32>
    %cst_207 = arith.constant dense<0.000000e+00> : vector<128x128xf32>
    %265 = tpu.matmul %250, %257, %cst_207 {dimension_numbers = #tpu.dot_dimension_numbers<[1], [1], [0], [0], [0, 0, 1, 0], [], []>} : vector<128x12xf32>, vector<128x12xf32>, vector<128x128xf32> -> vector<128x128xf32>
    %cst_208 = arith.constant 0.288675129 : f32
    %266 = vector.broadcast %cst_208 : f32 to vector<128x128xf32>
    %267 = arith.mulf %265, %266 : vector<128x128xf32>
    %cst_209 = arith.constant 0.000000e+00 : f32
    %268 = vector.broadcast %cst_209 : f32 to vector<1x128xf32>
    %269 = arith.cmpf oeq, %7, %268 : vector<1x128xf32>
    %cst_210 = arith.constant -1.000000e+09 : f32
    %270 = vector.shape_cast %269 : vector<1x128xi1> to vector<1x128xi1>
    %271 = vector.broadcast %270 : vector<1x128xi1> to vector<128x128xi1>
    %272 = vector.broadcast %cst_210 : f32 to vector<128x128xf32>
    %273 = arith.select %271, %272, %267 : vector<128x128xi1>, vector<128x128xf32>
    %cst_211 = arith.constant dense<0xFF800000> : vector<128xf32>
    %274 = vector.multi_reduction <maximumf>, %273, %cst_211 [1] : vector<128x128xf32> to vector<128xf32>
    %275 = vector.shape_cast %274 : vector<128xf32> to vector<128x1xf32>
    %276 = vector.broadcast %275 : vector<128x1xf32> to vector<128x128xf32>
    %277 = arith.subf %273, %276 : vector<128x128xf32>
    %278 = math.exp %277 : vector<128x128xf32>
    %cst_212 = arith.constant dense<0.000000e+00> : vector<128xf32>
    %279 = vector.multi_reduction <add>, %278, %cst_212 [1] : vector<128x128xf32> to vector<128xf32>
    %280 = vector.shape_cast %279 : vector<128xf32> to vector<128x1xf32>
    %281 = vector.broadcast %280 : vector<128x1xf32> to vector<128x128xf32>
    %282 = arith.divf %278, %281 : vector<128x128xf32>
    %c0_213 = arith.constant 0 : index
    %c5_214 = arith.constant 5 : index
    %c0_215 = arith.constant 0 : index
    %c0_216 = arith.constant 0 : index
    %283 = vector.load %arg14[%c0_213, %c5_214, %c0_215, %c0_216] : memref<1x8x128x128xf32, #tpu.memory_space<vmem>>, vector<1x1x128x128xf32>
    %284 = vector.shape_cast %283 : vector<1x1x128x128xf32> to vector<128x128xf32>
    %285 = vector.shape_cast %282 : vector<128x128xf32> to vector<1x1x128x128xf32>
    tpu.vector_store %arg14[%c0_213, %c5_214, %c0_215, %c0_216], %285 {strides = array<i32>} : memref<1x8x128x128xf32, #tpu.memory_space<vmem>>, vector<1x1x128x128xf32>,
    %cst_217 = arith.constant dense<0.000000e+00> : vector<128x32xf32>
    %286 = tpu.matmul %282, %264, %cst_217 {dimension_numbers = #tpu.dot_dimension_numbers<[1], [0], [0], [1], [0, 0, 1, 1], [], []>} : vector<128x128xf32>, vector<128x32xf32>, vector<128x32xf32> -> vector<128x32xf32>
    %c5_218 = arith.constant 5 : index
    %c0_219 = arith.constant 0 : index
    %c0_220 = arith.constant 0 : index
    %287 = vector.load %arg11[%c5_218, %c0_219, %c0_220] : memref<8x32x128xf32, #tpu.memory_space<vmem>>, vector<1x32x128xf32>
    %288 = vector.shape_cast %287 : vector<1x32x128xf32> to vector<32x128xf32>
    %cst_221 = arith.constant dense<0.000000e+00> : vector<128x128xf32>
    %289 = tpu.matmul %286, %288, %cst_221 {dimension_numbers = #tpu.dot_dimension_numbers<[1], [0], [0], [1], [0, 0, 1, 1], [], []>} : vector<128x32xf32>, vector<32x128xf32>, vector<128x128xf32> -> vector<128x128xf32>
    %290 = arith.addf %243, %289 : vector<128x128xf32>
    %c6 = arith.constant 6 : index
    %c0_222 = arith.constant 0 : index
    %c0_223 = arith.constant 0 : index
    %291 = vector.load %arg5[%c6, %c0_222, %c0_223] : memref<8x128x12xf32, #tpu.memory_space<vmem>>, vector<1x128x12xf32>
    %292 = vector.shape_cast %291 : vector<1x128x12xf32> to vector<128x12xf32>
    %cst_224 = arith.constant dense<0.000000e+00> : vector<128x12xf32>
    %293 = tpu.matmul %1, %292, %cst_224 {dimension_numbers = #tpu.dot_dimension_numbers<[1], [0], [0], [1], [0, 0, 1, 1], [], []>} : vector<128x128xf32>, vector<128x12xf32>, vector<128x12xf32> -> vector<128x12xf32>
    %c6_225 = arith.constant 6 : index
    %c0_226 = arith.constant 0 : index
    %c0_227 = arith.constant 0 : index
    %294 = vector.load %arg6[%c6_225, %c0_226, %c0_227] : memref<8x1x12xf32, #tpu.memory_space<vmem>>, vector<1x1x12xf32>
    %295 = vector.shape_cast %294 : vector<1x1x12xf32> to vector<1x12xf32>
    %296 = vector.broadcast %295 : vector<1x12xf32> to vector<128x12xf32>
    %297 = arith.addf %293, %296 : vector<128x12xf32>
    %c6_228 = arith.constant 6 : index
    %c0_229 = arith.constant 0 : index
    %c0_230 = arith.constant 0 : index
    %298 = vector.load %arg7[%c6_228, %c0_229, %c0_230] : memref<8x128x12xf32, #tpu.memory_space<vmem>>, vector<1x128x12xf32>
    %299 = vector.shape_cast %298 : vector<1x128x12xf32> to vector<128x12xf32>
    %cst_231 = arith.constant dense<0.000000e+00> : vector<128x12xf32>
    %300 = tpu.matmul %3, %299, %cst_231 {dimension_numbers = #tpu.dot_dimension_numbers<[1], [0], [0], [1], [0, 0, 1, 1], [], []>} : vector<128x128xf32>, vector<128x12xf32>, vector<128x12xf32> -> vector<128x12xf32>
    %c6_232 = arith.constant 6 : index
    %c0_233 = arith.constant 0 : index
    %c0_234 = arith.constant 0 : index
    %301 = vector.load %arg8[%c6_232, %c0_233, %c0_234] : memref<8x1x12xf32, #tpu.memory_space<vmem>>, vector<1x1x12xf32>
    %302 = vector.shape_cast %301 : vector<1x1x12xf32> to vector<1x12xf32>
    %303 = vector.broadcast %302 : vector<1x12xf32> to vector<128x12xf32>
    %304 = arith.addf %300, %303 : vector<128x12xf32>
    %c6_235 = arith.constant 6 : index
    %c0_236 = arith.constant 0 : index
    %c0_237 = arith.constant 0 : index
    %305 = vector.load %arg9[%c6_235, %c0_236, %c0_237] : memref<8x128x32xf32, #tpu.memory_space<vmem>>, vector<1x128x32xf32>
    %306 = vector.shape_cast %305 : vector<1x128x32xf32> to vector<128x32xf32>
    %cst_238 = arith.constant dense<0.000000e+00> : vector<128x32xf32>
    %307 = tpu.matmul %5, %306, %cst_238 {dimension_numbers = #tpu.dot_dimension_numbers<[1], [0], [0], [1], [0, 0, 1, 1], [], []>} : vector<128x128xf32>, vector<128x32xf32>, vector<128x32xf32> -> vector<128x32xf32>
    %c6_239 = arith.constant 6 : index
    %c0_240 = arith.constant 0 : index
    %c0_241 = arith.constant 0 : index
    %308 = vector.load %arg10[%c6_239, %c0_240, %c0_241] : memref<8x1x32xf32, #tpu.memory_space<vmem>>, vector<1x1x32xf32>
    %309 = vector.shape_cast %308 : vector<1x1x32xf32> to vector<1x32xf32>
    %310 = vector.broadcast %309 : vector<1x32xf32> to vector<128x32xf32>
    %311 = arith.addf %307, %310 : vector<128x32xf32>
    %cst_242 = arith.constant dense<0.000000e+00> : vector<128x128xf32>
    %312 = tpu.matmul %297, %304, %cst_242 {dimension_numbers = #tpu.dot_dimension_numbers<[1], [1], [0], [0], [0, 0, 1, 0], [], []>} : vector<128x12xf32>, vector<128x12xf32>, vector<128x128xf32> -> vector<128x128xf32>
    %cst_243 = arith.constant 0.288675129 : f32
    %313 = vector.broadcast %cst_243 : f32 to vector<128x128xf32>
    %314 = arith.mulf %312, %313 : vector<128x128xf32>
    %cst_244 = arith.constant 0.000000e+00 : f32
    %315 = vector.broadcast %cst_244 : f32 to vector<1x128xf32>
    %316 = arith.cmpf oeq, %7, %315 : vector<1x128xf32>
    %cst_245 = arith.constant -1.000000e+09 : f32
    %317 = vector.shape_cast %316 : vector<1x128xi1> to vector<1x128xi1>
    %318 = vector.broadcast %317 : vector<1x128xi1> to vector<128x128xi1>
    %319 = vector.broadcast %cst_245 : f32 to vector<128x128xf32>
    %320 = arith.select %318, %319, %314 : vector<128x128xi1>, vector<128x128xf32>
    %cst_246 = arith.constant dense<0xFF800000> : vector<128xf32>
    %321 = vector.multi_reduction <maximumf>, %320, %cst_246 [1] : vector<128x128xf32> to vector<128xf32>
    %322 = vector.shape_cast %321 : vector<128xf32> to vector<128x1xf32>
    %323 = vector.broadcast %322 : vector<128x1xf32> to vector<128x128xf32>
    %324 = arith.subf %320, %323 : vector<128x128xf32>
    %325 = math.exp %324 : vector<128x128xf32>
    %cst_247 = arith.constant dense<0.000000e+00> : vector<128xf32>
    %326 = vector.multi_reduction <add>, %325, %cst_247 [1] : vector<128x128xf32> to vector<128xf32>
    %327 = vector.shape_cast %326 : vector<128xf32> to vector<128x1xf32>
    %328 = vector.broadcast %327 : vector<128x1xf32> to vector<128x128xf32>
    %329 = arith.divf %325, %328 : vector<128x128xf32>
    %c0_248 = arith.constant 0 : index
    %c6_249 = arith.constant 6 : index
    %c0_250 = arith.constant 0 : index
    %c0_251 = arith.constant 0 : index
    %330 = vector.load %arg14[%c0_248, %c6_249, %c0_250, %c0_251] : memref<1x8x128x128xf32, #tpu.memory_space<vmem>>, vector<1x1x128x128xf32>
    %331 = vector.shape_cast %330 : vector<1x1x128x128xf32> to vector<128x128xf32>
    %332 = vector.shape_cast %329 : vector<128x128xf32> to vector<1x1x128x128xf32>
    tpu.vector_store %arg14[%c0_248, %c6_249, %c0_250, %c0_251], %332 {strides = array<i32>} : memref<1x8x128x128xf32, #tpu.memory_space<vmem>>, vector<1x1x128x128xf32>,
    %cst_252 = arith.constant dense<0.000000e+00> : vector<128x32xf32>
    %333 = tpu.matmul %329, %311, %cst_252 {dimension_numbers = #tpu.dot_dimension_numbers<[1], [0], [0], [1], [0, 0, 1, 1], [], []>} : vector<128x128xf32>, vector<128x32xf32>, vector<128x32xf32> -> vector<128x32xf32>
    %c6_253 = arith.constant 6 : index
    %c0_254 = arith.constant 0 : index
    %c0_255 = arith.constant 0 : index
    %334 = vector.load %arg11[%c6_253, %c0_254, %c0_255] : memref<8x32x128xf32, #tpu.memory_space<vmem>>, vector<1x32x128xf32>
    %335 = vector.shape_cast %334 : vector<1x32x128xf32> to vector<32x128xf32>
    %cst_256 = arith.constant dense<0.000000e+00> : vector<128x128xf32>
    %336 = tpu.matmul %333, %335, %cst_256 {dimension_numbers = #tpu.dot_dimension_numbers<[1], [0], [0], [1], [0, 0, 1, 1], [], []>} : vector<128x32xf32>, vector<32x128xf32>, vector<128x128xf32> -> vector<128x128xf32>
    %337 = arith.addf %290, %336 : vector<128x128xf32>
    %c7 = arith.constant 7 : index
    %c0_257 = arith.constant 0 : index
    %c0_258 = arith.constant 0 : index
    %338 = vector.load %arg5[%c7, %c0_257, %c0_258] : memref<8x128x12xf32, #tpu.memory_space<vmem>>, vector<1x128x12xf32>
    %339 = vector.shape_cast %338 : vector<1x128x12xf32> to vector<128x12xf32>
    %cst_259 = arith.constant dense<0.000000e+00> : vector<128x12xf32>
    %340 = tpu.matmul %1, %339, %cst_259 {dimension_numbers = #tpu.dot_dimension_numbers<[1], [0], [0], [1], [0, 0, 1, 1], [], []>} : vector<128x128xf32>, vector<128x12xf32>, vector<128x12xf32> -> vector<128x12xf32>
    %c7_260 = arith.constant 7 : index
    %c0_261 = arith.constant 0 : index
    %c0_262 = arith.constant 0 : index
    %341 = vector.load %arg6[%c7_260, %c0_261, %c0_262] : memref<8x1x12xf32, #tpu.memory_space<vmem>>, vector<1x1x12xf32>
    %342 = vector.shape_cast %341 : vector<1x1x12xf32> to vector<1x12xf32>
    %343 = vector.broadcast %342 : vector<1x12xf32> to vector<128x12xf32>
    %344 = arith.addf %340, %343 : vector<128x12xf32>
    %c7_263 = arith.constant 7 : index
    %c0_264 = arith.constant 0 : index
    %c0_265 = arith.constant 0 : index
    %345 = vector.load %arg7[%c7_263, %c0_264, %c0_265] : memref<8x128x12xf32, #tpu.memory_space<vmem>>, vector<1x128x12xf32>
    %346 = vector.shape_cast %345 : vector<1x128x12xf32> to vector<128x12xf32>
    %cst_266 = arith.constant dense<0.000000e+00> : vector<128x12xf32>
    %347 = tpu.matmul %3, %346, %cst_266 {dimension_numbers = #tpu.dot_dimension_numbers<[1], [0], [0], [1], [0, 0, 1, 1], [], []>} : vector<128x128xf32>, vector<128x12xf32>, vector<128x12xf32> -> vector<128x12xf32>
    %c7_267 = arith.constant 7 : index
    %c0_268 = arith.constant 0 : index
    %c0_269 = arith.constant 0 : index
    %348 = vector.load %arg8[%c7_267, %c0_268, %c0_269] : memref<8x1x12xf32, #tpu.memory_space<vmem>>, vector<1x1x12xf32>
    %349 = vector.shape_cast %348 : vector<1x1x12xf32> to vector<1x12xf32>
    %350 = vector.broadcast %349 : vector<1x12xf32> to vector<128x12xf32>
    %351 = arith.addf %347, %350 : vector<128x12xf32>
    %c7_270 = arith.constant 7 : index
    %c0_271 = arith.constant 0 : index
    %c0_272 = arith.constant 0 : index
    %352 = vector.load %arg9[%c7_270, %c0_271, %c0_272] : memref<8x128x32xf32, #tpu.memory_space<vmem>>, vector<1x128x32xf32>
    %353 = vector.shape_cast %352 : vector<1x128x32xf32> to vector<128x32xf32>
    %cst_273 = arith.constant dense<0.000000e+00> : vector<128x32xf32>
    %354 = tpu.matmul %5, %353, %cst_273 {dimension_numbers = #tpu.dot_dimension_numbers<[1], [0], [0], [1], [0, 0, 1, 1], [], []>} : vector<128x128xf32>, vector<128x32xf32>, vector<128x32xf32> -> vector<128x32xf32>
    %c7_274 = arith.constant 7 : index
    %c0_275 = arith.constant 0 : index
    %c0_276 = arith.constant 0 : index
    %355 = vector.load %arg10[%c7_274, %c0_275, %c0_276] : memref<8x1x32xf32, #tpu.memory_space<vmem>>, vector<1x1x32xf32>
    %356 = vector.shape_cast %355 : vector<1x1x32xf32> to vector<1x32xf32>
    %357 = vector.broadcast %356 : vector<1x32xf32> to vector<128x32xf32>
    %358 = arith.addf %354, %357 : vector<128x32xf32>
    %cst_277 = arith.constant dense<0.000000e+00> : vector<128x128xf32>
    %359 = tpu.matmul %344, %351, %cst_277 {dimension_numbers = #tpu.dot_dimension_numbers<[1], [1], [0], [0], [0, 0, 1, 0], [], []>} : vector<128x12xf32>, vector<128x12xf32>, vector<128x128xf32> -> vector<128x128xf32>
    %cst_278 = arith.constant 0.288675129 : f32
    %360 = vector.broadcast %cst_278 : f32 to vector<128x128xf32>
    %361 = arith.mulf %359, %360 : vector<128x128xf32>
    %cst_279 = arith.constant 0.000000e+00 : f32
    %362 = vector.broadcast %cst_279 : f32 to vector<1x128xf32>
    %363 = arith.cmpf oeq, %7, %362 : vector<1x128xf32>
    %cst_280 = arith.constant -1.000000e+09 : f32
    %364 = vector.shape_cast %363 : vector<1x128xi1> to vector<1x128xi1>
    %365 = vector.broadcast %364 : vector<1x128xi1> to vector<128x128xi1>
    %366 = vector.broadcast %cst_280 : f32 to vector<128x128xf32>
    %367 = arith.select %365, %366, %361 : vector<128x128xi1>, vector<128x128xf32>
    %cst_281 = arith.constant dense<0xFF800000> : vector<128xf32>
    %368 = vector.multi_reduction <maximumf>, %367, %cst_281 [1] : vector<128x128xf32> to vector<128xf32>
    %369 = vector.shape_cast %368 : vector<128xf32> to vector<128x1xf32>
    %370 = vector.broadcast %369 : vector<128x1xf32> to vector<128x128xf32>
    %371 = arith.subf %367, %370 : vector<128x128xf32>
    %372 = math.exp %371 : vector<128x128xf32>
    %cst_282 = arith.constant dense<0.000000e+00> : vector<128xf32>
    %373 = vector.multi_reduction <add>, %372, %cst_282 [1] : vector<128x128xf32> to vector<128xf32>
    %374 = vector.shape_cast %373 : vector<128xf32> to vector<128x1xf32>
    %375 = vector.broadcast %374 : vector<128x1xf32> to vector<128x128xf32>
    %376 = arith.divf %372, %375 : vector<128x128xf32>
    %c0_283 = arith.constant 0 : index
    %c7_284 = arith.constant 7 : index
    %c0_285 = arith.constant 0 : index
    %c0_286 = arith.constant 0 : index
    %377 = vector.load %arg14[%c0_283, %c7_284, %c0_285, %c0_286] : memref<1x8x128x128xf32, #tpu.memory_space<vmem>>, vector<1x1x128x128xf32>
    %378 = vector.shape_cast %377 : vector<1x1x128x128xf32> to vector<128x128xf32>
    %379 = vector.shape_cast %376 : vector<128x128xf32> to vector<1x1x128x128xf32>
    tpu.vector_store %arg14[%c0_283, %c7_284, %c0_285, %c0_286], %379 {strides = array<i32>} : memref<1x8x128x128xf32, #tpu.memory_space<vmem>>, vector<1x1x128x128xf32>,
    %cst_287 = arith.constant dense<0.000000e+00> : vector<128x32xf32>
    %380 = tpu.matmul %376, %358, %cst_287 {dimension_numbers = #tpu.dot_dimension_numbers<[1], [0], [0], [1], [0, 0, 1, 1], [], []>} : vector<128x128xf32>, vector<128x32xf32>, vector<128x32xf32> -> vector<128x32xf32>
    %c7_288 = arith.constant 7 : index
    %c0_289 = arith.constant 0 : index
    %c0_290 = arith.constant 0 : index
    %381 = vector.load %arg11[%c7_288, %c0_289, %c0_290] : memref<8x32x128xf32, #tpu.memory_space<vmem>>, vector<1x32x128xf32>
    %382 = vector.shape_cast %381 : vector<1x32x128xf32> to vector<32x128xf32>
    %cst_291 = arith.constant dense<0.000000e+00> : vector<128x128xf32>
    %383 = tpu.matmul %380, %382, %cst_291 {dimension_numbers = #tpu.dot_dimension_numbers<[1], [0], [0], [1], [0, 0, 1, 1], [], []>} : vector<128x32xf32>, vector<32x128xf32>, vector<128x128xf32> -> vector<128x128xf32>
    %384 = arith.addf %337, %383 : vector<128x128xf32>
    %c0_292 = arith.constant 0 : index
    %c0_293 = arith.constant 0 : index
    %385 = vector.load %arg12[%c0_292, %c0_293] : memref<1x128xf32, #tpu.memory_space<vmem>>, vector<1x128xf32>
    %386 = vector.broadcast %385 : vector<1x128xf32> to vector<128x128xf32>
    %387 = arith.addf %384, %386 : vector<128x128xf32>
    %c0_294 = arith.constant 0 : index
    %c0_295 = arith.constant 0 : index
    %c0_296 = arith.constant 0 : index
    %388 = vector.load %arg13[%c0_294, %c0_295, %c0_296] : memref<1x128x128xf32, #tpu.memory_space<vmem>>, vector<1x128x128xf32>
    %389 = vector.shape_cast %388 : vector<1x128x128xf32> to vector<128x128xf32>
    %390 = vector.shape_cast %387 : vector<128x128xf32> to vector<1x128x128xf32>
    tpu.vector_store %arg13[%c0_294, %c0_295, %c0_296], %390 {strides = array<i32>} : memref<1x128x128xf32, #tpu.memory_space<vmem>>, vector<1x128x128xf32>,
    return
  }
  func.func @transform_0(%arg0: i32) -> (i32, i32, i32) {
    %c0_i32 = arith.constant 0 : i32
    %c0_i32_0 = arith.constant 0 : i32
    %c0_i32_1 = arith.constant 0 : i32
    return %arg0, %c0_i32, %c0_i32_0 : i32, i32, i32
  }
  func.func @transform_1(%arg0: i32) -> (i32, i32, i32) {
    %c0_i32 = arith.constant 0 : i32
    %c0_i32_0 = arith.constant 0 : i32
    %c0_i32_1 = arith.constant 0 : i32
    return %arg0, %c0_i32, %c0_i32_0 : i32, i32, i32
  }
  func.func @transform_2(%arg0: i32) -> (i32, i32, i32) {
    %c0_i32 = arith.constant 0 : i32
    %c0_i32_0 = arith.constant 0 : i32
    %c0_i32_1 = arith.constant 0 : i32
    return %arg0, %c0_i32, %c0_i32_0 : i32, i32, i32
  }
  func.func @transform_3(%arg0: i32) -> (i32, i32, i32) {
    %c0_i32 = arith.constant 0 : i32
    %c0_i32_0 = arith.constant 0 : i32
    %c0_i32_1 = arith.constant 0 : i32
    return %arg0, %c0_i32, %c0_i32_0 : i32, i32, i32
  }
  func.func @transform_4(%arg0: i32) -> (i32, i32, i32) {
    %c0_i32 = arith.constant 0 : i32
    %c0_i32_0 = arith.constant 0 : i32
    %c0_i32_1 = arith.constant 0 : i32
    %c0_i32_2 = arith.constant 0 : i32
    return %c0_i32, %c0_i32_0, %c0_i32_1 : i32, i32, i32
  }
  func.func @transform_5(%arg0: i32) -> (i32, i32, i32) {
    %c0_i32 = arith.constant 0 : i32
    %c0_i32_0 = arith.constant 0 : i32
    %c0_i32_1 = arith.constant 0 : i32
    %c0_i32_2 = arith.constant 0 : i32
    return %c0_i32, %c0_i32_0, %c0_i32_1 : i32, i32, i32
  }
  func.func @transform_6(%arg0: i32) -> (i32, i32, i32) {
    %c0_i32 = arith.constant 0 : i32
    %c0_i32_0 = arith.constant 0 : i32
    %c0_i32_1 = arith.constant 0 : i32
    %c0_i32_2 = arith.constant 0 : i32
    return %c0_i32, %c0_i32_0, %c0_i32_1 : i32, i32, i32
  }
  func.func @transform_7(%arg0: i32) -> (i32, i32, i32) {
    %c0_i32 = arith.constant 0 : i32
    %c0_i32_0 = arith.constant 0 : i32
    %c0_i32_1 = arith.constant 0 : i32
    %c0_i32_2 = arith.constant 0 : i32
    return %c0_i32, %c0_i32_0, %c0_i32_1 : i32, i32, i32
  }
  func.func @transform_8(%arg0: i32) -> (i32, i32, i32) {
    %c0_i32 = arith.constant 0 : i32
    %c0_i32_0 = arith.constant 0 : i32
    %c0_i32_1 = arith.constant 0 : i32
    %c0_i32_2 = arith.constant 0 : i32
    return %c0_i32, %c0_i32_0, %c0_i32_1 : i32, i32, i32
  }
  func.func @transform_9(%arg0: i32) -> (i32, i32, i32) {
    %c0_i32 = arith.constant 0 : i32
    %c0_i32_0 = arith.constant 0 : i32
    %c0_i32_1 = arith.constant 0 : i32
    %c0_i32_2 = arith.constant 0 : i32
    return %c0_i32, %c0_i32_0, %c0_i32_1 : i32, i32, i32
  }
  func.func @transform_10(%arg0: i32) -> (i32, i32, i32) {
    %c0_i32 = arith.constant 0 : i32
    %c0_i32_0 = arith.constant 0 : i32
    %c0_i32_1 = arith.constant 0 : i32
    %c0_i32_2 = arith.constant 0 : i32
    return %c0_i32, %c0_i32_0, %c0_i32_1 : i32, i32, i32
  }
  func.func @transform_11(%arg0: i32) -> (i32, i32) {
    %c0_i32 = arith.constant 0 : i32
    %c0_i32_0 = arith.constant 0 : i32
    %c0_i32_1 = arith.constant 0 : i32
    return %c0_i32, %c0_i32_0 : i32, i32
  }
  func.func @transform_12(%arg0: i32) -> (i32, i32, i32) {
    %c0_i32 = arith.constant 0 : i32
    %c0_i32_0 = arith.constant 0 : i32
    %c0_i32_1 = arith.constant 0 : i32
    return %arg0, %c0_i32, %c0_i32_0 : i32, i32, i32
  }
  func.func @transform_13(%arg0: i32) -> (i32, i32, i32, i32) {
    %c0_i32 = arith.constant 0 : i32
    %c0_i32_0 = arith.constant 0 : i32
    %c0_i32_1 = arith.constant 0 : i32
    %c0_i32_2 = arith.constant 0 : i32
    return %arg0, %c0_i32, %c0_i32_0, %c0_i32_1 : i32, i32, i32, i32
  }
}

</mosaic_0001>

<bundles_post_ra>
// kernel: tpu_custom_call.1
= control target key start
LH: loop header
LB: loop body
LE: loop exit
PB: predicated region body
PF: predicated region fallthrough
CT: control target
= control target key end

     0   :  { %s23175_s0 = inlined_call_operand.vmem [shape: f32[2,128,128], index: 0, kind: input, shape index: {}]   ;;  %s23176_s1 = inlined_call_operand.vmem [shape: f32[2,128,128], index: 1, kind: input, shape index: {}]   ;;  %s23177_s2 = inlined_call_operand.vmem [shape: f32[2,128,128], index: 2, kind: input, shape index: {}]   ;;  %s23178_s3 = inlined_call_operand.vmem [shape: f32[2,1,128], index: 3, kind: input, shape index: {}]   ;;  %s23179_s4 = inlined_call_operand.vmem [shape: f32[8,128,12], index: 4, kind: input, shape index: {}]   ;;  %s23180_s5 = inlined_call_operand.vmem [shape: f32[8,1,12], index: 5, kind: input, shape index: {}]   ;;  %s23181_s6 = inlined_call_operand.vmem [shape: f32[8,128,12], index: 6, kind: input, shape index: {}]   ;;  %s23182_s7 = inlined_call_operand.vmem [shape: f32[8,1,12], index: 7, kind: input, shape index: {}]   ;;  %s23183_s8 = inlined_call_operand.vmem [shape: f32[8,128,32], index: 8, kind: input, shape index: {}]   ;;  %s23184_s9 = inlined_call_operand.vmem [shape: f32[8,1,32], index: 9, kind: input, shape index: {}]   ;;  %s23185_s10 = inlined_call_operand.vmem [shape: f32[8,32,128], index: 10, kind: input, shape index: {}]   ;;  %s23186_s11 = inlined_call_operand.vmem [shape: f32[1,128], index: 11, kind: input, shape index: {}]   ;;  %s23187_s12 = inlined_call_operand.hbm [shape: f32[2,128,128], index: 12, kind: output, shape index: {0}]   ;;  %s23188_s13 = inlined_call_operand.hbm [shape: f32[2,8,128,128], index: 13, kind: output, shape index: {1}]  }
   0x1   :  { %23194 = sst [smem:[#allocation18_spill]] %s23175_s0 }
   0x2   :  { %23195 = sst [smem:[#allocation19_spill]] %s23176_s1 }
   0x3   :  { %19 = vsyncpa [#allocation3], 0 }
   0x4   :  { %21 = vsyncpa [#allocation3 + $0x1], 0 }
   0x5   :  { %22 = vsyncpa [#allocation5], 0 }
   0x6   :  { %24 = vsyncpa [#allocation5 + $0x1], 0  ;;  %s18613_s25 = smov 0   ;;  %s18615_s26 = smov 0  }
   0x7   :  { %s18617_s27 = smov 0   ;;  %s18619_s28 = smov 0  }
   0x8 LB: > { %23196 = sst [smem:[#allocation8_spill]] %s18524_s25  ;;  %s18634_s29 = sadd.s32 4294967295, %s18536_s28   ;;  %s18536_s28 = sphi %s18619_s28, %s23219_s28   ;;  %s18532_s27 = sphi %s18617_s27, %s23221_s27   ;;  %s18528_s26 = sphi %s18615_s26, %s23223_s26   ;;  %s18524_s25 = sphi %s18613_s25, %s23222_s25  }
   0x9   : > { %23197 = sst [smem:[#allocation9_spill]] %s18532_s27  ;;  %s11147_s30 = sadd.s32 4294967294, %s18536_s28  }
   0xa   : > { %s18638_s14 = sadd.s32 1, %s18536_s28   ;;  %s309_s15 = sadd.s32 1, %s18532_s27 }
   0xb   : > { %23198 = sst [smem:[#allocation10_spill]] %s18638_s14  ;;  %s306_s16 = ssub.s32 %s18536_s28, %s18638_s14 }
   0xc   : > { %p319_p0 = scmp.ne.s32.totalorder %s18532_s27, %s18528_s26  ;;  %p307_p1 = scmp.eq.s32.totalorder %s306_s16, 0 }
   0xd   : > { %p320_p2 = scmp.eq.s32.totalorder %s18634_s29, 1  ;;  %p325_p3 = scmp.ne.s32.totalorder %s18528_s26, %s18524_s25 }
   0xe   : > { %p326_p4 = scmp.eq.s32.totalorder %s11147_s30, 1  ;;  %p11150_p7 = scmp.ge.s32.totalorder %s18536_s28, 1 }
   0xf   : > { %s18649_s17 = scalar_select %p307_p1, %s18532_s27, %s309_s15  }
  0x10   : > { %p18651_p5 = por %p320_p2, %p319_p0  ;;  %p18655_p6 = por %p326_p4, %p325_p3 }
  0x11   : > { %23199 = sst [smem:[#allocation11_spill]] %s18649_s17  ;;  %p424_p8 = scmp.lt.s32.totalorder %s18536_s28, 3 }
  0x12   : > { %s23201_s19 = scalar_select %p18655_p6, 1, 0 }
  0x13   : > { %p425_p9 = pnand %p11150_p7, %p424_p8 }
  0x14   : > { %23202 = sst [smem:[#allocation12_spill]] %s23201_s19 }
  0x15   : > { %428 = sbr.rel (%p425_p9) target bundleno = 7599 (0x1daf), region = 68 }
  0x1c   : > { %v553_v0 = vld [vmem:[%s23179_s4] sm:$0xff]  ;;  %v554_v1 = vld [vmem:[%s23179_s4 + $0x8] sm:$0xff]  ;;  %v555_v2 = vld [vmem:[%s23179_s4 + $0x10] sm:$0xff]  ;;  %p486_p10 = scmp.lt.s32.totalorder %s18634_s29, 1  ;;  %s23203_s0 = sld [smem:[#allocation18_spill]]  ;;  %vm1057_vm0 = vcmask 97280  }
  0x1d   : > { %v16014_v3 = vpack.c.bf16 %v554_v1, %v553_v0  ;;  %v556_v4 = vld [vmem:[%s23179_s4 + $0x18] sm:$0xff]  ;;  %v557_v6 = vld [vmem:[%s23179_s4 + $0x20] sm:$0xff]  ;;  %v558_v7 = vld [vmem:[%s23179_s4 + $0x28] sm:$0xff]  ;;  %s23204_s1 = sld [smem:[#allocation19_spill]]  ;;  %vm2741_vm4 = vcmask 261120   ;;  %s18539_s21 = smov [#allocation4]  }
  0x1e   : > { %v16018_v5 = vpack.c.bf16 %v556_v4, %v555_v2  ;;  %s18681_s22 = scalar_select %p486_p10, %s18634_s29, 1  ;;  %v16022_v8 = vpack.c.bf16 %v558_v7, %v557_v6  ;;  %v559_v9 = vld [vmem:[%s23179_s4 + $0x30] sm:$0xff]  ;;  %v560_v10 = vld [vmem:[%s23179_s4 + $0x38] sm:$0xff]  ;;  %v561_v13 = vld [vmem:[%s23179_s4 + $0x40] sm:$0xff] }
  0x1f   : > { %16015 = vmatprep.subr.bf16.mxu1 %v16014_v3  ;;  %v16026_v12 = vpack.c.bf16 %v560_v10, %v559_v9  ;;  %v562_v14 = vld [vmem:[%s23179_s4 + $0x48] sm:$0xff]  ;;  %v563_v16 = vld [vmem:[%s23179_s4 + $0x50] sm:$0xff]  ;;  %v564_v17 = vld [vmem:[%s23179_s4 + $0x58] sm:$0xff] }
  0x20   : > { %16017 = vmatpush3.bf16.msra.mxu1 %v16014_v3  ;;  %s18684_s23 = sshll.u32 %s18681_s22, 7  ;;  %v16030_v15 = vpack.c.bf16 %v562_v14, %v561_v13  ;;  %v16034_v18 = vpack.c.bf16 %v564_v17, %v563_v16  ;;  %v565_v19 = vld [vmem:[%s23179_s4 + $0x60] sm:$0xff]  ;;  %v566_v20 = vld [vmem:[%s23179_s4 + $0x68] sm:$0xff]  ;;  %v567_v22 = vld [vmem:[%s23179_s4 + $0x70] sm:$0xff] }
  0x21   : > { %16019 = vmatprep.subr.bf16.mxu1 %v16018_v5  ;;  %v16038_v21 = vpack.c.bf16 %v566_v20, %v565_v19  ;;  %v568_v23 = vld [vmem:[%s23179_s4 + $0x78] sm:$0xff]  ;;  %v721_v25 = vld [vmem:[%s23181_s6] sm:$0xff]  ;;  %v722_v26 = vld [vmem:[%s23181_s6 + $0x8] sm:$0xff]  ;;  %s18984_s25 = scalar_lea.vmem %s23177_s2, %s18684_s23 }
  0x22   : > { %s18690_s15 = scalar_lea.vmem %s23203_s0, %s18684_s23  ;;  %v16042_v24 = vpack.c.bf16 %v568_v23, %v567_v22  ;;  %v16046_v27 = vpack.c.bf16 %v722_v26, %v721_v25  ;;  %v723_v28 = vld [vmem:[%s23181_s6 + $0x10] sm:$0xff]  ;;  %v724_v29 = vld [vmem:[%s23181_s6 + $0x18] sm:$0xff]  ;;  %v725_v33 = vld [vmem:[%s23181_s6 + $0x20] sm:$0xff]  ;;  %s503_s0 = scalar_lea.vmem %s23178_s3, %s18681_s22 }
  0x23   : > { %v504_v11 = vld [vmem:[%s18690_s15] sm:$0xff]  ;;  %v505_v30 = vld [vmem:[%s18690_s15 + $0x8] sm:$0xff]  ;;  %v506_v31 = vld [vmem:[%s18690_s15 + $0x10] sm:$0xff]  ;;  %v16050_v32 = vpack.c.bf16 %v724_v29, %v723_v28  ;;  %s18789_s24 = scalar_lea.vmem %s23204_s1, %s18684_s23  ;;  %s19274_s1 = sand.u32 1, %s18528_s26  }
  0x24   : > { %13550 = vmatprep.mubr.f32.mxu1 %v504_v11  ;;  %16021 = vmatpush3.bf16.msra.mxu1 %v16018_v5  ;;  %v726_v34 = vld [vmem:[%s23181_s6 + $0x28] sm:$0xff]  ;;  %v507_v35 = vld [vmem:[%s18690_s15 + $0x18] sm:$0xff]  ;;  %v508_v36 = vld [vmem:[%s18690_s15 + $0x20] sm:$0xff]  ;;  %s11152_s23 = sshll.u32 %s19274_s1, 10  ;;  %s10991_s14 = scalar_lea.sflag [#allocation5], %s19274_s1 }
  0x25   : > { %16023 = vmatprep.subr.bf16.mxu1 %v16022_v8  ;;  %v16054_v37 = vpack.c.bf16 %v726_v34, %v725_v33  ;;  %v727_v38 = vld [vmem:[%s23181_s6 + $0x30] sm:$0xff]  ;;  %v728_v39 = vld [vmem:[%s23181_s6 + $0x38] sm:$0xff]  ;;  %v509_v40 = vld [vmem:[%s18690_s15 + $0x28] sm:$0xff]  ;;  %s19291_s30 = scalar_lea.vmem [#allocation4], %s11152_s23  ;;  %s12077_s23 = sshll.u32 %s18634_s29, 14 }
  0x26   : > { %v510_v41 = vld [vmem:[%s18690_s15 + $0x30] sm:$0xff]  ;;  %v16058_v42 = vpack.c.bf16 %v728_v39, %v727_v38  ;;  %v729_v43 = vld [vmem:[%s23181_s6 + $0x40] sm:$0xff]  ;;  %v730_v44 = vld [vmem:[%s23181_s6 + $0x48] sm:$0xff]  ;;  %s11020_s27 = sshll.u32 %s19291_s30, 4  ;;  %s23071_s27 = int_to_ptr.vmem [resolvable:$true] %s11020_s27 }
  0x27   : > { %v511_v45 = vld [vmem:[%s18690_s15 + $0x38] sm:$0xff]  ;;  %v512_v46 = vld [vmem:[%s18690_s15 + $0x40] sm:$0xff]  ;;  %v16062_v47 = vpack.c.bf16 %v730_v44, %v729_v43  ;;  %v731_v48 = vld [vmem:[%s23181_s6 + $0x50] sm:$0xff] }
  0x28   : > { %16025 = vmatpush3.bf16.msra.mxu1 %v16022_v8  ;;  %v732_v49 = vld [vmem:[%s23181_s6 + $0x58] sm:$0xff]  ;;  %v513_v50 = vld [vmem:[%s18690_s15 + $0x48] sm:$0xff]  ;;  %v514_v51 = vld [vmem:[%s18690_s15 + $0x50] sm:$0xff] }
  0x29   : > { %16027 = vmatprep.subr.bf16.mxu1 %v16026_v12  ;;  %v16066_v52 = vpack.c.bf16 %v732_v49, %v731_v48  ;;  %v733_v53 = vld [vmem:[%s23181_s6 + $0x60] sm:$0xff]  ;;  %v734_v54 = vld [vmem:[%s23181_s6 + $0x68] sm:$0xff]  ;;  %v515_v55 = vld [vmem:[%s18690_s15 + $0x58] sm:$0xff] }
  0x2a   : > { %v516_v56 = vld [vmem:[%s18690_s15 + $0x60] sm:$0xff]  ;;  %v16070_v57 = vpack.c.bf16 %v734_v54, %v733_v53  ;;  %v735_v58 = vld [vmem:[%s23181_s6 + $0x70] sm:$0xff]  ;;  %v736_v59 = vld [vmem:[%s23181_s6 + $0x78] sm:$0xff] }
  0x2b   : > { %v517_v60 = vld [vmem:[%s18690_s15 + $0x68] sm:$0xff]  ;;  %v518_v61 = vld [vmem:[%s18690_s15 + $0x70] sm:$0xff]  ;;  %v16074_v62 = vpack.c.bf16 %v736_v59, %v735_v58  ;;  %v519_v63 = vld [vmem:[%s18690_s15 + $0x78] sm:$0xff] }
  0x2c   : > { %16029 = vmatpush3.bf16.msra.mxu1 %v16026_v12  ;;  %v18793_v0 = vld [vmem:[%s18789_s24] sm:$0xff]  ;;  %v18797_v1 = vld [vmem:[%s18789_s24 + $0x8] sm:$0xff]  ;;  %v18800_v2 = vld [vmem:[%s18789_s24 + $0x10] sm:$0xff] }
  0x2d   : > { %16031 = vmatprep.subr.bf16.mxu1 %v16030_v15  ;;  %v18805_v3 = vld [vmem:[%s18789_s24 + $0x18] sm:$0xff]  ;;  %v18808_v4 = vld [vmem:[%s18789_s24 + $0x20] sm:$0xff]  ;;  %v18813_v5 = vld [vmem:[%s18789_s24 + $0x28] sm:$0xff] }
  0x2e   : > { %v18816_v6 = vld [vmem:[%s18789_s24 + $0x30] sm:$0xff]  ;;  %v18821_v7 = vld [vmem:[%s18789_s24 + $0x38] sm:$0xff]  ;;  %v18824_v8 = vld [vmem:[%s18789_s24 + $0x40] sm:$0xff] }
  0x2f   : > { %v18829_v9 = vld [vmem:[%s18789_s24 + $0x48] sm:$0xff]  ;;  %v18832_v10 = vld [vmem:[%s18789_s24 + $0x50] sm:$0xff]  ;;  %v18837_v11 = vld [vmem:[%s18789_s24 + $0x58] sm:$0xff] }
  0x30   : > { %16033 = vmatpush3.bf16.msra.mxu1 %v16030_v15  ;;  %v18840_v12 = vld [vmem:[%s18789_s24 + $0x60] sm:$0xff]  ;;  %v18845_v13 = vld [vmem:[%s18789_s24 + $0x68] sm:$0xff]  ;;  %v18848_v14 = vld [vmem:[%s18789_s24 + $0x70] sm:$0xff] }
  0x31   : > { %16035 = vmatprep.subr.bf16.mxu1 %v16034_v18  ;;  %v18853_v15 = vld [vmem:[%s18789_s24 + $0x78] sm:$0xff]  ;;  %v11159_v16 = vld [vmem:[%s23180_s5] ss:$0 sm:$0xff]  ;;  %vm18895_vm1 = vmpackc.low %vm1057_vm0, %vm1057_vm0 }
  0x32   : > { %v11160_v49 = vld [vmem:[%s23182_s7] ss:$0 sm:$0xff] }
  0x33   : > { %v11978_v54 = vld [vmem:[%s23183_s8 + $0x380] sm:$0xff] }
  0x34   : > { %16037 = vmatpush3.bf16.msra.mxu1 %v16034_v18 }
  0x35   : > { %16039 = vmatprep.subr.bf16.mxu1 %v16038_v21 }
  0x38   : > { %16041 = vmatpush3.bf16.msra.mxu1 %v16038_v21 }
  0x39   : > { %16043 = vmatprep.subr.bf16.mxu1 %v16042_v24 }
  0x3c   : > { %16045 = vmatpush3.bf16.msra.mxu1 %v16042_v24 }
  0x3d   : > { %16047 = vmatprep.subr.bf16.mxu1 %v16046_v27 }
  0x3f   : > { %13551 = vmatmul.mubr.f32.vlgmr.msra.gmra.mrb[0].mxu1 %v505_v30 }
  0x40   : > { %16049 = vmatpush3.bf16.msra.mxu1 %v16046_v27  ;;  %13553 = vmatprep.mubr.f32.mxu1 %v506_v31 }
  0x41   : > { %16051 = vmatprep.subr.bf16.mxu1 %v16050_v32 }
  0x43   : > { %13554 = vmatmul.mubr.f32.gmra.mrb[2].mxu1 %v507_v35 }
  0x44   : > { %16053 = vmatpush3.bf16.msra.mxu1 %v16050_v32  ;;  %13556 = vmatprep.mubr.f32.mxu1 %v508_v36 }
  0x45   : > { %16055 = vmatprep.subr.bf16.mxu1 %v16054_v37 }
  0x47   : > { %13557 = vmatmul.mubr.f32.gmra.mrb[4].mxu1 %v509_v40 }
  0x48   : > { %16057 = vmatpush3.bf16.msra.mxu1 %v16054_v37  ;;  %13559 = vmatprep.mubr.f32.mxu1 %v510_v41 }
  0x49   : > { %16059 = vmatprep.subr.bf16.mxu1 %v16058_v42 }
  0x4b   : > { %13560 = vmatmul.mubr.f32.gmra.mrb[6].mxu1 %v511_v45 }
  0x4c   : > { %16061 = vmatpush3.bf16.msra.mxu1 %v16058_v42  ;;  %13562 = vmatprep.mubr.f32.mxu1 %v512_v46 }
  0x4d   : > { %16063 = vmatprep.subr.bf16.mxu1 %v16062_v47 }
  0x4f   : > { %13563 = vmatmul.mubr.f32.gmra.mrb[8].mxu1 %v513_v50 }
  0x50   : > { %16065 = vmatpush3.bf16.msra.mxu1 %v16062_v47  ;;  %13565 = vmatprep.mubr.f32.mxu1 %v514_v51 }
  0x51   : > { %16067 = vmatprep.subr.bf16.mxu1 %v16066_v52 }
  0x53   : > { %13566 = vmatmul.mubr.f32.gmra.mrb[10].mxu1 %v515_v55 }
  0x54   : > { %16069 = vmatpush3.bf16.msra.mxu1 %v16066_v52  ;;  %13568 = vmatprep.mubr.f32.mxu1 %v516_v56 }
  0x55   : > { %16071 = vmatprep.subr.bf16.mxu1 %v16070_v57 }
  0x57   : > { %13569 = vmatmul.mubr.f32.gmra.mrb[12].mxu1 %v517_v60 }
  0x58   : > { %16073 = vmatpush3.bf16.msra.mxu1 %v16070_v57  ;;  %13571 = vmatprep.mubr.f32.mxu1 %v518_v61 }
  0x59   : > { %16075 = vmatprep.subr.bf16.mxu1 %v16074_v62 }
  0x5b   : > { %13572 = vmatmul.mubr.f32.gmra.mrb[14].mxu1 %v519_v63 }
  0x5c   : > { %16077 = vmatpush3.bf16.msra.mxu1 %v16074_v62  ;;  %13606 = vmatprep.mubr.f32.mxu1 %v18793_v0 }
  0x5f   : > { %13607 = vmatmul.mubr.f32.vlgmr.msra.gmra.mrb[16].mxu1 %v18797_v1 }
  0x60   : > { %13609 = vmatprep.mubr.f32.mxu1 %v18800_v2 }
  0x63   : > { %13610 = vmatmul.mubr.f32.gmra.mrb[18].mxu1 %v18805_v3 }
  0x64   : > { %13612 = vmatprep.mubr.f32.mxu1 %v18808_v4 }
  0x67   : > { %13613 = vmatmul.mubr.f32.gmra.mrb[20].mxu1 %v18813_v5 }
  0x68   : > { %13615 = vmatprep.mubr.f32.mxu1 %v18816_v6 }
  0x6b   : > { %13616 = vmatmul.mubr.f32.gmra.mrb[22].mxu1 %v18821_v7 }
  0x6c   : > { %13618 = vmatprep.mubr.f32.mxu1 %v18824_v8 }
  0x6f   : > { %13619 = vmatmul.mubr.f32.gmra.mrb[24].mxu1 %v18829_v9 }
  0x70   : > { %13621 = vmatprep.mubr.f32.mxu1 %v18832_v10 }
  0x73   : > { %13622 = vmatmul.mubr.f32.gmra.mrb[26].mxu1 %v18837_v11 }
  0x74   : > { %13624 = vmatprep.mubr.f32.mxu1 %v18840_v12 }
  0x77   : > { %13625 = vmatmul.mubr.f32.gmra.mrb[28].mxu1 %v18845_v13 }
  0x78   : > { %13627 = vmatprep.mubr.f32.mxu1 %v18848_v14 }
  0x7b   : > { %13628 = vmatmul.mubr.f32.gmra.mrb[30].mxu1 %v18853_v15 }
 0x112   : > { %v13552_v17 = vpop.f32.mrb[0].mxu1 }
 0x113   : > { %v18859_v18 = vadd.f32 %v13552_v17, %v11159_v16  ;;  %v642_v19 = vpop.f32.mrb[1].mxu1 }
 0x114   : > { %v643_v20 = vadd.f32 %v11159_v16, %v642_v19 }
 0x116   : > { %v13555_v21 = vpop.f32.mrb[2].mxu1  ;;  %13718 = vmatprep.mubr.msk.f32.mxu1 %vm1057_vm0, %v643_v20 }
 0x117   : > { %v18862_v22 = vadd.f32 %v13555_v21, %v11159_v16  ;;  %v652_v23 = vpop.f32.mrb[3].mxu1 }
 0x118   : > { %v18864_v24 = vadd.f32 %v11159_v16, %v652_v23 }
 0x11a   : > { %v13558_v25 = vpop.f32.mrb[4].mxu1 }
 0x11b   : > { %v18866_v26 = vadd.f32 %v13558_v25, %v11159_v16  ;;  %v662_v27 = vpop.f32.mrb[5].mxu1 }
 0x11c   : > { %v18868_v28 = vadd.f32 %v11159_v16, %v662_v27 }
 0x11e   : > { %v13561_v29 = vpop.f32.mrb[6].mxu1 }
 0x11f   : > { %v18870_v30 = vadd.f32 %v13561_v29, %v11159_v16  ;;  %v672_v31 = vpop.f32.mrb[7].mxu1 }
 0x120   : > { %v18872_v32 = vadd.f32 %v11159_v16, %v672_v31 }
 0x122   : > { %v13564_v33 = vpop.f32.mrb[8].mxu1 }
 0x123   : > { %v18874_v34 = vadd.f32 %v13564_v33, %v11159_v16  ;;  %v682_v35 = vpop.f32.mrb[9].mxu1 }
 0x124   : > { %v18876_v36 = vadd.f32 %v11159_v16, %v682_v35 }
 0x126   : > { %v13567_v37 = vpop.f32.mrb[10].mxu1 }
 0x127   : > { %v18878_v38 = vadd.f32 %v13567_v37, %v11159_v16  ;;  %v692_v39 = vpop.f32.mrb[11].mxu1 }
 0x128   : > { %v18880_v40 = vadd.f32 %v11159_v16, %v692_v39 }
 0x12a   : > { %v13570_v41 = vpop.f32.mrb[12].mxu1 }
 0x12b   : > { %v18882_v42 = vadd.f32 %v13570_v41, %v11159_v16  ;;  %v702_v43 = vpop.f32.mrb[13].mxu1 }
 0x12c   : > { %v18884_v44 = vadd.f32 %v11159_v16, %v702_v43 }
 0x12e   : > { %v13573_v45 = vpop.f32.mrb[14].mxu1 }
 0x12f   : > { %v18886_v46 = vadd.f32 %v13573_v45, %v11159_v16  ;;  %v712_v47 = vpop.f32.mrb[15].mxu1 }
 0x130   : > { %v18888_v48 = vadd.f32 %v11159_v16, %v712_v47 }
 0x132   : > { %v13608_v50 = vpop.f32.mrb[16].mxu1 }
 0x133   : > { %v816_v51 = vadd.f32 %v13608_v50, %v11160_v49  ;;  %v810_v52 = vpop.f32.mrb[17].mxu1 }
 0x134   : > { %v811_v53 = vadd.f32 %v11160_v49, %v810_v52 }
 0x136   : > { %v16110_v55 = vpack.c.bf16 %v816_v51, %v811_v53  ;;  %v13611_v56 = vpop.f32.mrb[18].mxu1 }
 0x137   : > { %v826_v57 = vadd.f32 %v13611_v56, %v11160_v49  ;;  %v820_v58 = vpop.f32.mrb[19].mxu1 }
 0x138   : > { %16112 = vmatprep.subr.msk.bf16.mxu1 %vm18895_vm1, %v16110_v55  ;;  %v821_v59 = vadd.f32 %v11160_v49, %v820_v58 }
 0x139   : > { %16115 = vmatpush3.bf16.xpose.msk.msra.mxu1 %vm18895_vm1, %v16110_v55 }
 0x13a   : > { %v16116_v60 = vpack.c.bf16 %v826_v57, %v821_v59  ;;  %v13614_v61 = vpop.f32.mrb[20].mxu1 }
 0x13b   : > { %v836_v62 = vadd.f32 %v13614_v61, %v11160_v49  ;;  %v830_v63 = vpop.f32.mrb[21].mxu1 }
 0x13c   : > { %16118 = vmatprep.subr.msk.bf16.mxu1 %vm18895_vm1, %v16116_v60  ;;  %v831_v16 = vadd.f32 %v11160_v49, %v830_v63  ;;  %v902_v63 = vld [vmem:[%s23183_s8 + $0x68] sm:$0xff] }
 0x13e   : > { %v16122_v17 = vpack.c.bf16 %v836_v62, %v831_v16  ;;  %v13617_v19 = vpop.f32.mrb[22].mxu1  ;;  %v901_v62 = vld [vmem:[%s23183_s8 + $0x60] sm:$0xff] }
 0x13f   : > { %v846_v20 = vadd.f32 %v13617_v19, %v11160_v49  ;;  %v840_v21 = vpop.f32.mrb[23].mxu1  ;;  %v16102_v16 = vpack.c.bf16 %v902_v63, %v901_v62  ;;  %v904_v19 = vld [vmem:[%s23183_s8 + $0x78] sm:$0xff] }
 0x140   : > { %v841_v23 = vadd.f32 %v11160_v49, %v840_v21  ;;  %v537_v21 = vld [vmem:[%s18984_s25 + $0x8] sm:$0xff] }
 0x141   : > { %16121 = vmatpush3.bf16.xpose.msk.msra.mxu1 %vm18895_vm1, %v16116_v60  ;;  %v900_v60 = vld [vmem:[%s23183_s8 + $0x58] sm:$0xff] }
 0x142   : > { %16124 = vmatprep.subr.msk.bf16.mxu1 %vm18895_vm1, %v16122_v17  ;;  %v16128_v25 = vpack.c.bf16 %v846_v20, %v841_v23  ;;  %v13620_v27 = vpop.f32.mrb[24].mxu1  ;;  %v538_v23 = vld [vmem:[%s18984_s25 + $0x10] sm:$0xff] }
 0x143   : > { %v856_v29 = vadd.f32 %v13620_v27, %v11160_v49  ;;  %v850_v31 = vpop.f32.mrb[25].mxu1  ;;  %v540_v27 = vld [vmem:[%s18984_s25 + $0x20] sm:$0xff] }
 0x144   : > { %v851_v33 = vadd.f32 %v11160_v49, %v850_v31  ;;  %v542_v31 = vld [vmem:[%s18984_s25 + $0x30] sm:$0xff] }
 0x146   : > { %v16134_v35 = vpack.c.bf16 %v856_v29, %v851_v33  ;;  %v13623_v37 = vpop.f32.mrb[26].mxu1  ;;  %v541_v29 = vld [vmem:[%s18984_s25 + $0x28] sm:$0xff]  ;;  %v543_v33 = vld [vmem:[%s18984_s25 + $0x38] sm:$0xff] }
 0x147   : > { %v866_v39 = vadd.f32 %v13623_v37, %v11160_v49  ;;  %v860_v41 = vpop.f32.mrb[27].mxu1  ;;  %v545_v37 = vld [vmem:[%s18984_s25 + $0x48] sm:$0xff] }
 0x148   : > { %v861_v43 = vadd.f32 %v11160_v49, %v860_v41  ;;  %v547_v41 = vld [vmem:[%s18984_s25 + $0x58] sm:$0xff] }
 0x149   : > { %16127 = vmatpush3.bf16.xpose.msk.msra.mxu1 %vm18895_vm1, %v16122_v17  ;;  %v903_v17 = vld [vmem:[%s23183_s8 + $0x70] sm:$0xff] }
 0x14a   : > { %16130 = vmatprep.subr.msk.bf16.mxu1 %vm18895_vm1, %v16128_v25  ;;  %v16140_v45 = vpack.c.bf16 %v866_v39, %v861_v43  ;;  %v13626_v47 = vpop.f32.mrb[28].mxu1  ;;  %v16106_v20 = vpack.c.bf16 %v904_v19, %v903_v17  ;;  %v546_v39 = vld [vmem:[%s18984_s25 + $0x50] sm:$0xff]  ;;  %v548_v43 = vld [vmem:[%s18984_s25 + $0x60] sm:$0xff] }
 0x14b   : > { %v876_v50 = vadd.f32 %v13626_v47, %v11160_v49  ;;  %v870_v51 = vpop.f32.mrb[29].mxu1  ;;  %v550_v47 = vld [vmem:[%s18984_s25 + $0x70] sm:$0xff] }
 0x14c   : > { %v871_v52 = vadd.f32 %v11160_v49, %v870_v51  ;;  %v1317_v51 = vlaneseq }
 0x14e   : > { %v16146_v53 = vpack.c.bf16 %v876_v50, %v871_v52  ;;  %v13629_v55 = vpop.f32.mrb[30].mxu1  ;;  %v551_v50 = vld [vmem:[%s18984_s25 + $0x78] sm:$0xff]  ;;  %v552_v52 = vld [vmem:[%s503_s0] sm:$0x1]  ;;  %s18446_s0 = sshll.u32 %s18539_s21, 4  ;;  %s18447_s0 = int_to_ptr.vmem [resolvable:$false] %s18446_s0 }
 0x14f   : > { %v886_v56 = vadd.f32 %v13629_v55, %v11160_v49  ;;  %v880_v57 = vpop.f32.mrb[31].mxu1  ;;  %vm1315_vm2 = vcmp.eq.f32.partialorder %v552_v52, 0.0  ;;  %p18449_p0 = scmp.lt.s32.totalorder %s23071_s27, %s18447_s0 }
 0x150   : > { %v881_v58 = vadd.f32 %v11160_v49, %v880_v57  ;;  %v899_v49 = vld [vmem:[%s23183_s8 + $0x50] sm:$0xff] }
 0x151   : > { %16133 = vmatpush3.bf16.xpose.msk.msra.mxu1 %vm18895_vm1, %v16128_v25  ;;  %v16098_v61 = vpack.c.bf16 %v900_v60, %v899_v49  ;;  %v539_v25 = vld [vmem:[%s18984_s25 + $0x18] sm:$0xff] }
 0x152   : > { %16136 = vmatprep.subr.msk.bf16.mxu1 %vm18895_vm1, %v16134_v35  ;;  %v16152_v59 = vpack.c.bf16 %v886_v56, %v881_v58  ;;  %v18538_v56 = vmov 0  }
 0x153   : > { %v1316_v57 = vsel %vm1315_vm2, 1, %v18538_v56 }
 0x159   : > { %16139 = vmatpush3.bf16.xpose.msk.msra.mxu1 %vm18895_vm1, %v16134_v35  ;;  %v544_v35 = vld [vmem:[%s18984_s25 + $0x40] sm:$0xff] }
 0x15a   : > { %16142 = vmatprep.subr.msk.bf16.mxu1 %vm18895_vm1, %v16140_v45 }
 0x161   : > { %16145 = vmatpush3.bf16.xpose.msk.msra.mxu1 %vm18895_vm1, %v16140_v45  ;;  %v549_v45 = vld [vmem:[%s18984_s25 + $0x68] sm:$0xff] }
 0x162   : > { %16148 = vmatprep.subr.msk.bf16.mxu1 %vm18895_vm1, %v16146_v53 }
 0x169   : > { %16151 = vmatpush3.bf16.xpose.msk.msra.mxu1 %vm18895_vm1, %v16146_v53  ;;  %v1318_v53 = vshrl.u32 %v1317_v51, 7 }
 0x16a   : > { %16154 = vmatprep.subr.msk.bf16.mxu1 %vm18895_vm1, %v16152_v59 }
 0x16b   : > { %v1319_v55 = vsub.s32 0, %v1318_v53 }
 0x16d   : > { %v19036_v58 = vrot.slane %v1316_v57, %v1319_v55 }
 0x16f   : > { %vm1321_vm3 = vcmp.eq.s32.totalorder %v19036_v58, 1 }
 0x171   : > { %16157 = vmatpush3.bf16.xpose.msk.msra.mxu1 %vm18895_vm1, %v16152_v59 }
 0x178   : > { %13719 = vmatmul.mubr.msk.f32.vlgmr.msra.gmra.mrb[32].mxu1 %vm1057_vm0, %v18859_v18  ;;  %v889_v18 = vld [vmem:[%s23183_s8] sm:$0xff] }
 0x179   : > { %13721 = vmatprep.mubr.msk.f32.mxu1 %vm1057_vm0, %v18864_v24 }
 0x17c   : > { %13722 = vmatmul.mubr.msk.f32.gmra.mrb[34].mxu1 %vm1057_vm0, %v18862_v22  ;;  %v890_v22 = vld [vmem:[%s23183_s8 + $0x8] sm:$0xff] }
 0x17d   : > { %13724 = vmatprep.mubr.msk.f32.mxu1 %vm1057_vm0, %v18868_v28  ;;  %v16078_v24 = vpack.c.bf16 %v890_v22, %v889_v18  ;;  %v892_v28 = vld [vmem:[%s23183_s8 + $0x18] sm:$0xff] }
 0x17f   : > { %16079 = vmatprep.subr.bf16.mxu0 %v16078_v24 }
 0x180   : > { %13725 = vmatmul.mubr.msk.f32.gmra.mrb[36].mxu1 %vm1057_vm0, %v18866_v26  ;;  %v891_v26 = vld [vmem:[%s23183_s8 + $0x10] sm:$0xff]  ;;  %16081 = vmatpush3.bf16.msra.mxu0 %v16078_v24 }
 0x181   : > { %13727 = vmatprep.mubr.msk.f32.mxu1 %vm1057_vm0, %v18872_v32  ;;  %v894_v32 = vld [vmem:[%s23183_s8 + $0x28] sm:$0xff] }
 0x184   : > { %13728 = vmatmul.mubr.msk.f32.gmra.mrb[38].mxu1 %vm1057_vm0, %v18870_v30  ;;  %v16082_v30 = vpack.c.bf16 %v892_v28, %v891_v26 }
 0x185   : > { %13730 = vmatprep.mubr.msk.f32.mxu1 %vm1057_vm0, %v18876_v36  ;;  %v895_v36 = vld [vmem:[%s23183_s8 + $0x30] sm:$0xff] }
 0x186   : > { %16083 = vmatprep.subr.bf16.mxu0 %v16082_v30 }
 0x187   : > { %16085 = vmatpush3.bf16.msra.mxu0 %v16082_v30 }
 0x188   : > { %13731 = vmatmul.mubr.msk.f32.gmra.mrb[40].mxu1 %vm1057_vm0, %v18874_v34 }
 0x189   : > { %13733 = vmatprep.mubr.msk.f32.mxu1 %vm1057_vm0, %v18880_v40  ;;  %v536_v40 = vld [vmem:[%s18984_s25] sm:$0xff] }
 0x18a   : > { %13662 = vmatprep.mubr.f32.mxu0 %v536_v40 }
 0x18c   : > { %13734 = vmatmul.mubr.msk.f32.gmra.mrb[42].mxu1 %vm1057_vm0, %v18878_v38  ;;  %v896_v38 = vld [vmem:[%s23183_s8 + $0x38] sm:$0xff] }
 0x18d   : > { %13736 = vmatprep.mubr.msk.f32.mxu1 %vm1057_vm0, %v18884_v44  ;;  %v897_v44 = vld [vmem:[%s23183_s8 + $0x40] sm:$0xff] }
 0x190   : > { %13737 = vmatmul.mubr.msk.f32.gmra.mrb[44].mxu1 %vm1057_vm0, %v18882_v42  ;;  %v16090_v42 = vpack.c.bf16 %v896_v38, %v895_v36 }
 0x191   : > { %13739 = vmatprep.mubr.msk.f32.mxu1 %vm1057_vm0, %v18888_v48 }
 0x194   : > { %13740 = vmatmul.mubr.msk.f32.gmra.mrb[46].mxu1 %vm1057_vm0, %v18886_v46  ;;  %v898_v46 = vld [vmem:[%s23183_s8 + $0x48] sm:$0xff] }
 0x195   : > { %13886 = vmatprep.mubr.f32.mxu1 %v18793_v0  ;;  %v893_v0 = vld [vmem:[%s23183_s8 + $0x20] sm:$0xff]  ;;  %v16094_v48 = vpack.c.bf16 %v898_v46, %v897_v44 }
 0x196   : > { %v16086_v34 = vpack.c.bf16 %v894_v32, %v893_v0 }
 0x198   : > { %16087 = vmatprep.subr.bf16.mxu0 %v16086_v34 }
 0x199   : > { %16089 = vmatpush3.bf16.msra.mxu0 %v16086_v34 }
 0x19a   : > { %16091 = vmatprep.subr.bf16.mxu0 %v16090_v42 }
 0x19d   : > { %16093 = vmatpush3.bf16.msra.mxu0 %v16090_v42 }
 0x19e   : > { %16095 = vmatprep.subr.bf16.mxu0 %v16094_v48 }
 0x1a1   : > { %16097 = vmatpush3.bf16.msra.mxu0 %v16094_v48 }
 0x1a2   : > { %16099 = vmatprep.subr.bf16.mxu0 %v16098_v61 }
 0x1a5   : > { %16101 = vmatpush3.bf16.msra.mxu0 %v16098_v61 }
 0x1a6   : > { %16103 = vmatprep.subr.bf16.mxu0 %v16102_v16 }
 0x1a9   : > { %16105 = vmatpush3.bf16.msra.mxu0 %v16102_v16 }
 0x1aa   : > { %16107 = vmatprep.subr.bf16.mxu0 %v16106_v20 }
 0x1ad   : > { %16109 = vmatpush3.bf16.msra.mxu0 %v16106_v20 }
 0x1b0   : > { %13663 = vmatmul.mubr.f32.vlgmr.msra.gmra.mrb[0].mxu0 %v537_v21 }
 0x1b1   : > { %13665 = vmatprep.mubr.f32.mxu0 %v538_v23 }
 0x1b4   : > { %13666 = vmatmul.mubr.f32.gmra.mrb[2].mxu0 %v539_v25 }
 0x1b5   : > { %13668 = vmatprep.mubr.f32.mxu0 %v540_v27 }
 0x1b8   : > { %13669 = vmatmul.mubr.f32.gmra.mrb[4].mxu0 %v541_v29 }
 0x1b9   : > { %13671 = vmatprep.mubr.f32.mxu0 %v542_v31 }
 0x1bc   : > { %13672 = vmatmul.mubr.f32.gmra.mrb[6].mxu0 %v543_v33 }
 0x1bd   : > { %13674 = vmatprep.mubr.f32.mxu0 %v544_v35 }
 0x1c0   : > { %13675 = vmatmul.mubr.f32.gmra.mrb[8].mxu0 %v545_v37 }
 0x1c1   : > { %13677 = vmatprep.mubr.f32.mxu0 %v546_v39 }
 0x1c4   : > { %13678 = vmatmul.mubr.f32.gmra.mrb[10].mxu0 %v547_v41 }
 0x1c5   : > { %13680 = vmatprep.mubr.f32.mxu0 %v548_v43 }
 0x1c8   : > { %13681 = vmatmul.mubr.f32.gmra.mrb[12].mxu0 %v549_v45 }
 0x1c9   : > { %13683 = vmatprep.mubr.f32.mxu0 %v550_v47 }
 0x1cc   : > { %13684 = vmatmul.mubr.f32.gmra.mrb[14].mxu0 %v551_v50 }
 0x24b   : > { %v13720_v59 = vpop.f32.mrb[32].mxu1 }
 0x24c   : > { %v1220_v18 = vpop.f32.mrb[33].mxu1  ;;  %v1300_v28 = vmul.f32 0.28867513, %v13720_v59 }
 0x24d   : > { %v1299_v22 = vmul.f32 0.28867513, %v1220_v18  ;;  %v11212_v18 = vld [vmem:[%s23181_s6 + $0x80] sm:$0xff] }
 0x24e   : > { %v19046_v36 = vsel %vm1321_vm3, -1e+09, %v1300_v28 }
 0x24f   : > { %v13723_v24 = vpop.f32.mrb[34].mxu1  ;;  %v19041_v26 = vsel %vm1321_vm3, -1e+09, %v1299_v22  ;;  %v11213_v22 = vld [vmem:[%s23181_s6 + $0x88] sm:$0xff] }
 0x250   : > { %1338 = vmax.xlane.f32.xlu0 %v19041_v26  ;;  %v1230_v0 = vpop.f32.mrb[35].mxu1  ;;  %v1302_v32 = vmul.f32 0.28867513, %v13723_v24  ;;  %v11214_v24 = vld [vmem:[%s23181_s6 + $0x90] sm:$0xff]  ;;  %v16222_v28 = vpack.c.bf16 %v11213_v22, %v11212_v18 }
 0x251   : > { %v1301_v30 = vmul.f32 0.28867513, %v1230_v0  ;;  %v11215_v0 = vld [vmem:[%s23181_s6 + $0x98] sm:$0xff] }
 0x252   : > { %v19056_v44 = vsel %vm1321_vm3, -1e+09, %v1302_v32  ;;  %v11216_v32 = vld [vmem:[%s23181_s6 + $0xa0] sm:$0xff]  ;;  %16223 = vmatprep.subr.bf16.mxu1 %v16222_v28 }
 0x253   : > { %v13726_v34 = vpop.f32.mrb[36].mxu1  ;;  %v19050_v38 = vsel %vm1321_vm3, -1e+09, %v1301_v30  ;;  %v16226_v30 = vpack.c.bf16 %v11215_v0, %v11214_v24  ;;  %16225 = vmatpush3.bf16.msra.mxu1 %v16222_v28 }
 0x254   : > { %1340 = vmax.xlane.f32.xlu0 %v19046_v36  ;;  %1342 = vmax.xlane.f32.xlu1 %v19050_v38  ;;  %v1240_v40 = vpop.f32.mrb[37].mxu1  ;;  %v1304_v49 = vmul.f32 0.28867513, %v13726_v34  ;;  %v11217_v34 = vld [vmem:[%s23181_s6 + $0xa8] sm:$0xff] }
 0x255   : > { %v1303_v42 = vmul.f32 0.28867513, %v1240_v40  ;;  %16227 = vmatprep.subr.bf16.mxu1 %v16226_v30  ;;  %v16230_v40 = vpack.c.bf16 %v11217_v34, %v11216_v32 }
 0x256   : > { %v19066_v16 = vsel %vm1321_vm3, -1e+09, %v1304_v49 }
 0x257   : > { %v13729_v46 = vpop.f32.mrb[38].mxu1  ;;  %v19060_v48 = vsel %vm1321_vm3, -1e+09, %v1303_v42  ;;  %v11218_v42 = vld [vmem:[%s23181_s6 + $0xb0] sm:$0xff]  ;;  %16229 = vmatpush3.bf16.msra.mxu1 %v16226_v30 }
 0x258   : > { %1344 = vmax.xlane.f32.xlu1 %v19056_v44  ;;  %1346 = vmax.xlane.f32.xlu0 %v19060_v48  ;;  %v1250_v60 = vpop.f32.mrb[39].mxu1  ;;  %v1306_v62 = vmul.f32 0.28867513, %v13729_v46  ;;  %v11219_v46 = vld [vmem:[%s23181_s6 + $0xb8] sm:$0xff] }
 0x259   : > { %v1305_v61 = vmul.f32 0.28867513, %v1250_v60  ;;  %16231 = vmatprep.subr.bf16.mxu1 %v16230_v40  ;;  %v16234_v49 = vpack.c.bf16 %v11219_v46, %v11218_v42  ;;  %v11220_v60 = vld [vmem:[%s23181_s6 + $0xc0] sm:$0xff] }
 0x25a   : > { %v19076_v21 = vsel %vm1321_vm3, -1e+09, %v1306_v62 }
 0x25b   : > { %v13732_v63 = vpop.f32.mrb[40].mxu1  ;;  %v19070_v17 = vsel %vm1321_vm3, -1e+09, %v1305_v61  ;;  %v11221_v61 = vld [vmem:[%s23181_s6 + $0xc8] sm:$0xff]  ;;  %16233 = vmatpush3.bf16.msra.mxu1 %v16230_v40 }
 0x25c   : > { %1348 = vmax.xlane.f32.xlu1 %v19066_v16  ;;  %1350 = vmax.xlane.f32.xlu0 %v19070_v17  ;;  %v1260_v19 = vpop.f32.mrb[41].mxu1  ;;  %v1308_v27 = vmul.f32 0.28867513, %v13732_v63  ;;  %v16238_v62 = vpack.c.bf16 %v11221_v61, %v11220_v60  ;;  %v11222_v63 = vld [vmem:[%s23181_s6 + $0xd0] sm:$0xff] }
 0x25d   : > { %v1307_v20 = vmul.f32 0.28867513, %v1260_v19  ;;  %16235 = vmatprep.subr.bf16.mxu1 %v16234_v49  ;;  %v11223_v19 = vld [vmem:[%s23181_s6 + $0xd8] sm:$0xff] }
 0x25e   : > { %v19086_v37 = vsel %vm1321_vm3, -1e+09, %v1308_v27  ;;  %v11225_v27 = vld [vmem:[%s23181_s6 + $0xe8] sm:$0xff] }
 0x25f   : > { %v13735_v23 = vpop.f32.mrb[42].mxu1  ;;  %v19080_v25 = vsel %vm1321_vm3, -1e+09, %v1307_v20  ;;  %16237 = vmatpush3.bf16.msra.mxu1 %v16234_v49  ;;  %v16242_v20 = vpack.c.bf16 %v11223_v19, %v11222_v63 }
 0x260   : > { %1352 = vmax.xlane.f32.xlu1 %v19076_v21  ;;  %1354 = vmax.xlane.f32.xlu0 %v19080_v25  ;;  %v1270_v29 = vpop.f32.mrb[43].mxu1  ;;  %v1310_v33 = vmul.f32 0.28867513, %v13735_v23  ;;  %v11224_v23 = vld [vmem:[%s23181_s6 + $0xe0] sm:$0xff] }
 0x261   : > { %v1309_v31 = vmul.f32 0.28867513, %v1270_v29  ;;  %16239 = vmatprep.subr.bf16.mxu1 %v16238_v62  ;;  %v16246_v29 = vpack.c.bf16 %v11225_v27, %v11224_v23 }
 0x262   : > { %v19096_v45 = vsel %vm1321_vm3, -1e+09, %v1310_v33  ;;  %v11227_v33 = vld [vmem:[%s23181_s6 + $0xf8] sm:$0xff] }
 0x263   : > { %v13738_v35 = vpop.f32.mrb[44].mxu1  ;;  %v19090_v39 = vsel %vm1321_vm3, -1e+09, %v1309_v31  ;;  %16241 = vmatpush3.bf16.msra.mxu1 %v16238_v62  ;;  %v11226_v31 = vld [vmem:[%s23181_s6 + $0xf0] sm:$0xff] }
 0x264   : > { %1356 = vmax.xlane.f32.xlu1 %v19086_v37  ;;  %1358 = vmax.xlane.f32.xlu0 %v19090_v39  ;;  %v1280_v41 = vpop.f32.mrb[45].mxu1  ;;  %v1312_v51 = vmul.f32 0.28867513, %v13738_v35  ;;  %v16250_v35 = vpack.c.bf16 %v11227_v33, %v11226_v31 }
 0x265   : > { %v1311_v43 = vmul.f32 0.28867513, %v1280_v41  ;;  %16243 = vmatprep.subr.bf16.mxu1 %v16242_v20 }
 0x266   : > { %v19106_v55 = vsel %vm1321_vm3, -1e+09, %v1312_v51 }
 0x267   : > { %v13741_v47 = vpop.f32.mrb[46].mxu1  ;;  %v19100_v50 = vsel %vm1321_vm3, -1e+09, %v1311_v43  ;;  %16245 = vmatpush3.bf16.msra.mxu1 %v16242_v20 }
 0x268   : > { %1360 = vmax.xlane.f32.xlu1 %v19096_v45  ;;  %1362 = vmax.xlane.f32.xlu0 %v19100_v50  ;;  %v1290_v52 = vpop.f32.mrb[47].mxu1  ;;  %v1314_v57 = vmul.f32 0.28867513, %v13741_v47 }
 0x269   : > { %v1313_v53 = vmul.f32 0.28867513, %v1290_v52  ;;  %16247 = vmatprep.subr.bf16.mxu1 %v16246_v29 }
 0x26a   : > { %v19116_v59 = vsel %vm1321_vm3, -1e+09, %v1314_v57 }
 0x26b   : > { %v19110_v56 = vsel %vm1321_vm3, -1e+09, %v1313_v53  ;;  %16249 = vmatpush3.bf16.msra.mxu1 %v16246_v29 }
 0x26c   : > { %1364 = vmax.xlane.f32.xlu1 %v19106_v55  ;;  %1366 = vmax.xlane.f32.xlu0 %v19110_v56 }
 0x26d   : > { %16251 = vmatprep.subr.bf16.mxu1 %v16250_v35 }
 0x26f   : > { %16253 = vmatpush3.bf16.msra.mxu1 %v16250_v35 }
 0x270   : > { %1368 = vmax.xlane.f32.xlu1 %v19116_v59 }
 0x272   : > { %13887 = vmatmul.mubr.f32.vlgmr.msra.gmra.mrb[48].mxu1 %v18797_v1 }
 0x273   : > { %13889 = vmatprep.mubr.f32.mxu1 %v18800_v2 }
 0x276   : > { %13890 = vmatmul.mubr.f32.gmra.mrb[50].mxu1 %v18805_v3 }
 0x277   : > { %13892 = vmatprep.mubr.f32.mxu1 %v18808_v4 }
 0x27a   : > { %13893 = vmatmul.mubr.f32.gmra.mrb[52].mxu1 %v18813_v5 }
 0x27b   : > { %13895 = vmatprep.mubr.f32.mxu1 %v18816_v6 }
 0x27e   : > { %13896 = vmatmul.mubr.f32.gmra.mrb[54].mxu1 %v18821_v7 }
 0x27f   : > { %13898 = vmatprep.mubr.f32.mxu1 %v18824_v8  ;;  %v19188_v8 = vld [vmem:[%s23184_s9] ss:$0 sm:$0xff] }
 0x282   : > { %13899 = vmatmul.mubr.f32.gmra.mrb[56].mxu1 %v18829_v9 }
 0x283   : > { %13901 = vmatprep.mubr.f32.mxu1 %v18832_v10 }
 0x286   : > { %13902 = vmatmul.mubr.f32.gmra.mrb[58].mxu1 %v18837_v11  ;;  %v13664_v11 = vpop.f32.mrb[0].mxu0 }
 0x287   : > { %13904 = vmatprep.mubr.f32.mxu1 %v18840_v12 }
 0x28a   : > { %13905 = vmatmul.mubr.f32.gmra.mrb[60].mxu1 %v18845_v13 }
 0x28b   : > { %13907 = vmatprep.mubr.f32.mxu1 %v18848_v14  ;;  %v984_v14 = vadd.f32 %v13664_v11, %v19188_v8 }
 0x28e   : > { %13908 = vmatmul.mubr.f32.gmra.mrb[62].mxu1 %v18853_v15 }
 0x2dd   : > { %v1339_v1 = vpop.xlane.xlu0 %1338 }
 0x2de   : > { %v1370_v2 = vsub.f32 %v19041_v26, %v1339_v1 }
 0x2e0   : > { %v1386_v3 = vmul.f32 1.442695, %v1370_v2 }
 0x2e1   : > { %v1341_v4 = vpop.xlane.xlu0 %1340  ;;  %v1343_v5 = vpop.xlane.xlu1 %1342 }
 0x2e2   : > { %17645 = vpow2.f32 %v1386_v3  ;;  %v1371_v6 = vsub.f32 %v19046_v36, %v1341_v4  ;;  %v1372_v7 = vsub.f32 %v19050_v38, %v1343_v5  ;;  %v978_v36 = vpop.f32.mrb[1].mxu0 }
 0x2e3   : > { %v979_v38 = vadd.f32 %v19188_v8, %v978_v36  ;;  %v13667_v47 = vpop.f32.mrb[2].mxu0 }
 0x2e4   : > { %v1388_v9 = vmul.f32 1.442695, %v1371_v6  ;;  %v1390_v10 = vmul.f32 1.442695, %v1372_v7  ;;  %v994_v53 = vadd.f32 %v13667_v47, %v19188_v8 }
 0x2e5   : > { %v1345_v12 = vpop.xlane.xlu1 %1344  ;;  %v1347_v13 = vpop.xlane.xlu0 %1346  ;;  %v16158_v57 = vpack.c.bf16 %v984_v14, %v979_v38 }
 0x2e6   : > { %17647 = vpow2.f32 %v1388_v9  ;;  %v1373_v15 = vsub.f32 %v19056_v44, %v1345_v12  ;;  %v1374_v26 = vsub.f32 %v19060_v48, %v1347_v13  ;;  %v988_v44 = vpop.f32.mrb[3].mxu0 }
 0x2e7   : > { %17649 = vpow2.f32 %v1390_v10  ;;  %v989_v48 = vadd.f32 %v19188_v8, %v988_v44  ;;  %16159 = vmatprep.subr.bf16.mxu0 %v16158_v57  ;;  %v13670_v30 = vpop.f32.mrb[4].mxu0 }
 0x2e8   : > { %v1392_v41 = vmul.f32 1.442695, %v1373_v15  ;;  %v1394_v43 = vmul.f32 1.442695, %v1374_v26  ;;  %16161 = vmatpush3.bf16.msra.mxu0 %v16158_v57  ;;  %v1004_v40 = vadd.f32 %v13670_v30, %v19188_v8  ;;  %v998_v46 = vpop.f32.mrb[5].mxu0 }
 0x2e9   : > { %v1349_v51 = vpop.xlane.xlu1 %1348  ;;  %v1351_v52 = vpop.xlane.xlu0 %1350  ;;  %v999_v49 = vadd.f32 %v19188_v8, %v998_v46 }
 0x2ea   : > { %17651 = vpow2.f32 %v1392_v41  ;;  %v1375_v18 = vsub.f32 %v19066_v16, %v1349_v51  ;;  %v1376_v22 = vsub.f32 %v19070_v17, %v1351_v52  ;;  %v16162_v16 = vpack.c.bf16 %v994_v53, %v989_v48  ;;  %v13673_v63 = vpop.f32.mrb[6].mxu0 }
 0x2eb   : > { %17653 = vpow2.f32 %v1394_v43  ;;  %v1008_v31 = vpop.f32.mrb[7].mxu0 }
 0x2ec   : > { %v19198_v24 = vpop.eup %17645  ;;  %v1396_v28 = vmul.f32 1.442695, %v1375_v18  ;;  %v1398_v0 = vmul.f32 1.442695, %v1376_v22  ;;  %16163 = vmatprep.subr.bf16.mxu0 %v16162_v16  ;;  %v1009_v33 = vadd.f32 %v19188_v8, %v1008_v31  ;;  %v13676_v3 = vpop.f32.mrb[8].mxu0 }
 0x2ed   : > { %v1353_v32 = vpop.xlane.xlu1 %1352  ;;  %v1355_v34 = vpop.xlane.xlu0 %1354  ;;  %1418 = vadd.xlane.f32.xlu0 %v19198_v24  ;;  %16165 = vmatpush3.bf16.msra.mxu0 %v16162_v16  ;;  %v19279_v31 = vld [vmem:[%s23182_s7 + $0x1] ss:$0 sm:$0xff] }
 0x2ee   : > { %17655 = vpow2.f32 %v1396_v28  ;;  %v1377_v17 = vsub.f32 %v19076_v21, %v1353_v32  ;;  %v1378_v42 = vsub.f32 %v19080_v25, %v1355_v34  ;;  %v1014_v21 = vadd.f32 %v13673_v63, %v19188_v8  ;;  %v1018_v10 = vpop.f32.mrb[9].mxu0 }
 0x2ef   : > { %17657 = vpow2.f32 %v1398_v0  ;;  %v16166_v25 = vpack.c.bf16 %v1004_v40, %v999_v49  ;;  %v1019_v11 = vadd.f32 %v19188_v8, %v1018_v10  ;;  %v13679_v15 = vpop.f32.mrb[10].mxu0  ;;  %v11196_v10 = vld [vmem:[%s23179_s4 + $0x90] sm:$0xff] }
 0x2f0   : > { %v19205_v60 = vpop.eup %17647  ;;  %v1400_v61 = vmul.f32 1.442695, %v1377_v17  ;;  %v1402_v62 = vmul.f32 1.442695, %v1378_v42  ;;  %v1028_v47 = vpop.f32.mrb[11].mxu0 }
 0x2f1   : > { %v19207_v19 = vpop.eup %17649  ;;  %v1357_v20 = vpop.xlane.xlu1 %1356  ;;  %1420 = vadd.xlane.f32.xlu1 %v19205_v60  ;;  %16167 = vmatprep.subr.bf16.mxu0 %v16166_v25  ;;  %v1029_v51 = vadd.f32 %v19188_v8, %v1028_v47 }
 0x2f2   : > { %v1359_v23 = vpop.xlane.xlu0 %1358  ;;  %17659 = vpow2.f32 %v1400_v61  ;;  %v1379_v27 = vsub.f32 %v19086_v37, %v1357_v20  ;;  %1422 = vadd.xlane.f32.xlu0 %v19207_v19  ;;  %16169 = vmatpush3.bf16.msra.mxu0 %v16166_v25  ;;  %v1024_v37 = vadd.f32 %v13676_v3, %v19188_v8  ;;  %v13682_v18 = vpop.f32.mrb[12].mxu0  ;;  %v11195_v20 = vld [vmem:[%s23179_s4 + $0x88] sm:$0xff] }
 0x2f3   : > { %v1380_v29 = vsub.f32 %v19090_v39, %v1359_v23  ;;  %17661 = vpow2.f32 %v1402_v62  ;;  %v16170_v39 = vpack.c.bf16 %v1014_v21, %v1009_v33  ;;  %v1044_v44 = vadd.f32 %v13682_v18, %v19188_v8  ;;  %v1038_v48 = vpop.f32.mrb[13].mxu0 }
 0x2f4   : > { %v19215_v35 = vpop.eup %17651  ;;  %v1404_v1 = vmul.f32 1.442695, %v1379_v27  ;;  %v16174_v38 = vpack.c.bf16 %v1024_v37, %v1019_v11  ;;  %v1039_v0 = vadd.f32 %v19188_v8, %v1038_v48  ;;  %v13685_v34 = vpop.f32.mrb[14].mxu0  ;;  %v11197_v11 = vld [vmem:[%s23179_s4 + $0x98] sm:$0xff] }
 0x2f5   : > { %v1406_v2 = vmul.f32 1.442695, %v1380_v29  ;;  %v19217_v4 = vpop.eup %17653  ;;  %v1361_v5 = vpop.xlane.xlu1 %1360  ;;  %1424 = vadd.xlane.f32.xlu1 %v19215_v35  ;;  %16171 = vmatprep.subr.bf16.mxu0 %v16170_v39  ;;  %v1054_v17 = vadd.f32 %v13685_v34, %v19188_v8 }
 0x2f6   : > { %v1363_v6 = vpop.xlane.xlu0 %1362  ;;  %17663 = vpow2.f32 %v1404_v1  ;;  %v1381_v7 = vsub.f32 %v19096_v45, %v1361_v5  ;;  %1426 = vadd.xlane.f32.xlu0 %v19217_v4  ;;  %16173 = vmatpush3.bf16.msra.mxu0 %v16170_v39  ;;  %v16182_v40 = vpack.c.bf16 %v1044_v44, %v1039_v0  ;;  %v1048_v42 = vpop.f32.mrb[15].mxu0 }
 0x2f7   : > { %v1382_v9 = vsub.f32 %v19100_v50, %v1363_v6  ;;  %17665 = vpow2.f32 %v1406_v2  ;;  %v1034_v50 = vadd.f32 %v13679_v15, %v19188_v8  ;;  %16175 = vmatprep.subr.bf16.mxu0 %v16174_v38 }
 0x2f8   : > { %v19225_v12 = vpop.eup %17655  ;;  %v1408_v13 = vmul.f32 1.442695, %v1381_v7 }
 0x2f9   : > { %v1410_v14 = vmul.f32 1.442695, %v1382_v9  ;;  %v19227_v26 = vpop.eup %17657  ;;  %v1365_v36 = vpop.xlane.xlu1 %1364  ;;  %1428 = vadd.xlane.f32.xlu1 %v19225_v12 }
 0x2fa   : > { %v1367_v45 = vpop.xlane.xlu0 %1366  ;;  %17667 = vpow2.f32 %v1408_v13  ;;  %v1383_v41 = vsub.f32 %v19106_v55, %v1365_v36  ;;  %1430 = vadd.xlane.f32.xlu0 %v19227_v26  ;;  %16177 = vmatpush3.bf16.msra.mxu0 %v16174_v38 }
 0x2fb   : > { %v1384_v43 = vsub.f32 %v19110_v56, %v1367_v45  ;;  %17669 = vpow2.f32 %v1410_v14  ;;  %v16178_v56 = vpack.c.bf16 %v1034_v50, %v1029_v51 }
 0x2fc   : > { %v19235_v52 = vpop.eup %17659  ;;  %v1412_v53 = vmul.f32 1.442695, %v1383_v41 }
 0x2fd   : > { %v1414_v57 = vmul.f32 1.442695, %v1384_v43  ;;  %v19237_v22 = vpop.eup %17661  ;;  %1432 = vadd.xlane.f32.xlu1 %v19235_v52  ;;  %v1369_v55 = vpop.xlane.xlu1 %1368  ;;  %16179 = vmatprep.subr.bf16.mxu0 %v16178_v56  ;;  %v16194_v43 = vpack.c.bf16 %v11197_v11, %v11196_v10 }
 0x2fe   : > { %17671 = vpow2.f32 %v1412_v53  ;;  %v1385_v28 = vsub.f32 %v19116_v59, %v1369_v55  ;;  %1434 = vadd.xlane.f32.xlu0 %v19237_v22  ;;  %16181 = vmatpush3.bf16.msra.mxu0 %v16178_v56  ;;  %v1049_v59 = vadd.f32 %v19188_v8, %v1048_v42  ;;  %v11194_v8 = vld [vmem:[%s23179_s4 + $0x80] sm:$0xff]  ;;  %v11201_v42 = vld [vmem:[%s23179_s4 + $0xb8] sm:$0xff] }
 0x2ff   : > { %17673 = vpow2.f32 %v1414_v57  ;;  %16183 = vmatprep.subr.bf16.mxu0 %v16182_v40  ;;  %v16190_v23 = vpack.c.bf16 %v11195_v20, %v11194_v8  ;;  %v11198_v53 = vld [vmem:[%s23179_s4 + $0xa0] sm:$0xff]  ;;  %v11199_v57 = vld [vmem:[%s23179_s4 + $0xa8] sm:$0xff] }
 0x300   : > { %v19244_v30 = vpop.eup %17663  ;;  %v1416_v32 = vmul.f32 1.442695, %v1385_v28  ;;  %v16186_v49 = vpack.c.bf16 %v1054_v17, %v1049_v59  ;;  %v11200_v17 = vld [vmem:[%s23179_s4 + $0xb0] sm:$0xff] }
 0x301   : > { %v19246_v16 = vpop.eup %17665  ;;  %1436 = vadd.xlane.f32.xlu1 %v19244_v30 }
 0x302   : > { %17675 = vpow2.f32 %v1416_v32  ;;  %1438 = vadd.xlane.f32.xlu0 %v19246_v16  ;;  %16185 = vmatpush3.bf16.msra.mxu0 %v16182_v40  ;;  %v16198_v32 = vpack.c.bf16 %v11199_v57, %v11198_v53 }
 0x303   : > { %16187 = vmatprep.subr.bf16.mxu0 %v16186_v49 }
 0x304   : > { %v19252_v46 = vpop.eup %17667 }
 0x305   : > { %v19254_v61 = vpop.eup %17669  ;;  %1440 = vadd.xlane.f32.xlu1 %v19252_v46 }
 0x306   : > { %1442 = vadd.xlane.f32.xlu0 %v19254_v61  ;;  %16189 = vmatpush3.bf16.msra.mxu0 %v16186_v49 }
 0x307   : > { %16191 = vmatprep.subr.bf16.mxu0 %v16190_v23 }
 0x308   : > { %v19258_v62 = vpop.eup %17671 }
 0x309   : > { %v19260_v63 = vpop.eup %17673  ;;  %1444 = vadd.xlane.f32.xlu1 %v19258_v62 }
 0x30a   : > { %1446 = vadd.xlane.f32.xlu0 %v19260_v63 }
 0x30c   : > { %v19270_v21 = vpop.eup %17675 }
 0x30d   : > { %1448 = vadd.xlane.f32.xlu1 %v19270_v21 }
 0x345   : > { %v13888_v2 = vpop.f32.mrb[48].mxu1 }
 0x346   : > { %v1914_v3 = vadd.f32 %v13888_v2, %v19279_v31  ;;  %v1908_v5 = vpop.f32.mrb[49].mxu1  ;;  %v11202_v2 = vld [vmem:[%s23179_s4 + $0xc0] sm:$0xff] }
 0x347   : > { %v1909_v37 = vadd.f32 %v19279_v31, %v1908_v5 }
 0x349   : > { %v16286_v13 = vpack.c.bf16 %v1914_v3, %v1909_v37  ;;  %v13891_v14 = vpop.f32.mrb[50].mxu1  ;;  %v11203_v3 = vld [vmem:[%s23179_s4 + $0xc8] sm:$0xff] }
 0x34a   : > { %v1918_v15 = vpop.f32.mrb[51].mxu1  ;;  %v16206_v11 = vpack.c.bf16 %v11203_v3, %v11202_v2 }
 0x34b   : > { %16288 = vmatprep.subr.msk.bf16.mxu1 %vm18895_vm1, %v16286_v13  ;;  %v1919_v45 = vadd.f32 %v19279_v31, %v1918_v15  ;;  %v11205_v15 = vld [vmem:[%s23179_s4 + $0xd8] sm:$0xff] }
 0x34c   : > { %16291 = vmatpush3.bf16.xpose.msk.msra.mxu1 %vm18895_vm1, %v16286_v13 }
 0x34d   : > { %v13894_v55 = vpop.f32.mrb[52].mxu1 }
 0x34e   : > { %v1928_v44 = vpop.f32.mrb[53].mxu1 }
 0x37a   : > { %v1419_v25 = vpop.xlane.xlu0 %1418 }
 0x37b   : > { %17677 = vrcp.f32 %v1419_v25 }
 0x37e   : > { %v1421_v27 = vpop.xlane.xlu1 %1420 }
 0x37f   : > { %17679 = vrcp.f32 %v1421_v27  ;;  %v1423_v29 = vpop.xlane.xlu0 %1422 }
 0x380   : > { %17681 = vrcp.f32 %v1423_v29  ;;  %v16202_v29 = vpack.c.bf16 %v11201_v42, %v11200_v17  ;;  %v19425_v17 = vld [vmem:[%s18690_s15 + $0x40] sm:$0xff]  ;;  %v19429_v42 = vld [vmem:[%s18690_s15 + $0x48] sm:$0xff] }
 0x382   : > { %v1425_v33 = vpop.xlane.xlu1 %1424 }
 0x383   : > { %17683 = vrcp.f32 %v1425_v33  ;;  %v1427_v1 = vpop.xlane.xlu0 %1426 }
 0x384   : > { %17685 = vrcp.f32 %v1427_v1 }
 0x385   : > { %v17678_v6 = vpop.eup %17677 }
 0x386   : > { %v1429_v39 = vpop.xlane.xlu1 %1428  ;;  %v1451_v7 = vmul.f32 %v17678_v6, %v19198_v24  ;;  %v1924_v24 = vadd.f32 %v13891_v14, %v19279_v31 }
 0x387   : > { %17687 = vrcp.f32 %v1429_v39  ;;  %v1431_v9 = vpop.xlane.xlu0 %1430 }
 0x388   : > { %17689 = vrcp.f32 %v1431_v9  ;;  %1482 = vst [vmem:[%s19291_s30] sm:$0xff] %v1451_v7  ;;  %13774 = vmatprep.mubr.f32.mxu0 %v1451_v7  ;;  %v16292_v18 = vpack.c.bf16 %v1924_v24, %v1919_v45  ;;  %v11204_v24 = vld [vmem:[%s23179_s4 + $0xd0] sm:$0xff] }
 0x389   : > { %v17680_v36 = vpop.eup %17679 }
 0x38a   : > { %v17682_v50 = vpop.eup %17681  ;;  %v1433_v38 = vpop.xlane.xlu1 %1432  ;;  %v1453_v41 = vmul.f32 %v17680_v36, %v19205_v60  ;;  %v1934_v60 = vadd.f32 %v13894_v55, %v19279_v31  ;;  %16294 = vmatprep.subr.msk.bf16.mxu1 %vm18895_vm1, %v16292_v18  ;;  %v11209_v55 = vld [vmem:[%s23179_s4 + $0xf8] sm:$0xff] }
 0x38b   : > { %17691 = vrcp.f32 %v1433_v38  ;;  %v1435_v47 = vpop.xlane.xlu0 %1434  ;;  %v1455_v51 = vmul.f32 %v17682_v50, %v19207_v19  ;;  %v1929_v19 = vadd.f32 %v19279_v31, %v1928_v44  ;;  %16297 = vmatpush3.bf16.xpose.msk.msra.mxu1 %vm18895_vm1, %v16292_v18  ;;  %v16210_v38 = vpack.c.bf16 %v11205_v15, %v11204_v24  ;;  %v11208_v18 = vld [vmem:[%s23179_s4 + $0xf0] sm:$0xff] }
 0x38c   : > { %17693 = vrcp.f32 %v1435_v47  ;;  %1483 = vst [vmem:[%s19291_s30 + $0x8] sm:$0xff] %v1453_v41  ;;  %13775 = vmatmul.mubr.f32.vlgmr.msra.gmra.mrb[16].mxu0 %v1453_v41  ;;  %v11207_v47 = vld [vmem:[%s23179_s4 + $0xe8] sm:$0xff]  ;;  %v16218_v44 = vpack.c.bf16 %v11209_v55, %v11208_v18  ;;  %v11334_v18 = vld [vmem:[%s23179_s4 + $0x110] sm:$0xff]  ;;  %v11335_v55 = vld [vmem:[%s23179_s4 + $0x118] sm:$0xff] }
 0x38d   : > { %v17684_v48 = vpop.eup %17683  ;;  %1484 = vst [vmem:[%s19291_s30 + $0x10] sm:$0xff] %v1455_v51  ;;  %13777 = vmatprep.mubr.f32.mxu0 %v1455_v51  ;;  %16193 = vmatpush3.bf16.msra.mxu0 %v16190_v23  ;;  %v16298_v59 = vpack.c.bf16 %v1934_v60, %v1929_v19 }
 0x38e   : > { %v17686_v56 = vpop.eup %17685  ;;  %v1437_v28 = vpop.xlane.xlu1 %1436  ;;  %v1457_v0 = vmul.f32 %v17684_v48, %v19215_v35  ;;  %16195 = vmatprep.subr.bf16.mxu0 %v16194_v43 }
 0x38f   : > { %17695 = vrcp.f32 %v1437_v28  ;;  %v1439_v34 = vpop.xlane.xlu0 %1438  ;;  %v1459_v40 = vmul.f32 %v17686_v56, %v19217_v4  ;;  %v13897_v35 = vpop.f32.mrb[54].mxu1  ;;  %16300 = vmatprep.subr.msk.bf16.mxu1 %vm18895_vm1, %v16298_v59  ;;  %v19397_v56 = vld [vmem:[%s18690_s15 + $0x8] sm:$0xff]  ;;  %v19405_v28 = vld [vmem:[%s18690_s15 + $0x18] sm:$0xff] }
 0x390   : > { %17697 = vrcp.f32 %v1439_v34  ;;  %1485 = vst [vmem:[%s19291_s30 + $0x18] sm:$0xff] %v1457_v0  ;;  %13778 = vmatmul.mubr.f32.gmra.mrb[18].mxu0 %v1457_v0  ;;  %v1944_v49 = vadd.f32 %v13897_v35, %v19279_v31  ;;  %v1938_v8 = vpop.f32.mrb[55].mxu1  ;;  %v19409_v0 = vld [vmem:[%s18690_s15 + $0x20] sm:$0xff]  ;;  %v19417_v34 = vld [vmem:[%s18690_s15 + $0x30] sm:$0xff]  ;;  %v19437_v35 = vld [vmem:[%s18690_s15 + $0x58] sm:$0xff] }
 0x391   : > { %v17688_v20 = vpop.eup %17687  ;;  %1486 = vst [vmem:[%s19291_s30 + $0x20] sm:$0xff] %v1459_v40  ;;  %13780 = vmatprep.mubr.f32.mxu0 %v1459_v40  ;;  %16197 = vmatpush3.bf16.msra.mxu0 %v16194_v43  ;;  %v1939_v4 = vadd.f32 %v19279_v31, %v1938_v8  ;;  %v13900_v5 = vpop.f32.mrb[56].mxu1  ;;  %v11206_v43 = vld [vmem:[%s23179_s4 + $0xe0] sm:$0xff]  ;;  %v19421_v40 = vld [vmem:[%s18690_s15 + $0x38] sm:$0xff]  ;;  %v19445_v8 = vld [vmem:[%s18690_s15 + $0x68] sm:$0xff] }
 0x392   : > { %v17690_v23 = vpop.eup %17689  ;;  %v1441_v25 = vpop.xlane.xlu1 %1440  ;;  %v1461_v27 = vmul.f32 %v17688_v20, %v19225_v12  ;;  %16199 = vmatprep.subr.bf16.mxu0 %v16198_v32  ;;  %v1954_v6 = vadd.f32 %v13900_v5, %v19279_v31  ;;  %v16214_v53 = vpack.c.bf16 %v11207_v47, %v11206_v43  ;;  %v19449_v20 = vld [vmem:[%s18690_s15 + $0x70] sm:$0xff] }
 0x393   : > { %17699 = vrcp.f32 %v1441_v25  ;;  %v1443_v33 = vpop.xlane.xlu0 %1442  ;;  %v1463_v1 = vmul.f32 %v17690_v23, %v19227_v26  ;;  %v19338_v12 = vpack.c.bf16 %v1944_v49, %v1939_v4  ;;  %v1948_v26 = vpop.f32.mrb[57].mxu1  ;;  %16303 = vmatpush3.bf16.xpose.msk.msra.mxu1 %vm18895_vm1, %v16298_v59  ;;  %v19433_v59 = vld [vmem:[%s18690_s15 + $0x50] sm:$0xff]  ;;  %v19441_v49 = vld [vmem:[%s18690_s15 + $0x60] sm:$0xff]  ;;  %v19453_v4 = vld [vmem:[%s18690_s15 + $0x78] sm:$0xff] }
 0x394   : > { %17701 = vrcp.f32 %v1443_v33  ;;  %1487 = vst [vmem:[%s19291_s30 + $0x28] sm:$0xff] %v1461_v27  ;;  %13781 = vmatmul.mubr.f32.gmra.mrb[20].mxu0 %v1461_v27  ;;  %v1949_v39 = vadd.f32 %v19279_v31, %v1948_v26  ;;  %v18173_v23 = vld [vmem:[%s18984_s25] sm:$0xff]  ;;  %v13903_v25 = vpop.f32.mrb[58].mxu1 }
 0x395   : > { %v17692_v37 = vpop.eup %17691  ;;  %1488 = vst [vmem:[%s19291_s30 + $0x30] sm:$0xff] %v1463_v1  ;;  %13783 = vmatprep.mubr.f32.mxu0 %v1463_v1  ;;  %16201 = vmatpush3.bf16.msra.mxu0 %v16198_v32  ;;  %v19413_v32 = vld [vmem:[%s18690_s15 + $0x28] sm:$0xff]  ;;  %v1964_v27 = vadd.f32 %v13903_v25, %v19279_v31 }
 0x396   : > { %v17694_v7 = vpop.eup %17693  ;;  %v1445_v9 = vpop.xlane.xlu1 %1444  ;;  %v1465_v10 = vmul.f32 %v17692_v37, %v19235_v52  ;;  %16203 = vmatprep.subr.bf16.mxu0 %v16202_v29  ;;  %v16310_v36 = vpack.c.bf16 %v1954_v6, %v1949_v39  ;;  %16306 = vmatprep.subr.msk.bf16.mxu1 %vm18895_vm1, %v19338_v12 }
 0x397   : > { %17703 = vrcp.f32 %v1445_v9  ;;  %v1447_v13 = vpop.xlane.xlu0 %1446  ;;  %v1467_v14 = vmul.f32 %v17694_v7, %v19237_v22 }
 0x398   : > { %17705 = vrcp.f32 %v1447_v13  ;;  %1489 = vst [vmem:[%s19291_s30 + $0x38] sm:$0xff] %v1465_v10  ;;  %13784 = vmatmul.mubr.f32.gmra.mrb[22].mxu0 %v1465_v10  ;;  %v11332_v10 = vld [vmem:[%s23179_s4 + $0x100] sm:$0xff] }
 0x399   : > { %v17696_v52 = vpop.eup %17695  ;;  %1490 = vst [vmem:[%s19291_s30 + $0x40] sm:$0xff] %v1467_v14  ;;  %13786 = vmatprep.mubr.f32.mxu0 %v1467_v14  ;;  %16205 = vmatpush3.bf16.msra.mxu0 %v16202_v29  ;;  %v1958_v29 = vpop.f32.mrb[59].mxu1 }
 0x39a   : > { %v17698_v45 = vpop.eup %17697  ;;  %v1449_v22 = vpop.xlane.xlu1 %1448  ;;  %v1469_v50 = vmul.f32 %v17696_v52, %v19244_v30  ;;  %16207 = vmatprep.subr.bf16.mxu0 %v16206_v11  ;;  %v1959_v33 = vadd.f32 %v19279_v31, %v1958_v29 }
 0x39b   : > { %17707 = vrcp.f32 %v1449_v22  ;;  %v1471_v41 = vmul.f32 %v17698_v45, %v19246_v16  ;;  %16309 = vmatpush3.bf16.xpose.msk.msra.mxu1 %vm18895_vm1, %v19338_v12  ;;  %v13906_v2 = vpop.f32.mrb[60].mxu1 }
 0x39c   : > { %1491 = vst [vmem:[%s19291_s30 + $0x48] sm:$0xff] %v1469_v50  ;;  %13787 = vmatmul.mubr.f32.gmra.mrb[24].mxu0 %v1469_v50  ;;  %16312 = vmatprep.subr.msk.bf16.mxu1 %vm18895_vm1, %v16310_v36  ;;  %v16316_v1 = vpack.c.bf16 %v1964_v27, %v1959_v33  ;;  %v1974_v3 = vadd.f32 %v13906_v2, %v19279_v31  ;;  %v1968_v12 = vpop.f32.mrb[61].mxu1  ;;  %v11339_v2 = vld [vmem:[%s23179_s4 + $0x138] sm:$0xff] }
 0x39d   : > { %v17700_v30 = vpop.eup %17699  ;;  %1492 = vst [vmem:[%s19291_s30 + $0x50] sm:$0xff] %v1471_v41  ;;  %13789 = vmatprep.mubr.f32.mxu0 %v1471_v41  ;;  %16209 = vmatpush3.bf16.msra.mxu0 %v16206_v11  ;;  %v1969_v5 = vadd.f32 %v19279_v31, %v1968_v12  ;;  %v13909_v26 = vpop.f32.mrb[62].mxu1  ;;  %v11333_v11 = vld [vmem:[%s23179_s4 + $0x108] sm:$0xff] }
 0x39e   : > { %v17702_v16 = vpop.eup %17701  ;;  %v1473_v51 = vmul.f32 %v17700_v30, %v19252_v46  ;;  %16211 = vmatprep.subr.bf16.mxu0 %v16210_v38  ;;  %v1984_v37 = vadd.f32 %v13909_v26, %v19279_v31  ;;  %v1978_v39 = vpop.f32.mrb[63].mxu1  ;;  %v16382_v13 = vpack.c.bf16 %v11333_v11, %v11332_v10 }
 0x39f   : > { %v1475_v57 = vmul.f32 %v17702_v16, %v19254_v61  ;;  %v16322_v6 = vpack.c.bf16 %v1974_v3, %v1969_v5  ;;  %v1979_v7 = vadd.f32 %v19279_v31, %v1978_v39  ;;  %v11341_v39 = vld [vmem:[%s23179_s4 + $0x148] sm:$0xff] }
 0x3a0   : > { %1493 = vst [vmem:[%s19291_s30 + $0x58] sm:$0xff] %v1473_v51  ;;  %13790 = vmatmul.mubr.f32.gmra.mrb[26].mxu0 %v1473_v51 }
 0x3a1   : > { %v17704_v60 = vpop.eup %17703  ;;  %1494 = vst [vmem:[%s19291_s30 + $0x60] sm:$0xff] %v1475_v57  ;;  %13792 = vmatprep.mubr.f32.mxu0 %v1475_v57  ;;  %16213 = vmatpush3.bf16.msra.mxu0 %v16210_v38  ;;  %v16328_v9 = vpack.c.bf16 %v1984_v37, %v1979_v7  ;;  %v11340_v37 = vld [vmem:[%s23179_s4 + $0x140] sm:$0xff] }
 0x3a2   : > { %v17706_v46 = vpop.eup %17705  ;;  %v1477_v61 = vmul.f32 %v17704_v60, %v19258_v62  ;;  %16215 = vmatprep.subr.bf16.mxu0 %v16214_v53  ;;  %v16398_v11 = vpack.c.bf16 %v11341_v39, %v11340_v37  ;;  %v11351_v37 = vld [vmem:[%s23181_s6 + $0x108] sm:$0xff] }
 0x3a3   : > { %v1479_v48 = vmul.f32 %v17706_v46, %v19260_v63  ;;  %v19391_v63 = vld [vmem:[%s18690_s15] sm:$0xff]  ;;  %16315 = vmatpush3.bf16.xpose.msk.msra.mxu1 %vm18895_vm1, %v16310_v36 }
 0x3a4   : > { %1495 = vst [vmem:[%s19291_s30 + $0x68] sm:$0xff] %v1477_v61  ;;  %13793 = vmatmul.mubr.f32.gmra.mrb[28].mxu0 %v1477_v61  ;;  %16318 = vmatprep.subr.msk.bf16.mxu1 %vm18895_vm1, %v16316_v1 }
 0x3a5   : > { %v17708_v19 = vpop.eup %17707  ;;  %1496 = vst [vmem:[%s19291_s30 + $0x70] sm:$0xff] %v1479_v48  ;;  %13795 = vmatprep.mubr.f32.mxu0 %v1479_v48  ;;  %16217 = vmatpush3.bf16.msra.mxu0 %v16214_v53  ;;  %v19516_v53 = vld [vmem:[%s23180_s5 + $0x1] ss:$0 sm:$0xff] }
 0x3a6   : > { %v1481_v62 = vmul.f32 %v17708_v19, %v19270_v21  ;;  %16219 = vmatprep.subr.bf16.mxu0 %v16218_v44  ;;  %v19401_v21 = vld [vmem:[%s18690_s15 + $0x10] sm:$0xff]  ;;  %v11336_v19 = vld [vmem:[%s23179_s4 + $0x120] sm:$0xff] }
 0x3a8   : > { %1497 = vst [vmem:[%s19291_s30 + $0x78] sm:$0xff] %v1481_v62  ;;  %13796 = vmatmul.mubr.f32.gmra.mrb[30].mxu0 %v1481_v62  ;;  %v11337_v62 = vld [vmem:[%s23179_s4 + $0x128] sm:$0xff] }
 0x3a9   : > { %16221 = vmatpush3.bf16.msra.mxu0 %v16218_v44  ;;  %13830 = vmatprep.mubr.f32.mxu0 %v19391_v63  ;;  %v16386_v44 = vpack.c.bf16 %v11335_v55, %v11334_v18  ;;  %v16390_v29 = vpack.c.bf16 %v11337_v62, %v11336_v19  ;;  %v11343_v18 = vld [vmem:[%s23179_s4 + $0x158] sm:$0xff]  ;;  %v11345_v19 = vld [vmem:[%s23179_s4 + $0x168] sm:$0xff] }
 0x3ab   : > { %16321 = vmatpush3.bf16.xpose.msk.msra.mxu1 %vm18895_vm1, %v16316_v1  ;;  %v11338_v1 = vld [vmem:[%s23179_s4 + $0x130] sm:$0xff] }
 0x3ac   : > { %13831 = vmatmul.mubr.f32.vlgmr.msra.gmra.mrb[32].mxu0 %v19397_v56  ;;  %16324 = vmatprep.subr.msk.bf16.mxu1 %vm18895_vm1, %v16322_v6 }
 0x3ad   : > { %13833 = vmatprep.mubr.f32.mxu0 %v19401_v21 }
 0x3b0   : > { %13834 = vmatmul.mubr.f32.gmra.mrb[34].mxu0 %v19405_v28 }
 0x3b1   : > { %13836 = vmatprep.mubr.f32.mxu0 %v19409_v0 }
 0x3b3   : > { %16327 = vmatpush3.bf16.xpose.msk.msra.mxu1 %vm18895_vm1, %v16322_v6  ;;  %v16394_v6 = vpack.c.bf16 %v11339_v2, %v11338_v1  ;;  %v11347_v1 = vld [vmem:[%s23179_s4 + $0x178] sm:$0xff] }
 0x3b4   : > { %13837 = vmatmul.mubr.f32.gmra.mrb[36].mxu0 %v19413_v32  ;;  %16330 = vmatprep.subr.msk.bf16.mxu1 %vm18895_vm1, %v16328_v9 }
 0x3b5   : > { %13839 = vmatprep.mubr.f32.mxu0 %v19417_v34 }
 0x3b8   : > { %13840 = vmatmul.mubr.f32.gmra.mrb[38].mxu0 %v19421_v40 }
 0x3b9   : > { %13842 = vmatprep.mubr.f32.mxu0 %v19425_v17 }
 0x3bb   : > { %16333 = vmatpush3.bf16.xpose.msk.msra.mxu1 %vm18895_vm1, %v16328_v9 }
 0x3bc   : > { %13843 = vmatmul.mubr.f32.gmra.mrb[40].mxu0 %v19429_v42  ;;  %16383 = vmatprep.subr.bf16.mxu1 %v16382_v13 }
 0x3bd   : > { %13845 = vmatprep.mubr.f32.mxu0 %v19433_v59 }
 0x3c0   : > { %13846 = vmatmul.mubr.f32.gmra.mrb[42].mxu0 %v19437_v35 }
 0x3c1   : > { %13848 = vmatprep.mubr.f32.mxu0 %v19441_v49 }
 0x3c4   : > { %13849 = vmatmul.mubr.f32.gmra.mrb[44].mxu0 %v19445_v8 }
 0x3c5   : > { %13851 = vmatprep.mubr.f32.mxu0 %v19449_v20 }
 0x3c8   : > { %13852 = vmatmul.mubr.f32.gmra.mrb[46].mxu0 %v19453_v4 }
 0x3c9   : > { %13942 = vmatprep.mubr.f32.mxu0 %v18173_v23 }
 0x45f   : > { %v19481_v14 = vpop.f32.mrb[16].mxu0 }
 0x460   : > { %v19483_v31 = vpop.f32.mrb[17].mxu0 }
 0x463   : > { %v19485_v24 = vpop.f32.mrb[18].mxu0 }
 0x464   : > { %v19487_v15 = vpop.f32.mrb[19].mxu0 }
 0x467   : > { %v19489_v36 = vpop.f32.mrb[20].mxu0 }
 0x468   : > { %v19491_v52 = vpop.f32.mrb[21].mxu0 }
 0x46b   : > { %v19493_v45 = vpop.f32.mrb[22].mxu0 }
 0x46c   : > { %v19495_v22 = vpop.f32.mrb[23].mxu0 }
 0x46f   : > { %v19497_v50 = vpop.f32.mrb[24].mxu0 }
 0x470   : > { %v19499_v38 = vpop.f32.mrb[25].mxu0 }
 0x473   : > { %v19501_v41 = vpop.f32.mrb[26].mxu0 }
 0x474   : > { %23207 = vst [vmem:[#allocation13_spill] sm:$0xff] %v19501_v41  ;;  %v19503_v43 = vpop.f32.mrb[27].mxu0 }
 0x477   : > { %v19505_v47 = vpop.f32.mrb[28].mxu0 }
 0x478   : > { %23208 = vst [vmem:[#allocation14_spill] sm:$0xff] %v19505_v47  ;;  %v19507_v30 = vpop.f32.mrb[29].mxu0 }
 0x479   : > { %23209 = vst [vmem:[#allocation15_spill] sm:$0xff] %v19507_v30 }
 0x47b   : > { %v19509_v16 = vpop.f32.mrb[30].mxu0 }
 0x47c   : > { %23210 = vst [vmem:[#allocation16_spill] sm:$0xff] %v19509_v16  ;;  %v19511_v51 = vpop.f32.mrb[31].mxu0 }
 0x47d   : > { %23211 = vst [vmem:[#allocation17_spill] sm:$0xff] %v19511_v51 }
 0x47f   : > { %v13832_v57 = vpop.f32.mrb[32].mxu0 }
 0x480   : > { %v1738_v60 = vpop.f32.mrb[33].mxu0  ;;  %v1744_v61 = vadd.f32 %v13832_v57, %v19516_v53  ;;  %v11342_v57 = vld [vmem:[%s23179_s4 + $0x150] sm:$0xff] }
 0x481   : > { %v1739_v46 = vadd.f32 %v19516_v53, %v1738_v60 }
 0x483   : > { %v13835_v48 = vpop.f32.mrb[34].mxu0  ;;  %13998 = vmatprep.mubr.msk.f32.mxu1 %vm1057_vm0, %v1739_v46 }
 0x484   : > { %v1748_v23 = vpop.f32.mrb[35].mxu0  ;;  %13999 = vmatmul.mubr.msk.f32.vlgmr.msra.gmra.mrb[64].mxu1 %vm1057_vm0, %v1744_v61  ;;  %v1754_v27 = vadd.f32 %v13835_v48, %v19516_v53  ;;  %v16402_v61 = vpack.c.bf16 %v11343_v18, %v11342_v57  ;;  %v11344_v48 = vld [vmem:[%s23179_s4 + $0x160] sm:$0xff]  ;;  %v11355_v18 = vld [vmem:[%s23181_s6 + $0x128] sm:$0xff] }
 0x485   : > { %v1749_v25 = vadd.f32 %v19516_v53, %v1748_v23  ;;  %16385 = vmatpush3.bf16.msra.mxu1 %v16382_v13 }
 0x486   : > { %16387 = vmatprep.subr.bf16.mxu1 %v16386_v44 }
 0x487   : > { %v13838_v33 = vpop.f32.mrb[36].mxu0  ;;  %14001 = vmatprep.mubr.msk.f32.mxu1 %vm1057_vm0, %v1749_v25 }
 0x488   : > { %v1758_v3 = vpop.f32.mrb[37].mxu0  ;;  %14002 = vmatmul.mubr.msk.f32.gmra.mrb[66].mxu1 %vm1057_vm0, %v1754_v27  ;;  %v1764_v5 = vadd.f32 %v13838_v33, %v19516_v53  ;;  %v16406_v27 = vpack.c.bf16 %v11345_v19, %v11344_v48  ;;  %v11346_v33 = vld [vmem:[%s23179_s4 + $0x170] sm:$0xff]  ;;  %v11363_v48 = vld [vmem:[%s23181_s6 + $0x168] sm:$0xff]  ;;  %v11365_v19 = vld [vmem:[%s23181_s6 + $0x178] sm:$0xff] }
 0x489   : > { %v1759_v12 = vadd.f32 %v19516_v53, %v1758_v3  ;;  %16389 = vmatpush3.bf16.msra.mxu1 %v16386_v44 }
 0x48a   : > { %16391 = vmatprep.subr.bf16.mxu1 %v16390_v29 }
 0x48b   : > { %v13841_v26 = vpop.f32.mrb[38].mxu0  ;;  %14004 = vmatprep.mubr.msk.f32.mxu1 %vm1057_vm0, %v1759_v12 }
 0x48c   : > { %v1768_v7 = vpop.f32.mrb[39].mxu0  ;;  %14005 = vmatmul.mubr.msk.f32.gmra.mrb[68].mxu1 %vm1057_vm0, %v1764_v5  ;;  %v1774_v10 = vadd.f32 %v13841_v26, %v19516_v53  ;;  %v16410_v5 = vpack.c.bf16 %v11347_v1, %v11346_v33  ;;  %v11350_v26 = vld [vmem:[%s23181_s6 + $0x100] sm:$0xff]  ;;  %v18185_v33 = vld [vmem:[%s18789_s24 + $0x58] sm:$0xff] }
 0x48d   : > { %v1769_v9 = vadd.f32 %v19516_v53, %v1768_v7  ;;  %16393 = vmatpush3.bf16.msra.mxu1 %v16390_v29  ;;  %v18186_v1 = vld [vmem:[%s18789_s24 + $0x60] sm:$0xff] }
 0x48e   : > { %16395 = vmatprep.subr.bf16.mxu1 %v16394_v6 }
 0x48f   : > { %v13844_v13 = vpop.f32.mrb[40].mxu0  ;;  %14007 = vmatprep.mubr.msk.f32.mxu1 %vm1057_vm0, %v1769_v9 }
 0x490   : > { %v1778_v55 = vpop.f32.mrb[41].mxu0  ;;  %14008 = vmatmul.mubr.msk.f32.gmra.mrb[70].mxu1 %vm1057_vm0, %v1774_v10  ;;  %v1784_v46 = vadd.f32 %v13844_v13, %v19516_v53  ;;  %v16414_v10 = vpack.c.bf16 %v11351_v37, %v11350_v26  ;;  %v11353_v13 = vld [vmem:[%s23181_s6 + $0x118] sm:$0xff]  ;;  %v11232_v26 = vld [vmem:[%s23183_s8 + $0x90] sm:$0xff] }
 0x491   : > { %v1779_v60 = vadd.f32 %v19516_v53, %v1778_v55  ;;  %16397 = vmatpush3.bf16.msra.mxu1 %v16394_v6 }
 0x492   : > { %16399 = vmatprep.subr.bf16.mxu1 %v16398_v11 }
 0x493   : > { %v13847_v44 = vpop.f32.mrb[42].mxu0  ;;  %14010 = vmatprep.mubr.msk.f32.mxu1 %vm1057_vm0, %v1779_v60  ;;  %v11356_v60 = vld [vmem:[%s23181_s6 + $0x130] sm:$0xff] }
 0x494   : > { %v1788_v62 = vpop.f32.mrb[43].mxu0  ;;  %14011 = vmatmul.mubr.msk.f32.gmra.mrb[72].mxu1 %vm1057_vm0, %v1784_v46  ;;  %v1794_v25 = vadd.f32 %v13847_v44, %v19516_v53  ;;  %v11357_v46 = vld [vmem:[%s23181_s6 + $0x138] sm:$0xff] }
 0x495   : > { %v1789_v23 = vadd.f32 %v19516_v53, %v1788_v62  ;;  %16401 = vmatpush3.bf16.msra.mxu1 %v16398_v11  ;;  %v11352_v11 = vld [vmem:[%s23181_s6 + $0x110] sm:$0xff]  ;;  %v11361_v44 = vld [vmem:[%s23181_s6 + $0x158] sm:$0xff]  ;;  %v18178_v62 = vld [vmem:[%s18789_s24 + $0x20] sm:$0xff] }
 0x496   : > { %16403 = vmatprep.subr.bf16.mxu1 %v16402_v61  ;;  %v16418_v57 = vpack.c.bf16 %v11353_v13, %v11352_v11  ;;  %v11236_v13 = vld [vmem:[%s23183_s8 + $0xb0] sm:$0xff] }
 0x497   : > { %v13850_v29 = vpop.f32.mrb[44].mxu0  ;;  %14013 = vmatprep.mubr.msk.f32.mxu1 %vm1057_vm0, %v1789_v23  ;;  %v18181_v23 = vld [vmem:[%s18789_s24 + $0x38] sm:$0xff] }
 0x498   : > { %v1798_v2 = vpop.f32.mrb[45].mxu0  ;;  %14014 = vmatmul.mubr.msk.f32.gmra.mrb[74].mxu1 %vm1057_vm0, %v1794_v25  ;;  %v1804_v12 = vadd.f32 %v13850_v29, %v19516_v53  ;;  %v18182_v25 = vld [vmem:[%s18789_s24 + $0x40] sm:$0xff]  ;;  %v18184_v29 = vld [vmem:[%s18789_s24 + $0x50] sm:$0xff] }
 0x499   : > { %v1799_v3 = vadd.f32 %v19516_v53, %v1798_v2  ;;  %16405 = vmatpush3.bf16.msra.mxu1 %v16402_v61  ;;  %v11359_v61 = vld [vmem:[%s23181_s6 + $0x148] sm:$0xff] }
 0x49a   : > { %16407 = vmatprep.subr.bf16.mxu1 %v16406_v27  ;;  %v18187_v2 = vld [vmem:[%s18789_s24 + $0x68] sm:$0xff] }
 0x49b   : > { %v13853_v6 = vpop.f32.mrb[46].mxu0  ;;  %14016 = vmatprep.mubr.msk.f32.mxu1 %vm1057_vm0, %v1799_v3  ;;  %v18188_v3 = vld [vmem:[%s18789_s24 + $0x70] sm:$0xff] }
 0x49c   : > { %v1808_v39 = vpop.f32.mrb[47].mxu0  ;;  %14017 = vmatmul.mubr.msk.f32.gmra.mrb[76].mxu1 %vm1057_vm0, %v1804_v12  ;;  %v1814_v9 = vadd.f32 %v13853_v6, %v19516_v53  ;;  %v18189_v12 = vld [vmem:[%s18789_s24 + $0x78] sm:$0xff]  ;;  %v11231_v6 = vld [vmem:[%s23183_s8 + $0x88] sm:$0xff] }
 0x49d   : > { %v1809_v7 = vadd.f32 %v19516_v53, %v1808_v39  ;;  %16409 = vmatpush3.bf16.msra.mxu1 %v16406_v27  ;;  %v11354_v53 = vld [vmem:[%s23181_s6 + $0x120] sm:$0xff]  ;;  %v18183_v27 = vld [vmem:[%s18789_s24 + $0x48] sm:$0xff]  ;;  %v11233_v39 = vld [vmem:[%s23183_s8 + $0x98] sm:$0xff] }
 0x49e   : > { %16411 = vmatprep.subr.bf16.mxu1 %v16410_v5  ;;  %v16422_v55 = vpack.c.bf16 %v11355_v18, %v11354_v53  ;;  %v11238_v18 = vld [vmem:[%s23183_s8 + $0xc0] sm:$0xff] }
 0x49f   : > { %14019 = vmatprep.mubr.msk.f32.mxu1 %vm1057_vm0, %v1809_v7  ;;  %v16258_v7 = vpack.c.bf16 %v11233_v39, %v11232_v26 }
 0x4a0   : > { %14020 = vmatmul.mubr.msk.f32.gmra.mrb[78].mxu1 %vm1057_vm0, %v1814_v9  ;;  %v11234_v9 = vld [vmem:[%s23183_s8 + $0xa0] sm:$0xff] }
 0x4a1   : > { %16413 = vmatpush3.bf16.msra.mxu1 %v16410_v5  ;;  %14174 = vmatprep.mubr.f32.mxu1 %v19391_v63  ;;  %v11230_v5 = vld [vmem:[%s23183_s8 + $0x80] sm:$0xff] }
 0x4a2   : > { %16415 = vmatprep.subr.bf16.mxu1 %v16414_v10  ;;  %v16254_v37 = vpack.c.bf16 %v11231_v6, %v11230_v5 }
 0x4a4   : > { %14175 = vmatmul.mubr.f32.vlgmr.msra.gmra.mrb[80].mxu1 %v19397_v56  ;;  %v16426_v56 = vpack.c.bf16 %v11357_v46, %v11356_v60  ;;  %16255 = vmatprep.subr.bf16.mxu0 %v16254_v37  ;;  %v11240_v46 = vld [vmem:[%s23183_s8 + $0xd0] sm:$0xff] }
 0x4a5   : > { %16417 = vmatpush3.bf16.msra.mxu1 %v16414_v10  ;;  %14177 = vmatprep.mubr.f32.mxu1 %v19401_v21  ;;  %v11358_v21 = vld [vmem:[%s23181_s6 + $0x140] sm:$0xff]  ;;  %v11235_v10 = vld [vmem:[%s23183_s8 + $0xa8] sm:$0xff] }
 0x4a6   : > { %16419 = vmatprep.subr.bf16.mxu1 %v16418_v57  ;;  %16257 = vmatpush3.bf16.msra.mxu0 %v16254_v37  ;;  %v16262_v11 = vpack.c.bf16 %v11235_v10, %v11234_v9 }
 0x4a7   : > { %16259 = vmatprep.subr.bf16.mxu0 %v16258_v7 }
 0x4a8   : > { %14178 = vmatmul.mubr.f32.gmra.mrb[82].mxu1 %v19405_v28  ;;  %v16430_v28 = vpack.c.bf16 %v11359_v61, %v11358_v21  ;;  %v11242_v61 = vld [vmem:[%s23183_s8 + $0xe0] sm:$0xff] }
 0x4a9   : > { %16421 = vmatpush3.bf16.msra.mxu1 %v16418_v57  ;;  %14180 = vmatprep.mubr.f32.mxu1 %v19409_v0  ;;  %v11360_v0 = vld [vmem:[%s23181_s6 + $0x150] sm:$0xff]  ;;  %v11237_v57 = vld [vmem:[%s23183_s8 + $0xb8] sm:$0xff] }
 0x4aa   : > { %16423 = vmatprep.subr.bf16.mxu1 %v16422_v55  ;;  %16261 = vmatpush3.bf16.msra.mxu0 %v16258_v7  ;;  %v16266_v53 = vpack.c.bf16 %v11237_v57, %v11236_v13 }
 0x4ab   : > { %16263 = vmatprep.subr.bf16.mxu0 %v16262_v11 }
 0x4ac   : > { %14181 = vmatmul.mubr.f32.gmra.mrb[84].mxu1 %v19413_v32  ;;  %v16434_v32 = vpack.c.bf16 %v11361_v44, %v11360_v0  ;;  %v11244_v44 = vld [vmem:[%s23183_s8 + $0xf0] sm:$0xff] }
 0x4ad   : > { %16425 = vmatpush3.bf16.msra.mxu1 %v16422_v55  ;;  %14183 = vmatprep.mubr.f32.mxu1 %v19417_v34  ;;  %v11362_v34 = vld [vmem:[%s23181_s6 + $0x160] sm:$0xff]  ;;  %v11239_v55 = vld [vmem:[%s23183_s8 + $0xc8] sm:$0xff] }
 0x4ae   : > { %16427 = vmatprep.subr.bf16.mxu1 %v16426_v56  ;;  %16265 = vmatpush3.bf16.msra.mxu0 %v16262_v11  ;;  %v16270_v60 = vpack.c.bf16 %v11239_v55, %v11238_v18 }
 0x4af   : > { %16267 = vmatprep.subr.bf16.mxu0 %v16266_v53 }
 0x4b0   : > { %14184 = vmatmul.mubr.f32.gmra.mrb[86].mxu1 %v19421_v40  ;;  %v16438_v40 = vpack.c.bf16 %v11363_v48, %v11362_v34  ;;  %v18190_v48 = vld [vmem:[%s18984_s25 + $0x8] sm:$0xff] }
 0x4b1   : > { %16429 = vmatpush3.bf16.msra.mxu1 %v16426_v56  ;;  %14186 = vmatprep.mubr.f32.mxu1 %v19425_v17  ;;  %v11364_v17 = vld [vmem:[%s23181_s6 + $0x170] sm:$0xff]  ;;  %v11241_v56 = vld [vmem:[%s23183_s8 + $0xd8] sm:$0xff] }
 0x4b2   : > { %16431 = vmatprep.subr.bf16.mxu1 %v16430_v28  ;;  %16269 = vmatpush3.bf16.msra.mxu0 %v16266_v53  ;;  %v16274_v21 = vpack.c.bf16 %v11241_v56, %v11240_v46 }
 0x4b3   : > { %16271 = vmatprep.subr.bf16.mxu0 %v16270_v60 }
 0x4b4   : > { %14187 = vmatmul.mubr.f32.gmra.mrb[88].mxu1 %v19429_v42  ;;  %v16442_v42 = vpack.c.bf16 %v11365_v19, %v11364_v17  ;;  %v18192_v17 = vld [vmem:[%s18984_s25 + $0x18] sm:$0xff]  ;;  %v18193_v19 = vld [vmem:[%s18984_s25 + $0x20] sm:$0xff] }
 0x4b5   : > { %16433 = vmatpush3.bf16.msra.mxu1 %v16430_v28  ;;  %14189 = vmatprep.mubr.f32.mxu1 %v19433_v59  ;;  %v18174_v59 = vld [vmem:[%s18789_s24] sm:$0xff]  ;;  %v11243_v28 = vld [vmem:[%s23183_s8 + $0xe8] sm:$0xff] }
 0x4b6   : > { %16435 = vmatprep.subr.bf16.mxu1 %v16434_v32  ;;  %16273 = vmatpush3.bf16.msra.mxu0 %v16270_v60  ;;  %v16278_v0 = vpack.c.bf16 %v11243_v28, %v11242_v61 }
 0x4b7   : > { %16275 = vmatprep.subr.bf16.mxu0 %v16274_v21 }
 0x4b8   : > { %14190 = vmatmul.mubr.f32.gmra.mrb[90].mxu1 %v19437_v35  ;;  %v18175_v35 = vld [vmem:[%s18789_s24 + $0x8] sm:$0xff] }
 0x4b9   : > { %16437 = vmatpush3.bf16.msra.mxu1 %v16434_v32  ;;  %14192 = vmatprep.mubr.f32.mxu1 %v19441_v49  ;;  %v18176_v49 = vld [vmem:[%s18789_s24 + $0x10] sm:$0xff]  ;;  %v11245_v32 = vld [vmem:[%s23183_s8 + $0xf8] sm:$0xff] }
 0x4ba   : > { %16439 = vmatprep.subr.bf16.mxu1 %v16438_v40  ;;  %16277 = vmatpush3.bf16.msra.mxu0 %v16274_v21  ;;  %v16282_v34 = vpack.c.bf16 %v11245_v32, %v11244_v44 }
 0x4bb   : > { %16279 = vmatprep.subr.bf16.mxu0 %v16278_v0 }
 0x4bc   : > { %14193 = vmatmul.mubr.f32.gmra.mrb[92].mxu1 %v19445_v8  ;;  %v18177_v8 = vld [vmem:[%s18789_s24 + $0x18] sm:$0xff] }
 0x4bd   : > { %16441 = vmatpush3.bf16.msra.mxu1 %v16438_v40  ;;  %14195 = vmatprep.mubr.f32.mxu1 %v19449_v20  ;;  %v18179_v20 = vld [vmem:[%s18789_s24 + $0x28] sm:$0xff]  ;;  %v18191_v40 = vld [vmem:[%s18984_s25 + $0x10] sm:$0xff] }
 0x4be   : > { %16443 = vmatprep.subr.bf16.mxu1 %v16442_v42  ;;  %16281 = vmatpush3.bf16.msra.mxu0 %v16278_v0 }
 0x4bf   : > { %16283 = vmatprep.subr.bf16.mxu0 %v16282_v34 }
 0x4c0   : > { %14196 = vmatmul.mubr.f32.gmra.mrb[94].mxu1 %v19453_v4  ;;  %v18180_v4 = vld [vmem:[%s18789_s24 + $0x30] sm:$0xff] }
 0x4c1   : > { %16445 = vmatpush3.bf16.msra.mxu1 %v16442_v42  ;;  %14230 = vmatprep.mubr.f32.mxu1 %v18174_v59  ;;  %v18194_v42 = vld [vmem:[%s18984_s25 + $0x28] sm:$0xff]  ;;  %v18195_v59 = vld [vmem:[%s18984_s25 + $0x30] sm:$0xff] }
 0x4c2   : > { %16285 = vmatpush3.bf16.msra.mxu0 %v16282_v34 }
 0x4c4   : > { %14231 = vmatmul.mubr.f32.vlgmr.msra.gmra.mrb[96].mxu1 %v18175_v35  ;;  %v18196_v35 = vld [vmem:[%s18984_s25 + $0x38] sm:$0xff] }
 0x4c5   : > { %14233 = vmatprep.mubr.f32.mxu1 %v18176_v49  ;;  %13943 = vmatmul.mubr.f32.vlgmr.msra.gmra.mrb[48].mxu0 %v18190_v48  ;;  %v18197_v49 = vld [vmem:[%s18984_s25 + $0x40] sm:$0xff] }
 0x4c6   : > { %13945 = vmatprep.mubr.f32.mxu0 %v18191_v40 }
 0x4c8   : > { %14234 = vmatmul.mubr.f32.gmra.mrb[98].mxu1 %v18177_v8  ;;  %v18198_v8 = vld [vmem:[%s18984_s25 + $0x48] sm:$0xff] }
 0x4c9   : > { %14236 = vmatprep.mubr.f32.mxu1 %v18178_v62  ;;  %13946 = vmatmul.mubr.f32.gmra.mrb[50].mxu0 %v18192_v17  ;;  %v18199_v62 = vld [vmem:[%s18984_s25 + $0x50] sm:$0xff] }
 0x4ca   : > { %13948 = vmatprep.mubr.f32.mxu0 %v18193_v19 }
 0x4cc   : > { %14237 = vmatmul.mubr.f32.gmra.mrb[100].mxu1 %v18179_v20  ;;  %v18200_v20 = vld [vmem:[%s18984_s25 + $0x58] sm:$0xff] }
 0x4cd   : > { %14239 = vmatprep.mubr.f32.mxu1 %v18180_v4  ;;  %13949 = vmatmul.mubr.f32.gmra.mrb[52].mxu0 %v18194_v42  ;;  %v18201_v4 = vld [vmem:[%s18984_s25 + $0x60] sm:$0xff] }
 0x4ce   : > { %13951 = vmatprep.mubr.f32.mxu0 %v18195_v59 }
 0x4d0   : > { %14240 = vmatmul.mubr.f32.gmra.mrb[102].mxu1 %v18181_v23  ;;  %v18202_v23 = vld [vmem:[%s18984_s25 + $0x68] sm:$0xff] }
 0x4d1   : > { %14242 = vmatprep.mubr.f32.mxu1 %v18182_v25  ;;  %13952 = vmatmul.mubr.f32.gmra.mrb[54].mxu0 %v18196_v35  ;;  %v18203_v25 = vld [vmem:[%s18984_s25 + $0x70] sm:$0xff] }
 0x4d2   : > { %13954 = vmatprep.mubr.f32.mxu0 %v18197_v49 }
 0x4d4   : > { %14243 = vmatmul.mubr.f32.gmra.mrb[104].mxu1 %v18183_v27  ;;  %v18204_v27 = vld [vmem:[%s18984_s25 + $0x78] sm:$0xff] }
 0x4d5   : > { %14245 = vmatprep.mubr.f32.mxu1 %v18184_v29  ;;  %13955 = vmatmul.mubr.f32.gmra.mrb[56].mxu0 %v18198_v8 }
 0x4d6   : > { %13957 = vmatprep.mubr.f32.mxu0 %v18199_v62 }
 0x4d8   : > { %14246 = vmatmul.mubr.f32.gmra.mrb[106].mxu1 %v18185_v33 }
 0x4d9   : > { %14248 = vmatprep.mubr.f32.mxu1 %v18186_v1  ;;  %13958 = vmatmul.mubr.f32.gmra.mrb[58].mxu0 %v18200_v20 }
 0x4da   : > { %13960 = vmatprep.mubr.f32.mxu0 %v18201_v4 }
 0x4dc   : > { %14249 = vmatmul.mubr.f32.gmra.mrb[108].mxu1 %v18187_v2 }
 0x4dd   : > { %14251 = vmatprep.mubr.f32.mxu1 %v18188_v3  ;;  %13961 = vmatmul.mubr.f32.gmra.mrb[60].mxu0 %v18202_v23 }
 0x4de   : > { %13963 = vmatprep.mubr.f32.mxu0 %v18203_v25 }
 0x4e0   : > { %14252 = vmatmul.mubr.f32.gmra.mrb[110].mxu1 %v18189_v12 }
 0x4e1   : > { %13964 = vmatmul.mubr.f32.gmra.mrb[62].mxu0 %v18204_v27 }
 0x557   : > { %v14000_v29 = vpop.f32.mrb[64].mxu1 }
 0x558   : > { %v2319_v33 = vpop.f32.mrb[65].mxu1  ;;  %v2399_v1 = vmul.f32 0.28867513, %v14000_v29 }
 0x559   : > { %v2398_v2 = vmul.f32 0.28867513, %v2319_v33  ;;  %v11349_v33 = vld [vmem:[%s23180_s5 + $0x2] ss:$0 sm:$0xff] }
 0x55a   : > { %v19737_v3 = vsel %vm1321_vm3, -1e+09, %v2399_v1 }
 0x55b   : > { %2432 = vmax.xlane.f32.xlu1 %v19737_v3  ;;  %v14003_v12 = vpop.f32.mrb[66].mxu1  ;;  %v19742_v5 = vsel %vm1321_vm3, -1e+09, %v2398_v2 }
 0x55c   : > { %2430 = vmax.xlane.f32.xlu0 %v19742_v5  ;;  %v2329_v6 = vpop.f32.mrb[67].mxu1  ;;  %v2401_v26 = vmul.f32 0.28867513, %v14003_v12 }
 0x55d   : > { %v2400_v37 = vmul.f32 0.28867513, %v2329_v6 }
 0x55e   : > { %v19747_v39 = vsel %vm1321_vm3, -1e+09, %v2401_v26 }
 0x55f   : > { %2436 = vmax.xlane.f32.xlu1 %v19747_v39  ;;  %v14006_v7 = vpop.f32.mrb[68].mxu1  ;;  %v19752_v9 = vsel %vm1321_vm3, -1e+09, %v2400_v37 }
 0x560   : > { %2434 = vmax.xlane.f32.xlu0 %v19752_v9  ;;  %v2339_v10 = vpop.f32.mrb[69].mxu1  ;;  %v2403_v11 = vmul.f32 0.28867513, %v14006_v7 }
 0x561   : > { %v2402_v13 = vmul.f32 0.28867513, %v2339_v10 }
 0x562   : > { %v19757_v57 = vsel %vm1321_vm3, -1e+09, %v2403_v11 }
 0x563   : > { %2440 = vmax.xlane.f32.xlu1 %v19757_v57  ;;  %v14009_v53 = vpop.f32.mrb[70].mxu1  ;;  %v19762_v18 = vsel %vm1321_vm3, -1e+09, %v2402_v13 }
 0x564   : > { %2438 = vmax.xlane.f32.xlu0 %v19762_v18  ;;  %v2349_v55 = vpop.f32.mrb[71].mxu1  ;;  %v2405_v60 = vmul.f32 0.28867513, %v14009_v53 }
 0x565   : > { %v2404_v46 = vmul.f32 0.28867513, %v2349_v55 }
 0x566   : > { %v19767_v56 = vsel %vm1321_vm3, -1e+09, %v2405_v60 }
 0x567   : > { %2444 = vmax.xlane.f32.xlu1 %v19767_v56  ;;  %v14012_v21 = vpop.f32.mrb[72].mxu1  ;;  %v19772_v61 = vsel %vm1321_vm3, -1e+09, %v2404_v46 }
 0x568   : > { %2442 = vmax.xlane.f32.xlu0 %v19772_v61  ;;  %v2359_v28 = vpop.f32.mrb[73].mxu1  ;;  %v2407_v0 = vmul.f32 0.28867513, %v14012_v21 }
 0x569   : > { %v2406_v44 = vmul.f32 0.28867513, %v2359_v28 }
 0x56a   : > { %v19777_v32 = vsel %vm1321_vm3, -1e+09, %v2407_v0 }
 0x56b   : > { %2448 = vmax.xlane.f32.xlu1 %v19777_v32  ;;  %v14015_v34 = vpop.f32.mrb[74].mxu1  ;;  %v19782_v48 = vsel %vm1321_vm3, -1e+09, %v2406_v44 }
 0x56c   : > { %2446 = vmax.xlane.f32.xlu0 %v19782_v48  ;;  %v2369_v40 = vpop.f32.mrb[75].mxu1  ;;  %v2409_v17 = vmul.f32 0.28867513, %v14015_v34 }
 0x56d   : > { %v2408_v19 = vmul.f32 0.28867513, %v2369_v40 }
 0x56e   : > { %v19787_v42 = vsel %vm1321_vm3, -1e+09, %v2409_v17 }
 0x56f   : > { %2452 = vmax.xlane.f32.xlu1 %v19787_v42  ;;  %v14018_v59 = vpop.f32.mrb[76].mxu1  ;;  %v19792_v35 = vsel %vm1321_vm3, -1e+09, %v2408_v19 }
 0x570   : > { %2450 = vmax.xlane.f32.xlu0 %v19792_v35  ;;  %v2379_v49 = vpop.f32.mrb[77].mxu1  ;;  %v2411_v8 = vmul.f32 0.28867513, %v14018_v59 }
 0x571   : > { %v2410_v62 = vmul.f32 0.28867513, %v2379_v49 }
 0x572   : > { %v19797_v20 = vsel %vm1321_vm3, -1e+09, %v2411_v8 }
 0x573   : > { %2456 = vmax.xlane.f32.xlu1 %v19797_v20  ;;  %v14021_v4 = vpop.f32.mrb[78].mxu1  ;;  %v19802_v23 = vsel %vm1321_vm3, -1e+09, %v2410_v62 }
 0x574   : > { %2454 = vmax.xlane.f32.xlu0 %v19802_v23  ;;  %v2389_v25 = vpop.f32.mrb[79].mxu1  ;;  %v2413_v27 = vmul.f32 0.28867513, %v14021_v4 }
 0x575   : > { %v2412_v29 = vmul.f32 0.28867513, %v2389_v25 }
 0x576   : > { %v19810_v1 = vsel %vm1321_vm3, -1e+09, %v2413_v27 }
 0x577   : > { %2460 = vmax.xlane.f32.xlu1 %v19810_v1  ;;  %v19815_v2 = vsel %vm1321_vm3, -1e+09, %v2412_v29  ;;  %v14176_v12 = vpop.f32.mrb[80].mxu1 }
 0x578   : > { %2458 = vmax.xlane.f32.xlu0 %v19815_v2  ;;  %v19818_v6 = vadd.f32 %v14176_v12, %v11349_v33  ;;  %v3219_v26 = vpop.f32.mrb[81].mxu1 }
 0x579   : > { %v3220_v37 = vadd.f32 %v11349_v33, %v3219_v26 }
 0x57b   : > { %v14179_v7 = vpop.f32.mrb[82].mxu1  ;;  %14342 = vmatprep.mubr.msk.f32.mxu1 %vm1057_vm0, %v3220_v37 }
 0x57c   : > { %v19821_v10 = vadd.f32 %v14179_v7, %v11349_v33  ;;  %v3229_v11 = vpop.f32.mrb[83].mxu1 }
 0x57d   : > { %v19823_v13 = vadd.f32 %v11349_v33, %v3229_v11  ;;  %v11367_v11 = vld [vmem:[%s23182_s7 + $0x2] ss:$0 sm:$0xff] }
 0x57f   : > { %v14182_v53 = vpop.f32.mrb[84].mxu1 }
 0x580   : > { %v19825_v55 = vadd.f32 %v14182_v53, %v11349_v33  ;;  %v3239_v60 = vpop.f32.mrb[85].mxu1 }
 0x581   : > { %v19827_v46 = vadd.f32 %v11349_v33, %v3239_v60 }
 0x583   : > { %v14185_v21 = vpop.f32.mrb[86].mxu1 }
 0x584   : > { %v19829_v28 = vadd.f32 %v14185_v21, %v11349_v33  ;;  %v3249_v0 = vpop.f32.mrb[87].mxu1 }
 0x585   : > { %v19831_v44 = vadd.f32 %v11349_v33, %v3249_v0 }
 0x587   : > { %v14188_v34 = vpop.f32.mrb[88].mxu1 }
 0x588   : > { %v19833_v40 = vadd.f32 %v14188_v34, %v11349_v33  ;;  %v3259_v17 = vpop.f32.mrb[89].mxu1 }
 0x589   : > { %v19835_v19 = vadd.f32 %v11349_v33, %v3259_v17 }
 0x58b   : > { %v14191_v59 = vpop.f32.mrb[90].mxu1 }
 0x58c   : > { %v19837_v49 = vadd.f32 %v14191_v59, %v11349_v33  ;;  %v3269_v8 = vpop.f32.mrb[91].mxu1 }
 0x58d   : > { %v19839_v62 = vadd.f32 %v11349_v33, %v3269_v8 }
 0x58f   : > { %v14194_v4 = vpop.f32.mrb[92].mxu1 }
 0x590   : > { %v19841_v25 = vadd.f32 %v14194_v4, %v11349_v33  ;;  %v3279_v27 = vpop.f32.mrb[93].mxu1 }
 0x591   : > { %v19843_v29 = vadd.f32 %v11349_v33, %v3279_v27 }
 0x593   : > { %v14197_v12 = vpop.f32.mrb[94].mxu1 }
 0x594   : > { %v19845_v26 = vadd.f32 %v14197_v12, %v11349_v33  ;;  %v3289_v37 = vpop.f32.mrb[95].mxu1 }
 0x595   : > { %v19847_v7 = vadd.f32 %v11349_v33, %v3289_v37 }
 0x597   : > { %v14232_v53 = vpop.f32.mrb[96].mxu1 }
 0x598   : > { %v3395_v60 = vadd.f32 %v14232_v53, %v11367_v11  ;;  %v3389_v21 = vpop.f32.mrb[97].mxu1 }
 0x599   : > { %v3390_v0 = vadd.f32 %v11367_v11, %v3389_v21 }
 0x59b   : > { %v16478_v34 = vpack.c.bf16 %v3395_v60, %v3390_v0  ;;  %v14235_v17 = vpop.f32.mrb[98].mxu1 }
 0x59c   : > { %v3405_v59 = vadd.f32 %v14235_v17, %v11367_v11  ;;  %v3399_v8 = vpop.f32.mrb[99].mxu1 }
 0x59d   : > { %16480 = vmatprep.subr.msk.bf16.mxu1 %vm18895_vm1, %v16478_v34  ;;  %v3400_v4 = vadd.f32 %v11367_v11, %v3399_v8 }
 0x59e   : > { %16483 = vmatpush3.bf16.xpose.msk.msra.mxu1 %vm18895_vm1, %v16478_v34 }
 0x59f   : > { %v16484_v33 = vpack.c.bf16 %v3405_v59, %v3400_v4  ;;  %v14238_v27 = vpop.f32.mrb[100].mxu1 }
 0x5a0   : > { %v3415_v12 = vadd.f32 %v14238_v27, %v11367_v11  ;;  %v3409_v37 = vpop.f32.mrb[101].mxu1 }
 0x5a1   : > { %16486 = vmatprep.subr.msk.bf16.mxu1 %vm18895_vm1, %v16484_v33  ;;  %v3410_v53 = vadd.f32 %v11367_v11, %v3409_v37 }
 0x5a3   : > { %v16490_v21 = vpack.c.bf16 %v3415_v12, %v3410_v53  ;;  %v14241_v60 = vpop.f32.mrb[102].mxu1 }
 0x5a4   : > { %v3425_v0 = vadd.f32 %v14241_v60, %v11367_v11  ;;  %v3419_v17 = vpop.f32.mrb[103].mxu1 }
 0x5a5   : > { %v3420_v16 = vadd.f32 %v11367_v11, %v3419_v17 }
 0x5a6   : > { %16489 = vmatpush3.bf16.xpose.msk.msra.mxu1 %vm18895_vm1, %v16484_v33 }
 0x5a7   : > { %16492 = vmatprep.subr.msk.bf16.mxu1 %vm18895_vm1, %v16490_v21  ;;  %v16496_v34 = vpack.c.bf16 %v3425_v0, %v3420_v16  ;;  %v14244_v59 = vpop.f32.mrb[104].mxu1 }
 0x5a8   : > { %v3435_v8 = vadd.f32 %v14244_v59, %v11367_v11  ;;  %v3429_v4 = vpop.f32.mrb[105].mxu1 }
 0x5a9   : > { %v3430_v27 = vadd.f32 %v11367_v11, %v3429_v4 }
 0x5ab   : > { %v16502_v51 = vpack.c.bf16 %v3435_v8, %v3430_v27  ;;  %v14247_v47 = vpop.f32.mrb[106].mxu1 }
 0x5ac   : > { %v3445_v30 = vadd.f32 %v14247_v47, %v11367_v11  ;;  %v3439_v37 = vpop.f32.mrb[107].mxu1 }
 0x5ad   : > { %v3440_v12 = vadd.f32 %v11367_v11, %v3439_v37 }
 0x5ae   : > { %16495 = vmatpush3.bf16.xpose.msk.msra.mxu1 %vm18895_vm1, %v16490_v21 }
 0x5af   : > { %16498 = vmatprep.subr.msk.bf16.mxu1 %vm18895_vm1, %v16496_v34  ;;  %v16508_v33 = vpack.c.bf16 %v3445_v30, %v3440_v12  ;;  %v14250_v53 = vpop.f32.mrb[108].mxu1 }
 0x5b0   : > { %v3455_v60 = vadd.f32 %v14250_v53, %v11367_v11  ;;  %v3449_v17 = vpop.f32.mrb[109].mxu1 }
 0x5b1   : > { %v3450_v16 = vadd.f32 %v11367_v11, %v3449_v17 }
 0x5b3   : > { %v16514_v0 = vpack.c.bf16 %v3455_v60, %v3450_v16  ;;  %v14253_v59 = vpop.f32.mrb[110].mxu1 }
 0x5b4   : > { %v3465_v41 = vadd.f32 %v14253_v59, %v11367_v11  ;;  %v3459_v4 = vpop.f32.mrb[111].mxu1 }
 0x5b5   : > { %v3460_v8 = vadd.f32 %v11367_v11, %v3459_v4 }
 0x5b6   : > { %16501 = vmatpush3.bf16.xpose.msk.msra.mxu1 %vm18895_vm1, %v16496_v34 }
 0x5b7   : > { %16504 = vmatprep.subr.msk.bf16.mxu1 %vm18895_vm1, %v16502_v51  ;;  %v16520_v47 = vpack.c.bf16 %v3465_v41, %v3460_v8 }
 0x5be   : > { %16507 = vmatpush3.bf16.xpose.msk.msra.mxu1 %vm18895_vm1, %v16502_v51 }
 0x5bf   : > { %16510 = vmatprep.subr.msk.bf16.mxu1 %vm18895_vm1, %v16508_v33 }
 0x5c6   : > { %16513 = vmatpush3.bf16.xpose.msk.msra.mxu1 %vm18895_vm1, %v16508_v33 }
 0x5c7   : > { %16516 = vmatprep.subr.msk.bf16.mxu1 %vm18895_vm1, %v16514_v0 }
 0x5ce   : > { %16519 = vmatpush3.bf16.xpose.msk.msra.mxu1 %vm18895_vm1, %v16514_v0 }
 0x5cf   : > { %16522 = vmatprep.subr.msk.bf16.mxu1 %vm18895_vm1, %v16520_v47 }
 0x5d6   : > { %16525 = vmatpush3.bf16.xpose.msk.msra.mxu1 %vm18895_vm1, %v16520_v47 }
 0x5dd   : > { %14343 = vmatmul.mubr.msk.f32.vlgmr.msra.gmra.mrb[112].mxu1 %vm1057_vm0, %v19818_v6 }
 0x5de   : > { %14345 = vmatprep.mubr.msk.f32.mxu1 %vm1057_vm0, %v19823_v13 }
 0x5e1   : > { %14346 = vmatmul.mubr.msk.f32.gmra.mrb[114].mxu1 %vm1057_vm0, %v19821_v10 }
 0x5e2   : > { %14348 = vmatprep.mubr.msk.f32.mxu1 %vm1057_vm0, %v19827_v46 }
 0x5e5   : > { %14349 = vmatmul.mubr.msk.f32.gmra.mrb[116].mxu1 %vm1057_vm0, %v19825_v55  ;;  %v19905_v55 = vld [vmem:[%s23184_s9 + $0x1] ss:$0 sm:$0xff] }
 0x5e6   : > { %14351 = vmatprep.mubr.msk.f32.mxu1 %vm1057_vm0, %v19831_v44 }
 0x5e8   : > { %v2433_v41 = vpop.xlane.xlu1 %2432 }
 0x5e9   : > { %v2463_v30 = vsub.f32 %v19737_v3, %v2433_v41  ;;  %v2431_v51 = vpop.xlane.xlu0 %2430  ;;  %14352 = vmatmul.mubr.msk.f32.gmra.mrb[118].mxu1 %vm1057_vm0, %v19829_v28  ;;  %v13944_v28 = vpop.f32.mrb[48].mxu0 }
 0x5ea   : > { %v2462_v6 = vsub.f32 %v19742_v5, %v2431_v51  ;;  %14354 = vmatprep.mubr.msk.f32.mxu1 %vm1057_vm0, %v19835_v19  ;;  %v2084_v11 = vadd.f32 %v13944_v28, %v19905_v55  ;;  %v2078_v21 = vpop.f32.mrb[49].mxu0 }
 0x5eb   : > { %v2480_v10 = vmul.f32 1.442695, %v2463_v30  ;;  %v2079_v37 = vadd.f32 %v19905_v55, %v2078_v21 }
 0x5ec   : > { %v2478_v13 = vmul.f32 1.442695, %v2462_v6  ;;  %v2437_v46 = vpop.xlane.xlu1 %2436 }
 0x5ed   : > { %17709 = vpow2.f32 %v2480_v10  ;;  %v2465_v3 = vsub.f32 %v19747_v39, %v2437_v46  ;;  %v2435_v44 = vpop.xlane.xlu0 %2434  ;;  %14355 = vmatmul.mubr.msk.f32.gmra.mrb[120].mxu1 %vm1057_vm0, %v19833_v40  ;;  %v16334_v40 = vpack.c.bf16 %v2084_v11, %v2079_v37 }
 0x5ee   : > { %17711 = vpow2.f32 %v2478_v13  ;;  %v2464_v5 = vsub.f32 %v19752_v9, %v2435_v44  ;;  %14357 = vmatprep.mubr.msk.f32.mxu1 %vm1057_vm0, %v19839_v62  ;;  %v13947_v62 = vpop.f32.mrb[50].mxu0 }
 0x5ef   : > { %v2484_v19 = vmul.f32 1.442695, %v2465_v3  ;;  %v2094_v53 = vadd.f32 %v13947_v62, %v19905_v55  ;;  %v2088_v60 = vpop.f32.mrb[51].mxu0  ;;  %16335 = vmatprep.subr.bf16.mxu0 %v16334_v40 }
 0x5f0   : > { %v2482_v34 = vmul.f32 1.442695, %v2464_v5  ;;  %v2441_v27 = vpop.xlane.xlu1 %2440  ;;  %16337 = vmatpush3.bf16.msra.mxu0 %v16334_v40  ;;  %v13950_v59 = vpop.f32.mrb[52].mxu0 }
 0x5f1   : > { %17713 = vpow2.f32 %v2484_v19  ;;  %v2467_v39 = vsub.f32 %v19757_v57, %v2441_v27  ;;  %v2439_v12 = vpop.xlane.xlu0 %2438  ;;  %14358 = vmatmul.mubr.msk.f32.gmra.mrb[122].mxu1 %vm1057_vm0, %v19837_v49  ;;  %v2089_v57 = vadd.f32 %v19905_v55, %v2088_v60  ;;  %v2104_v47 = vadd.f32 %v13950_v59, %v19905_v55  ;;  %v2098_v41 = vpop.f32.mrb[53].mxu0 }
 0x5f2   : > { %17715 = vpow2.f32 %v2482_v34  ;;  %v2466_v9 = vsub.f32 %v19762_v18, %v2439_v12  ;;  %14360 = vmatprep.mubr.msk.f32.mxu1 %vm1057_vm0, %v19843_v29  ;;  %v13953_v13 = vpop.f32.mrb[54].mxu0 }
 0x5f3   : > { %v2488_v33 = vmul.f32 1.442695, %v2467_v39  ;;  %v16338_v29 = vpack.c.bf16 %v2094_v53, %v2089_v57  ;;  %v2114_v44 = vadd.f32 %v13953_v13, %v19905_v55 }
 0x5f4   : > { %v2486_v17 = vmul.f32 1.442695, %v2466_v9  ;;  %v2445_v16 = vpop.xlane.xlu1 %2444 }
 0x5f5   : > { %17717 = vpow2.f32 %v2488_v33  ;;  %v2469_v49 = vsub.f32 %v19767_v56, %v2445_v16  ;;  %v2443_v0 = vpop.xlane.xlu0 %2442  ;;  %14361 = vmatmul.mubr.msk.f32.gmra.mrb[124].mxu1 %vm1057_vm0, %v19841_v25  ;;  %v2099_v25 = vadd.f32 %v19905_v55, %v2098_v41  ;;  %16339 = vmatprep.subr.bf16.mxu0 %v16338_v29 }
 0x5f6   : > { %17719 = vpow2.f32 %v2486_v17  ;;  %v2468_v18 = vsub.f32 %v19772_v61, %v2443_v0  ;;  %14363 = vmatprep.mubr.msk.f32.mxu1 %vm1057_vm0, %v19847_v7  ;;  %16341 = vmatpush3.bf16.msra.mxu0 %v16338_v29 }
 0x5f7   : > { %v19929_v4 = vpop.eup %17709  ;;  %v2492_v8 = vmul.f32 1.442695, %v2469_v49  ;;  %v16342_v10 = vpack.c.bf16 %v2104_v47, %v2099_v25 }
 0x5f8   : > { %v19932_v56 = vpop.eup %17711  ;;  %v2490_v30 = vmul.f32 1.442695, %v2468_v18  ;;  %v2449_v51 = vpop.xlane.xlu1 %2448  ;;  %2512 = vadd.xlane.f32.xlu1 %v19929_v4 }
 0x5f9   : > { %17721 = vpow2.f32 %v2492_v8  ;;  %v2471_v61 = vsub.f32 %v19777_v32, %v2449_v51  ;;  %v2447_v7 = vpop.xlane.xlu0 %2446  ;;  %14364 = vmatmul.mubr.msk.f32.gmra.mrb[126].mxu1 %vm1057_vm0, %v19845_v26  ;;  %2510 = vadd.xlane.f32.xlu0 %v19932_v56  ;;  %v2108_v32 = vpop.f32.mrb[55].mxu0 }
 0x5fa   : > { %17723 = vpow2.f32 %v2490_v30  ;;  %v2470_v6 = vsub.f32 %v19782_v48, %v2447_v7  ;;  %14486 = vmatprep.mubr.f32.mxu1 %v19391_v63  ;;  %v2109_v19 = vadd.f32 %v19905_v55, %v2108_v32  ;;  %16343 = vmatprep.subr.bf16.mxu0 %v16342_v10  ;;  %v13956_v34 = vpop.f32.mrb[56].mxu0 }
 0x5fb   : > { %v19942_v46 = vpop.eup %17713  ;;  %v2496_v3 = vmul.f32 1.442695, %v2471_v61  ;;  %16345 = vmatpush3.bf16.msra.mxu0 %v16342_v10  ;;  %v2124_v39 = vadd.f32 %v13956_v34, %v19905_v55  ;;  %v2118_v12 = vpop.f32.mrb[57].mxu0 }
 0x5fc   : > { %v19945_v5 = vpop.eup %17715  ;;  %v2494_v28 = vmul.f32 1.442695, %v2470_v6  ;;  %v2453_v26 = vpop.xlane.xlu1 %2452  ;;  %2516 = vadd.xlane.f32.xlu1 %v19942_v46  ;;  %v16346_v21 = vpack.c.bf16 %v2114_v44, %v2109_v19 }
 0x5fd   : > { %17725 = vpow2.f32 %v2496_v3  ;;  %v2473_v48 = vsub.f32 %v19787_v42, %v2453_v26  ;;  %v2451_v11 = vpop.xlane.xlu0 %2450  ;;  %2514 = vadd.xlane.f32.xlu0 %v19945_v5  ;;  %v2119_v42 = vadd.f32 %v19905_v55, %v2118_v12  ;;  %v13959_v17 = vpop.f32.mrb[58].mxu0 }
 0x5fe   : > { %17727 = vpow2.f32 %v2494_v28  ;;  %v2472_v63 = vsub.f32 %v19792_v35, %v2451_v11  ;;  %16347 = vmatprep.subr.bf16.mxu0 %v16346_v21  ;;  %v2134_v49 = vadd.f32 %v13959_v17, %v19905_v55  ;;  %v2128_v0 = vpop.f32.mrb[59].mxu0 }
 0x5ff   : > { %v19952_v27 = vpop.eup %17717  ;;  %v2500_v37 = vmul.f32 1.442695, %v2473_v48  ;;  %v16350_v60 = vpack.c.bf16 %v2124_v39, %v2119_v42  ;;  %16349 = vmatpush3.bf16.msra.mxu0 %v16346_v21  ;;  %v2129_v59 = vadd.f32 %v19905_v55, %v2128_v0  ;;  %v13962_v30 = vpop.f32.mrb[60].mxu0 }
 0x600   : > { %v19955_v9 = vpop.eup %17719  ;;  %v2498_v40 = vmul.f32 1.442695, %v2472_v63  ;;  %v2457_v62 = vpop.xlane.xlu1 %2456  ;;  %2520 = vadd.xlane.f32.xlu1 %v19952_v27  ;;  %v2144_v61 = vadd.f32 %v13962_v30, %v19905_v55 }
 0x601   : > { %17729 = vpow2.f32 %v2500_v37  ;;  %v2475_v35 = vsub.f32 %v19797_v20, %v2457_v62  ;;  %v2455_v33 = vpop.xlane.xlu0 %2454  ;;  %2518 = vadd.xlane.f32.xlu0 %v19955_v9  ;;  %16351 = vmatprep.subr.bf16.mxu0 %v16350_v60  ;;  %v16354_v41 = vpack.c.bf16 %v2134_v49, %v2129_v59  ;;  %v2138_v7 = vpop.f32.mrb[61].mxu0 }
 0x602   : > { %17731 = vpow2.f32 %v2498_v40  ;;  %v2474_v53 = vsub.f32 %v19802_v23, %v2455_v33  ;;  %v13965_v13 = vpop.f32.mrb[62].mxu0 }
 0x603   : > { %v19962_v16 = vpop.eup %17721  ;;  %v2504_v57 = vmul.f32 1.442695, %v2475_v35  ;;  %16353 = vmatpush3.bf16.msra.mxu0 %v16350_v60  ;;  %v2154_v44 = vadd.f32 %v13965_v13, %v19905_v55  ;;  %v2148_v32 = vpop.f32.mrb[63].mxu0 }
 0x604   : > { %v19965_v18 = vpop.eup %17723  ;;  %v2502_v29 = vmul.f32 1.442695, %v2474_v53  ;;  %2524 = vadd.xlane.f32.xlu1 %v19962_v16  ;;  %v2461_v20 = vpop.xlane.xlu1 %2460  ;;  %16355 = vmatprep.subr.bf16.mxu0 %v16354_v41  ;;  %v2149_v26 = vadd.f32 %v19905_v55, %v2148_v32 }
 0x605   : > { %17733 = vpow2.f32 %v2504_v57  ;;  %v2477_v23 = vsub.f32 %v19810_v1, %v2461_v20  ;;  %2522 = vadd.xlane.f32.xlu0 %v19965_v18  ;;  %v2459_v8 = vpop.xlane.xlu0 %2458  ;;  %v2139_v1 = vadd.f32 %v19905_v55, %v2138_v7 }
 0x606   : > { %17735 = vpow2.f32 %v2502_v29  ;;  %v2476_v47 = vsub.f32 %v19815_v2, %v2459_v8  ;;  %v16362_v19 = vpack.c.bf16 %v2154_v44, %v2149_v26 }
 0x607   : > { %v19972_v51 = vpop.eup %17725  ;;  %v2508_v25 = vmul.f32 1.442695, %v2477_v23  ;;  %v16358_v2 = vpack.c.bf16 %v2144_v61, %v2139_v1  ;;  %16357 = vmatpush3.bf16.msra.mxu0 %v16354_v41 }
 0x608   : > { %v19975_v6 = vpop.eup %17727  ;;  %v2506_v10 = vmul.f32 1.442695, %v2476_v47  ;;  %2528 = vadd.xlane.f32.xlu1 %v19972_v51 }
 0x609   : > { %17737 = vpow2.f32 %v2508_v25  ;;  %2526 = vadd.xlane.f32.xlu0 %v19975_v6  ;;  %16359 = vmatprep.subr.bf16.mxu0 %v16358_v2 }
 0x60a   : > { %17739 = vpow2.f32 %v2506_v10 }
 0x60b   : > { %v19980_v3 = vpop.eup %17729  ;;  %16361 = vmatpush3.bf16.msra.mxu0 %v16358_v2 }
 0x60c   : > { %v19983_v28 = vpop.eup %17731  ;;  %2532 = vadd.xlane.f32.xlu1 %v19980_v3  ;;  %16363 = vmatprep.subr.bf16.mxu0 %v16362_v19 }
 0x60d   : > { %2530 = vadd.xlane.f32.xlu0 %v19983_v28 }
 0x60f   : > { %v19988_v48 = vpop.eup %17733  ;;  %16365 = vmatpush3.bf16.msra.mxu0 %v16362_v19 }
 0x610   : > { %v19990_v11 = vpop.eup %17735  ;;  %2536 = vadd.xlane.f32.xlu1 %v19988_v48 }
 0x611   : > { %2534 = vadd.xlane.f32.xlu0 %v19990_v11 }
 0x613   : > { %v19994_v63 = vpop.eup %17737 }
 0x614   : > { %v19996_v21 = vpop.eup %17739  ;;  %2540 = vadd.xlane.f32.xlu1 %v19994_v63 }
 0x615   : > { %2538 = vadd.xlane.f32.xlu0 %v19996_v21 }
 0x685   : > { %v2513_v55 = vpop.xlane.xlu1 %2512 }
 0x686   : > { %17741 = vrcp.f32 %v2513_v55  ;;  %v2511_v34 = vpop.xlane.xlu0 %2510 }
 0x687   : > { %17743 = vrcp.f32 %v2511_v34 }
 0x689   : > { %v2517_v37 = vpop.xlane.xlu1 %2516 }
 0x68a   : > { %17745 = vrcp.f32 %v2517_v37  ;;  %v2515_v39 = vpop.xlane.xlu0 %2514 }
 0x68b   : > { %17747 = vrcp.f32 %v2515_v39 }
 0x68d   : > { %v2521_v12 = vpop.xlane.xlu1 %2520 }
 0x68e   : > { %17749 = vrcp.f32 %v2521_v12  ;;  %v2519_v40 = vpop.xlane.xlu0 %2518 }
 0x68f   : > { %17751 = vrcp.f32 %v2519_v40 }
 0x690   : > { %v17742_v62 = vpop.eup %17741 }
 0x691   : > { %v17744_v42 = vpop.eup %17743  ;;  %v2525_v35 = vpop.xlane.xlu1 %2524  ;;  %v2545_v33 = vmul.f32 %v17742_v62, %v19929_v4 }
 0x692   : > { %17753 = vrcp.f32 %v2525_v35  ;;  %v2523_v53 = vpop.xlane.xlu0 %2522  ;;  %v2543_v60 = vmul.f32 %v17744_v42, %v19932_v56 }
 0x693   : > { %17755 = vrcp.f32 %v2523_v53  ;;  %11281 = vst [vmem:[%s19291_s30 + $0x88] sm:$0xff] %v2545_v33 }
 0x694   : > { %v17746_v17 = vpop.eup %17745  ;;  %11280 = vst [vmem:[%s19291_s30 + $0x80] sm:$0xff] %v2543_v60  ;;  %14054 = vmatprep.mubr.f32.mxu0 %v2543_v60 }
 0x695   : > { %v17748_v57 = vpop.eup %17747  ;;  %v2529_v49 = vpop.xlane.xlu1 %2528  ;;  %14055 = vmatmul.mubr.f32.vlgmr.msra.gmra.mrb[64].mxu0 %v2545_v33  ;;  %v2549_v0 = vmul.f32 %v17746_v17, %v19942_v46 }
 0x696   : > { %17757 = vrcp.f32 %v2529_v49  ;;  %v2527_v29 = vpop.xlane.xlu0 %2526  ;;  %v2547_v4 = vmul.f32 %v17748_v57, %v19945_v5 }
 0x697   : > { %17759 = vrcp.f32 %v2527_v29  ;;  %11283 = vst [vmem:[%s19291_s30 + $0x98] sm:$0xff] %v2549_v0 }
 0x698   : > { %v17750_v56 = vpop.eup %17749  ;;  %11282 = vst [vmem:[%s19291_s30 + $0x90] sm:$0xff] %v2547_v4  ;;  %14057 = vmatprep.mubr.f32.mxu0 %v2547_v4 }
 0x699   : > { %v17752_v20 = vpop.eup %17751  ;;  %v2533_v59 = vpop.xlane.xlu1 %2532  ;;  %14058 = vmatmul.mubr.f32.gmra.mrb[66].mxu0 %v2549_v0  ;;  %v2553_v23 = vmul.f32 %v17750_v56, %v19952_v27 }
 0x69a   : > { %17761 = vrcp.f32 %v2533_v59  ;;  %v2531_v8 = vpop.xlane.xlu0 %2530  ;;  %v2551_v46 = vmul.f32 %v17752_v20, %v19955_v9 }
 0x69b   : > { %17763 = vrcp.f32 %v2531_v8  ;;  %11285 = vst [vmem:[%s19291_s30 + $0xa8] sm:$0xff] %v2553_v23 }
 0x69c   : > { %v17754_v5 = vpop.eup %17753  ;;  %11284 = vst [vmem:[%s19291_s30 + $0xa0] sm:$0xff] %v2551_v46  ;;  %14060 = vmatprep.mubr.f32.mxu0 %v2551_v46 }
 0x69d   : > { %v17756_v47 = vpop.eup %17755  ;;  %v2537_v41 = vpop.xlane.xlu1 %2536  ;;  %14061 = vmatmul.mubr.f32.gmra.mrb[68].mxu0 %v2553_v23  ;;  %v2557_v30 = vmul.f32 %v17754_v5, %v19962_v16 }
 0x69e   : > { %17765 = vrcp.f32 %v2537_v41  ;;  %v2535_v25 = vpop.xlane.xlu0 %2534  ;;  %v2555_v27 = vmul.f32 %v17756_v47, %v19965_v18 }
 0x69f   : > { %17767 = vrcp.f32 %v2535_v25  ;;  %11287 = vst [vmem:[%s19291_s30 + $0xb8] sm:$0xff] %v2557_v30 }
 0x6a0   : > { %v17758_v9 = vpop.eup %17757  ;;  %11286 = vst [vmem:[%s19291_s30 + $0xb0] sm:$0xff] %v2555_v27  ;;  %14063 = vmatprep.mubr.f32.mxu0 %v2555_v27 }
 0x6a1   : > { %v17760_v61 = vpop.eup %17759  ;;  %v2541_v7 = vpop.xlane.xlu1 %2540  ;;  %14064 = vmatmul.mubr.f32.gmra.mrb[70].mxu0 %v2557_v30  ;;  %v2561_v10 = vmul.f32 %v17758_v9, %v19972_v51 }
 0x6a2   : > { %17769 = vrcp.f32 %v2541_v7  ;;  %v2539_v16 = vpop.xlane.xlu0 %2538  ;;  %v2559_v1 = vmul.f32 %v17760_v61, %v19975_v6 }
 0x6a3   : > { %17771 = vrcp.f32 %v2539_v16  ;;  %11289 = vst [vmem:[%s19291_s30 + $0xc8] sm:$0xff] %v2561_v10 }
 0x6a4   : > { %v17762_v18 = vpop.eup %17761  ;;  %11288 = vst [vmem:[%s19291_s30 + $0xc0] sm:$0xff] %v2559_v1  ;;  %14066 = vmatprep.mubr.f32.mxu0 %v2559_v1 }
 0x6a5   : > { %v17764_v2 = vpop.eup %17763  ;;  %14067 = vmatmul.mubr.f32.gmra.mrb[72].mxu0 %v2561_v10  ;;  %v2565_v13 = vmul.f32 %v17762_v18, %v19980_v3 }
 0x6a6   : > { %v2563_v44 = vmul.f32 %v17764_v2, %v19983_v28 }
 0x6a7   : > { %11291 = vst [vmem:[%s19291_s30 + $0xd8] sm:$0xff] %v2565_v13 }
 0x6a8   : > { %v17766_v51 = vpop.eup %17765  ;;  %11290 = vst [vmem:[%s19291_s30 + $0xd0] sm:$0xff] %v2563_v44  ;;  %14069 = vmatprep.mubr.f32.mxu0 %v2563_v44 }
 0x6a9   : > { %v17768_v6 = vpop.eup %17767  ;;  %14070 = vmatmul.mubr.f32.gmra.mrb[74].mxu0 %v2565_v13  ;;  %v2569_v32 = vmul.f32 %v17766_v51, %v19988_v48 }
 0x6aa   : > { %v2567_v26 = vmul.f32 %v17768_v6, %v19990_v11 }
 0x6ab   : > { %11293 = vst [vmem:[%s19291_s30 + $0xe8] sm:$0xff] %v2569_v32 }
 0x6ac   : > { %v17770_v19 = vpop.eup %17769  ;;  %11292 = vst [vmem:[%s19291_s30 + $0xe0] sm:$0xff] %v2567_v26  ;;  %14072 = vmatprep.mubr.f32.mxu0 %v2567_v26 }
 0x6ad   : > { %v17772_v55 = vpop.eup %17771  ;;  %14073 = vmatmul.mubr.f32.gmra.mrb[76].mxu0 %v2569_v32  ;;  %v2573_v3 = vmul.f32 %v17770_v19, %v19994_v63  ;;  %v11296_v19 = vld [vmem:[%s23185_s10 + $0x20] sm:$0xff] }
 0x6ae   : > { %v2571_v28 = vmul.f32 %v17772_v55, %v19996_v21  ;;  %v11297_v55 = vld [vmem:[%s23185_s10 + $0x28] sm:$0xff] }
 0x6af   : > { %11295 = vst [vmem:[%s19291_s30 + $0xf8] sm:$0xff] %v2573_v3 }
 0x6b0   : > { %11294 = vst [vmem:[%s19291_s30 + $0xf0] sm:$0xff] %v2571_v28  ;;  %14075 = vmatprep.mubr.f32.mxu0 %v2571_v28  ;;  %v14344_v34 = vpop.f32.mrb[112].mxu1  ;;  %v16366_v28 = vpack.c.bf16 %v11297_v55, %v11296_v19 }
 0x6b1   : > { %v3880_v37 = vmul.f32 0.28867513, %v14344_v34  ;;  %14076 = vmatmul.mubr.f32.gmra.mrb[78].mxu0 %v2573_v3  ;;  %v3800_v39 = vpop.f32.mrb[113].mxu1  ;;  %v11298_v34 = vld [vmem:[%s23185_s10 + $0x30] sm:$0xff] }
 0x6b2   : > { %v3879_v48 = vmul.f32 0.28867513, %v3800_v39  ;;  %16367 = vmatprep.subr.bf16.mxu0 %v16366_v28 }
 0x6b3   : > { %v20034_v11 = vsel %vm1321_vm3, -1e+09, %v3880_v37  ;;  %16369 = vmatpush3.bf16.msra.mxu0 %v16366_v28  ;;  %v11299_v37 = vld [vmem:[%s23185_s10 + $0x38] sm:$0xff] }
 0x6b4   : > { %3913 = vmax.xlane.f32.xlu1 %v20034_v11  ;;  %v14347_v12 = vpop.f32.mrb[114].mxu1  ;;  %v20039_v63 = vsel %vm1321_vm3, -1e+09, %v3879_v48  ;;  %v16370_v39 = vpack.c.bf16 %v11299_v37, %v11298_v34  ;;  %v1643_v48 = vld [vmem:[%s23185_s10] sm:$0xff] }
 0x6b5   : > { %v3882_v21 = vmul.f32 0.28867513, %v14347_v12  ;;  %v3810_v40 = vpop.f32.mrb[115].mxu1  ;;  %3911 = vmax.xlane.f32.xlu0 %v20039_v63  ;;  %v1644_v12 = vld [vmem:[%s23185_s10 + $0x8] sm:$0xff] }
 0x6b6   : > { %v3881_v62 = vmul.f32 0.28867513, %v3810_v40  ;;  %16371 = vmatprep.subr.bf16.mxu0 %v16370_v39 }
 0x6b7   : > { %v20044_v42 = vsel %vm1321_vm3, -1e+09, %v3882_v21  ;;  %16373 = vmatpush3.bf16.msra.mxu0 %v16370_v39  ;;  %v20130_v21 = vpack.c.bf16 %v1644_v12, %v1643_v48 }
 0x6b8   : > { %3917 = vmax.xlane.f32.xlu1 %v20044_v42  ;;  %v14350_v35 = vpop.f32.mrb[116].mxu1  ;;  %v20049_v33 = vsel %vm1321_vm3, -1e+09, %v3881_v62 }
 0x6b9   : > { %v3884_v53 = vmul.f32 0.28867513, %v14350_v35  ;;  %v3820_v60 = vpop.f32.mrb[117].mxu1  ;;  %3915 = vmax.xlane.f32.xlu0 %v20049_v33  ;;  %16375 = vmatprep.subr.bf16.mxu0 %v20130_v21 }
 0x6ba   : > { %v3883_v17 = vmul.f32 0.28867513, %v3820_v60 }
 0x6bb   : > { %v20054_v57 = vsel %vm1321_vm3, -1e+09, %v3884_v53 }
 0x6bc   : > { %3921 = vmax.xlane.f32.xlu1 %v20054_v57  ;;  %v14353_v49 = vpop.f32.mrb[118].mxu1  ;;  %v20059_v0 = vsel %vm1321_vm3, -1e+09, %v3883_v17 }
 0x6bd   : > { %v3886_v29 = vmul.f32 0.28867513, %v14353_v49  ;;  %v3830_v4 = vpop.f32.mrb[119].mxu1  ;;  %3919 = vmax.xlane.f32.xlu0 %v20059_v0 }
 0x6be   : > { %v3885_v56 = vmul.f32 0.28867513, %v3830_v4 }
 0x6bf   : > { %v20064_v20 = vsel %vm1321_vm3, -1e+09, %v3886_v29 }
 0x6c0   : > { %3925 = vmax.xlane.f32.xlu1 %v20064_v20  ;;  %v14356_v59 = vpop.f32.mrb[120].mxu1  ;;  %v20069_v23 = vsel %vm1321_vm3, -1e+09, %v3885_v56 }
 0x6c1   : > { %v3888_v8 = vmul.f32 0.28867513, %v14356_v59  ;;  %v3840_v46 = vpop.f32.mrb[121].mxu1  ;;  %3923 = vmax.xlane.f32.xlu0 %v20069_v23 }
 0x6c2   : > { %v3887_v5 = vmul.f32 0.28867513, %v3840_v46 }
 0x6c3   : > { %v20074_v47 = vsel %vm1321_vm3, -1e+09, %v3888_v8 }
 0x6c4   : > { %3929 = vmax.xlane.f32.xlu1 %v20074_v47  ;;  %v14359_v41 = vpop.f32.mrb[122].mxu1  ;;  %v20079_v30 = vsel %vm1321_vm3, -1e+09, %v3887_v5 }
 0x6c5   : > { %v3890_v25 = vmul.f32 0.28867513, %v14359_v41  ;;  %v3850_v27 = vpop.f32.mrb[123].mxu1  ;;  %3927 = vmax.xlane.f32.xlu0 %v20079_v30 }
 0x6c6   : > { %v3889_v9 = vmul.f32 0.28867513, %v3850_v27 }
 0x6c7   : > { %v20084_v61 = vsel %vm1321_vm3, -1e+09, %v3890_v25 }
 0x6c8   : > { %3933 = vmax.xlane.f32.xlu1 %v20084_v61  ;;  %v14362_v7 = vpop.f32.mrb[124].mxu1  ;;  %v20089_v10 = vsel %vm1321_vm3, -1e+09, %v3889_v9 }
 0x6c9   : > { %v3892_v16 = vmul.f32 0.28867513, %v14362_v7  ;;  %v3860_v1 = vpop.f32.mrb[125].mxu1  ;;  %3931 = vmax.xlane.f32.xlu0 %v20089_v10 }
 0x6ca   : > { %v3891_v18 = vmul.f32 0.28867513, %v3860_v1 }
 0x6cb   : > { %v20094_v2 = vsel %vm1321_vm3, -1e+09, %v3892_v16 }
 0x6cc   : > { %3937 = vmax.xlane.f32.xlu1 %v20094_v2  ;;  %v14365_v13 = vpop.f32.mrb[126].mxu1  ;;  %v20099_v44 = vsel %vm1321_vm3, -1e+09, %v3891_v18 }
 0x6cd   : > { %v3894_v51 = vmul.f32 0.28867513, %v14365_v13  ;;  %v3870_v6 = vpop.f32.mrb[127].mxu1  ;;  %3935 = vmax.xlane.f32.xlu0 %v20099_v44 }
 0x6ce   : > { %v3893_v32 = vmul.f32 0.28867513, %v3870_v6 }
 0x6cf   : > { %v20104_v26 = vsel %vm1321_vm3, -1e+09, %v3894_v51 }
 0x6d0   : > { %3941 = vmax.xlane.f32.xlu1 %v20104_v26  ;;  %v20115_v3 = vsel %vm1321_vm3, -1e+09, %v3893_v32 }
 0x6d1   : > { %3939 = vmax.xlane.f32.xlu0 %v20115_v3 }
 0x741   : > { %v3914_v40 = vpop.xlane.xlu1 %3913 }
 0x742   : > { %v3944_v62 = vsub.f32 %v20034_v11, %v3914_v40  ;;  %v3912_v35 = vpop.xlane.xlu0 %3911 }
 0x743   : > { %v3943_v53 = vsub.f32 %v20039_v63, %v3912_v35 }
 0x744   : > { %v3961_v60 = vmul.f32 1.442695, %v3944_v62 }
 0x745   : > { %v3959_v17 = vmul.f32 1.442695, %v3943_v53  ;;  %v3918_v49 = vpop.xlane.xlu1 %3917 }
 0x746   : > { %17773 = vpow2.f32 %v3961_v60  ;;  %v3946_v29 = vsub.f32 %v20044_v42, %v3918_v49  ;;  %v3916_v4 = vpop.xlane.xlu0 %3915 }
 0x747   : > { %17775 = vpow2.f32 %v3959_v17  ;;  %v3945_v56 = vsub.f32 %v20049_v33, %v3916_v4 }
 0x748   : > { %v3965_v59 = vmul.f32 1.442695, %v3946_v29 }
 0x749   : > { %v3963_v8 = vmul.f32 1.442695, %v3945_v56  ;;  %v3922_v46 = vpop.xlane.xlu1 %3921 }
 0x74a   : > { %17777 = vpow2.f32 %v3965_v59  ;;  %v3948_v5 = vsub.f32 %v20054_v57, %v3922_v46  ;;  %v3920_v11 = vpop.xlane.xlu0 %3919 }
 0x74b   : > { %17779 = vpow2.f32 %v3963_v8  ;;  %v3947_v63 = vsub.f32 %v20059_v0, %v3920_v11  ;;  %v1646_v8 = vld [vmem:[%s23185_s10 + $0x18] sm:$0xff] }
 0x74c   : > { %v3969_v41 = vmul.f32 1.442695, %v3948_v5 }
 0x74d   : > { %v3967_v25 = vmul.f32 1.442695, %v3947_v63  ;;  %v3926_v27 = vpop.xlane.xlu1 %3925 }
 0x74e   : > { %17781 = vpow2.f32 %v3969_v41  ;;  %v3950_v42 = vsub.f32 %v20064_v20, %v3926_v27  ;;  %v3924_v9 = vpop.xlane.xlu0 %3923  ;;  %v11369_v27 = vld [vmem:[%s23183_s8 + $0x108] sm:$0xff] }
 0x74f   : > { %17783 = vpow2.f32 %v3967_v25  ;;  %v3949_v33 = vsub.f32 %v20069_v23, %v3924_v9  ;;  %v11368_v25 = vld [vmem:[%s23183_s8 + $0x100] sm:$0xff] }
 0x750   : > { %v20141_v7 = vpop.eup %17773  ;;  %v3973_v16 = vmul.f32 1.442695, %v3950_v42 }
 0x751   : > { %v20143_v1 = vpop.eup %17775  ;;  %v3971_v57 = vmul.f32 1.442695, %v3949_v33  ;;  %v3930_v18 = vpop.xlane.xlu1 %3929  ;;  %3993 = vadd.xlane.f32.xlu1 %v20141_v7 }
 0x752   : > { %17785 = vpow2.f32 %v3973_v16  ;;  %v3952_v0 = vsub.f32 %v20074_v47, %v3930_v18  ;;  %3991 = vadd.xlane.f32.xlu0 %v20143_v1  ;;  %v3928_v13 = vpop.xlane.xlu0 %3927 }
 0x753   : > { %17787 = vpow2.f32 %v3971_v57  ;;  %v3951_v20 = vsub.f32 %v20079_v30, %v3928_v13  ;;  %v16446_v57 = vpack.c.bf16 %v11369_v27, %v11368_v25  ;;  %v20313_v25 = vld [vmem:[%s18984_s25 + $0x18] sm:$0xff]  ;;  %v20317_v27 = vld [vmem:[%s18984_s25 + $0x20] sm:$0xff] }
 0x754   : > { %v20149_v51 = vpop.eup %17777  ;;  %v3977_v23 = vmul.f32 1.442695, %v3952_v0 }
 0x755   : > { %v20151_v6 = vpop.eup %17779  ;;  %v3975_v32 = vmul.f32 1.442695, %v3951_v20  ;;  %v3934_v19 = vpop.xlane.xlu1 %3933  ;;  %3997 = vadd.xlane.f32.xlu1 %v20149_v51 }
 0x756   : > { %17789 = vpow2.f32 %v3977_v23  ;;  %v3954_v55 = vsub.f32 %v20084_v61, %v3934_v19  ;;  %3995 = vadd.xlane.f32.xlu0 %v20151_v6  ;;  %v3932_v47 = vpop.xlane.xlu0 %3931 }
 0x757   : > { %17791 = vpow2.f32 %v3975_v32  ;;  %v3953_v28 = vsub.f32 %v20089_v10, %v3932_v47 }
 0x758   : > { %v20157_v34 = vpop.eup %17781  ;;  %v3981_v30 = vmul.f32 1.442695, %v3954_v55 }
 0x759   : > { %v20159_v37 = vpop.eup %17783  ;;  %v3979_v39 = vmul.f32 1.442695, %v3953_v28  ;;  %v3938_v48 = vpop.xlane.xlu1 %3937  ;;  %4001 = vadd.xlane.f32.xlu1 %v20157_v34 }
 0x75a   : > { %17793 = vpow2.f32 %v3981_v30  ;;  %v3956_v12 = vsub.f32 %v20094_v2, %v3938_v48  ;;  %3999 = vadd.xlane.f32.xlu0 %v20159_v37  ;;  %v3936_v61 = vpop.xlane.xlu0 %3935  ;;  %v11371_v48 = vld [vmem:[%s23183_s8 + $0x118] sm:$0xff] }
 0x75b   : > { %17795 = vpow2.f32 %v3979_v39  ;;  %v3955_v40 = vsub.f32 %v20099_v44, %v3936_v61  ;;  %v11370_v39 = vld [vmem:[%s23183_s8 + $0x110] sm:$0xff]  ;;  %v11372_v61 = vld [vmem:[%s23183_s8 + $0x120] sm:$0xff] }
 0x75c   : > { %v20165_v62 = vpop.eup %17785  ;;  %v3985_v10 = vmul.f32 1.442695, %v3956_v12  ;;  %v16450_v12 = vpack.c.bf16 %v11371_v48, %v11370_v39 }
 0x75d   : > { %v20167_v35 = vpop.eup %17787  ;;  %v3983_v53 = vmul.f32 1.442695, %v3955_v40  ;;  %4005 = vadd.xlane.f32.xlu1 %v20165_v62  ;;  %v3942_v60 = vpop.xlane.xlu1 %3941  ;;  %v11373_v40 = vld [vmem:[%s23183_s8 + $0x128] sm:$0xff] }
 0x75e   : > { %17797 = vpow2.f32 %v3985_v10  ;;  %v3958_v17 = vsub.f32 %v20104_v26, %v3942_v60  ;;  %4003 = vadd.xlane.f32.xlu0 %v20167_v35  ;;  %v3940_v2 = vpop.xlane.xlu0 %3939  ;;  %v16454_v10 = vpack.c.bf16 %v11373_v40, %v11372_v61  ;;  %v11377_v60 = vld [vmem:[%s23183_s8 + $0x148] sm:$0xff] }
 0x75f   : > { %17799 = vpow2.f32 %v3983_v53  ;;  %v3957_v49 = vsub.f32 %v20115_v3, %v3940_v2  ;;  %v1645_v3 = vld [vmem:[%s23185_s10 + $0x10] sm:$0xff]  ;;  %v11375_v53 = vld [vmem:[%s23183_s8 + $0x138] sm:$0xff]  ;;  %v11381_v2 = vld [vmem:[%s23183_s8 + $0x168] sm:$0xff] }
 0x760   : > { %v20173_v29 = vpop.eup %17789  ;;  %v3989_v44 = vmul.f32 1.442695, %v3958_v17  ;;  %v16378_v41 = vpack.c.bf16 %v1646_v8, %v1645_v3  ;;  %v11379_v17 = vld [vmem:[%s23183_s8 + $0x158] sm:$0xff]  ;;  %v23215_v3 = vld [vmem:[#allocation17_spill] sm:$0xff] }
 0x761   : > { %v20175_v4 = vpop.eup %17791  ;;  %v3987_v56 = vmul.f32 1.442695, %v3957_v49  ;;  %4009 = vadd.xlane.f32.xlu1 %v20173_v29  ;;  %v11383_v49 = vld [vmem:[%s23183_s8 + $0x178] sm:$0xff] }
 0x762   : > { %17801 = vpow2.f32 %v3989_v44  ;;  %4007 = vadd.xlane.f32.xlu0 %v20175_v4  ;;  %v23212_v44 = vld [vmem:[#allocation13_spill] sm:$0xff]  ;;  %v23216_v8 = vld [vmem:[#allocation16_spill] sm:$0xff] }
 0x763   : > { %17803 = vpow2.f32 %v3987_v56  ;;  %v23214_v56 = vld [vmem:[#allocation14_spill] sm:$0xff] }
 0x764   : > { %v20179_v59 = vpop.eup %17793 }
 0x765   : > { %v20181_v26 = vpop.eup %17795  ;;  %4013 = vadd.xlane.f32.xlu1 %v20179_v59 }
 0x766   : > { %4011 = vadd.xlane.f32.xlu0 %v20181_v26 }
 0x768   : > { %v20191_v46 = vpop.eup %17797  ;;  %v14056_v5 = vpop.f32.mrb[64].mxu0 }
 0x769   : > { %v20193_v11 = vpop.eup %17799  ;;  %4017 = vadd.xlane.f32.xlu1 %v20191_v46  ;;  %v2657_v63 = vpop.f32.mrb[65].mxu0 }
 0x76a   : > { %14086 = vmatprep.mubr.msk.f32.mxu0 %vm2741_vm4, %v2657_v63  ;;  %4015 = vadd.xlane.f32.xlu0 %v20193_v11  ;;  %v20305_v63 = vld [vmem:[%s18984_s25 + $0x8] sm:$0xff] }
 0x76b   : > { %14087 = vmatmul.mubr.msk.f32.vlgmr.msra.gmra.mrb[80].mxu0 %vm2741_vm4, %v14056_v5  ;;  %v20301_v5 = vld [vmem:[%s18984_s25] sm:$0xff] }
 0x76c   : > { %v20205_v42 = vpop.eup %17801  ;;  %v14059_v9 = vpop.f32.mrb[66].mxu0  ;;  %16377 = vmatpush3.bf16.msra.mxu0 %v20130_v21 }
 0x76d   : > { %v20208_v33 = vpop.eup %17803  ;;  %4021 = vadd.xlane.f32.xlu1 %v20205_v42  ;;  %v2667_v16 = vpop.f32.mrb[67].mxu0  ;;  %16379 = vmatprep.subr.bf16.mxu0 %v16378_v41 }
 0x76e   : > { %14089 = vmatprep.mubr.msk.f32.mxu0 %vm2741_vm4, %v2667_v16  ;;  %4019 = vadd.xlane.f32.xlu0 %v20208_v33  ;;  %v20325_v16 = vld [vmem:[%s18984_s25 + $0x30] sm:$0xff] }
 0x76f   : > { %14090 = vmatmul.mubr.msk.f32.gmra.mrb[82].mxu0 %vm2741_vm4, %v14059_v9  ;;  %v20321_v9 = vld [vmem:[%s18984_s25 + $0x28] sm:$0xff] }
 0x770   : > { %v14062_v18 = vpop.f32.mrb[68].mxu0  ;;  %16381 = vmatpush3.bf16.msra.mxu0 %v16378_v41  ;;  %v20309_v41 = vld [vmem:[%s18984_s25 + $0x10] sm:$0xff] }
 0x771   : > { %v2677_v0 = vpop.f32.mrb[69].mxu0  ;;  %16447 = vmatprep.subr.bf16.mxu0 %v16446_v57 }
 0x772   : > { %14092 = vmatprep.mubr.msk.f32.mxu0 %vm2741_vm4, %v2677_v0  ;;  %v20337_v0 = vld [vmem:[%s18984_s25 + $0x48] sm:$0xff] }
 0x773   : > { %14093 = vmatmul.mubr.msk.f32.gmra.mrb[84].mxu0 %vm2741_vm4, %v14062_v18  ;;  %v20333_v18 = vld [vmem:[%s18984_s25 + $0x40] sm:$0xff] }
 0x774   : > { %v14065_v21 = vpop.f32.mrb[70].mxu0 }
 0x775   : > { %v2687_v13 = vpop.f32.mrb[71].mxu0 }
 0x776   : > { %14095 = vmatprep.mubr.msk.f32.mxu0 %vm2741_vm4, %v2687_v13  ;;  %v20345_v13 = vld [vmem:[%s18984_s25 + $0x58] sm:$0xff] }
 0x777   : > { %14096 = vmatmul.mubr.msk.f32.gmra.mrb[86].mxu0 %vm2741_vm4, %v14065_v21  ;;  %v20341_v21 = vld [vmem:[%s18984_s25 + $0x50] sm:$0xff] }
 0x778   : > { %v14068_v20 = vpop.f32.mrb[72].mxu0 }
 0x779   : > { %v2697_v23 = vpop.f32.mrb[73].mxu0 }
 0x77a   : > { %14098 = vmatprep.mubr.msk.f32.mxu0 %vm2741_vm4, %v2697_v23  ;;  %v20353_v23 = vld [vmem:[%s18984_s25 + $0x68] sm:$0xff] }
 0x77b   : > { %14099 = vmatmul.mubr.msk.f32.gmra.mrb[88].mxu0 %vm2741_vm4, %v14068_v20  ;;  %v20349_v20 = vld [vmem:[%s18984_s25 + $0x60] sm:$0xff] }
 0x77c   : > { %v14071_v32 = vpop.f32.mrb[74].mxu0 }
 0x77d   : > { %v2707_v19 = vpop.f32.mrb[75].mxu0 }
 0x77e   : > { %14101 = vmatprep.mubr.msk.f32.mxu0 %vm2741_vm4, %v2707_v19  ;;  %v20361_v19 = vld [vmem:[%s18984_s25 + $0x78] sm:$0xff] }
 0x77f   : > { %14102 = vmatmul.mubr.msk.f32.gmra.mrb[90].mxu0 %vm2741_vm4, %v14071_v32  ;;  %v20357_v32 = vld [vmem:[%s18984_s25 + $0x70] sm:$0xff] }
 0x780   : > { %v14074_v55 = vpop.f32.mrb[76].mxu0 }
 0x781   : > { %v2717_v47 = vpop.f32.mrb[77].mxu0 }
 0x782   : > { %14104 = vmatprep.mubr.msk.f32.mxu0 %vm2741_vm4, %v2717_v47 }
 0x783   : > { %14105 = vmatmul.mubr.msk.f32.gmra.mrb[92].mxu0 %vm2741_vm4, %v14074_v55 }
 0x784   : > { %v14077_v28 = vpop.f32.mrb[78].mxu0 }
 0x785   : > { %v2727_v30 = vpop.f32.mrb[79].mxu0 }
 0x786   : > { %14107 = vmatprep.mubr.msk.f32.mxu0 %vm2741_vm4, %v2727_v30 }
 0x787   : > { %14108 = vmatmul.mubr.msk.f32.gmra.mrb[94].mxu0 %vm2741_vm4, %v14077_v28 }
 0x788   : > { %14118 = vmatprep.mubr.msk.f32.mxu0 %vm2741_vm4, %v19483_v31  ;;  %v11374_v31 = vld [vmem:[%s23183_s8 + $0x130] sm:$0xff] }
 0x78b   : > { %14119 = vmatmul.mubr.msk.f32.vlgmr.msra.gmra.mrb[80].mxu0 %vm2741_vm4, %v19481_v14  ;;  %v16458_v14 = vpack.c.bf16 %v11375_v53, %v11374_v31 }
 0x78c   : > { %14121 = vmatprep.mubr.msk.f32.mxu0 %vm2741_vm4, %v19487_v15  ;;  %16449 = vmatpush3.bf16.msra.mxu0 %v16446_v57  ;;  %v11376_v15 = vld [vmem:[%s23183_s8 + $0x140] sm:$0xff]  ;;  %v20329_v57 = vld [vmem:[%s18984_s25 + $0x38] sm:$0xff] }
 0x78d   : > { %16451 = vmatprep.subr.bf16.mxu0 %v16450_v12 }
 0x78f   : > { %14122 = vmatmul.mubr.msk.f32.gmra.mrb[82].mxu0 %vm2741_vm4, %v19485_v24  ;;  %v16462_v24 = vpack.c.bf16 %v11377_v60, %v11376_v15 }
 0x790   : > { %14124 = vmatprep.mubr.msk.f32.mxu0 %vm2741_vm4, %v19491_v52  ;;  %16453 = vmatpush3.bf16.msra.mxu0 %v16450_v12  ;;  %v11378_v52 = vld [vmem:[%s23183_s8 + $0x150] sm:$0xff] }
 0x791   : > { %16455 = vmatprep.subr.bf16.mxu0 %v16454_v10 }
 0x793   : > { %14125 = vmatmul.mubr.msk.f32.gmra.mrb[84].mxu0 %vm2741_vm4, %v19489_v36  ;;  %v16466_v36 = vpack.c.bf16 %v11379_v17, %v11378_v52 }
 0x794   : > { %14127 = vmatprep.mubr.msk.f32.mxu0 %vm2741_vm4, %v19495_v22  ;;  %16457 = vmatpush3.bf16.msra.mxu0 %v16454_v10  ;;  %v11380_v22 = vld [vmem:[%s23183_s8 + $0x160] sm:$0xff] }
 0x795   : > { %16459 = vmatprep.subr.bf16.mxu0 %v16458_v14 }
 0x797   : > { %14128 = vmatmul.mubr.msk.f32.gmra.mrb[86].mxu0 %vm2741_vm4, %v19493_v45  ;;  %v16470_v45 = vpack.c.bf16 %v11381_v2, %v11380_v22 }
 0x798   : > { %14130 = vmatprep.mubr.msk.f32.mxu0 %vm2741_vm4, %v19499_v38  ;;  %16461 = vmatpush3.bf16.msra.mxu0 %v16458_v14  ;;  %v11382_v38 = vld [vmem:[%s23183_s8 + $0x170] sm:$0xff] }
 0x799   : > { %16463 = vmatprep.subr.bf16.mxu0 %v16462_v24 }
 0x79b   : > { %14131 = vmatmul.mubr.msk.f32.gmra.mrb[88].mxu0 %vm2741_vm4, %v19497_v50  ;;  %v23213_v50 = vld [vmem:[#allocation15_spill] sm:$0xff] }
 0x79c   : > { %14133 = vmatprep.mubr.msk.f32.mxu0 %vm2741_vm4, %v19503_v43  ;;  %16465 = vmatpush3.bf16.msra.mxu0 %v16462_v24  ;;  %v16474_v43 = vpack.c.bf16 %v11383_v49, %v11382_v38 }
 0x79d   : > { %16467 = vmatprep.subr.bf16.mxu0 %v16466_v36 }
 0x79f   : > { %14134 = vmatmul.mubr.msk.f32.gmra.mrb[90].mxu0 %vm2741_vm4, %v23212_v44 }
 0x7a0   : > { %14136 = vmatprep.mubr.msk.f32.mxu0 %vm2741_vm4, %v23213_v50  ;;  %16469 = vmatpush3.bf16.msra.mxu0 %v16466_v36 }
 0x7a1   : > { %16471 = vmatprep.subr.bf16.mxu0 %v16470_v45 }
 0x7a3   : > { %14137 = vmatmul.mubr.msk.f32.gmra.mrb[92].mxu0 %vm2741_vm4, %v23214_v56 }
 0x7a4   : > { %14139 = vmatprep.mubr.msk.f32.mxu0 %vm2741_vm4, %v23215_v3  ;;  %16473 = vmatpush3.bf16.msra.mxu0 %v16470_v45 }
 0x7a5   : > { %16475 = vmatprep.subr.bf16.mxu0 %v16474_v43 }
 0x7a7   : > { %14140 = vmatmul.mubr.msk.f32.gmra.mrb[94].mxu0 %vm2741_vm4, %v23216_v8 }
 0x7a8   : > { %16477 = vmatpush3.bf16.msra.mxu0 %v16474_v43  ;;  %14286 = vmatprep.mubr.f32.mxu0 %v20301_v5 }
 0x7ab   : > { %14287 = vmatmul.mubr.f32.vlgmr.msra.gmra.mrb[96].mxu0 %v20305_v63 }
 0x7ac   : > { %14289 = vmatprep.mubr.f32.mxu0 %v20309_v41 }
 0x7af   : > { %14290 = vmatmul.mubr.f32.gmra.mrb[98].mxu0 %v20313_v25 }
 0x7b0   : > { %14292 = vmatprep.mubr.f32.mxu0 %v20317_v27 }
 0x7b3   : > { %14293 = vmatmul.mubr.f32.gmra.mrb[100].mxu0 %v20321_v9 }
 0x7b4   : > { %14295 = vmatprep.mubr.f32.mxu0 %v20325_v16 }
 0x7b7   : > { %14296 = vmatmul.mubr.f32.gmra.mrb[102].mxu0 %v20329_v57 }
 0x7b8   : > { %14298 = vmatprep.mubr.f32.mxu0 %v20333_v18 }
 0x7bb   : > { %14299 = vmatmul.mubr.f32.gmra.mrb[104].mxu0 %v20337_v0 }
 0x7bc   : > { %14301 = vmatprep.mubr.f32.mxu0 %v20341_v21 }
 0x7bf   : > { %14302 = vmatmul.mubr.f32.gmra.mrb[106].mxu0 %v20345_v13 }
 0x7c0   : > { %14304 = vmatprep.mubr.f32.mxu0 %v20349_v20 }
 0x7c3   : > { %14305 = vmatmul.mubr.f32.gmra.mrb[108].mxu0 %v20353_v23 }
 0x7c4   : > { %14307 = vmatprep.mubr.f32.mxu0 %v20357_v32 }
 0x7c7   : > { %14308 = vmatmul.mubr.f32.gmra.mrb[110].mxu0 %v20361_v19 }
 0x7de   : > { %v3994_v55 = vpop.xlane.xlu1 %3993 }
 0x7df   : > { %17805 = vrcp.f32 %v3994_v55  ;;  %v3992_v47 = vpop.xlane.xlu0 %3991 }
 0x7e0   : > { %17807 = vrcp.f32 %v3992_v47 }
 0x7e2   : > { %v3998_v28 = vpop.xlane.xlu1 %3997 }
 0x7e3   : > { %17809 = vrcp.f32 %v3998_v28  ;;  %v3996_v30 = vpop.xlane.xlu0 %3995 }
 0x7e4   : > { %17811 = vrcp.f32 %v3996_v30 }
 0x7e6   : > { %v4002_v39 = vpop.xlane.xlu1 %4001 }
 0x7e7   : > { %17813 = vrcp.f32 %v4002_v39  ;;  %v4000_v48 = vpop.xlane.xlu0 %3999 }
 0x7e8   : > { %17815 = vrcp.f32 %v4000_v48 }
 0x7e9   : > { %v17806_v12 = vpop.eup %17805 }
 0x7ea   : > { %v17808_v61 = vpop.eup %17807  ;;  %v4006_v40 = vpop.xlane.xlu1 %4005  ;;  %v20365_v10 = vmul.f32 %v17806_v12, %v20141_v7 }
 0x7eb   : > { %17817 = vrcp.f32 %v4006_v40  ;;  %v4004_v31 = vpop.xlane.xlu0 %4003  ;;  %v4024_v53 = vmul.f32 %v17808_v61, %v20143_v1 }
 0x7ec   : > { %17819 = vrcp.f32 %v4004_v31  ;;  %11419 = vst [vmem:[%s19291_s30 + $0x108] sm:$0xff] %v20365_v10 }
 0x7ed   : > { %v17810_v14 = vpop.eup %17809  ;;  %11418 = vst [vmem:[%s19291_s30 + $0x100] sm:$0xff] %v4024_v53  ;;  %14398 = vmatprep.mubr.f32.mxu0 %v4024_v53 }
 0x7ee   : > { %v17812_v15 = vpop.eup %17811  ;;  %v4010_v60 = vpop.xlane.xlu1 %4009  ;;  %v20372_v24 = vmul.f32 %v17810_v14, %v20149_v51 }
 0x7ef   : > { %17821 = vrcp.f32 %v4010_v60  ;;  %v4008_v7 = vpop.xlane.xlu0 %4007  ;;  %v20375_v52 = vmul.f32 %v17812_v15, %v20151_v6 }
 0x7f0   : > { %17823 = vrcp.f32 %v4008_v7  ;;  %11421 = vst [vmem:[%s19291_s30 + $0x118] sm:$0xff] %v20372_v24 }
 0x7f1   : > { %v17814_v1 = vpop.eup %17813  ;;  %11420 = vst [vmem:[%s19291_s30 + $0x110] sm:$0xff] %v20375_v52 }
 0x7f2   : > { %v17816_v17 = vpop.eup %17815  ;;  %v4014_v36 = vpop.xlane.xlu1 %4013  ;;  %v20382_v22 = vmul.f32 %v17814_v1, %v20157_v34 }
 0x7f3   : > { %17825 = vrcp.f32 %v4014_v36  ;;  %v4012_v51 = vpop.xlane.xlu0 %4011  ;;  %v20385_v2 = vmul.f32 %v17816_v17, %v20159_v37 }
 0x7f4   : > { %17827 = vrcp.f32 %v4012_v51  ;;  %11423 = vst [vmem:[%s19291_s30 + $0x128] sm:$0xff] %v20382_v22 }
 0x7f5   : > { %v17818_v6 = vpop.eup %17817  ;;  %11422 = vst [vmem:[%s19291_s30 + $0x120] sm:$0xff] %v20385_v2 }
 0x7f6   : > { %v17820_v45 = vpop.eup %17819  ;;  %v4018_v38 = vpop.xlane.xlu1 %4017  ;;  %v20392_v49 = vmul.f32 %v17818_v6, %v20165_v62 }
 0x7f7   : > { %17829 = vrcp.f32 %v4018_v38  ;;  %v4016_v34 = vpop.xlane.xlu0 %4015  ;;  %v20395_v44 = vmul.f32 %v17820_v45, %v20167_v35 }
 0x7f8   : > { %17831 = vrcp.f32 %v4016_v34  ;;  %11425 = vst [vmem:[%s19291_s30 + $0x138] sm:$0xff] %v20392_v49 }
 0x7f9   : > { %v17822_v37 = vpop.eup %17821  ;;  %11424 = vst [vmem:[%s19291_s30 + $0x130] sm:$0xff] %v20395_v44 }
 0x7fa   : > { %v17824_v50 = vpop.eup %17823  ;;  %v4022_v43 = vpop.xlane.xlu1 %4021  ;;  %v20402_v56 = vmul.f32 %v17822_v37, %v20173_v29 }
 0x7fb   : > { %17833 = vrcp.f32 %v4022_v43  ;;  %v4020_v62 = vpop.xlane.xlu0 %4019  ;;  %v20405_v3 = vmul.f32 %v17824_v50, %v20175_v4 }
 0x7fc   : > { %17835 = vrcp.f32 %v4020_v62  ;;  %11427 = vst [vmem:[%s19291_s30 + $0x148] sm:$0xff] %v20402_v56 }
 0x7fd   : > { %v17826_v35 = vpop.eup %17825  ;;  %11426 = vst [vmem:[%s19291_s30 + $0x140] sm:$0xff] %v20405_v3 }
 0x7fe   : > { %v17828_v8 = vpop.eup %17827  ;;  %v20412_v55 = vmul.f32 %v17826_v35, %v20179_v59 }
 0x7ff   : > { %v20415_v29 = vmul.f32 %v17828_v8, %v20181_v26 }
 0x800   : > { %11429 = vst [vmem:[%s19291_s30 + $0x158] sm:$0xff] %v20412_v55 }
 0x801   : > { %v17830_v4 = vpop.eup %17829  ;;  %11428 = vst [vmem:[%s19291_s30 + $0x150] sm:$0xff] %v20415_v29 }
 0x802   : > { %v17832_v47 = vpop.eup %17831  ;;  %v20422_v28 = vmul.f32 %v17830_v4, %v20191_v46  ;;  %v11385_v46 = vld [vmem:[%s23184_s9 + $0x2] ss:$0 sm:$0xff] }
 0x803   : > { %v20425_v30 = vmul.f32 %v17832_v47, %v20193_v11 }
 0x804   : > { %11431 = vst [vmem:[%s19291_s30 + $0x168] sm:$0xff] %v20422_v28 }
 0x805   : > { %v17834_v39 = vpop.eup %17833  ;;  %11430 = vst [vmem:[%s19291_s30 + $0x160] sm:$0xff] %v20425_v30 }
 0x806   : > { %v17836_v59 = vpop.eup %17835  ;;  %v20432_v26 = vmul.f32 %v17834_v39, %v20205_v42 }
 0x807   : > { %v20435_v48 = vmul.f32 %v17836_v59, %v20208_v33 }
 0x808   : > { %11433 = vst [vmem:[%s19291_s30 + $0x178] sm:$0xff] %v20432_v26 }
 0x809   : > { %11432 = vst [vmem:[%s19291_s30 + $0x170] sm:$0xff] %v20435_v48 }
 0x87e   : > { %v14288_v11 = vpop.f32.mrb[96].mxu0 }
 0x87f   : > { %v3565_v12 = vadd.f32 %v14288_v11, %v11385_v46  ;;  %v3559_v61 = vpop.f32.mrb[97].mxu0 }
 0x880   : > { %v3560_v40 = vadd.f32 %v11385_v46, %v3559_v61 }
 0x882   : > { %v16526_v31 = vpack.c.bf16 %v3565_v12, %v3560_v40  ;;  %v14291_v53 = vpop.f32.mrb[98].mxu0 }
 0x883   : > { %v3575_v14 = vadd.f32 %v14291_v53, %v11385_v46  ;;  %v3569_v42 = vpop.f32.mrb[99].mxu0 }
 0x884   : > { %v3570_v15 = vadd.f32 %v11385_v46, %v3569_v42  ;;  %16527 = vmatprep.subr.bf16.mxu0 %v16526_v31 }
 0x885   : > { %16529 = vmatpush3.bf16.msra.mxu0 %v16526_v31 }
 0x886   : > { %v16530_v33 = vpack.c.bf16 %v3575_v14, %v3570_v15  ;;  %v14294_v60 = vpop.f32.mrb[100].mxu0  ;;  %v11434_v15 = vld [vmem:[%s23185_s10 + $0x40] sm:$0xff] }
 0x887   : > { %v3585_v7 = vadd.f32 %v14294_v60, %v11385_v46  ;;  %v3579_v1 = vpop.f32.mrb[101].mxu0 }
 0x888   : > { %v3580_v17 = vadd.f32 %v11385_v46, %v3579_v1  ;;  %16531 = vmatprep.subr.bf16.mxu0 %v16530_v33 }
 0x889   : > { %16533 = vmatpush3.bf16.msra.mxu0 %v16530_v33  ;;  %v11435_v33 = vld [vmem:[%s23185_s10 + $0x48] sm:$0xff] }
 0x88a   : > { %v16534_v36 = vpack.c.bf16 %v3585_v7, %v3580_v17  ;;  %v14297_v51 = vpop.f32.mrb[102].mxu0  ;;  %v16558_v1 = vpack.c.bf16 %v11435_v33, %v11434_v15  ;;  %v11436_v17 = vld [vmem:[%s23185_s10 + $0x50] sm:$0xff]  ;;  %v18232_v15 = vld [vmem:[%s18690_s15 + $0x60] sm:$0xff]  ;;  %v18233_v33 = vld [vmem:[%s18690_s15 + $0x68] sm:$0xff] }
 0x88b   : > { %v3595_v6 = vadd.f32 %v14297_v51, %v11385_v46  ;;  %v3589_v45 = vpop.f32.mrb[103].mxu0 }
 0x88c   : > { %v3590_v38 = vadd.f32 %v11385_v46, %v3589_v45  ;;  %16535 = vmatprep.subr.bf16.mxu0 %v16534_v36 }
 0x88d   : > { %16537 = vmatpush3.bf16.msra.mxu0 %v16534_v36  ;;  %v11437_v36 = vld [vmem:[%s23185_s10 + $0x58] sm:$0xff] }
 0x88e   : > { %v16538_v34 = vpack.c.bf16 %v3595_v6, %v3590_v38  ;;  %v14300_v37 = vpop.f32.mrb[104].mxu0  ;;  %v16562_v51 = vpack.c.bf16 %v11437_v36, %v11436_v17  ;;  %v11463_v6 = vld [vmem:[%s23179_s4 + $0x1c8] sm:$0xff]  ;;  %v11464_v38 = vld [vmem:[%s23179_s4 + $0x1d0] sm:$0xff]  ;;  %v11475_v17 = vld [vmem:[%s23181_s6 + $0x198] sm:$0xff] }
 0x88f   : > { %v3605_v50 = vadd.f32 %v14300_v37, %v11385_v46  ;;  %v3599_v43 = vpop.f32.mrb[105].mxu0 }
 0x890   : > { %v3600_v62 = vadd.f32 %v11385_v46, %v3599_v43  ;;  %16539 = vmatprep.subr.bf16.mxu0 %v16538_v34  ;;  %v11467_v43 = vld [vmem:[%s23179_s4 + $0x1e8] sm:$0xff] }
 0x891   : > { %16541 = vmatpush3.bf16.msra.mxu0 %v16538_v34  ;;  %v11465_v34 = vld [vmem:[%s23179_s4 + $0x1d8] sm:$0xff] }
 0x892   : > { %v16542_v35 = vpack.c.bf16 %v3605_v50, %v3600_v62  ;;  %v14303_v8 = vpop.f32.mrb[106].mxu0  ;;  %v16586_v37 = vpack.c.bf16 %v11465_v34, %v11464_v38  ;;  %v11466_v50 = vld [vmem:[%s23179_s4 + $0x1e0] sm:$0xff] }
 0x893   : > { %v3615_v4 = vadd.f32 %v14303_v8, %v11385_v46  ;;  %v3609_v47 = vpop.f32.mrb[107].mxu0  ;;  %v16590_v62 = vpack.c.bf16 %v11467_v43, %v11466_v50  ;;  %v11469_v8 = vld [vmem:[%s23179_s4 + $0x1f8] sm:$0xff]  ;;  %v11485_v50 = vld [vmem:[%s23181_s6 + $0x1e8] sm:$0xff] }
 0x894   : > { %v3610_v39 = vadd.f32 %v11385_v46, %v3609_v47  ;;  %16543 = vmatprep.subr.bf16.mxu0 %v16542_v35  ;;  %v18221_v47 = vld [vmem:[%s18690_s15 + $0x8] sm:$0xff] }
 0x895   : > { %16545 = vmatpush3.bf16.msra.mxu0 %v16542_v35  ;;  %v11468_v35 = vld [vmem:[%s23179_s4 + $0x1f0] sm:$0xff] }
 0x896   : > { %v16546_v59 = vpack.c.bf16 %v3615_v4, %v3610_v39  ;;  %v14306_v11 = vpop.f32.mrb[108].mxu0  ;;  %v16594_v4 = vpack.c.bf16 %v11469_v8, %v11468_v35  ;;  %v18222_v39 = vld [vmem:[%s18690_s15 + $0x10] sm:$0xff] }
 0x897   : > { %v3625_v12 = vadd.f32 %v14306_v11, %v11385_v46  ;;  %v3619_v61 = vpop.f32.mrb[109].mxu0  ;;  %v18224_v11 = vld [vmem:[%s18690_s15 + $0x20] sm:$0xff]  ;;  %v11486_v8 = vld [vmem:[%s23181_s6 + $0x1f0] sm:$0xff] }
 0x898   : > { %v3620_v40 = vadd.f32 %v11385_v46, %v3619_v61  ;;  %16547 = vmatprep.subr.bf16.mxu0 %v16546_v59  ;;  %v18226_v61 = vld [vmem:[%s18690_s15 + $0x30] sm:$0xff] }
 0x899   : > { %16549 = vmatpush3.bf16.msra.mxu0 %v16546_v59  ;;  %v18223_v59 = vld [vmem:[%s18690_s15 + $0x18] sm:$0xff] }
 0x89a   : > { %v16550_v31 = vpack.c.bf16 %v3625_v12, %v3620_v40  ;;  %v14309_v53 = vpop.f32.mrb[110].mxu0  ;;  %v18225_v12 = vld [vmem:[%s18690_s15 + $0x28] sm:$0xff]  ;;  %v18227_v40 = vld [vmem:[%s18690_s15 + $0x38] sm:$0xff] }
 0x89b   : > { %v3635_v14 = vadd.f32 %v14309_v53, %v11385_v46  ;;  %v3629_v42 = vpop.f32.mrb[111].mxu0  ;;  %v18229_v53 = vld [vmem:[%s18690_s15 + $0x48] sm:$0xff] }
 0x89c   : > { %v3630_v60 = vadd.f32 %v11385_v46, %v3629_v42  ;;  %16551 = vmatprep.subr.bf16.mxu0 %v16550_v31  ;;  %v11462_v46 = vld [vmem:[%s23179_s4 + $0x1c0] sm:$0xff]  ;;  %v18231_v42 = vld [vmem:[%s18690_s15 + $0x58] sm:$0xff] }
 0x89d   : > { %16553 = vmatpush3.bf16.msra.mxu0 %v16550_v31  ;;  %v16582_v45 = vpack.c.bf16 %v11463_v6, %v11462_v46  ;;  %v18228_v31 = vld [vmem:[%s18690_s15 + $0x40] sm:$0xff]  ;;  %v11482_v46 = vld [vmem:[%s23181_s6 + $0x1d0] sm:$0xff]  ;;  %v11483_v6 = vld [vmem:[%s23181_s6 + $0x1d8] sm:$0xff] }
 0x89e   : > { %v16554_v7 = vpack.c.bf16 %v3635_v14, %v3630_v60  ;;  %v18230_v14 = vld [vmem:[%s18690_s15 + $0x50] sm:$0xff]  ;;  %v16618_v34 = vpack.c.bf16 %v11483_v6, %v11482_v46 }
 0x89f   : > { %v18234_v60 = vld [vmem:[%s18690_s15 + $0x70] sm:$0xff] }
 0x8a0   : > { %16555 = vmatprep.subr.bf16.mxu0 %v16554_v7 }
 0x8a1   : > { %16557 = vmatpush3.bf16.msra.mxu0 %v16554_v7  ;;  %v18235_v7 = vld [vmem:[%s18690_s15 + $0x78] sm:$0xff] }
 0x8a2   : > { %16559 = vmatprep.subr.bf16.mxu0 %v16558_v1 }
 0x8a4   : > { %14399 = vmatmul.mubr.f32.vlgmr.msra.gmra.mrb[112].mxu0 %v20365_v10  ;;  %v11472_v10 = vld [vmem:[%s23181_s6 + $0x180] sm:$0xff] }
 0x8a5   : > { %14401 = vmatprep.mubr.f32.mxu0 %v20375_v52  ;;  %16561 = vmatpush3.bf16.msra.mxu0 %v16558_v1  ;;  %v11474_v1 = vld [vmem:[%s23181_s6 + $0x190] sm:$0xff] }
 0x8a6   : > { %16563 = vmatprep.subr.bf16.mxu0 %v16562_v51 }
 0x8a8   : > { %14402 = vmatmul.mubr.f32.gmra.mrb[114].mxu0 %v20372_v24  ;;  %v11473_v24 = vld [vmem:[%s23181_s6 + $0x188] sm:$0xff] }
 0x8a9   : > { %14404 = vmatprep.mubr.f32.mxu0 %v20385_v2  ;;  %16565 = vmatpush3.bf16.msra.mxu0 %v16562_v51  ;;  %v20477_v52 = vpack.c.bf16 %v11473_v24, %v11472_v10  ;;  %v11455_v2 = vld [vmem:[%s23179_s4 + $0x188] sm:$0xff]  ;;  %v16602_v10 = vpack.c.bf16 %v11475_v17, %v11474_v1  ;;  %v11476_v24 = vld [vmem:[%s23181_s6 + $0x1a0] sm:$0xff]  ;;  %v18246_v1 = vld [vmem:[%s18789_s24 + $0x50] sm:$0xff] }
 0x8aa   : > { %v18247_v17 = vld [vmem:[%s18789_s24 + $0x58] sm:$0xff] }
 0x8ab   : > { %16599 = vmatprep.subr.bf16.mxu0 %v20477_v52 }
 0x8ac   : > { %14405 = vmatmul.mubr.f32.gmra.mrb[116].mxu0 %v20382_v22  ;;  %v11454_v22 = vld [vmem:[%s23179_s4 + $0x180] sm:$0xff] }
 0x8ad   : > { %14407 = vmatprep.mubr.f32.mxu0 %v20395_v44  ;;  %v16566_v44 = vpack.c.bf16 %v11455_v2, %v11454_v22 }
 0x8af   : > { %16567 = vmatprep.subr.bf16.mxu1 %v16566_v44 }
 0x8b0   : > { %14408 = vmatmul.mubr.f32.gmra.mrb[118].mxu0 %v20392_v49  ;;  %v11456_v49 = vld [vmem:[%s23179_s4 + $0x190] sm:$0xff]  ;;  %16569 = vmatpush3.bf16.msra.mxu1 %v16566_v44 }
 0x8b1   : > { %14410 = vmatprep.mubr.f32.mxu0 %v20405_v3  ;;  %v11478_v44 = vld [vmem:[%s23181_s6 + $0x1b0] sm:$0xff] }
 0x8b4   : > { %14411 = vmatmul.mubr.f32.gmra.mrb[120].mxu0 %v20402_v56  ;;  %v11457_v56 = vld [vmem:[%s23179_s4 + $0x198] sm:$0xff] }
 0x8b5   : > { %14413 = vmatprep.mubr.f32.mxu0 %v20415_v29  ;;  %v16570_v3 = vpack.c.bf16 %v11457_v56, %v11456_v49  ;;  %v11459_v29 = vld [vmem:[%s23179_s4 + $0x1a8] sm:$0xff]  ;;  %v11479_v56 = vld [vmem:[%s23181_s6 + $0x1b8] sm:$0xff] }
 0x8b7   : > { %16571 = vmatprep.subr.bf16.mxu1 %v16570_v3 }
 0x8b8   : > { %14414 = vmatmul.mubr.f32.gmra.mrb[122].mxu0 %v20412_v55  ;;  %v11458_v55 = vld [vmem:[%s23179_s4 + $0x1a0] sm:$0xff]  ;;  %16573 = vmatpush3.bf16.msra.mxu1 %v16570_v3 }
 0x8b9   : > { %14416 = vmatprep.mubr.f32.mxu0 %v20425_v30  ;;  %v11460_v30 = vld [vmem:[%s23179_s4 + $0x1b0] sm:$0xff] }
 0x8bc   : > { %14417 = vmatmul.mubr.f32.gmra.mrb[124].mxu0 %v20422_v28  ;;  %v16574_v28 = vpack.c.bf16 %v11459_v29, %v11458_v55  ;;  %v11480_v29 = vld [vmem:[%s23181_s6 + $0x1c0] sm:$0xff] }
 0x8bd   : > { %14419 = vmatprep.mubr.f32.mxu0 %v20435_v48 }
 0x8be   : > { %16575 = vmatprep.subr.bf16.mxu1 %v16574_v28 }
 0x8bf   : > { %16577 = vmatpush3.bf16.msra.mxu1 %v16574_v28  ;;  %v11481_v28 = vld [vmem:[%s23181_s6 + $0x1c8] sm:$0xff] }
 0x8c0   : > { %14420 = vmatmul.mubr.f32.gmra.mrb[126].mxu0 %v20432_v26  ;;  %v11461_v26 = vld [vmem:[%s23179_s4 + $0x1b8] sm:$0xff] }
 0x8c1   : > { %v16578_v48 = vpack.c.bf16 %v11461_v26, %v11460_v30 }
 0x8c3   : > { %16579 = vmatprep.subr.bf16.mxu1 %v16578_v48 }
 0x8c4   : > { %16581 = vmatpush3.bf16.msra.mxu1 %v16578_v48  ;;  %v16614_v48 = vpack.c.bf16 %v11481_v28, %v11480_v29 }
 0x8c5   : > { %16583 = vmatprep.subr.bf16.mxu1 %v16582_v45 }
 0x8c8   : > { %16585 = vmatpush3.bf16.msra.mxu1 %v16582_v45 }
 0x8c9   : > { %16587 = vmatprep.subr.bf16.mxu1 %v16586_v37 }
 0x8cc   : > { %16589 = vmatpush3.bf16.msra.mxu1 %v16586_v37  ;;  %v11484_v37 = vld [vmem:[%s23181_s6 + $0x1e0] sm:$0xff] }
 0x8cd   : > { %16591 = vmatprep.subr.bf16.mxu1 %v16590_v62  ;;  %v16622_v35 = vpack.c.bf16 %v11485_v50, %v11484_v37 }
 0x8d0   : > { %16593 = vmatpush3.bf16.msra.mxu1 %v16590_v62 }
 0x8d1   : > { %16595 = vmatprep.subr.bf16.mxu1 %v16594_v4 }
 0x8d4   : > { %16597 = vmatpush3.bf16.msra.mxu1 %v16594_v4  ;;  %v11487_v4 = vld [vmem:[%s23181_s6 + $0x1f8] sm:$0xff] }
 0x8d7   : > { %14487 = vmatmul.mubr.f32.vlgmr.msra.gmra.mrb[128].mxu1 %v18221_v47 }
 0x8d8   : > { %14489 = vmatprep.mubr.f32.mxu1 %v18222_v39 }
 0x8db   : > { %14490 = vmatmul.mubr.f32.gmra.mrb[130].mxu1 %v18223_v59  ;;  %v16626_v59 = vpack.c.bf16 %v11487_v4, %v11486_v8 }
 0x8dc   : > { %14492 = vmatprep.mubr.f32.mxu1 %v18224_v11 }
 0x8df   : > { %14493 = vmatmul.mubr.f32.gmra.mrb[132].mxu1 %v18225_v12 }
 0x8e0   : > { %14495 = vmatprep.mubr.f32.mxu1 %v18226_v61  ;;  %v18236_v61 = vld [vmem:[%s18789_s24] sm:$0xff] }
 0x8e3   : > { %14496 = vmatmul.mubr.f32.gmra.mrb[134].mxu1 %v18227_v40  ;;  %v18237_v40 = vld [vmem:[%s18789_s24 + $0x8] sm:$0xff] }
 0x8e4   : > { %14498 = vmatprep.mubr.f32.mxu1 %v18228_v31  ;;  %v18238_v31 = vld [vmem:[%s18789_s24 + $0x10] sm:$0xff] }
 0x8e7   : > { %14499 = vmatmul.mubr.f32.gmra.mrb[136].mxu1 %v18229_v53  ;;  %v18239_v53 = vld [vmem:[%s18789_s24 + $0x18] sm:$0xff] }
 0x8e8   : > { %14501 = vmatprep.mubr.f32.mxu1 %v18230_v14  ;;  %v18240_v14 = vld [vmem:[%s18789_s24 + $0x20] sm:$0xff] }
 0x8eb   : > { %14502 = vmatmul.mubr.f32.gmra.mrb[138].mxu1 %v18231_v42  ;;  %v18241_v42 = vld [vmem:[%s18789_s24 + $0x28] sm:$0xff] }
 0x8ec   : > { %14504 = vmatprep.mubr.f32.mxu1 %v18232_v15  ;;  %v18242_v15 = vld [vmem:[%s18789_s24 + $0x30] sm:$0xff] }
 0x8ef   : > { %14505 = vmatmul.mubr.f32.gmra.mrb[140].mxu1 %v18233_v33  ;;  %v18243_v33 = vld [vmem:[%s18789_s24 + $0x38] sm:$0xff] }
 0x8f0   : > { %14507 = vmatprep.mubr.f32.mxu1 %v18234_v60  ;;  %v18244_v60 = vld [vmem:[%s18789_s24 + $0x40] sm:$0xff] }
 0x8f3   : > { %14508 = vmatmul.mubr.f32.gmra.mrb[142].mxu1 %v18235_v7  ;;  %v18245_v7 = vld [vmem:[%s18789_s24 + $0x48] sm:$0xff] }
 0x8f4   : > { %14598 = vmatprep.mubr.f32.mxu1 %v20301_v5  ;;  %v11477_v5 = vld [vmem:[%s23181_s6 + $0x1a8] sm:$0xff] }
 0x8f5   : > { %v16606_v49 = vpack.c.bf16 %v11477_v5, %v11476_v24  ;;  %v18251_v24 = vld [vmem:[%s18789_s24 + $0x78] sm:$0xff] }
 0x977   : > { %v14400_v36 = vpop.f32.mrb[112].mxu0 }
 0x978   : > { %v4138_v51 = vpop.f32.mrb[113].mxu0 }
 0x979   : > { %14430 = vmatprep.mubr.msk.f32.mxu0 %vm2741_vm4, %v4138_v51  ;;  %v18249_v51 = vld [vmem:[%s18789_s24 + $0x68] sm:$0xff] }
 0x97a   : > { %14431 = vmatmul.mubr.msk.f32.vlgmr.msra.gmra.mrb[80].mxu0 %vm2741_vm4, %v14400_v36  ;;  %v18248_v36 = vld [vmem:[%s18789_s24 + $0x60] sm:$0xff] }
 0x97b   : > { %v14403_v22 = vpop.f32.mrb[114].mxu0  ;;  %16601 = vmatpush3.bf16.msra.mxu0 %v20477_v52  ;;  %v16610_v52 = vpack.c.bf16 %v11479_v56, %v11478_v44 }
 0x97c   : > { %v4148_v2 = vpop.f32.mrb[115].mxu0  ;;  %16603 = vmatprep.subr.bf16.mxu0 %v16602_v10 }
 0x97d   : > { %14433 = vmatprep.mubr.msk.f32.mxu0 %vm2741_vm4, %v4148_v2 }
 0x97e   : > { %14434 = vmatmul.mubr.msk.f32.gmra.mrb[82].mxu0 %vm2741_vm4, %v14403_v22  ;;  %v11471_v22 = vld [vmem:[%s23180_s5 + $0x3] ss:$0 sm:$0xff] }
 0x97f   : > { %v14406_v3 = vpop.f32.mrb[116].mxu0  ;;  %16605 = vmatpush3.bf16.msra.mxu0 %v16602_v10  ;;  %v18250_v10 = vld [vmem:[%s18789_s24 + $0x70] sm:$0xff] }
 0x980   : > { %v4158_v55 = vpop.f32.mrb[117].mxu0  ;;  %16607 = vmatprep.subr.bf16.mxu0 %v16606_v49 }
 0x981   : > { %14436 = vmatprep.mubr.msk.f32.mxu0 %vm2741_vm4, %v4158_v55 }
 0x982   : > { %14437 = vmatmul.mubr.msk.f32.gmra.mrb[84].mxu0 %vm2741_vm4, %v14406_v3 }
 0x983   : > { %v14409_v30 = vpop.f32.mrb[118].mxu0  ;;  %16609 = vmatpush3.bf16.msra.mxu0 %v16606_v49 }
 0x984   : > { %v4168_v26 = vpop.f32.mrb[119].mxu0  ;;  %16611 = vmatprep.subr.bf16.mxu0 %v16610_v52 }
 0x985   : > { %14439 = vmatprep.mubr.msk.f32.mxu0 %vm2741_vm4, %v4168_v26 }
 0x986   : > { %14440 = vmatmul.mubr.msk.f32.gmra.mrb[86].mxu0 %vm2741_vm4, %v14409_v30 }
 0x987   : > { %v14412_v45 = vpop.f32.mrb[120].mxu0  ;;  %16613 = vmatpush3.bf16.msra.mxu0 %v16610_v52 }
 0x988   : > { %v4178_v38 = vpop.f32.mrb[121].mxu0  ;;  %16615 = vmatprep.subr.bf16.mxu0 %v16614_v48 }
 0x989   : > { %14442 = vmatprep.mubr.msk.f32.mxu0 %vm2741_vm4, %v4178_v38 }
 0x98a   : > { %14443 = vmatmul.mubr.msk.f32.gmra.mrb[88].mxu0 %vm2741_vm4, %v14412_v45 }
 0x98b   : > { %v14415_v43 = vpop.f32.mrb[122].mxu0  ;;  %16617 = vmatpush3.bf16.msra.mxu0 %v16614_v48 }
 0x98c   : > { %v4188_v62 = vpop.f32.mrb[123].mxu0  ;;  %16619 = vmatprep.subr.bf16.mxu0 %v16618_v34 }
 0x98d   : > { %14445 = vmatprep.mubr.msk.f32.mxu0 %vm2741_vm4, %v4188_v62 }
 0x98e   : > { %14446 = vmatmul.mubr.msk.f32.gmra.mrb[90].mxu0 %vm2741_vm4, %v14415_v43 }
 0x98f   : > { %v14418_v47 = vpop.f32.mrb[124].mxu0  ;;  %16621 = vmatpush3.bf16.msra.mxu0 %v16618_v34 }
 0x990   : > { %v4198_v39 = vpop.f32.mrb[125].mxu0  ;;  %16623 = vmatprep.subr.bf16.mxu0 %v16622_v35 }
 0x991   : > { %14448 = vmatprep.mubr.msk.f32.mxu0 %vm2741_vm4, %v4198_v39 }
 0x992   : > { %14449 = vmatmul.mubr.msk.f32.gmra.mrb[92].mxu0 %vm2741_vm4, %v14418_v47 }
 0x993   : > { %v14421_v11 = vpop.f32.mrb[126].mxu0  ;;  %16625 = vmatpush3.bf16.msra.mxu0 %v16622_v35 }
 0x994   : > { %v4208_v12 = vpop.f32.mrb[127].mxu0  ;;  %16627 = vmatprep.subr.bf16.mxu0 %v16626_v59 }
 0x995   : > { %14451 = vmatprep.mubr.msk.f32.mxu0 %vm2741_vm4, %v4208_v12 }
 0x996   : > { %14452 = vmatmul.mubr.msk.f32.gmra.mrb[94].mxu0 %vm2741_vm4, %v14421_v11 }
 0x997   : > { %16629 = vmatpush3.bf16.msra.mxu0 %v16626_v59  ;;  %14542 = vmatprep.mubr.f32.mxu0 %v18236_v61 }
 0x99a   : > { %14543 = vmatmul.mubr.f32.vlgmr.msra.gmra.mrb[128].mxu0 %v18237_v40 }
 0x99b   : > { %14545 = vmatprep.mubr.f32.mxu0 %v18238_v31  ;;  %v11489_v31 = vld [vmem:[%s23182_s7 + $0x3] ss:$0 sm:$0xff] }
 0x99e   : > { %14546 = vmatmul.mubr.f32.gmra.mrb[130].mxu0 %v18239_v53 }
 0x99f   : > { %14548 = vmatprep.mubr.f32.mxu0 %v18240_v14 }
 0x9a2   : > { %14549 = vmatmul.mubr.f32.gmra.mrb[132].mxu0 %v18241_v42 }
 0x9a3   : > { %14551 = vmatprep.mubr.f32.mxu0 %v18242_v15 }
 0x9a6   : > { %14552 = vmatmul.mubr.f32.gmra.mrb[134].mxu0 %v18243_v33 }
 0x9a7   : > { %14554 = vmatprep.mubr.f32.mxu0 %v18244_v60 }
 0x9aa   : > { %14555 = vmatmul.mubr.f32.gmra.mrb[136].mxu0 %v18245_v7  ;;  %v14488_v5 = vpop.f32.mrb[128].mxu1 }
 0x9ab   : > { %14557 = vmatprep.mubr.f32.mxu0 %v18246_v1  ;;  %v20622_v2 = vadd.f32 %v14488_v5, %v11471_v22  ;;  %v4522_v49 = vpop.f32.mrb[129].mxu1 }
 0x9ac   : > { %v4523_v44 = vadd.f32 %v11471_v22, %v4522_v49 }
 0x9ae   : > { %14558 = vmatmul.mubr.f32.gmra.mrb[138].mxu0 %v18247_v17  ;;  %v14491_v56 = vpop.f32.mrb[130].mxu1 }
 0x9af   : > { %14560 = vmatprep.mubr.f32.mxu0 %v18248_v36  ;;  %v20624_v3 = vadd.f32 %v14491_v56, %v11471_v22  ;;  %v4532_v55 = vpop.f32.mrb[131].mxu1 }
 0x9b0   : > { %v20627_v52 = vadd.f32 %v11471_v22, %v4532_v55 }
 0x9b2   : > { %14561 = vmatmul.mubr.f32.gmra.mrb[140].mxu0 %v18249_v51  ;;  %v14494_v29 = vpop.f32.mrb[132].mxu1 }
 0x9b3   : > { %14563 = vmatprep.mubr.f32.mxu0 %v18250_v10  ;;  %v20629_v28 = vadd.f32 %v14494_v29, %v11471_v22  ;;  %v4542_v30 = vpop.f32.mrb[133].mxu1 }
 0x9b4   : > { %v20631_v26 = vadd.f32 %v11471_v22, %v4542_v30 }
 0x9b6   : > { %14564 = vmatmul.mubr.f32.gmra.mrb[142].mxu0 %v18251_v24  ;;  %v14497_v48 = vpop.f32.mrb[134].mxu1 }
 0x9b7   : > { %14654 = vmatprep.mubr.msk.f32.mxu0 %vm1057_vm0, %v4523_v44  ;;  %v20633_v46 = vadd.f32 %v14497_v48, %v11471_v22  ;;  %v4552_v6 = vpop.f32.mrb[135].mxu1 }
 0x9b8   : > { %v20635_v45 = vadd.f32 %v11471_v22, %v4552_v6 }
 0x9ba   : > { %v14500_v38 = vpop.f32.mrb[136].mxu1 }
 0x9bb   : > { %v20637_v34 = vadd.f32 %v14500_v38, %v11471_v22  ;;  %v4562_v37 = vpop.f32.mrb[137].mxu1 }
 0x9bc   : > { %v20639_v50 = vadd.f32 %v11471_v22, %v4562_v37 }
 0x9be   : > { %v14503_v43 = vpop.f32.mrb[138].mxu1 }
 0x9bf   : > { %v20641_v62 = vadd.f32 %v14503_v43, %v11471_v22  ;;  %v4572_v35 = vpop.f32.mrb[139].mxu1 }
 0x9c0   : > { %v20643_v8 = vadd.f32 %v11471_v22, %v4572_v35 }
 0x9c2   : > { %v14506_v4 = vpop.f32.mrb[140].mxu1 }
 0x9c3   : > { %v20645_v47 = vadd.f32 %v14506_v4, %v11471_v22  ;;  %v4582_v39 = vpop.f32.mrb[141].mxu1 }
 0x9c4   : > { %v20647_v59 = vadd.f32 %v11471_v22, %v4582_v39 }
 0x9c6   : > { %v14509_v11 = vpop.f32.mrb[142].mxu1 }
 0x9c7   : > { %v20649_v12 = vadd.f32 %v14509_v11, %v11471_v22  ;;  %v4592_v61 = vpop.f32.mrb[143].mxu1 }
 0x9c8   : > { %v20651_v40 = vadd.f32 %v11471_v22, %v4592_v61 }
 0xa6d   : > { %v14544_v53 = vpop.f32.mrb[128].mxu0 }
 0xa6e   : > { %v4698_v14 = vadd.f32 %v14544_v53, %v11489_v31  ;;  %v4692_v42 = vpop.f32.mrb[129].mxu0 }
 0xa6f   : > { %v4693_v15 = vadd.f32 %v11489_v31, %v4692_v42 }
 0xa71   : > { %v16662_v33 = vpack.c.bf16 %v4698_v14, %v4693_v15  ;;  %v14547_v60 = vpop.f32.mrb[130].mxu0 }
 0xa72   : > { %v4708_v7 = vadd.f32 %v14547_v60, %v11489_v31  ;;  %v4702_v1 = vpop.f32.mrb[131].mxu0 }
 0xa73   : > { %16664 = vmatprep.subr.msk.bf16.mxu0 %vm18895_vm1, %v16662_v33  ;;  %v4703_v17 = vadd.f32 %v11489_v31, %v4702_v1 }
 0xa74   : > { %16667 = vmatpush3.bf16.xpose.msk.msra.mxu0 %vm18895_vm1, %v16662_v33 }
 0xa75   : > { %v16668_v36 = vpack.c.bf16 %v4708_v7, %v4703_v17  ;;  %v14550_v51 = vpop.f32.mrb[132].mxu0 }
 0xa76   : > { %v4718_v10 = vadd.f32 %v14550_v51, %v11489_v31  ;;  %v4712_v24 = vpop.f32.mrb[133].mxu0 }
 0xa77   : > { %16670 = vmatprep.subr.msk.bf16.mxu0 %vm18895_vm1, %v16668_v36  ;;  %v4713_v5 = vadd.f32 %v11489_v31, %v4712_v24  ;;  %v11503_v24 = vld [vmem:[%s23183_s8 + $0x1e8] sm:$0xff] }
 0xa79   : > { %v16674_v22 = vpack.c.bf16 %v4718_v10, %v4713_v5  ;;  %v14553_v49 = vpop.f32.mrb[134].mxu0  ;;  %v11502_v10 = vld [vmem:[%s23183_s8 + $0x1e0] sm:$0xff] }
 0xa7a   : > { %v4728_v44 = vadd.f32 %v14553_v49, %v11489_v31  ;;  %v4722_v56 = vpop.f32.mrb[135].mxu0  ;;  %v16654_v5 = vpack.c.bf16 %v11503_v24, %v11502_v10  ;;  %v11505_v49 = vld [vmem:[%s23183_s8 + $0x1f8] sm:$0xff] }
 0xa7b   : > { %v4723_v55 = vadd.f32 %v11489_v31, %v4722_v56 }
 0xa7c   : > { %16673 = vmatpush3.bf16.xpose.msk.msra.mxu0 %vm18895_vm1, %v16668_v36  ;;  %v11501_v36 = vld [vmem:[%s23183_s8 + $0x1d8] sm:$0xff] }
 0xa7d   : > { %16676 = vmatprep.subr.msk.bf16.mxu0 %vm18895_vm1, %v16674_v22  ;;  %v16680_v29 = vpack.c.bf16 %v4728_v44, %v4723_v55  ;;  %v14556_v30 = vpop.f32.mrb[136].mxu0 }
 0xa7e   : > { %v4738_v48 = vadd.f32 %v14556_v30, %v11489_v31  ;;  %v4732_v6 = vpop.f32.mrb[137].mxu0 }
 0xa7f   : > { %v4733_v38 = vadd.f32 %v11489_v31, %v4732_v6 }
 0xa81   : > { %v16686_v37 = vpack.c.bf16 %v4738_v48, %v4733_v38  ;;  %v14559_v43 = vpop.f32.mrb[138].mxu0 }
 0xa82   : > { %v4748_v35 = vadd.f32 %v14559_v43, %v11489_v31  ;;  %v4742_v4 = vpop.f32.mrb[139].mxu0 }
 0xa83   : > { %v4743_v39 = vadd.f32 %v11489_v31, %v4742_v4 }
 0xa84   : > { %16679 = vmatpush3.bf16.xpose.msk.msra.mxu0 %vm18895_vm1, %v16674_v22  ;;  %v11504_v22 = vld [vmem:[%s23183_s8 + $0x1f0] sm:$0xff] }
 0xa85   : > { %16682 = vmatprep.subr.msk.bf16.mxu0 %vm18895_vm1, %v16680_v29  ;;  %v16692_v11 = vpack.c.bf16 %v4748_v35, %v4743_v39  ;;  %v14562_v61 = vpop.f32.mrb[140].mxu0  ;;  %v16658_v44 = vpack.c.bf16 %v11505_v49, %v11504_v22 }
 0xa86   : > { %v4758_v53 = vadd.f32 %v14562_v61, %v11489_v31  ;;  %v4752_v14 = vpop.f32.mrb[141].mxu0 }
 0xa87   : > { %v4753_v42 = vadd.f32 %v11489_v31, %v4752_v14 }
 0xa89   : > { %v16698_v15 = vpack.c.bf16 %v4758_v53, %v4753_v42  ;;  %v14565_v33 = vpop.f32.mrb[142].mxu0 }
 0xa8a   : > { %v4768_v60 = vadd.f32 %v14565_v33, %v11489_v31  ;;  %v4762_v7 = vpop.f32.mrb[143].mxu0 }
 0xa8b   : > { %v4763_v1 = vadd.f32 %v11489_v31, %v4762_v7  ;;  %v11500_v31 = vld [vmem:[%s23183_s8 + $0x1d0] sm:$0xff] }
 0xa8c   : > { %16685 = vmatpush3.bf16.xpose.msk.msra.mxu0 %vm18895_vm1, %v16680_v29  ;;  %v16650_v51 = vpack.c.bf16 %v11501_v36, %v11500_v31 }
 0xa8d   : > { %16688 = vmatprep.subr.msk.bf16.mxu0 %vm18895_vm1, %v16686_v37  ;;  %v16704_v17 = vpack.c.bf16 %v4768_v60, %v4763_v1 }
 0xa94   : > { %16691 = vmatpush3.bf16.xpose.msk.msra.mxu0 %vm18895_vm1, %v16686_v37 }
 0xa95   : > { %16694 = vmatprep.subr.msk.bf16.mxu0 %vm18895_vm1, %v16692_v11 }
 0xa9c   : > { %16697 = vmatpush3.bf16.xpose.msk.msra.mxu0 %vm18895_vm1, %v16692_v11 }
 0xa9d   : > { %16700 = vmatprep.subr.msk.bf16.mxu0 %vm18895_vm1, %v16698_v15 }
 0xaa4   : > { %16703 = vmatpush3.bf16.xpose.msk.msra.mxu0 %vm18895_vm1, %v16698_v15 }
 0xaa5   : > { %16706 = vmatprep.subr.msk.bf16.mxu0 %vm18895_vm1, %v16704_v17 }
 0xaac   : > { %16709 = vmatpush3.bf16.xpose.msk.msra.mxu0 %vm18895_vm1, %v16704_v17 }
 0xab3   : > { %14655 = vmatmul.mubr.msk.f32.vlgmr.msra.gmra.mrb[144].mxu0 %vm1057_vm0, %v20622_v2  ;;  %v11490_v2 = vld [vmem:[%s23183_s8 + $0x180] sm:$0xff] }
 0xab4   : > { %14657 = vmatprep.mubr.msk.f32.mxu0 %vm1057_vm0, %v20627_v52  ;;  %v11492_v52 = vld [vmem:[%s23183_s8 + $0x190] sm:$0xff] }
 0xab7   : > { %14658 = vmatmul.mubr.msk.f32.gmra.mrb[146].mxu0 %vm1057_vm0, %v20624_v3  ;;  %v11491_v3 = vld [vmem:[%s23183_s8 + $0x188] sm:$0xff] }
 0xab8   : > { %14660 = vmatprep.mubr.msk.f32.mxu0 %vm1057_vm0, %v20631_v26  ;;  %v11493_v26 = vld [vmem:[%s23183_s8 + $0x198] sm:$0xff] }
 0xabb   : > { %14661 = vmatmul.mubr.msk.f32.gmra.mrb[148].mxu0 %vm1057_vm0, %v20629_v28  ;;  %v16630_v28 = vpack.c.bf16 %v11491_v3, %v11490_v2 }
 0xabc   : > { %14663 = vmatprep.mubr.msk.f32.mxu0 %vm1057_vm0, %v20635_v45  ;;  %v11494_v45 = vld [vmem:[%s23183_s8 + $0x1a0] sm:$0xff] }
 0xabd   : > { %16631 = vmatprep.subr.bf16.mxu1 %v16630_v28 }
 0xabe   : > { %16633 = vmatpush3.bf16.msra.mxu1 %v16630_v28 }
 0xabf   : > { %14664 = vmatmul.mubr.msk.f32.gmra.mrb[150].mxu0 %vm1057_vm0, %v20633_v46  ;;  %v16634_v46 = vpack.c.bf16 %v11493_v26, %v11492_v52 }
 0xac0   : > { %14666 = vmatprep.mubr.msk.f32.mxu0 %vm1057_vm0, %v20639_v50 }
 0xac1   : > { %16635 = vmatprep.subr.bf16.mxu1 %v16634_v46 }
 0xac2   : > { %16637 = vmatpush3.bf16.msra.mxu1 %v16634_v46 }
 0xac3   : > { %14667 = vmatmul.mubr.msk.f32.gmra.mrb[152].mxu0 %vm1057_vm0, %v20637_v34  ;;  %v11495_v34 = vld [vmem:[%s23183_s8 + $0x1a8] sm:$0xff] }
 0xac4   : > { %14669 = vmatprep.mubr.msk.f32.mxu0 %vm1057_vm0, %v20643_v8  ;;  %v16638_v50 = vpack.c.bf16 %v11495_v34, %v11494_v45  ;;  %v11497_v8 = vld [vmem:[%s23183_s8 + $0x1b8] sm:$0xff] }
 0xac6   : > { %16639 = vmatprep.subr.bf16.mxu1 %v16638_v50 }
 0xac7   : > { %14670 = vmatmul.mubr.msk.f32.gmra.mrb[154].mxu0 %vm1057_vm0, %v20641_v62  ;;  %v11496_v62 = vld [vmem:[%s23183_s8 + $0x1b0] sm:$0xff]  ;;  %16641 = vmatpush3.bf16.msra.mxu1 %v16638_v50 }
 0xac8   : > { %14672 = vmatprep.mubr.msk.f32.mxu0 %vm1057_vm0, %v20647_v59  ;;  %v11498_v59 = vld [vmem:[%s23183_s8 + $0x1c0] sm:$0xff] }
 0xacb   : > { %14673 = vmatmul.mubr.msk.f32.gmra.mrb[156].mxu0 %vm1057_vm0, %v20645_v47  ;;  %v16642_v47 = vpack.c.bf16 %v11497_v8, %v11496_v62 }
 0xacc   : > { %14675 = vmatprep.mubr.msk.f32.mxu0 %vm1057_vm0, %v20651_v40 }
 0xacd   : > { %16643 = vmatprep.subr.bf16.mxu1 %v16642_v47 }
 0xace   : > { %16645 = vmatpush3.bf16.msra.mxu1 %v16642_v47 }
 0xacf   : > { %14676 = vmatmul.mubr.msk.f32.gmra.mrb[158].mxu0 %vm1057_vm0, %v20649_v12  ;;  %v11499_v12 = vld [vmem:[%s23183_s8 + $0x1c8] sm:$0xff] }
 0xad0   : > { %v16646_v40 = vpack.c.bf16 %v11499_v12, %v11498_v59 }
 0xad2   : > { %16647 = vmatprep.subr.bf16.mxu1 %v16646_v40 }
 0xad3   : > { %16649 = vmatpush3.bf16.msra.mxu1 %v16646_v40 }
 0xad4   : > { %16651 = vmatprep.subr.bf16.mxu1 %v16650_v51 }
 0xad7   : > { %16653 = vmatpush3.bf16.msra.mxu1 %v16650_v51  ;;  %v20862_v51 = vld [vmem:[%s23184_s9 + $0x3] ss:$0 sm:$0xff] }
 0xad8   : > { %16655 = vmatprep.subr.bf16.mxu1 %v16654_v5 }
 0xadb   : > { %16657 = vmatpush3.bf16.msra.mxu1 %v16654_v5 }
 0xadc   : > { %16659 = vmatprep.subr.bf16.mxu1 %v16658_v44 }
 0xadf   : > { %16661 = vmatpush3.bf16.msra.mxu1 %v16658_v44 }
 0xae2   : > { %14599 = vmatmul.mubr.f32.vlgmr.msra.gmra.mrb[144].mxu1 %v20305_v63 }
 0xae3   : > { %14601 = vmatprep.mubr.f32.mxu1 %v20309_v41 }
 0xae6   : > { %14602 = vmatmul.mubr.f32.gmra.mrb[146].mxu1 %v20313_v25 }
 0xae7   : > { %14604 = vmatprep.mubr.f32.mxu1 %v20317_v27 }
 0xaea   : > { %14605 = vmatmul.mubr.f32.gmra.mrb[148].mxu1 %v20321_v9 }
 0xaeb   : > { %14607 = vmatprep.mubr.f32.mxu1 %v20325_v16 }
 0xaee   : > { %14608 = vmatmul.mubr.f32.gmra.mrb[150].mxu1 %v20329_v57 }
 0xaef   : > { %14610 = vmatprep.mubr.f32.mxu1 %v20333_v18 }
 0xaf2   : > { %14611 = vmatmul.mubr.f32.gmra.mrb[152].mxu1 %v20337_v0 }
 0xaf3   : > { %14613 = vmatprep.mubr.f32.mxu1 %v20341_v21 }
 0xaf6   : > { %14614 = vmatmul.mubr.f32.gmra.mrb[154].mxu1 %v20345_v13 }
 0xaf7   : > { %14616 = vmatprep.mubr.f32.mxu1 %v20349_v20 }
 0xafa   : > { %14617 = vmatmul.mubr.f32.gmra.mrb[156].mxu1 %v20353_v23 }
 0xafb   : > { %14619 = vmatprep.mubr.f32.mxu1 %v20357_v32 }
 0xafe   : > { %14620 = vmatmul.mubr.f32.gmra.mrb[158].mxu1 %v20361_v19 }
 0xb86   : > { %v14656_v63 = vpop.f32.mrb[144].mxu0 }
 0xb87   : > { %v5183_v41 = vmul.f32 0.28867513, %v14656_v63  ;;  %v5103_v25 = vpop.f32.mrb[145].mxu0 }
 0xb88   : > { %v5182_v27 = vmul.f32 0.28867513, %v5103_v25 }
 0xb89   : > { %v20783_v9 = vsel %vm1321_vm3, -1e+09, %v5183_v41 }
 0xb8a   : > { %5216 = vmax.xlane.f32.xlu1 %v20783_v9  ;;  %v14659_v16 = vpop.f32.mrb[146].mxu0  ;;  %v5198_v57 = vsel %vm1321_vm3, -1e+09, %v5182_v27 }
 0xb8b   : > { %v5185_v18 = vmul.f32 0.28867513, %v14659_v16  ;;  %5214 = vmax.xlane.f32.xlu0 %v5198_v57  ;;  %v5113_v0 = vpop.f32.mrb[147].mxu0 }
 0xb8c   : > { %v5184_v21 = vmul.f32 0.28867513, %v5113_v0 }
 0xb8d   : > { %v20790_v13 = vsel %vm1321_vm3, -1e+09, %v5185_v18 }
 0xb8e   : > { %5220 = vmax.xlane.f32.xlu1 %v20790_v13  ;;  %v14662_v20 = vpop.f32.mrb[148].mxu0  ;;  %v20795_v23 = vsel %vm1321_vm3, -1e+09, %v5184_v21 }
 0xb8f   : > { %v5187_v32 = vmul.f32 0.28867513, %v14662_v20  ;;  %5218 = vmax.xlane.f32.xlu0 %v20795_v23  ;;  %v5123_v19 = vpop.f32.mrb[149].mxu0 }
 0xb90   : > { %v5186_v56 = vmul.f32 0.28867513, %v5123_v19 }
 0xb91   : > { %v20800_v55 = vsel %vm1321_vm3, -1e+09, %v5187_v32 }
 0xb92   : > { %5224 = vmax.xlane.f32.xlu1 %v20800_v55  ;;  %v14665_v29 = vpop.f32.mrb[150].mxu0  ;;  %v20805_v30 = vsel %vm1321_vm3, -1e+09, %v5186_v56 }
 0xb93   : > { %v5189_v48 = vmul.f32 0.28867513, %v14665_v29  ;;  %5222 = vmax.xlane.f32.xlu0 %v20805_v30  ;;  %v5133_v6 = vpop.f32.mrb[151].mxu0 }
 0xb94   : > { %v5188_v38 = vmul.f32 0.28867513, %v5133_v6 }
 0xb95   : > { %v20810_v37 = vsel %vm1321_vm3, -1e+09, %v5189_v48 }
 0xb96   : > { %5228 = vmax.xlane.f32.xlu1 %v20810_v37  ;;  %v14668_v43 = vpop.f32.mrb[152].mxu0  ;;  %v20815_v35 = vsel %vm1321_vm3, -1e+09, %v5188_v38 }
 0xb97   : > { %v5191_v4 = vmul.f32 0.28867513, %v14668_v43  ;;  %5226 = vmax.xlane.f32.xlu0 %v20815_v35  ;;  %v5143_v39 = vpop.f32.mrb[153].mxu0 }
 0xb98   : > { %v5190_v11 = vmul.f32 0.28867513, %v5143_v39 }
 0xb99   : > { %v20820_v61 = vsel %vm1321_vm3, -1e+09, %v5191_v4 }
 0xb9a   : > { %5232 = vmax.xlane.f32.xlu1 %v20820_v61  ;;  %v14671_v53 = vpop.f32.mrb[154].mxu0  ;;  %v20825_v14 = vsel %vm1321_vm3, -1e+09, %v5190_v11 }
 0xb9b   : > { %v5193_v42 = vmul.f32 0.28867513, %v14671_v53  ;;  %5230 = vmax.xlane.f32.xlu0 %v20825_v14  ;;  %v5153_v15 = vpop.f32.mrb[155].mxu0 }
 0xb9c   : > { %v5192_v33 = vmul.f32 0.28867513, %v5153_v15 }
 0xb9d   : > { %v20830_v60 = vsel %vm1321_vm3, -1e+09, %v5193_v42 }
 0xb9e   : > { %5236 = vmax.xlane.f32.xlu1 %v20830_v60  ;;  %v14674_v7 = vpop.f32.mrb[156].mxu0  ;;  %v20835_v1 = vsel %vm1321_vm3, -1e+09, %v5192_v33 }
 0xb9f   : > { %v5195_v17 = vmul.f32 0.28867513, %v14674_v7  ;;  %5234 = vmax.xlane.f32.xlu0 %v20835_v1  ;;  %v5163_v2 = vpop.f32.mrb[157].mxu0 }
 0xba0   : > { %v5194_v3 = vmul.f32 0.28867513, %v5163_v2 }
 0xba1   : > { %v20840_v52 = vsel %vm1321_vm3, -1e+09, %v5195_v17 }
 0xba2   : > { %5240 = vmax.xlane.f32.xlu1 %v20840_v52  ;;  %v14677_v28 = vpop.f32.mrb[158].mxu0  ;;  %v20845_v26 = vsel %vm1321_vm3, -1e+09, %v5194_v3 }
 0xba3   : > { %v5197_v46 = vmul.f32 0.28867513, %v14677_v28  ;;  %5238 = vmax.xlane.f32.xlu0 %v20845_v26  ;;  %v5173_v45 = vpop.f32.mrb[159].mxu0 }
 0xba4   : > { %v5196_v34 = vmul.f32 0.28867513, %v5173_v45 }
 0xba5   : > { %v20850_v50 = vsel %vm1321_vm3, -1e+09, %v5197_v46 }
 0xba6   : > { %5244 = vmax.xlane.f32.xlu1 %v20850_v50  ;;  %v20855_v62 = vsel %vm1321_vm3, -1e+09, %v5196_v34 }
 0xba7   : > { %5242 = vmax.xlane.f32.xlu0 %v20855_v62 }
 0xbb5   : > { %v14600_v22 = vpop.f32.mrb[144].mxu1 }
 0xbb6   : > { %v4868_v44 = vadd.f32 %v14600_v22, %v20862_v51  ;;  %v4862_v63 = vpop.f32.mrb[145].mxu1 }
 0xbb7   : > { %v4863_v27 = vadd.f32 %v20862_v51, %v4862_v63 }
 0xbb9   : > { %v16710_v18 = vpack.c.bf16 %v4868_v44, %v4863_v27  ;;  %v14603_v0 = vpop.f32.mrb[146].mxu1 }
 0xbba   : > { %v4872_v20 = vpop.f32.mrb[147].mxu1 }
 0xbbb   : > { %v4873_v19 = vadd.f32 %v20862_v51, %v4872_v20  ;;  %16711 = vmatprep.subr.bf16.mxu1 %v16710_v18 }
 0xbbc   : > { %16713 = vmatpush3.bf16.msra.mxu1 %v16710_v18 }
 0xbbd   : > { %v14606_v48 = vpop.f32.mrb[148].mxu1 }
 0xbbe   : > { %v4888_v43 = vadd.f32 %v14606_v48, %v20862_v51  ;;  %v4882_v4 = vpop.f32.mrb[149].mxu1 }
 0xbc1   : > { %v14609_v7 = vpop.f32.mrb[150].mxu1 }
 0xbc2   : > { %v4898_v3 = vadd.f32 %v14609_v7, %v20862_v51  ;;  %v4892_v28 = vpop.f32.mrb[151].mxu1 }
 0xc17   : > { %v5217_v8 = vpop.xlane.xlu1 %5216 }
 0xc18   : > { %v5247_v47 = vsub.f32 %v20783_v9, %v5217_v8  ;;  %v5215_v59 = vpop.xlane.xlu0 %5214 }
 0xc19   : > { %v5246_v12 = vsub.f32 %v5198_v57, %v5215_v59 }
 0xc1a   : > { %v5264_v40 = vmul.f32 1.442695, %v5247_v47 }
 0xc1b   : > { %v5262_v31 = vmul.f32 1.442695, %v5246_v12  ;;  %v5221_v36 = vpop.xlane.xlu1 %5220  ;;  %v14612_v12 = vpop.f32.mrb[152].mxu1 }
 0xc1c   : > { %17837 = vpow2.f32 %v5264_v40  ;;  %v5249_v10 = vsub.f32 %v20790_v13, %v5221_v36  ;;  %v5219_v24 = vpop.xlane.xlu0 %5218  ;;  %v4878_v13 = vadd.f32 %v14603_v0, %v20862_v51  ;;  %v4908_v36 = vadd.f32 %v14612_v12, %v20862_v51 }
 0xc1d   : > { %17839 = vpow2.f32 %v5262_v31  ;;  %v5248_v5 = vsub.f32 %v20795_v23, %v5219_v24 }
 0xc1e   : > { %v5268_v49 = vmul.f32 1.442695, %v5249_v10  ;;  %v4902_v10 = vpop.f32.mrb[153].mxu1 }
 0xc1f   : > { %v5266_v41 = vmul.f32 1.442695, %v5248_v5  ;;  %v5225_v25 = vpop.xlane.xlu1 %5224 }
 0xc20   : > { %17841 = vpow2.f32 %v5268_v49  ;;  %v5251_v9 = vsub.f32 %v20800_v55, %v5225_v25  ;;  %v5223_v16 = vpop.xlane.xlu0 %5222 }
 0xc21   : > { %17843 = vpow2.f32 %v5266_v41  ;;  %v5250_v57 = vsub.f32 %v20805_v30, %v5223_v16  ;;  %v16714_v30 = vpack.c.bf16 %v4878_v13, %v4873_v19  ;;  %v14615_v41 = vpop.f32.mrb[154].mxu1 }
 0xc22   : > { %v5272_v21 = vmul.f32 1.442695, %v5251_v9  ;;  %v4918_v9 = vadd.f32 %v14615_v41, %v20862_v51  ;;  %v4912_v16 = vpop.f32.mrb[155].mxu1 }
 0xc23   : > { %v5270_v23 = vmul.f32 1.442695, %v5250_v57  ;;  %v5229_v32 = vpop.xlane.xlu1 %5228  ;;  %16715 = vmatprep.subr.bf16.mxu1 %v16714_v30  ;;  %v4913_v0 = vadd.f32 %v20862_v51, %v4912_v16 }
 0xc24   : > { %17845 = vpow2.f32 %v5272_v21  ;;  %v5253_v56 = vsub.f32 %v20810_v37, %v5229_v32  ;;  %v5227_v29 = vpop.xlane.xlu0 %5226  ;;  %v4883_v37 = vadd.f32 %v20862_v51, %v4882_v4  ;;  %16717 = vmatpush3.bf16.msra.mxu1 %v16714_v30 }
 0xc25   : > { %17847 = vpow2.f32 %v5270_v23  ;;  %v5252_v55 = vsub.f32 %v20815_v35, %v5227_v29  ;;  %v16730_v20 = vpack.c.bf16 %v4918_v9, %v4913_v0  ;;  %v14618_v23 = vpop.f32.mrb[156].mxu1  ;;  %v11580_v9 = vld [vmem:[%s23179_s4 + $0x220] sm:$0xff] }
 0xc26   : > { %v20874_v6 = vpop.eup %17837  ;;  %v5276_v38 = vmul.f32 1.442695, %v5253_v56  ;;  %v16718_v33 = vpack.c.bf16 %v4888_v43, %v4883_v37  ;;  %v4928_v56 = vadd.f32 %v14618_v23, %v20862_v51  ;;  %v4922_v29 = vpop.f32.mrb[157].mxu1 }
 0xc27   : > { %v20877_v39 = vpop.eup %17839  ;;  %v5274_v11 = vmul.f32 1.442695, %v5252_v55  ;;  %v5233_v53 = vpop.xlane.xlu1 %5232  ;;  %5296 = vadd.xlane.f32.xlu1 %v20874_v6 }
 0xc28   : > { %17849 = vpow2.f32 %v5276_v38  ;;  %v5255_v35 = vsub.f32 %v20820_v61, %v5233_v53  ;;  %v5231_v42 = vpop.xlane.xlu0 %5230  ;;  %5294 = vadd.xlane.f32.xlu0 %v20877_v39  ;;  %v4893_v61 = vadd.f32 %v20862_v51, %v4892_v28  ;;  %16719 = vmatprep.subr.bf16.mxu1 %v16718_v33  ;;  %v14621_v48 = vpop.f32.mrb[158].mxu1  ;;  %v11557_v28 = vld [vmem:[%s23185_s10 + $0x68] sm:$0xff] }
 0xc29   : > { %17851 = vpow2.f32 %v5274_v11  ;;  %v5254_v15 = vsub.f32 %v20825_v14, %v5231_v42  ;;  %16721 = vmatpush3.bf16.msra.mxu1 %v16718_v33  ;;  %v4938_v43 = vadd.f32 %v14621_v48, %v20862_v51  ;;  %v4932_v4 = vpop.f32.mrb[159].mxu1  ;;  %v11577_v33 = vld [vmem:[%s23179_s4 + $0x208] sm:$0xff] }
 0xc2a   : > { %v20884_v17 = vpop.eup %17841  ;;  %v5280_v2 = vmul.f32 1.442695, %v5255_v35  ;;  %v16722_v59 = vpack.c.bf16 %v4898_v3, %v4893_v61  ;;  %v4933_v53 = vadd.f32 %v20862_v51, %v4932_v4  ;;  %v11556_v3 = vld [vmem:[%s23185_s10 + $0x60] sm:$0xff]  ;;  %v11559_v61 = vld [vmem:[%s23185_s10 + $0x78] sm:$0xff] }
 0xc2b   : > { %v20887_v46 = vpop.eup %17843  ;;  %v5278_v45 = vmul.f32 1.442695, %v5254_v15  ;;  %v5237_v34 = vpop.xlane.xlu1 %5236  ;;  %5300 = vadd.xlane.f32.xlu1 %v20884_v17 }
 0xc2c   : > { %17853 = vpow2.f32 %v5280_v2  ;;  %v5257_v14 = vsub.f32 %v20830_v60, %v5237_v34  ;;  %v5235_v8 = vpop.xlane.xlu0 %5234  ;;  %5298 = vadd.xlane.f32.xlu0 %v20887_v46  ;;  %v4903_v60 = vadd.f32 %v20862_v51, %v4902_v10  ;;  %16723 = vmatprep.subr.bf16.mxu1 %v16722_v59  ;;  %v16738_v37 = vpack.c.bf16 %v4938_v43, %v4933_v53 }
 0xc2d   : > { %17855 = vpow2.f32 %v5278_v45  ;;  %v5256_v47 = vsub.f32 %v20835_v1, %v5235_v8  ;;  %16725 = vmatpush3.bf16.msra.mxu1 %v16722_v59  ;;  %v11558_v45 = vld [vmem:[%s23185_s10 + $0x70] sm:$0xff]  ;;  %v16742_v34 = vpack.c.bf16 %v11557_v28, %v11556_v3 }
 0xc2e   : > { %v20894_v40 = vpop.eup %17845  ;;  %v5284_v31 = vmul.f32 1.442695, %v5257_v14  ;;  %v16726_v63 = vpack.c.bf16 %v4908_v36, %v4903_v60  ;;  %v16746_v14 = vpack.c.bf16 %v11559_v61, %v11558_v45  ;;  %v11588_v61 = vld [vmem:[%s23179_s4 + $0x260] sm:$0xff] }
 0xc2f   : > { %v20897_v24 = vpop.eup %17847  ;;  %v5282_v5 = vmul.f32 1.442695, %v5256_v47  ;;  %v5241_v22 = vpop.xlane.xlu1 %5240  ;;  %5304 = vadd.xlane.f32.xlu1 %v20894_v40  ;;  %16743 = vmatprep.subr.bf16.mxu0 %v16742_v34 }
 0xc30   : > { %17857 = vpow2.f32 %v5284_v31  ;;  %v5259_v1 = vsub.f32 %v20840_v52, %v5241_v22  ;;  %v5239_v49 = vpop.xlane.xlu0 %5238  ;;  %5302 = vadd.xlane.f32.xlu0 %v20897_v24  ;;  %16727 = vmatprep.subr.bf16.mxu1 %v16726_v63  ;;  %v11579_v22 = vld [vmem:[%s23179_s4 + $0x218] sm:$0xff] }
 0xc31   : > { %17859 = vpow2.f32 %v5282_v5  ;;  %v5258_v44 = vsub.f32 %v20845_v26, %v5239_v49  ;;  %16729 = vmatpush3.bf16.msra.mxu1 %v16726_v63  ;;  %16745 = vmatpush3.bf16.msra.mxu0 %v16742_v34  ;;  %v11578_v5 = vld [vmem:[%s23179_s4 + $0x210] sm:$0xff] }
 0xc32   : > { %v20904_v25 = vpop.eup %17849  ;;  %v5288_v27 = vmul.f32 1.442695, %v5259_v1  ;;  %16731 = vmatprep.subr.bf16.mxu1 %v16730_v20  ;;  %16747 = vmatprep.subr.bf16.mxu0 %v16746_v14  ;;  %v16754_v41 = vpack.c.bf16 %v11579_v22, %v11578_v5  ;;  %v11594_v22 = vld [vmem:[%s23181_s6 + $0x200] sm:$0xff] }
 0xc33   : > { %v20907_v57 = vpop.eup %17851  ;;  %v5286_v18 = vmul.f32 1.442695, %v5258_v44  ;;  %5308 = vadd.xlane.f32.xlu1 %v20904_v25  ;;  %v5245_v52 = vpop.xlane.xlu1 %5244 }
 0xc34   : > { %17861 = vpow2.f32 %v5288_v27  ;;  %v5261_v26 = vsub.f32 %v20850_v50, %v5245_v52  ;;  %5306 = vadd.xlane.f32.xlu0 %v20907_v57  ;;  %v5243_v21 = vpop.xlane.xlu0 %5242  ;;  %v4923_v50 = vadd.f32 %v20862_v51, %v4922_v29  ;;  %v11576_v51 = vld [vmem:[%s23179_s4 + $0x200] sm:$0xff] }
 0xc35   : > { %17863 = vpow2.f32 %v5286_v18  ;;  %v5260_v13 = vsub.f32 %v20855_v62, %v5243_v21  ;;  %16733 = vmatpush3.bf16.msra.mxu1 %v16730_v20  ;;  %v16750_v2 = vpack.c.bf16 %v11577_v33, %v11576_v51  ;;  %16749 = vmatpush3.bf16.msra.mxu0 %v16746_v14  ;;  %v11586_v51 = vld [vmem:[%s23179_s4 + $0x250] sm:$0xff] }
 0xc36   : > { %v20914_v32 = vpop.eup %17853  ;;  %v5292_v19 = vmul.f32 1.442695, %v5261_v26  ;;  %v16734_v62 = vpack.c.bf16 %v4928_v56, %v4923_v50  ;;  %v11584_v50 = vld [vmem:[%s23179_s4 + $0x240] sm:$0xff] }
 0xc37   : > { %v20917_v55 = vpop.eup %17855  ;;  %v5290_v30 = vmul.f32 1.442695, %v5260_v13  ;;  %5312 = vadd.xlane.f32.xlu1 %v20914_v32  ;;  %v11582_v13 = vld [vmem:[%s23179_s4 + $0x230] sm:$0xff] }
 0xc38   : > { %17865 = vpow2.f32 %v5292_v19  ;;  %5310 = vadd.xlane.f32.xlu0 %v20917_v55  ;;  %16735 = vmatprep.subr.bf16.mxu1 %v16734_v62 }
 0xc39   : > { %17867 = vpow2.f32 %v5290_v30  ;;  %16737 = vmatpush3.bf16.msra.mxu1 %v16734_v62 }
 0xc3a   : > { %v20922_v38 = vpop.eup %17857  ;;  %16739 = vmatprep.subr.bf16.mxu1 %v16738_v37 }
 0xc3b   : > { %v20925_v11 = vpop.eup %17859  ;;  %5316 = vadd.xlane.f32.xlu1 %v20922_v38 }
 0xc3c   : > { %5314 = vadd.xlane.f32.xlu0 %v20925_v11 }
 0xc3d   : > { %16741 = vmatpush3.bf16.msra.mxu1 %v16738_v37 }
 0xc3e   : > { %v20930_v35 = vpop.eup %17861  ;;  %16751 = vmatprep.subr.bf16.mxu1 %v16750_v2 }
 0xc3f   : > { %v20932_v42 = vpop.eup %17863  ;;  %5320 = vadd.xlane.f32.xlu1 %v20930_v35 }
 0xc40   : > { %5318 = vadd.xlane.f32.xlu0 %v20932_v42 }
 0xc42   : > { %v20936_v15 = vpop.eup %17865 }
 0xc43   : > { %v20944_v7 = vpop.eup %17867  ;;  %5324 = vadd.xlane.f32.xlu1 %v20936_v15 }
 0xc44   : > { %5322 = vadd.xlane.f32.xlu0 %v20944_v7 }
 0xcb4   : > { %v5297_v8 = vpop.xlane.xlu1 %5296 }
 0xcb5   : > { %17869 = vrcp.f32 %v5297_v8  ;;  %v5295_v47 = vpop.xlane.xlu0 %5294 }
 0xcb6   : > { %17871 = vrcp.f32 %v5295_v47 }
 0xcb8   : > { %v5301_v59 = vpop.xlane.xlu1 %5300 }
 0xcb9   : > { %17873 = vrcp.f32 %v5301_v59  ;;  %v5299_v12 = vpop.xlane.xlu0 %5298 }
 0xcba   : > { %17875 = vrcp.f32 %v5299_v12  ;;  %v11590_v12 = vld [vmem:[%s23179_s4 + $0x270] sm:$0xff] }
 0xcbc   : > { %v5305_v31 = vpop.xlane.xlu1 %5304 }
 0xcbd   : > { %17877 = vrcp.f32 %v5305_v31  ;;  %v5303_v36 = vpop.xlane.xlu0 %5302  ;;  %v11591_v31 = vld [vmem:[%s23179_s4 + $0x278] sm:$0xff] }
 0xcbe   : > { %17879 = vrcp.f32 %v5303_v36 }
 0xcbf   : > { %v17870_v10 = vpop.eup %17869 }
 0xcc0   : > { %v17872_v60 = vpop.eup %17871  ;;  %v5309_v1 = vpop.xlane.xlu1 %5308  ;;  %v5329_v49 = vmul.f32 %v17870_v10, %v20874_v6  ;;  %v11581_v6 = vld [vmem:[%s23179_s4 + $0x228] sm:$0xff]  ;;  %v16778_v10 = vpack.c.bf16 %v11591_v31, %v11590_v12  ;;  %v18280_v12 = vld [vmem:[%s18789_s24 + $0x60] sm:$0xff] }
 0xcc1   : > { %17881 = vrcp.f32 %v5309_v1  ;;  %v5307_v44 = vpop.xlane.xlu0 %5306  ;;  %v5327_v63 = vmul.f32 %v17872_v60, %v20877_v39  ;;  %v16758_v26 = vpack.c.bf16 %v11581_v6, %v11580_v9  ;;  %v18253_v9 = vld [vmem:[%s18690_s15 + $0x8] sm:$0xff]  ;;  %v18254_v6 = vld [vmem:[%s18690_s15 + $0x10] sm:$0xff] }
 0xcc2   : > { %17883 = vrcp.f32 %v5307_v44  ;;  %11541 = vst [vmem:[%s19291_s30 + $0x188] sm:$0xff] %v5329_v49  ;;  %v11596_v44 = vld [vmem:[%s23181_s6 + $0x210] sm:$0xff]  ;;  %v18281_v31 = vld [vmem:[%s18789_s24 + $0x68] sm:$0xff] }
 0xcc3   : > { %v17874_v27 = vpop.eup %17873  ;;  %11540 = vst [vmem:[%s19291_s30 + $0x180] sm:$0xff] %v5327_v63  ;;  %14710 = vmatprep.mubr.f32.mxu1 %v5327_v63  ;;  %v11597_v63 = vld [vmem:[%s23181_s6 + $0x218] sm:$0xff] }
 0xcc4   : > { %v17876_v16 = vpop.eup %17875  ;;  %v5313_v18 = vpop.xlane.xlu1 %5312  ;;  %14711 = vmatmul.mubr.f32.vlgmr.msra.gmra.mrb[160].mxu1 %v5329_v49  ;;  %v5333_v39 = vmul.f32 %v17874_v27, %v20884_v17  ;;  %v11583_v17 = vld [vmem:[%s23179_s4 + $0x238] sm:$0xff]  ;;  %v11599_v27 = vld [vmem:[%s23181_s6 + $0x228] sm:$0xff] }
 0xcc5   : > { %17885 = vrcp.f32 %v5313_v18  ;;  %16753 = vmatpush3.bf16.msra.mxu1 %v16750_v2  ;;  %v5311_v52 = vpop.xlane.xlu0 %5310  ;;  %v5331_v0 = vmul.f32 %v17876_v16, %v20887_v46  ;;  %v16762_v29 = vpack.c.bf16 %v11583_v17, %v11582_v13  ;;  %v11600_v18 = vld [vmem:[%s23181_s6 + $0x230] sm:$0xff]  ;;  %v11603_v13 = vld [vmem:[%s23181_s6 + $0x248] sm:$0xff] }
 0xcc6   : > { %17887 = vrcp.f32 %v5311_v52  ;;  %11543 = vst [vmem:[%s19291_s30 + $0x198] sm:$0xff] %v5333_v39  ;;  %16755 = vmatprep.subr.bf16.mxu1 %v16754_v41  ;;  %v18255_v52 = vld [vmem:[%s18690_s15 + $0x18] sm:$0xff]  ;;  %v18257_v17 = vld [vmem:[%s18690_s15 + $0x28] sm:$0xff] }
 0xcc7   : > { %v17878_v21 = vpop.eup %17877  ;;  %11542 = vst [vmem:[%s19291_s30 + $0x190] sm:$0xff] %v5331_v0  ;;  %14713 = vmatprep.mubr.f32.mxu1 %v5331_v0  ;;  %v18256_v0 = vld [vmem:[%s18690_s15 + $0x20] sm:$0xff] }
 0xcc8   : > { %v17880_v20 = vpop.eup %17879  ;;  %v5317_v23 = vpop.xlane.xlu1 %5316  ;;  %14714 = vmatmul.mubr.f32.gmra.mrb[162].mxu1 %v5333_v39  ;;  %v5337_v46 = vmul.f32 %v17878_v21, %v20894_v40  ;;  %v11585_v40 = vld [vmem:[%s23179_s4 + $0x248] sm:$0xff]  ;;  %v11601_v39 = vld [vmem:[%s23181_s6 + $0x238] sm:$0xff]  ;;  %v11602_v21 = vld [vmem:[%s23181_s6 + $0x240] sm:$0xff] }
 0xcc9   : > { %17889 = vrcp.f32 %v5317_v23  ;;  %16757 = vmatpush3.bf16.msra.mxu1 %v16754_v41  ;;  %v5315_v19 = vpop.xlane.xlu0 %5314  ;;  %v5335_v56 = vmul.f32 %v17880_v20, %v20897_v24  ;;  %v16766_v53 = vpack.c.bf16 %v11585_v40, %v11584_v50  ;;  %v11598_v41 = vld [vmem:[%s23181_s6 + $0x220] sm:$0xff]  ;;  %v18258_v20 = vld [vmem:[%s18690_s15 + $0x30] sm:$0xff]  ;;  %v16798_v23 = vpack.c.bf16 %v11603_v13, %v11602_v21  ;;  %v11607_v40 = vld [vmem:[%s23181_s6 + $0x268] sm:$0xff] }
 0xcca   : > { %17891 = vrcp.f32 %v5315_v19  ;;  %11545 = vst [vmem:[%s19291_s30 + $0x1a8] sm:$0xff] %v5337_v46  ;;  %16759 = vmatprep.subr.bf16.mxu1 %v16758_v26  ;;  %v16790_v16 = vpack.c.bf16 %v11599_v27, %v11598_v41  ;;  %v11605_v19 = vld [vmem:[%s23181_s6 + $0x258] sm:$0xff]  ;;  %v11606_v50 = vld [vmem:[%s23181_s6 + $0x260] sm:$0xff] }
 0xccb   : > { %v17882_v30 = vpop.eup %17881  ;;  %11544 = vst [vmem:[%s19291_s30 + $0x1a0] sm:$0xff] %v5335_v56  ;;  %14716 = vmatprep.mubr.f32.mxu1 %v5335_v56  ;;  %v18259_v56 = vld [vmem:[%s18690_s15 + $0x38] sm:$0xff] }
 0xccc   : > { %v17884_v62 = vpop.eup %17883  ;;  %v5321_v48 = vpop.xlane.xlu1 %5320  ;;  %14717 = vmatmul.mubr.f32.gmra.mrb[164].mxu1 %v5337_v46  ;;  %v5341_v24 = vmul.f32 %v17882_v30, %v20904_v25  ;;  %v11587_v25 = vld [vmem:[%s23179_s4 + $0x258] sm:$0xff]  ;;  %v11604_v46 = vld [vmem:[%s23181_s6 + $0x250] sm:$0xff] }
 0xccd   : > { %17893 = vrcp.f32 %v5321_v48  ;;  %16761 = vmatpush3.bf16.msra.mxu1 %v16758_v26  ;;  %v5319_v43 = vpop.xlane.xlu0 %5318  ;;  %v5339_v4 = vmul.f32 %v17884_v62, %v20907_v57  ;;  %v16770_v45 = vpack.c.bf16 %v11587_v25, %v11586_v51  ;;  %v16794_v26 = vpack.c.bf16 %v11601_v39, %v11600_v18  ;;  %v18261_v62 = vld [vmem:[%s18690_s15 + $0x48] sm:$0xff]  ;;  %v18262_v48 = vld [vmem:[%s18690_s15 + $0x50] sm:$0xff]  ;;  %v18284_v39 = vld [vmem:[%s18984_s25] sm:$0xff] }
 0xcce   : > { %17895 = vrcp.f32 %v5319_v43  ;;  %11547 = vst [vmem:[%s19291_s30 + $0x1b8] sm:$0xff] %v5341_v24  ;;  %16763 = vmatprep.subr.bf16.mxu1 %v16762_v29  ;;  %v16802_v30 = vpack.c.bf16 %v11605_v19, %v11604_v46  ;;  %v11608_v43 = vld [vmem:[%s23181_s6 + $0x270] sm:$0xff]  ;;  %v18265_v25 = vld [vmem:[%s18690_s15 + $0x68] sm:$0xff] }
 0xccf   : > { %v17886_v37 = vpop.eup %17885  ;;  %11546 = vst [vmem:[%s19291_s30 + $0x1b0] sm:$0xff] %v5339_v4  ;;  %14719 = vmatprep.mubr.f32.mxu1 %v5339_v4  ;;  %v11609_v4 = vld [vmem:[%s23181_s6 + $0x278] sm:$0xff] }
 0xcd0   : > { %v17888_v33 = vpop.eup %17887  ;;  %v5325_v2 = vpop.xlane.xlu1 %5324  ;;  %14720 = vmatmul.mubr.f32.gmra.mrb[166].mxu1 %v5341_v24  ;;  %v5345_v57 = vmul.f32 %v17886_v37, %v20914_v32  ;;  %v11589_v32 = vld [vmem:[%s23179_s4 + $0x268] sm:$0xff]  ;;  %v16806_v24 = vpack.c.bf16 %v11607_v40, %v11606_v50  ;;  %v18264_v37 = vld [vmem:[%s18690_s15 + $0x60] sm:$0xff]  ;;  %v16810_v51 = vpack.c.bf16 %v11609_v4, %v11608_v43 }
 0xcd1   : > { %17897 = vrcp.f32 %v5325_v2  ;;  %16765 = vmatpush3.bf16.msra.mxu1 %v16762_v29  ;;  %v5323_v3 = vpop.xlane.xlu0 %5322  ;;  %v5343_v28 = vmul.f32 %v17888_v33, %v20917_v55  ;;  %v16774_v47 = vpack.c.bf16 %v11589_v32, %v11588_v61  ;;  %v18260_v29 = vld [vmem:[%s18690_s15 + $0x40] sm:$0xff]  ;;  %v18266_v33 = vld [vmem:[%s18690_s15 + $0x70] sm:$0xff]  ;;  %v18267_v2 = vld [vmem:[%s18690_s15 + $0x78] sm:$0xff] }
 0xcd2   : > { %17899 = vrcp.f32 %v5323_v3  ;;  %11549 = vst [vmem:[%s19291_s30 + $0x1c8] sm:$0xff] %v5345_v57  ;;  %16767 = vmatprep.subr.bf16.mxu1 %v16766_v53  ;;  %v18269_v3 = vld [vmem:[%s18789_s24 + $0x8] sm:$0xff]  ;;  %v18274_v32 = vld [vmem:[%s18789_s24 + $0x30] sm:$0xff] }
 0xcd3   : > { %v17890_v34 = vpop.eup %17889  ;;  %11548 = vst [vmem:[%s19291_s30 + $0x1c0] sm:$0xff] %v5343_v28  ;;  %14722 = vmatprep.mubr.f32.mxu1 %v5343_v28  ;;  %v18270_v28 = vld [vmem:[%s18789_s24 + $0x10] sm:$0xff]  ;;  %v18273_v61 = vld [vmem:[%s18789_s24 + $0x28] sm:$0xff] }
 0xcd4   : > { %v17892_v14 = vpop.eup %17891  ;;  %14723 = vmatmul.mubr.f32.gmra.mrb[168].mxu1 %v5345_v57  ;;  %v5349_v55 = vmul.f32 %v17890_v34, %v20922_v38  ;;  %v18268_v57 = vld [vmem:[%s18789_s24] sm:$0xff] }
 0xcd5   : > { %16769 = vmatpush3.bf16.msra.mxu1 %v16766_v53  ;;  %v5347_v8 = vmul.f32 %v17892_v14, %v20925_v11  ;;  %v18263_v53 = vld [vmem:[%s18690_s15 + $0x58] sm:$0xff]  ;;  %v18272_v34 = vld [vmem:[%s18789_s24 + $0x20] sm:$0xff] }
 0xcd6   : > { %11551 = vst [vmem:[%s19291_s30 + $0x1d8] sm:$0xff] %v5349_v55  ;;  %16771 = vmatprep.subr.bf16.mxu1 %v16770_v45  ;;  %v18275_v14 = vld [vmem:[%s18789_s24 + $0x38] sm:$0xff] }
 0xcd7   : > { %v17894_v59 = vpop.eup %17893  ;;  %11550 = vst [vmem:[%s19291_s30 + $0x1d0] sm:$0xff] %v5347_v8  ;;  %14725 = vmatprep.mubr.f32.mxu1 %v5347_v8  ;;  %v18277_v8 = vld [vmem:[%s18789_s24 + $0x48] sm:$0xff] }
 0xcd8   : > { %v17896_v38 = vpop.eup %17895  ;;  %14726 = vmatmul.mubr.f32.gmra.mrb[170].mxu1 %v5349_v55  ;;  %v5353_v36 = vmul.f32 %v17894_v59, %v20930_v35  ;;  %v11595_v35 = vld [vmem:[%s23181_s6 + $0x208] sm:$0xff]  ;;  %v18276_v55 = vld [vmem:[%s18789_s24 + $0x40] sm:$0xff]  ;;  %v18279_v59 = vld [vmem:[%s18789_s24 + $0x58] sm:$0xff] }
 0xcd9   : > { %16773 = vmatpush3.bf16.msra.mxu1 %v16770_v45  ;;  %v5351_v11 = vmul.f32 %v17896_v38, %v20932_v42  ;;  %v16782_v49 = vpack.c.bf16 %v11595_v35, %v11594_v22  ;;  %v18271_v45 = vld [vmem:[%s18789_s24 + $0x18] sm:$0xff]  ;;  %v18282_v38 = vld [vmem:[%s18789_s24 + $0x70] sm:$0xff] }
 0xcda   : > { %11553 = vst [vmem:[%s19291_s30 + $0x1e8] sm:$0xff] %v5353_v36  ;;  %16775 = vmatprep.subr.bf16.mxu1 %v16774_v47 }
 0xcdb   : > { %v17898_v5 = vpop.eup %17897  ;;  %11552 = vst [vmem:[%s19291_s30 + $0x1e0] sm:$0xff] %v5351_v11  ;;  %14728 = vmatprep.mubr.f32.mxu1 %v5351_v11 }
 0xcdc   : > { %v17900_v60 = vpop.eup %17899  ;;  %14729 = vmatmul.mubr.f32.gmra.mrb[172].mxu1 %v5353_v36  ;;  %v5357_v42 = vmul.f32 %v17898_v5, %v20936_v15  ;;  %v21047_v15 = vld [vmem:[%s18690_s15] sm:$0xff]  ;;  %v18283_v36 = vld [vmem:[%s18789_s24 + $0x78] sm:$0xff] }
 0xcdd   : > { %16777 = vmatpush3.bf16.msra.mxu1 %v16774_v47  ;;  %v5355_v1 = vmul.f32 %v17900_v60, %v20944_v7  ;;  %v16786_v7 = vpack.c.bf16 %v11597_v63, %v11596_v44  ;;  %v18278_v47 = vld [vmem:[%s18789_s24 + $0x50] sm:$0xff] }
 0xcde   : > { %11555 = vst [vmem:[%s19291_s30 + $0x1f8] sm:$0xff] %v5357_v42  ;;  %16779 = vmatprep.subr.bf16.mxu1 %v16778_v10 }
 0xcdf   : > { %11554 = vst [vmem:[%s19291_s30 + $0x1f0] sm:$0xff] %v5355_v1  ;;  %14731 = vmatprep.mubr.f32.mxu1 %v5355_v1 }
 0xce0   : > { %14732 = vmatmul.mubr.f32.gmra.mrb[174].mxu1 %v5357_v42 }
 0xce1   : > { %16781 = vmatpush3.bf16.msra.mxu1 %v16778_v10  ;;  %14798 = vmatprep.mubr.f32.mxu1 %v21047_v15 }
 0xce2   : > { %16783 = vmatprep.subr.bf16.mxu1 %v16782_v49 }
 0xce4   : > { %14799 = vmatmul.mubr.f32.vlgmr.msra.gmra.mrb[176].mxu1 %v18253_v9 }
 0xce5   : > { %16785 = vmatpush3.bf16.msra.mxu1 %v16782_v49  ;;  %14801 = vmatprep.mubr.f32.mxu1 %v18254_v6 }
 0xce6   : > { %16787 = vmatprep.subr.bf16.mxu1 %v16786_v7 }
 0xce8   : > { %14802 = vmatmul.mubr.f32.gmra.mrb[178].mxu1 %v18255_v52 }
 0xce9   : > { %16789 = vmatpush3.bf16.msra.mxu1 %v16786_v7  ;;  %14804 = vmatprep.mubr.f32.mxu1 %v18256_v0 }
 0xcea   : > { %16791 = vmatprep.subr.bf16.mxu1 %v16790_v16 }
 0xcec   : > { %14805 = vmatmul.mubr.f32.gmra.mrb[180].mxu1 %v18257_v17 }
 0xced   : > { %16793 = vmatpush3.bf16.msra.mxu1 %v16790_v16  ;;  %14807 = vmatprep.mubr.f32.mxu1 %v18258_v20  ;;  %v11593_v16 = vld [vmem:[%s23180_s5 + $0x4] ss:$0 sm:$0xff] }
 0xcee   : > { %16795 = vmatprep.subr.bf16.mxu1 %v16794_v26 }
 0xcf0   : > { %14808 = vmatmul.mubr.f32.gmra.mrb[182].mxu1 %v18259_v56 }
 0xcf1   : > { %16797 = vmatpush3.bf16.msra.mxu1 %v16794_v26  ;;  %14810 = vmatprep.mubr.f32.mxu1 %v18260_v29 }
 0xcf2   : > { %16799 = vmatprep.subr.bf16.mxu1 %v16798_v23 }
 0xcf4   : > { %14811 = vmatmul.mubr.f32.gmra.mrb[184].mxu1 %v18261_v62 }
 0xcf5   : > { %16801 = vmatpush3.bf16.msra.mxu1 %v16798_v23  ;;  %14813 = vmatprep.mubr.f32.mxu1 %v18262_v48 }
 0xcf6   : > { %16803 = vmatprep.subr.bf16.mxu1 %v16802_v30 }
 0xcf8   : > { %14814 = vmatmul.mubr.f32.gmra.mrb[186].mxu1 %v18263_v53 }
 0xcf9   : > { %16805 = vmatpush3.bf16.msra.mxu1 %v16802_v30  ;;  %14816 = vmatprep.mubr.f32.mxu1 %v18264_v37 }
 0xcfa   : > { %16807 = vmatprep.subr.bf16.mxu1 %v16806_v24 }
 0xcfc   : > { %14817 = vmatmul.mubr.f32.gmra.mrb[188].mxu1 %v18265_v25 }
 0xcfd   : > { %16809 = vmatpush3.bf16.msra.mxu1 %v16806_v24  ;;  %14819 = vmatprep.mubr.f32.mxu1 %v18266_v33 }
 0xcfe   : > { %16811 = vmatprep.subr.bf16.mxu1 %v16810_v51 }
 0xd00   : > { %14820 = vmatmul.mubr.f32.gmra.mrb[190].mxu1 %v18267_v2 }
 0xd01   : > { %16813 = vmatpush3.bf16.msra.mxu1 %v16810_v51  ;;  %14854 = vmatprep.mubr.f32.mxu1 %v18268_v57 }
 0xd04   : > { %14855 = vmatmul.mubr.f32.vlgmr.msra.gmra.mrb[192].mxu1 %v18269_v3 }
 0xd05   : > { %14857 = vmatprep.mubr.f32.mxu1 %v18270_v28 }
 0xd08   : > { %14858 = vmatmul.mubr.f32.gmra.mrb[194].mxu1 %v18271_v45 }
 0xd09   : > { %14860 = vmatprep.mubr.f32.mxu1 %v18272_v34 }
 0xd0c   : > { %14861 = vmatmul.mubr.f32.gmra.mrb[196].mxu1 %v18273_v61  ;;  %v11611_v61 = vld [vmem:[%s23182_s7 + $0x4] ss:$0 sm:$0xff] }
 0xd0d   : > { %14863 = vmatprep.mubr.f32.mxu1 %v18274_v32 }
 0xd10   : > { %14864 = vmatmul.mubr.f32.gmra.mrb[198].mxu1 %v18275_v14 }
 0xd11   : > { %14866 = vmatprep.mubr.f32.mxu1 %v18276_v55 }
 0xd14   : > { %14867 = vmatmul.mubr.f32.gmra.mrb[200].mxu1 %v18277_v8 }
 0xd15   : > { %14869 = vmatprep.mubr.f32.mxu1 %v18278_v47 }
 0xd18   : > { %14870 = vmatmul.mubr.f32.gmra.mrb[202].mxu1 %v18279_v59 }
 0xd19   : > { %14872 = vmatprep.mubr.f32.mxu1 %v18280_v12 }
 0xd1c   : > { %14873 = vmatmul.mubr.f32.gmra.mrb[204].mxu1 %v18281_v31 }
 0xd1d   : > { %14875 = vmatprep.mubr.f32.mxu1 %v18282_v38 }
 0xd20   : > { %14876 = vmatmul.mubr.f32.gmra.mrb[206].mxu1 %v18283_v36 }
 0xd97   : > { %v14712_v11 = vpop.f32.mrb[160].mxu1 }
 0xd98   : > { %v5441_v10 = vpop.f32.mrb[161].mxu1 }
 0xd99   : > { %14742 = vmatprep.mubr.msk.f32.mxu0 %vm2741_vm4, %v5441_v10 }
 0xd9a   : > { %14743 = vmatmul.mubr.msk.f32.vlgmr.msra.gmra.mrb[80].mxu0 %vm2741_vm4, %v14712_v11 }
 0xd9b   : > { %v14715_v5 = vpop.f32.mrb[162].mxu1 }
 0xd9c   : > { %v5451_v22 = vpop.f32.mrb[163].mxu1 }
 0xd9d   : > { %14745 = vmatprep.mubr.msk.f32.mxu0 %vm2741_vm4, %v5451_v22 }
 0xd9e   : > { %14746 = vmatmul.mubr.msk.f32.gmra.mrb[82].mxu0 %vm2741_vm4, %v14715_v5 }
 0xd9f   : > { %v14718_v35 = vpop.f32.mrb[164].mxu1 }
 0xda0   : > { %v5461_v60 = vpop.f32.mrb[165].mxu1 }
 0xda1   : > { %14748 = vmatprep.mubr.msk.f32.mxu0 %vm2741_vm4, %v5461_v60 }
 0xda2   : > { %14749 = vmatmul.mubr.msk.f32.gmra.mrb[84].mxu0 %vm2741_vm4, %v14718_v35 }
 0xda3   : > { %v14721_v42 = vpop.f32.mrb[166].mxu1 }
 0xda4   : > { %v5471_v1 = vpop.f32.mrb[167].mxu1 }
 0xda5   : > { %14751 = vmatprep.mubr.msk.f32.mxu0 %vm2741_vm4, %v5471_v1 }
 0xda6   : > { %14752 = vmatmul.mubr.msk.f32.gmra.mrb[86].mxu0 %vm2741_vm4, %v14721_v42 }
 0xda7   : > { %v14724_v49 = vpop.f32.mrb[168].mxu1 }
 0xda8   : > { %v5481_v44 = vpop.f32.mrb[169].mxu1 }
 0xda9   : > { %14754 = vmatprep.mubr.msk.f32.mxu0 %vm2741_vm4, %v5481_v44 }
 0xdaa   : > { %14755 = vmatmul.mubr.msk.f32.gmra.mrb[88].mxu0 %vm2741_vm4, %v14724_v49 }
 0xdab   : > { %v14727_v63 = vpop.f32.mrb[170].mxu1 }
 0xdac   : > { %v5491_v7 = vpop.f32.mrb[171].mxu1 }
 0xdad   : > { %14757 = vmatprep.mubr.msk.f32.mxu0 %vm2741_vm4, %v5491_v7 }
 0xdae   : > { %14758 = vmatmul.mubr.msk.f32.gmra.mrb[90].mxu0 %vm2741_vm4, %v14727_v63 }
 0xdaf   : > { %v14730_v41 = vpop.f32.mrb[172].mxu1 }
 0xdb0   : > { %v5501_v27 = vpop.f32.mrb[173].mxu1 }
 0xdb1   : > { %14760 = vmatprep.mubr.msk.f32.mxu0 %vm2741_vm4, %v5501_v27 }
 0xdb2   : > { %14761 = vmatmul.mubr.msk.f32.gmra.mrb[92].mxu0 %vm2741_vm4, %v14730_v41 }
 0xdb3   : > { %v14733_v9 = vpop.f32.mrb[174].mxu1 }
 0xdb4   : > { %v5511_v6 = vpop.f32.mrb[175].mxu1 }
 0xdb5   : > { %14763 = vmatprep.mubr.msk.f32.mxu0 %vm2741_vm4, %v5511_v6 }
 0xdb6   : > { %14764 = vmatmul.mubr.msk.f32.gmra.mrb[94].mxu0 %vm2741_vm4, %v14733_v9 }
 0xdb7   : > { %v14800_v18 = vpop.f32.mrb[176].mxu1  ;;  %14910 = vmatprep.mubr.f32.mxu0 %v18284_v39 }
 0xdb8   : > { %v21137_v52 = vadd.f32 %v14800_v18, %v11593_v16  ;;  %v5825_v0 = vpop.f32.mrb[177].mxu1 }
 0xdb9   : > { %v5826_v26 = vadd.f32 %v11593_v16, %v5825_v0 }
 0xdbb   : > { %v14803_v21 = vpop.f32.mrb[178].mxu1  ;;  %14966 = vmatprep.mubr.msk.f32.mxu1 %vm1057_vm0, %v5826_v26 }
 0xdbc   : > { %v21140_v13 = vadd.f32 %v14803_v21, %v11593_v16  ;;  %v5835_v17 = vpop.f32.mrb[179].mxu1 }
 0xdbd   : > { %v21142_v20 = vadd.f32 %v11593_v16, %v5835_v17 }
 0xdbf   : > { %v14806_v23 = vpop.f32.mrb[180].mxu1 }
 0xdc0   : > { %v21144_v46 = vadd.f32 %v14806_v23, %v11593_v16  ;;  %v5845_v19 = vpop.f32.mrb[181].mxu1 }
 0xdc1   : > { %v21146_v56 = vadd.f32 %v11593_v16, %v5845_v19 }
 0xdc3   : > { %v14809_v29 = vpop.f32.mrb[182].mxu1 }
 0xdc4   : > { %v21148_v30 = vadd.f32 %v14809_v29, %v11593_v16  ;;  %v5855_v50 = vpop.f32.mrb[183].mxu1 }
 0xdc5   : > { %v21150_v40 = vadd.f32 %v11593_v16, %v5855_v50 }
 0xdc7   : > { %v14812_v62 = vpop.f32.mrb[184].mxu1 }
 0xdc8   : > { %v21152_v48 = vadd.f32 %v14812_v62, %v11593_v16  ;;  %v5865_v24 = vpop.f32.mrb[185].mxu1 }
 0xdc9   : > { %v21154_v43 = vadd.f32 %v11593_v16, %v5865_v24 }
 0xdcb   : > { %v14815_v4 = vpop.f32.mrb[186].mxu1 }
 0xdcc   : > { %v21156_v53 = vadd.f32 %v14815_v4, %v11593_v16  ;;  %v5875_v37 = vpop.f32.mrb[187].mxu1 }
 0xdcd   : > { %v21158_v51 = vadd.f32 %v11593_v16, %v5875_v37 }
 0xdcf   : > { %v14818_v25 = vpop.f32.mrb[188].mxu1 }
 0xdd0   : > { %v21160_v33 = vadd.f32 %v14818_v25, %v11593_v16  ;;  %v5885_v2 = vpop.f32.mrb[189].mxu1  ;;  %v11621_v25 = vld [vmem:[%s23183_s8 + $0x248] sm:$0xff] }
 0xdd1   : > { %v21162_v57 = vadd.f32 %v11593_v16, %v5885_v2  ;;  %v11622_v2 = vld [vmem:[%s23183_s8 + $0x250] sm:$0xff] }
 0xdd3   : > { %v14821_v3 = vpop.f32.mrb[190].mxu1 }
 0xdd4   : > { %v21164_v28 = vadd.f32 %v14821_v3, %v11593_v16  ;;  %v5895_v45 = vpop.f32.mrb[191].mxu1 }
 0xdd5   : > { %v21166_v34 = vadd.f32 %v11593_v16, %v5895_v45  ;;  %v11625_v45 = vld [vmem:[%s23183_s8 + $0x268] sm:$0xff] }
 0xdd7   : > { %v14856_v32 = vpop.f32.mrb[192].mxu1 }
 0xdd8   : > { %v6001_v14 = vadd.f32 %v14856_v32, %v11611_v61  ;;  %v5995_v55 = vpop.f32.mrb[193].mxu1  ;;  %v11627_v32 = vld [vmem:[%s23183_s8 + $0x278] sm:$0xff] }
 0xdd9   : > { %v5996_v8 = vadd.f32 %v11611_v61, %v5995_v55  ;;  %v18285_v55 = vld [vmem:[%s18984_s25 + $0x8] sm:$0xff] }
 0xddb   : > { %v16846_v47 = vpack.c.bf16 %v6001_v14, %v5996_v8  ;;  %v14859_v59 = vpop.f32.mrb[194].mxu1  ;;  %v18286_v8 = vld [vmem:[%s18984_s25 + $0x10] sm:$0xff] }
 0xddc   : > { %v6011_v12 = vadd.f32 %v14859_v59, %v11611_v61  ;;  %v6005_v31 = vpop.f32.mrb[195].mxu1  ;;  %v18288_v59 = vld [vmem:[%s18984_s25 + $0x20] sm:$0xff] }
 0xddd   : > { %16848 = vmatprep.subr.msk.bf16.mxu1 %vm18895_vm1, %v16846_v47  ;;  %v6006_v38 = vadd.f32 %v11611_v61, %v6005_v31  ;;  %v18290_v31 = vld [vmem:[%s18984_s25 + $0x30] sm:$0xff] }
 0xdde   : > { %16851 = vmatpush3.bf16.xpose.msk.msra.mxu1 %vm18895_vm1, %v16846_v47  ;;  %v18287_v47 = vld [vmem:[%s18984_s25 + $0x18] sm:$0xff] }
 0xddf   : > { %v16852_v36 = vpack.c.bf16 %v6011_v12, %v6006_v38  ;;  %v14862_v11 = vpop.f32.mrb[196].mxu1  ;;  %v18289_v12 = vld [vmem:[%s18984_s25 + $0x28] sm:$0xff]  ;;  %v18291_v38 = vld [vmem:[%s18984_s25 + $0x38] sm:$0xff] }
 0xde0   : > { %v6021_v10 = vadd.f32 %v14862_v11, %v11611_v61  ;;  %v6015_v5 = vpop.f32.mrb[197].mxu1  ;;  %v18293_v11 = vld [vmem:[%s18984_s25 + $0x48] sm:$0xff] }
 0xde1   : > { %16854 = vmatprep.subr.msk.bf16.mxu1 %vm18895_vm1, %v16852_v36  ;;  %v6016_v22 = vadd.f32 %v11611_v61, %v6015_v5  ;;  %v18295_v5 = vld [vmem:[%s18984_s25 + $0x58] sm:$0xff] }
 0xde3   : > { %v16858_v35 = vpack.c.bf16 %v6021_v10, %v6016_v22  ;;  %v14865_v60 = vpop.f32.mrb[198].mxu1  ;;  %v18294_v10 = vld [vmem:[%s18984_s25 + $0x50] sm:$0xff]  ;;  %v18296_v22 = vld [vmem:[%s18984_s25 + $0x60] sm:$0xff] }
 0xde4   : > { %v6031_v42 = vadd.f32 %v14865_v60, %v11611_v61  ;;  %v6025_v1 = vpop.f32.mrb[199].mxu1  ;;  %v18298_v60 = vld [vmem:[%s18984_s25 + $0x70] sm:$0xff] }
 0xde5   : > { %v6026_v49 = vadd.f32 %v11611_v61, %v6025_v1 }
 0xde6   : > { %16857 = vmatpush3.bf16.xpose.msk.msra.mxu1 %vm18895_vm1, %v16852_v36  ;;  %v18292_v36 = vld [vmem:[%s18984_s25 + $0x40] sm:$0xff] }
 0xde7   : > { %16860 = vmatprep.subr.msk.bf16.mxu1 %vm18895_vm1, %v16858_v35  ;;  %v16864_v44 = vpack.c.bf16 %v6031_v42, %v6026_v49  ;;  %v14868_v63 = vpop.f32.mrb[200].mxu1  ;;  %v18299_v42 = vld [vmem:[%s18984_s25 + $0x78] sm:$0xff] }
 0xde8   : > { %v6041_v7 = vadd.f32 %v14868_v63, %v11611_v61  ;;  %v6035_v41 = vpop.f32.mrb[201].mxu1 }
 0xde9   : > { %v6036_v27 = vadd.f32 %v11611_v61, %v6035_v41 }
 0xdeb   : > { %v16870_v9 = vpack.c.bf16 %v6041_v7, %v6036_v27  ;;  %v14871_v6 = vpop.f32.mrb[202].mxu1 }
 0xdec   : > { %v6051_v16 = vadd.f32 %v14871_v6, %v11611_v61  ;;  %v6045_v18 = vpop.f32.mrb[203].mxu1 }
 0xded   : > { %v6046_v39 = vadd.f32 %v11611_v61, %v6045_v18 }
 0xdee   : > { %16863 = vmatpush3.bf16.xpose.msk.msra.mxu1 %vm18895_vm1, %v16858_v35  ;;  %v18297_v35 = vld [vmem:[%s18984_s25 + $0x68] sm:$0xff] }
 0xdef   : > { %16866 = vmatprep.subr.msk.bf16.mxu1 %vm18895_vm1, %v16864_v44  ;;  %v16876_v0 = vpack.c.bf16 %v6051_v16, %v6046_v39  ;;  %v14874_v26 = vpop.f32.mrb[204].mxu1 }
 0xdf0   : > { %v6061_v21 = vadd.f32 %v14874_v26, %v11611_v61  ;;  %v6055_v17 = vpop.f32.mrb[205].mxu1 }
 0xdf1   : > { %v6056_v23 = vadd.f32 %v11611_v61, %v6055_v17 }
 0xdf3   : > { %v16882_v19 = vpack.c.bf16 %v6061_v21, %v6056_v23  ;;  %v14877_v29 = vpop.f32.mrb[206].mxu1 }
 0xdf4   : > { %v6071_v50 = vadd.f32 %v14877_v29, %v11611_v61  ;;  %v6065_v62 = vpop.f32.mrb[207].mxu1 }
 0xdf5   : > { %v6066_v24 = vadd.f32 %v11611_v61, %v6065_v62  ;;  %v11626_v61 = vld [vmem:[%s23183_s8 + $0x270] sm:$0xff] }
 0xdf6   : > { %16869 = vmatpush3.bf16.xpose.msk.msra.mxu1 %vm18895_vm1, %v16864_v44  ;;  %v16842_v14 = vpack.c.bf16 %v11627_v32, %v11626_v61 }
 0xdf7   : > { %16872 = vmatprep.subr.msk.bf16.mxu1 %vm18895_vm1, %v16870_v9  ;;  %v16888_v4 = vpack.c.bf16 %v6071_v50, %v6066_v24 }
 0xdfe   : > { %16875 = vmatpush3.bf16.xpose.msk.msra.mxu1 %vm18895_vm1, %v16870_v9 }
 0xdff   : > { %16878 = vmatprep.subr.msk.bf16.mxu1 %vm18895_vm1, %v16876_v0 }
 0xe06   : > { %16881 = vmatpush3.bf16.xpose.msk.msra.mxu1 %vm18895_vm1, %v16876_v0 }
 0xe07   : > { %16884 = vmatprep.subr.msk.bf16.mxu1 %vm18895_vm1, %v16882_v19 }
 0xe0e   : > { %16887 = vmatpush3.bf16.xpose.msk.msra.mxu1 %vm18895_vm1, %v16882_v19 }
 0xe0f   : > { %16890 = vmatprep.subr.msk.bf16.mxu1 %vm18895_vm1, %v16888_v4 }
 0xe16   : > { %16893 = vmatpush3.bf16.xpose.msk.msra.mxu1 %vm18895_vm1, %v16888_v4 }
 0xe1d   : > { %14967 = vmatmul.mubr.msk.f32.vlgmr.msra.gmra.mrb[208].mxu1 %vm1057_vm0, %v21137_v52  ;;  %v11612_v52 = vld [vmem:[%s23183_s8 + $0x200] sm:$0xff] }
 0xe1e   : > { %14969 = vmatprep.mubr.msk.f32.mxu1 %vm1057_vm0, %v21142_v20  ;;  %v11614_v20 = vld [vmem:[%s23183_s8 + $0x210] sm:$0xff] }
 0xe21   : > { %14970 = vmatmul.mubr.msk.f32.gmra.mrb[210].mxu1 %vm1057_vm0, %v21140_v13  ;;  %v11613_v13 = vld [vmem:[%s23183_s8 + $0x208] sm:$0xff] }
 0xe22   : > { %14972 = vmatprep.mubr.msk.f32.mxu1 %vm1057_vm0, %v21146_v56  ;;  %v11615_v56 = vld [vmem:[%s23183_s8 + $0x218] sm:$0xff] }
 0xe25   : > { %14973 = vmatmul.mubr.msk.f32.gmra.mrb[212].mxu1 %vm1057_vm0, %v21144_v46  ;;  %v16814_v46 = vpack.c.bf16 %v11613_v13, %v11612_v52 }
 0xe26   : > { %14975 = vmatprep.mubr.msk.f32.mxu1 %vm1057_vm0, %v21150_v40  ;;  %v11617_v40 = vld [vmem:[%s23183_s8 + $0x228] sm:$0xff] }
 0xe27   : > { %16815 = vmatprep.subr.bf16.mxu0 %v16814_v46 }
 0xe28   : > { %16817 = vmatpush3.bf16.msra.mxu0 %v16814_v46 }
 0xe29   : > { %14976 = vmatmul.mubr.msk.f32.gmra.mrb[214].mxu1 %vm1057_vm0, %v21148_v30  ;;  %v16818_v30 = vpack.c.bf16 %v11615_v56, %v11614_v20 }
 0xe2a   : > { %14978 = vmatprep.mubr.msk.f32.mxu1 %vm1057_vm0, %v21154_v43  ;;  %v11618_v43 = vld [vmem:[%s23183_s8 + $0x230] sm:$0xff] }
 0xe2b   : > { %16819 = vmatprep.subr.bf16.mxu0 %v16818_v30 }
 0xe2c   : > { %16821 = vmatpush3.bf16.msra.mxu0 %v16818_v30 }
 0xe2d   : > { %14979 = vmatmul.mubr.msk.f32.gmra.mrb[216].mxu1 %vm1057_vm0, %v21152_v48 }
 0xe2e   : > { %14981 = vmatprep.mubr.msk.f32.mxu1 %vm1057_vm0, %v21158_v51  ;;  %v11620_v51 = vld [vmem:[%s23183_s8 + $0x240] sm:$0xff] }
 0xe31   : > { %14982 = vmatmul.mubr.msk.f32.gmra.mrb[218].mxu1 %vm1057_vm0, %v21156_v53  ;;  %v11619_v53 = vld [vmem:[%s23183_s8 + $0x238] sm:$0xff] }
 0xe32   : > { %14984 = vmatprep.mubr.msk.f32.mxu1 %vm1057_vm0, %v21162_v57  ;;  %v16826_v37 = vpack.c.bf16 %v11619_v53, %v11618_v43  ;;  %v11623_v57 = vld [vmem:[%s23183_s8 + $0x258] sm:$0xff] }
 0xe33   : > { %v16834_v3 = vpack.c.bf16 %v11623_v57, %v11622_v2 }
 0xe35   : > { %14985 = vmatmul.mubr.msk.f32.gmra.mrb[220].mxu1 %vm1057_vm0, %v21160_v33  ;;  %v16830_v33 = vpack.c.bf16 %v11621_v25, %v11620_v51 }
 0xe36   : > { %14987 = vmatprep.mubr.msk.f32.mxu1 %vm1057_vm0, %v21166_v34 }
 0xe39   : > { %14988 = vmatmul.mubr.msk.f32.gmra.mrb[222].mxu1 %vm1057_vm0, %v21164_v28  ;;  %v11624_v28 = vld [vmem:[%s23183_s8 + $0x260] sm:$0xff] }
 0xe3a   : > { %15110 = vmatprep.mubr.f32.mxu1 %v21047_v15  ;;  %v11616_v15 = vld [vmem:[%s23183_s8 + $0x220] sm:$0xff]  ;;  %v16838_v34 = vpack.c.bf16 %v11625_v45, %v11624_v28 }
 0xe3b   : > { %v16822_v48 = vpack.c.bf16 %v11617_v40, %v11616_v15 }
 0xe3d   : > { %16823 = vmatprep.subr.bf16.mxu0 %v16822_v48 }
 0xe3e   : > { %16825 = vmatpush3.bf16.msra.mxu0 %v16822_v48 }
 0xe3f   : > { %16827 = vmatprep.subr.bf16.mxu0 %v16826_v37 }
 0xe42   : > { %16829 = vmatpush3.bf16.msra.mxu0 %v16826_v37 }
 0xe43   : > { %16831 = vmatprep.subr.bf16.mxu0 %v16830_v33 }
 0xe46   : > { %16833 = vmatpush3.bf16.msra.mxu0 %v16830_v33 }
 0xe47   : > { %16835 = vmatprep.subr.bf16.mxu0 %v16834_v3 }
 0xe4a   : > { %16837 = vmatpush3.bf16.msra.mxu0 %v16834_v3 }
 0xe4b   : > { %16839 = vmatprep.subr.bf16.mxu0 %v16838_v34 }
 0xe4e   : > { %16841 = vmatpush3.bf16.msra.mxu0 %v16838_v34 }
 0xe4f   : > { %16843 = vmatprep.subr.bf16.mxu0 %v16842_v14 }
 0xe52   : > { %16845 = vmatpush3.bf16.msra.mxu0 %v16842_v14 }
 0xe55   : > { %14911 = vmatmul.mubr.f32.vlgmr.msra.gmra.mrb[160].mxu0 %v18285_v55 }
 0xe56   : > { %14913 = vmatprep.mubr.f32.mxu0 %v18286_v8 }
 0xe59   : > { %14914 = vmatmul.mubr.f32.gmra.mrb[162].mxu0 %v18287_v47 }
 0xe5a   : > { %14916 = vmatprep.mubr.f32.mxu0 %v18288_v59 }
 0xe5d   : > { %14917 = vmatmul.mubr.f32.gmra.mrb[164].mxu0 %v18289_v12 }
 0xe5e   : > { %14919 = vmatprep.mubr.f32.mxu0 %v18290_v31 }
 0xe61   : > { %14920 = vmatmul.mubr.f32.gmra.mrb[166].mxu0 %v18291_v38 }
 0xe62   : > { %14922 = vmatprep.mubr.f32.mxu0 %v18292_v36 }
 0xe65   : > { %14923 = vmatmul.mubr.f32.gmra.mrb[168].mxu0 %v18293_v11  ;;  %v21378_v11 = vld [vmem:[%s23184_s9 + $0x4] ss:$0 sm:$0xff] }
 0xe66   : > { %14925 = vmatprep.mubr.f32.mxu0 %v18294_v10 }
 0xe69   : > { %14926 = vmatmul.mubr.f32.gmra.mrb[170].mxu0 %v18295_v5 }
 0xe6a   : > { %14928 = vmatprep.mubr.f32.mxu0 %v18296_v22 }
 0xe6d   : > { %14929 = vmatmul.mubr.f32.gmra.mrb[172].mxu0 %v18297_v35 }
 0xe6e   : > { %14931 = vmatprep.mubr.f32.mxu0 %v18298_v60 }
 0xe71   : > { %14932 = vmatmul.mubr.f32.gmra.mrb[174].mxu0 %v18299_v42 }
 0xef0   : > { %v14968_v1 = vpop.f32.mrb[208].mxu1 }
 0xef1   : > { %v6486_v49 = vmul.f32 0.28867513, %v14968_v1  ;;  %v6406_v44 = vpop.f32.mrb[209].mxu1 }
 0xef2   : > { %v6485_v63 = vmul.f32 0.28867513, %v6406_v44 }
 0xef3   : > { %v21299_v7 = vsel %vm1321_vm3, -1e+09, %v6486_v49 }
 0xef4   : > { %6519 = vmax.xlane.f32.xlu1 %v21299_v7  ;;  %v14971_v41 = vpop.f32.mrb[210].mxu1  ;;  %v6501_v27 = vsel %vm1321_vm3, -1e+09, %v6485_v63 }
 0xef5   : > { %v6488_v9 = vmul.f32 0.28867513, %v14971_v41  ;;  %6517 = vmax.xlane.f32.xlu0 %v6501_v27  ;;  %v6416_v6 = vpop.f32.mrb[211].mxu1 }
 0xef6   : > { %v6487_v16 = vmul.f32 0.28867513, %v6416_v6 }
 0xef7   : > { %v21306_v18 = vsel %vm1321_vm3, -1e+09, %v6488_v9 }
 0xef8   : > { %6523 = vmax.xlane.f32.xlu1 %v21306_v18  ;;  %v14974_v39 = vpop.f32.mrb[212].mxu1  ;;  %v21311_v0 = vsel %vm1321_vm3, -1e+09, %v6487_v16 }
 0xef9   : > { %v6490_v26 = vmul.f32 0.28867513, %v14974_v39  ;;  %6521 = vmax.xlane.f32.xlu0 %v21311_v0  ;;  %v6426_v21 = vpop.f32.mrb[213].mxu1 }
 0xefa   : > { %v6489_v17 = vmul.f32 0.28867513, %v6426_v21 }
 0xefb   : > { %v21316_v23 = vsel %vm1321_vm3, -1e+09, %v6490_v26 }
 0xefc   : > { %6527 = vmax.xlane.f32.xlu1 %v21316_v23  ;;  %v14977_v19 = vpop.f32.mrb[214].mxu1  ;;  %v21321_v29 = vsel %vm1321_vm3, -1e+09, %v6489_v17 }
 0xefd   : > { %v6492_v50 = vmul.f32 0.28867513, %v14977_v19  ;;  %6525 = vmax.xlane.f32.xlu0 %v21321_v29  ;;  %v6436_v62 = vpop.f32.mrb[215].mxu1 }
 0xefe   : > { %v6491_v24 = vmul.f32 0.28867513, %v6436_v62 }
 0xeff   : > { %v21326_v4 = vsel %vm1321_vm3, -1e+09, %v6492_v50 }
 0xf00   : > { %6531 = vmax.xlane.f32.xlu1 %v21326_v4  ;;  %v14980_v52 = vpop.f32.mrb[216].mxu1  ;;  %v21331_v13 = vsel %vm1321_vm3, -1e+09, %v6491_v24 }
 0xf01   : > { %v6494_v20 = vmul.f32 0.28867513, %v14980_v52  ;;  %6529 = vmax.xlane.f32.xlu0 %v21331_v13  ;;  %v6446_v46 = vpop.f32.mrb[217].mxu1 }
 0xf02   : > { %v6493_v56 = vmul.f32 0.28867513, %v6446_v46 }
 0xf03   : > { %v21336_v30 = vsel %vm1321_vm3, -1e+09, %v6494_v20 }
 0xf04   : > { %6535 = vmax.xlane.f32.xlu1 %v21336_v30  ;;  %v14983_v15 = vpop.f32.mrb[218].mxu1  ;;  %v21341_v40 = vsel %vm1321_vm3, -1e+09, %v6493_v56 }
 0xf05   : > { %v6496_v48 = vmul.f32 0.28867513, %v14983_v15  ;;  %6533 = vmax.xlane.f32.xlu0 %v21341_v40  ;;  %v6456_v43 = vpop.f32.mrb[219].mxu1 }
 0xf06   : > { %v6495_v53 = vmul.f32 0.28867513, %v6456_v43 }
 0xf07   : > { %v21346_v37 = vsel %vm1321_vm3, -1e+09, %v6496_v48 }
 0xf08   : > { %6539 = vmax.xlane.f32.xlu1 %v21346_v37  ;;  %v14986_v51 = vpop.f32.mrb[220].mxu1  ;;  %v21351_v25 = vsel %vm1321_vm3, -1e+09, %v6495_v53 }
 0xf09   : > { %v6498_v33 = vmul.f32 0.28867513, %v14986_v51  ;;  %6537 = vmax.xlane.f32.xlu0 %v21351_v25  ;;  %v6466_v2 = vpop.f32.mrb[221].mxu1 }
 0xf0a   : > { %v6497_v57 = vmul.f32 0.28867513, %v6466_v2 }
 0xf0b   : > { %v21356_v3 = vsel %vm1321_vm3, -1e+09, %v6498_v33 }
 0xf0c   : > { %6543 = vmax.xlane.f32.xlu1 %v21356_v3  ;;  %v14989_v28 = vpop.f32.mrb[222].mxu1  ;;  %v21361_v45 = vsel %vm1321_vm3, -1e+09, %v6497_v57 }
 0xf0d   : > { %v6500_v34 = vmul.f32 0.28867513, %v14989_v28  ;;  %6541 = vmax.xlane.f32.xlu0 %v21361_v45  ;;  %v6476_v61 = vpop.f32.mrb[223].mxu1 }
 0xf0e   : > { %v6499_v32 = vmul.f32 0.28867513, %v6476_v61 }
 0xf0f   : > { %v21366_v14 = vsel %vm1321_vm3, -1e+09, %v6500_v34 }
 0xf10   : > { %6547 = vmax.xlane.f32.xlu1 %v21366_v14  ;;  %v21371_v55 = vsel %vm1321_vm3, -1e+09, %v6499_v32 }
 0xf11   : > { %6545 = vmax.xlane.f32.xlu0 %v21371_v55 }
 0xf28   : > { %v14912_v35 = vpop.f32.mrb[160].mxu0 }
 0xf29   : > { %v6171_v42 = vadd.f32 %v14912_v35, %v21378_v11  ;;  %v6165_v1 = vpop.f32.mrb[161].mxu0 }
 0xf2a   : > { %v6166_v63 = vadd.f32 %v21378_v11, %v6165_v1 }
 0xf2c   : > { %v16894_v9 = vpack.c.bf16 %v6171_v42, %v6166_v63  ;;  %v14915_v6 = vpop.f32.mrb[162].mxu0 }
 0xf2d   : > { %v6175_v39 = vpop.f32.mrb[163].mxu0 }
 0xf2e   : > { %v6176_v21 = vadd.f32 %v21378_v11, %v6175_v39  ;;  %16895 = vmatprep.subr.bf16.mxu0 %v16894_v9 }
 0xf2f   : > { %16897 = vmatpush3.bf16.msra.mxu0 %v16894_v9 }
 0xf30   : > { %v14918_v50 = vpop.f32.mrb[164].mxu0 }
 0xf31   : > { %v6191_v52 = vadd.f32 %v14918_v50, %v21378_v11  ;;  %v6185_v20 = vpop.f32.mrb[165].mxu0 }
 0xf34   : > { %v14921_v51 = vpop.f32.mrb[166].mxu0 }
 0xf35   : > { %v6201_v57 = vadd.f32 %v14921_v51, %v21378_v11  ;;  %v6195_v28 = vpop.f32.mrb[167].mxu0  ;;  %v11679_v51 = vld [vmem:[%s23185_s10 + $0x88] sm:$0xff] }
 0xf81   : > { %v6520_v8 = vpop.xlane.xlu1 %6519 }
 0xf82   : > { %v6550_v47 = vsub.f32 %v21299_v7, %v6520_v8  ;;  %v6518_v59 = vpop.xlane.xlu0 %6517 }
 0xf83   : > { %v6549_v12 = vsub.f32 %v6501_v27, %v6518_v59 }
 0xf84   : > { %v6567_v31 = vmul.f32 1.442695, %v6550_v47 }
 0xf85   : > { %v6565_v38 = vmul.f32 1.442695, %v6549_v12  ;;  %v6524_v36 = vpop.xlane.xlu1 %6523  ;;  %v14924_v12 = vpop.f32.mrb[168].mxu0 }
 0xf86   : > { %17901 = vpow2.f32 %v6567_v31  ;;  %v6552_v10 = vsub.f32 %v21306_v18, %v6524_v36  ;;  %v6522_v5 = vpop.xlane.xlu0 %6521  ;;  %v6181_v18 = vadd.f32 %v14915_v6, %v21378_v11  ;;  %v6211_v36 = vadd.f32 %v14924_v12, %v21378_v11 }
 0xf87   : > { %17903 = vpow2.f32 %v6565_v38  ;;  %v6551_v22 = vsub.f32 %v21311_v0, %v6522_v5 }
 0xf88   : > { %v6571_v60 = vmul.f32 1.442695, %v6552_v10  ;;  %v6205_v10 = vpop.f32.mrb[169].mxu0 }
 0xf89   : > { %v6569_v49 = vmul.f32 1.442695, %v6551_v22  ;;  %v6528_v44 = vpop.xlane.xlu1 %6527 }
 0xf8a   : > { %17905 = vpow2.f32 %v6571_v60  ;;  %v6554_v7 = vsub.f32 %v21316_v23, %v6528_v44  ;;  %v6526_v41 = vpop.xlane.xlu0 %6525 }
 0xf8b   : > { %17907 = vpow2.f32 %v6569_v49  ;;  %v6553_v27 = vsub.f32 %v21321_v29, %v6526_v41  ;;  %v16898_v29 = vpack.c.bf16 %v6181_v18, %v6176_v21  ;;  %v14927_v49 = vpop.f32.mrb[170].mxu0 }
 0xf8c   : > { %v6575_v16 = vmul.f32 1.442695, %v6554_v7  ;;  %v6221_v7 = vadd.f32 %v14927_v49, %v21378_v11  ;;  %v6215_v41 = vpop.f32.mrb[171].mxu0 }
 0xf8d   : > { %v6573_v0 = vmul.f32 1.442695, %v6553_v27  ;;  %v6532_v26 = vpop.xlane.xlu1 %6531  ;;  %16899 = vmatprep.subr.bf16.mxu0 %v16898_v29  ;;  %v6216_v6 = vadd.f32 %v21378_v11, %v6215_v41 }
 0xf8e   : > { %17909 = vpow2.f32 %v6575_v16  ;;  %v6556_v17 = vsub.f32 %v21326_v4, %v6532_v26  ;;  %v6530_v19 = vpop.xlane.xlu0 %6529  ;;  %v6186_v4 = vadd.f32 %v21378_v11, %v6185_v20  ;;  %16901 = vmatpush3.bf16.msra.mxu0 %v16898_v29 }
 0xf8f   : > { %17911 = vpow2.f32 %v6573_v0  ;;  %v6555_v23 = vsub.f32 %v21331_v13, %v6530_v19  ;;  %v16914_v39 = vpack.c.bf16 %v6221_v7, %v6216_v6  ;;  %v14930_v0 = vpop.f32.mrb[172].mxu0 }
 0xf90   : > { %v21390_v62 = vpop.eup %17901  ;;  %v6579_v24 = vmul.f32 1.442695, %v6556_v17  ;;  %v16902_v53 = vpack.c.bf16 %v6191_v52, %v6186_v4  ;;  %v6231_v17 = vadd.f32 %v14930_v0, %v21378_v11  ;;  %v6225_v19 = vpop.f32.mrb[173].mxu0 }
 0xf91   : > { %v21393_v46 = vpop.eup %17903  ;;  %v6577_v56 = vmul.f32 1.442695, %v6555_v23  ;;  %v6536_v15 = vpop.xlane.xlu1 %6535  ;;  %6599 = vadd.xlane.f32.xlu1 %v21390_v62 }
 0xf92   : > { %17913 = vpow2.f32 %v6579_v24  ;;  %v6558_v13 = vsub.f32 %v21336_v30, %v6536_v15  ;;  %v6534_v48 = vpop.xlane.xlu0 %6533  ;;  %6597 = vadd.xlane.f32.xlu0 %v21393_v46  ;;  %v6196_v30 = vadd.f32 %v21378_v11, %v6195_v28  ;;  %16903 = vmatprep.subr.bf16.mxu0 %v16902_v53  ;;  %v14933_v50 = vpop.f32.mrb[174].mxu0 }
 0xf93   : > { %17915 = vpow2.f32 %v6577_v56  ;;  %v6557_v43 = vsub.f32 %v21341_v40, %v6534_v48  ;;  %16905 = vmatpush3.bf16.msra.mxu0 %v16902_v53  ;;  %v6241_v52 = vadd.f32 %v14933_v50, %v21378_v11  ;;  %v6235_v20 = vpop.f32.mrb[175].mxu0 }
 0xf94   : > { %v21400_v33 = vpop.eup %17905  ;;  %v6583_v2 = vmul.f32 1.442695, %v6558_v13  ;;  %v16906_v59 = vpack.c.bf16 %v6201_v57, %v6196_v30  ;;  %v6236_v15 = vadd.f32 %v21378_v11, %v6235_v20  ;;  %v11716_v20 = vld [vmem:[%s23181_s6 + $0x280] sm:$0xff] }
 0xf95   : > { %v21403_v34 = vpop.eup %17907  ;;  %v6581_v61 = vmul.f32 1.442695, %v6557_v43  ;;  %v6540_v32 = vpop.xlane.xlu1 %6539  ;;  %6603 = vadd.xlane.f32.xlu1 %v21400_v33 }
 0xf96   : > { %17917 = vpow2.f32 %v6583_v2  ;;  %v6560_v40 = vsub.f32 %v21346_v37, %v6540_v32  ;;  %v6538_v8 = vpop.xlane.xlu0 %6537  ;;  %6601 = vadd.xlane.f32.xlu0 %v21403_v34  ;;  %v6206_v37 = vadd.f32 %v21378_v11, %v6205_v10  ;;  %16907 = vmatprep.subr.bf16.mxu0 %v16906_v59  ;;  %v16922_v4 = vpack.c.bf16 %v6241_v52, %v6236_v15 }
 0xf97   : > { %17919 = vpow2.f32 %v6581_v61  ;;  %v6559_v47 = vsub.f32 %v21351_v25, %v6538_v8  ;;  %16909 = vmatpush3.bf16.msra.mxu0 %v16906_v59  ;;  %v11681_v59 = vld [vmem:[%s23185_s10 + $0x98] sm:$0xff] }
 0xf98   : > { %v21410_v31 = vpop.eup %17909  ;;  %v6587_v38 = vmul.f32 1.442695, %v6560_v40  ;;  %v16910_v1 = vpack.c.bf16 %v6211_v36, %v6206_v37 }
 0xf99   : > { %v21413_v5 = vpop.eup %17911  ;;  %v6585_v22 = vmul.f32 1.442695, %v6559_v47  ;;  %v6544_v35 = vpop.xlane.xlu1 %6543  ;;  %6607 = vadd.xlane.f32.xlu1 %v21410_v31  ;;  %v11680_v47 = vld [vmem:[%s23185_s10 + $0x90] sm:$0xff] }
 0xf9a   : > { %17921 = vpow2.f32 %v6587_v38  ;;  %v6562_v25 = vsub.f32 %v21356_v3, %v6544_v35  ;;  %v6542_v60 = vpop.xlane.xlu0 %6541  ;;  %6605 = vadd.xlane.f32.xlu0 %v21413_v5  ;;  %16911 = vmatprep.subr.bf16.mxu0 %v16910_v1  ;;  %v16930_v35 = vpack.c.bf16 %v11681_v59, %v11680_v47  ;;  %v11708_v47 = vld [vmem:[%s23179_s4 + $0x2d0] sm:$0xff]  ;;  %v11709_v59 = vld [vmem:[%s23179_s4 + $0x2d8] sm:$0xff] }
 0xf9b   : > { %17923 = vpow2.f32 %v6585_v22  ;;  %v6561_v42 = vsub.f32 %v21361_v45, %v6542_v60  ;;  %16913 = vmatpush3.bf16.msra.mxu0 %v16910_v1 }
 0xf9c   : > { %v21420_v44 = vpop.eup %17913  ;;  %v6591_v63 = vmul.f32 1.442695, %v6562_v25  ;;  %16915 = vmatprep.subr.bf16.mxu0 %v16914_v39 }
 0xf9d   : > { %v21423_v27 = vpop.eup %17915  ;;  %v6589_v9 = vmul.f32 1.442695, %v6561_v42  ;;  %6611 = vadd.xlane.f32.xlu1 %v21420_v44  ;;  %v6548_v3 = vpop.xlane.xlu1 %6547 }
 0xf9e   : > { %17925 = vpow2.f32 %v6591_v63  ;;  %v6564_v45 = vsub.f32 %v21366_v14, %v6548_v3  ;;  %6609 = vadd.xlane.f32.xlu0 %v21423_v27  ;;  %v6546_v16 = vpop.xlane.xlu0 %6545  ;;  %v6226_v14 = vadd.f32 %v21378_v11, %v6225_v19  ;;  %v11678_v11 = vld [vmem:[%s23185_s10 + $0x80] sm:$0xff] }
 0xf9f   : > { %17927 = vpow2.f32 %v6589_v9  ;;  %v6563_v18 = vsub.f32 %v21371_v55, %v6546_v16  ;;  %16917 = vmatpush3.bf16.msra.mxu0 %v16914_v39  ;;  %v16926_v2 = vpack.c.bf16 %v11679_v51, %v11678_v11  ;;  %v11702_v51 = vld [vmem:[%s23179_s4 + $0x2a0] sm:$0xff] }
 0xfa0   : > { %v21430_v26 = vpop.eup %17917  ;;  %v6595_v21 = vmul.f32 1.442695, %v6564_v45  ;;  %v16918_v55 = vpack.c.bf16 %v6231_v17, %v6226_v14 }
 0xfa1   : > { %v21433_v23 = vpop.eup %17919  ;;  %v6593_v29 = vmul.f32 1.442695, %v6563_v18  ;;  %6615 = vadd.xlane.f32.xlu1 %v21430_v26 }
 0xfa2   : > { %17929 = vpow2.f32 %v6595_v21  ;;  %6613 = vadd.xlane.f32.xlu0 %v21433_v23  ;;  %16919 = vmatprep.subr.bf16.mxu0 %v16918_v55 }
 0xfa3   : > { %17931 = vpow2.f32 %v6593_v29  ;;  %16921 = vmatpush3.bf16.msra.mxu0 %v16918_v55 }
 0xfa4   : > { %v21438_v24 = vpop.eup %17921  ;;  %16923 = vmatprep.subr.bf16.mxu0 %v16922_v4 }
 0xfa5   : > { %v21441_v56 = vpop.eup %17923  ;;  %6619 = vadd.xlane.f32.xlu1 %v21438_v24 }
 0xfa6   : > { %6617 = vadd.xlane.f32.xlu0 %v21441_v56 }
 0xfa7   : > { %16925 = vmatpush3.bf16.msra.mxu0 %v16922_v4  ;;  %v11698_v4 = vld [vmem:[%s23179_s4 + $0x280] sm:$0xff] }
 0xfa8   : > { %v21446_v13 = vpop.eup %17925  ;;  %16927 = vmatprep.subr.bf16.mxu0 %v16926_v2 }
 0xfa9   : > { %v21448_v48 = vpop.eup %17927  ;;  %6623 = vadd.xlane.f32.xlu1 %v21446_v13 }
 0xfaa   : > { %6621 = vadd.xlane.f32.xlu0 %v21448_v48 }
 0xfac   : > { %v21452_v43 = vpop.eup %17929 }
 0xfad   : > { %v21454_v53 = vpop.eup %17931  ;;  %6627 = vadd.xlane.f32.xlu1 %v21452_v43 }
 0xfae   : > { %6625 = vadd.xlane.f32.xlu0 %v21454_v53 }
0x101e   : > { %v6600_v57 = vpop.xlane.xlu1 %6599 }
0x101f   : > { %17933 = vrcp.f32 %v6600_v57  ;;  %v6598_v28 = vpop.xlane.xlu0 %6597 }
0x1020   : > { %17935 = vrcp.f32 %v6598_v28  ;;  %v11704_v28 = vld [vmem:[%s23179_s4 + $0x2b0] sm:$0xff] }
0x1022   : > { %v6604_v61 = vpop.xlane.xlu1 %6603 }
0x1023   : > { %17937 = vrcp.f32 %v6604_v61  ;;  %v6602_v32 = vpop.xlane.xlu0 %6601  ;;  %v11705_v61 = vld [vmem:[%s23179_s4 + $0x2b8] sm:$0xff] }
0x1024   : > { %17939 = vrcp.f32 %v6602_v32  ;;  %v16946_v32 = vpack.c.bf16 %v11705_v61, %v11704_v28  ;;  %v11731_v28 = vld [vmem:[%s23181_s6 + $0x2f8] sm:$0xff] }
0x1026   : > { %v6608_v30 = vpop.xlane.xlu1 %6607 }
0x1027   : > { %17941 = vrcp.f32 %v6608_v30  ;;  %v6606_v40 = vpop.xlane.xlu0 %6605  ;;  %v11706_v30 = vld [vmem:[%s23179_s4 + $0x2c0] sm:$0xff] }
0x1028   : > { %17943 = vrcp.f32 %v6606_v40  ;;  %v11707_v40 = vld [vmem:[%s23179_s4 + $0x2c8] sm:$0xff] }
0x1029   : > { %v17934_v8 = vpop.eup %17933 }
0x102a   : > { %v17936_v12 = vpop.eup %17935  ;;  %v6612_v38 = vpop.xlane.xlu1 %6611  ;;  %v6632_v36 = vmul.f32 %v17934_v8, %v21390_v62  ;;  %v16950_v8 = vpack.c.bf16 %v11707_v40, %v11706_v30 }
0x102b   : > { %17945 = vrcp.f32 %v6612_v38  ;;  %v6610_v10 = vpop.xlane.xlu0 %6609  ;;  %v6630_v22 = vmul.f32 %v17936_v12, %v21393_v46  ;;  %v16954_v12 = vpack.c.bf16 %v11709_v59, %v11708_v47  ;;  %v11710_v38 = vld [vmem:[%s23179_s4 + $0x2e0] sm:$0xff]  ;;  %v18317_v59 = vld [vmem:[%s18789_s24 + $0x8] sm:$0xff] }
0x102c   : > { %17947 = vrcp.f32 %v6610_v10  ;;  %11663 = vst [vmem:[%s19291_s30 + $0x208] sm:$0xff] %v6632_v36  ;;  %v18316_v47 = vld [vmem:[%s18789_s24] sm:$0xff] }
0x102d   : > { %v17938_v37 = vpop.eup %17937  ;;  %11662 = vst [vmem:[%s19291_s30 + $0x200] sm:$0xff] %v6630_v22  ;;  %15022 = vmatprep.mubr.f32.mxu0 %v6630_v22  ;;  %v11712_v22 = vld [vmem:[%s23179_s4 + $0x2f0] sm:$0xff] }
0x102e   : > { %v17940_v25 = vpop.eup %17939  ;;  %v6616_v60 = vpop.xlane.xlu1 %6615  ;;  %15023 = vmatmul.mubr.f32.vlgmr.msra.gmra.mrb[176].mxu0 %v6632_v36  ;;  %v6636_v42 = vmul.f32 %v17938_v37, %v21400_v33  ;;  %v11711_v36 = vld [vmem:[%s23179_s4 + $0x2e8] sm:$0xff] }
0x102f   : > { %17949 = vrcp.f32 %v6616_v60  ;;  %v6614_v1 = vpop.xlane.xlu0 %6613  ;;  %v6634_v62 = vmul.f32 %v17940_v25, %v21403_v34  ;;  %16929 = vmatpush3.bf16.msra.mxu0 %v16926_v2  ;;  %v11703_v2 = vld [vmem:[%s23179_s4 + $0x2a8] sm:$0xff]  ;;  %v16958_v10 = vpack.c.bf16 %v11711_v36, %v11710_v38  ;;  %v18301_v60 = vld [vmem:[%s18690_s15 + $0x10] sm:$0xff]  ;;  %v18319_v38 = vld [vmem:[%s18789_s24 + $0x18] sm:$0xff] }
0x1030   : > { %17951 = vrcp.f32 %v6614_v1  ;;  %11665 = vst [vmem:[%s19291_s30 + $0x218] sm:$0xff] %v6636_v42  ;;  %16931 = vmatprep.subr.bf16.mxu0 %v16930_v35  ;;  %v16942_v57 = vpack.c.bf16 %v11703_v2, %v11702_v51  ;;  %v18300_v25 = vld [vmem:[%s18690_s15 + $0x8] sm:$0xff]  ;;  %v18303_v1 = vld [vmem:[%s18690_s15 + $0x20] sm:$0xff] }
0x1031   : > { %v17942_v46 = vpop.eup %17941  ;;  %11664 = vst [vmem:[%s19291_s30 + $0x210] sm:$0xff] %v6634_v62  ;;  %15025 = vmatprep.mubr.f32.mxu0 %v6634_v62  ;;  %v18304_v62 = vld [vmem:[%s18690_s15 + $0x28] sm:$0xff]  ;;  %v18320_v36 = vld [vmem:[%s18789_s24 + $0x20] sm:$0xff] }
0x1032   : > { %v17944_v49 = vpop.eup %17943  ;;  %v6620_v63 = vpop.xlane.xlu1 %6619  ;;  %15026 = vmatmul.mubr.f32.gmra.mrb[178].mxu0 %v6636_v42  ;;  %v6640_v7 = vmul.f32 %v17942_v46, %v21410_v31  ;;  %v18302_v42 = vld [vmem:[%s18690_s15 + $0x18] sm:$0xff]  ;;  %v18305_v46 = vld [vmem:[%s18690_s15 + $0x30] sm:$0xff] }
0x1033   : > { %17953 = vrcp.f32 %v6620_v63  ;;  %v6618_v33 = vpop.xlane.xlu0 %6617  ;;  %v6638_v41 = vmul.f32 %v17944_v49, %v21413_v5  ;;  %16933 = vmatpush3.bf16.msra.mxu0 %v16930_v35  ;;  %v11713_v35 = vld [vmem:[%s23179_s4 + $0x2f8] sm:$0xff]  ;;  %v18307_v63 = vld [vmem:[%s18690_s15 + $0x40] sm:$0xff] }
0x1034   : > { %17955 = vrcp.f32 %v6618_v33  ;;  %11667 = vst [vmem:[%s19291_s30 + $0x228] sm:$0xff] %v6640_v7  ;;  %v16962_v37 = vpack.c.bf16 %v11713_v35, %v11712_v22  ;;  %v18306_v49 = vld [vmem:[%s18690_s15 + $0x38] sm:$0xff]  ;;  %v18309_v33 = vld [vmem:[%s18690_s15 + $0x50] sm:$0xff] }
0x1035   : > { %v17946_v34 = vpop.eup %17945  ;;  %11666 = vst [vmem:[%s19291_s30 + $0x220] sm:$0xff] %v6638_v41  ;;  %15028 = vmatprep.mubr.f32.mxu0 %v6638_v41  ;;  %v18310_v41 = vld [vmem:[%s18690_s15 + $0x58] sm:$0xff]  ;;  %v18322_v22 = vld [vmem:[%s18789_s24 + $0x30] sm:$0xff] }
0x1036   : > { %v17948_v9 = vpop.eup %17947  ;;  %v6624_v3 = vpop.xlane.xlu1 %6623  ;;  %15029 = vmatmul.mubr.f32.gmra.mrb[180].mxu0 %v6640_v7  ;;  %v6644_v6 = vmul.f32 %v17946_v34, %v21420_v44  ;;  %v18308_v7 = vld [vmem:[%s18690_s15 + $0x48] sm:$0xff]  ;;  %v18311_v34 = vld [vmem:[%s18690_s15 + $0x60] sm:$0xff]  ;;  %v18323_v35 = vld [vmem:[%s18789_s24 + $0x38] sm:$0xff] }
0x1037   : > { %17957 = vrcp.f32 %v6624_v3  ;;  %v6622_v31 = vpop.xlane.xlu0 %6621  ;;  %v6642_v45 = vmul.f32 %v17948_v9, %v21423_v27  ;;  %v18312_v9 = vld [vmem:[%s18690_s15 + $0x68] sm:$0xff]  ;;  %v18313_v3 = vld [vmem:[%s18690_s15 + $0x70] sm:$0xff] }
0x1038   : > { %17959 = vrcp.f32 %v6622_v31  ;;  %11669 = vst [vmem:[%s19291_s30 + $0x238] sm:$0xff] %v6644_v6  ;;  %v18315_v31 = vld [vmem:[%s18984_s25] sm:$0xff] }
0x1039   : > { %v17950_v5 = vpop.eup %17949  ;;  %11668 = vst [vmem:[%s19291_s30 + $0x230] sm:$0xff] %v6642_v45  ;;  %15031 = vmatprep.mubr.f32.mxu0 %v6642_v45  ;;  %v11718_v45 = vld [vmem:[%s23181_s6 + $0x290] sm:$0xff] }
0x103a   : > { %v17952_v16 = vpop.eup %17951  ;;  %v6628_v18 = vpop.xlane.xlu1 %6627  ;;  %15032 = vmatmul.mubr.f32.gmra.mrb[182].mxu0 %v6644_v6  ;;  %v6648_v39 = vmul.f32 %v17950_v5, %v21430_v26  ;;  %v18314_v6 = vld [vmem:[%s18690_s15 + $0x78] sm:$0xff] }
0x103b   : > { %17961 = vrcp.f32 %v6628_v18  ;;  %v6626_v44 = vpop.xlane.xlu0 %6625  ;;  %v6646_v0 = vmul.f32 %v17952_v16, %v21433_v23  ;;  %v11719_v5 = vld [vmem:[%s23181_s6 + $0x298] sm:$0xff] }
0x103c   : > { %17963 = vrcp.f32 %v6626_v44  ;;  %11671 = vst [vmem:[%s19291_s30 + $0x248] sm:$0xff] %v6648_v39  ;;  %v11720_v44 = vld [vmem:[%s23181_s6 + $0x2a0] sm:$0xff] }
0x103d   : > { %v17954_v27 = vpop.eup %17953  ;;  %11670 = vst [vmem:[%s19291_s30 + $0x240] sm:$0xff] %v6646_v0  ;;  %15034 = vmatprep.mubr.f32.mxu0 %v6646_v0  ;;  %v11721_v0 = vld [vmem:[%s23181_s6 + $0x2a8] sm:$0xff] }
0x103e   : > { %v17956_v21 = vpop.eup %17955  ;;  %15035 = vmatmul.mubr.f32.gmra.mrb[184].mxu0 %v6648_v39  ;;  %v6652_v17 = vmul.f32 %v17954_v27, %v21438_v24  ;;  %v16970_v39 = vpack.c.bf16 %v11719_v5, %v11718_v45 }
0x103f   : > { %v6650_v19 = vmul.f32 %v17956_v21, %v21441_v56  ;;  %v11717_v56 = vld [vmem:[%s23181_s6 + $0x288] sm:$0xff] }
0x1040   : > { %11673 = vst [vmem:[%s19291_s30 + $0x258] sm:$0xff] %v6652_v17  ;;  %v21508_v15 = vpack.c.bf16 %v11717_v56, %v11716_v20  ;;  %v11726_v56 = vld [vmem:[%s23181_s6 + $0x2d0] sm:$0xff] }
0x1041   : > { %v17958_v26 = vpop.eup %17957  ;;  %11672 = vst [vmem:[%s19291_s30 + $0x250] sm:$0xff] %v6650_v19  ;;  %15037 = vmatprep.mubr.f32.mxu0 %v6650_v19  ;;  %v11722_v19 = vld [vmem:[%s23181_s6 + $0x2b0] sm:$0xff] }
0x1042   : > { %v17960_v23 = vpop.eup %17959  ;;  %15038 = vmatmul.mubr.f32.gmra.mrb[186].mxu0 %v6652_v17  ;;  %v6656_v29 = vmul.f32 %v17958_v26, %v21446_v13  ;;  %16967 = vmatprep.subr.bf16.mxu0 %v21508_v15  ;;  %v11699_v13 = vld [vmem:[%s23179_s4 + $0x288] sm:$0xff]  ;;  %v16974_v17 = vpack.c.bf16 %v11721_v0, %v11720_v44  ;;  %v11723_v26 = vld [vmem:[%s23181_s6 + $0x2b8] sm:$0xff] }
0x1043   : > { %v6654_v14 = vmul.f32 %v17960_v23, %v21448_v48  ;;  %v11700_v48 = vld [vmem:[%s23179_s4 + $0x290] sm:$0xff] }
0x1044   : > { %11675 = vst [vmem:[%s19291_s30 + $0x268] sm:$0xff] %v6656_v29 }
0x1045   : > { %v17962_v55 = vpop.eup %17961  ;;  %11674 = vst [vmem:[%s19291_s30 + $0x260] sm:$0xff] %v6654_v14  ;;  %15040 = vmatprep.mubr.f32.mxu0 %v6654_v14  ;;  %v16978_v14 = vpack.c.bf16 %v11723_v26, %v11722_v19 }
0x1046   : > { %v17964_v50 = vpop.eup %17963  ;;  %15041 = vmatmul.mubr.f32.gmra.mrb[188].mxu0 %v6656_v29  ;;  %v6660_v24 = vmul.f32 %v17962_v55, %v21452_v43  ;;  %v16934_v43 = vpack.c.bf16 %v11699_v13, %v11698_v4  ;;  %v11724_v55 = vld [vmem:[%s23181_s6 + $0x2c0] sm:$0xff] }
0x1047   : > { %v6658_v52 = vmul.f32 %v17964_v50, %v21454_v53  ;;  %v11701_v53 = vld [vmem:[%s23179_s4 + $0x298] sm:$0xff]  ;;  %v11725_v50 = vld [vmem:[%s23181_s6 + $0x2c8] sm:$0xff] }
0x1048   : > { %11677 = vst [vmem:[%s19291_s30 + $0x278] sm:$0xff] %v6660_v24  ;;  %v16938_v11 = vpack.c.bf16 %v11701_v53, %v11700_v48  ;;  %16935 = vmatprep.subr.bf16.mxu1 %v16934_v43  ;;  %v16982_v20 = vpack.c.bf16 %v11725_v50, %v11724_v55  ;;  %v11729_v53 = vld [vmem:[%s23181_s6 + $0x2e8] sm:$0xff] }
0x1049   : > { %11676 = vst [vmem:[%s19291_s30 + $0x270] sm:$0xff] %v6658_v52  ;;  %15043 = vmatprep.mubr.f32.mxu0 %v6658_v52  ;;  %16937 = vmatpush3.bf16.msra.mxu1 %v16934_v43  ;;  %v11728_v43 = vld [vmem:[%s23181_s6 + $0x2e0] sm:$0xff] }
0x104a   : > { %15044 = vmatmul.mubr.f32.gmra.mrb[190].mxu0 %v6660_v24  ;;  %16939 = vmatprep.subr.bf16.mxu1 %v16938_v11  ;;  %v16990_v2 = vpack.c.bf16 %v11729_v53, %v11728_v43 }
0x104d   : > { %16941 = vmatpush3.bf16.msra.mxu1 %v16938_v11 }
0x104e   : > { %16943 = vmatprep.subr.bf16.mxu1 %v16942_v57 }
0x1051   : > { %16945 = vmatpush3.bf16.msra.mxu1 %v16942_v57  ;;  %v11730_v57 = vld [vmem:[%s23181_s6 + $0x2f0] sm:$0xff] }
0x1052   : > { %16947 = vmatprep.subr.bf16.mxu1 %v16946_v32  ;;  %v16994_v30 = vpack.c.bf16 %v11731_v28, %v11730_v57 }
0x1055   : > { %16949 = vmatpush3.bf16.msra.mxu1 %v16946_v32 }
0x1056   : > { %16951 = vmatprep.subr.bf16.mxu1 %v16950_v8 }
0x1059   : > { %16953 = vmatpush3.bf16.msra.mxu1 %v16950_v8 }
0x105a   : > { %16955 = vmatprep.subr.bf16.mxu1 %v16954_v12 }
0x105d   : > { %16957 = vmatpush3.bf16.msra.mxu1 %v16954_v12  ;;  %v18318_v12 = vld [vmem:[%s18789_s24 + $0x10] sm:$0xff] }
0x105e   : > { %16959 = vmatprep.subr.bf16.mxu1 %v16958_v10 }
0x1061   : > { %16961 = vmatpush3.bf16.msra.mxu1 %v16958_v10  ;;  %v18321_v10 = vld [vmem:[%s18789_s24 + $0x28] sm:$0xff] }
0x1062   : > { %16963 = vmatprep.subr.bf16.mxu1 %v16962_v37 }
0x1065   : > { %16965 = vmatpush3.bf16.msra.mxu1 %v16962_v37  ;;  %v18324_v37 = vld [vmem:[%s18789_s24 + $0x40] sm:$0xff] }
0x1068   : > { %15111 = vmatmul.mubr.f32.vlgmr.msra.gmra.mrb[224].mxu1 %v18300_v25  ;;  %v18325_v25 = vld [vmem:[%s18789_s24 + $0x48] sm:$0xff] }
0x1069   : > { %15113 = vmatprep.mubr.f32.mxu1 %v18301_v60  ;;  %v18326_v60 = vld [vmem:[%s18789_s24 + $0x50] sm:$0xff] }
0x106c   : > { %15114 = vmatmul.mubr.f32.gmra.mrb[226].mxu1 %v18302_v42  ;;  %v18327_v42 = vld [vmem:[%s18789_s24 + $0x58] sm:$0xff] }
0x106d   : > { %15116 = vmatprep.mubr.f32.mxu1 %v18303_v1  ;;  %v18328_v1 = vld [vmem:[%s18789_s24 + $0x60] sm:$0xff] }
0x1070   : > { %15117 = vmatmul.mubr.f32.gmra.mrb[228].mxu1 %v18304_v62  ;;  %v18329_v62 = vld [vmem:[%s18789_s24 + $0x68] sm:$0xff] }
0x1071   : > { %15119 = vmatprep.mubr.f32.mxu1 %v18305_v46  ;;  %v18330_v46 = vld [vmem:[%s18789_s24 + $0x70] sm:$0xff] }
0x1074   : > { %15120 = vmatmul.mubr.f32.gmra.mrb[230].mxu1 %v18306_v49  ;;  %v18331_v49 = vld [vmem:[%s18789_s24 + $0x78] sm:$0xff] }
0x1075   : > { %15122 = vmatprep.mubr.f32.mxu1 %v18307_v63 }
0x1078   : > { %15123 = vmatmul.mubr.f32.gmra.mrb[232].mxu1 %v18308_v7  ;;  %v11715_v7 = vld [vmem:[%s23180_s5 + $0x5] ss:$0 sm:$0xff] }
0x1079   : > { %15125 = vmatprep.mubr.f32.mxu1 %v18309_v33 }
0x107c   : > { %15126 = vmatmul.mubr.f32.gmra.mrb[234].mxu1 %v18310_v41 }
0x107d   : > { %15128 = vmatprep.mubr.f32.mxu1 %v18311_v34 }
0x1080   : > { %15129 = vmatmul.mubr.f32.gmra.mrb[236].mxu1 %v18312_v9 }
0x1081   : > { %15131 = vmatprep.mubr.f32.mxu1 %v18313_v3 }
0x1084   : > { %15132 = vmatmul.mubr.f32.gmra.mrb[238].mxu1 %v18314_v6 }
0x1085   : > { %15222 = vmatprep.mubr.f32.mxu1 %v18315_v31 }
0x1101   : > { %v15024_v16 = vpop.f32.mrb[176].mxu0 }
0x1102   : > { %v6744_v18 = vpop.f32.mrb[177].mxu0 }
0x1103   : > { %15054 = vmatprep.mubr.msk.f32.mxu0 %vm2741_vm4, %v6744_v18 }
0x1104   : > { %15055 = vmatmul.mubr.msk.f32.vlgmr.msra.gmra.mrb[80].mxu0 %vm2741_vm4, %v15024_v16 }
0x1105   : > { %v15027_v27 = vpop.f32.mrb[178].mxu0  ;;  %16969 = vmatpush3.bf16.msra.mxu0 %v21508_v15  ;;  %v11727_v15 = vld [vmem:[%s23181_s6 + $0x2d8] sm:$0xff] }
0x1106   : > { %v6754_v21 = vpop.f32.mrb[179].mxu0  ;;  %16971 = vmatprep.subr.bf16.mxu0 %v16970_v39  ;;  %v16986_v48 = vpack.c.bf16 %v11727_v15, %v11726_v56 }
0x1107   : > { %15057 = vmatprep.mubr.msk.f32.mxu0 %vm2741_vm4, %v6754_v21 }
0x1108   : > { %15058 = vmatmul.mubr.msk.f32.gmra.mrb[82].mxu0 %vm2741_vm4, %v15027_v27 }
0x1109   : > { %v15030_v23 = vpop.f32.mrb[180].mxu0  ;;  %16973 = vmatpush3.bf16.msra.mxu0 %v16970_v39 }
0x110a   : > { %v6764_v29 = vpop.f32.mrb[181].mxu0  ;;  %16975 = vmatprep.subr.bf16.mxu0 %v16974_v17 }
0x110b   : > { %15060 = vmatprep.mubr.msk.f32.mxu0 %vm2741_vm4, %v6764_v29 }
0x110c   : > { %15061 = vmatmul.mubr.msk.f32.gmra.mrb[84].mxu0 %vm2741_vm4, %v15030_v23 }
0x110d   : > { %v15033_v24 = vpop.f32.mrb[182].mxu0  ;;  %16977 = vmatpush3.bf16.msra.mxu0 %v16974_v17 }
0x110e   : > { %v6774_v52 = vpop.f32.mrb[183].mxu0  ;;  %16979 = vmatprep.subr.bf16.mxu0 %v16978_v14 }
0x110f   : > { %15063 = vmatprep.mubr.msk.f32.mxu0 %vm2741_vm4, %v6774_v52 }
0x1110   : > { %15064 = vmatmul.mubr.msk.f32.gmra.mrb[86].mxu0 %vm2741_vm4, %v15033_v24 }
0x1111   : > { %v15036_v4 = vpop.f32.mrb[184].mxu0  ;;  %16981 = vmatpush3.bf16.msra.mxu0 %v16978_v14 }
0x1112   : > { %v6784_v13 = vpop.f32.mrb[185].mxu0  ;;  %16983 = vmatprep.subr.bf16.mxu0 %v16982_v20 }
0x1113   : > { %15066 = vmatprep.mubr.msk.f32.mxu0 %vm2741_vm4, %v6784_v13 }
0x1114   : > { %15067 = vmatmul.mubr.msk.f32.gmra.mrb[88].mxu0 %vm2741_vm4, %v15036_v4 }
0x1115   : > { %v15039_v11 = vpop.f32.mrb[186].mxu0  ;;  %16985 = vmatpush3.bf16.msra.mxu0 %v16982_v20 }
0x1116   : > { %v6794_v51 = vpop.f32.mrb[187].mxu0  ;;  %16987 = vmatprep.subr.bf16.mxu0 %v16986_v48 }
0x1117   : > { %15069 = vmatprep.mubr.msk.f32.mxu0 %vm2741_vm4, %v6794_v51 }
0x1118   : > { %15070 = vmatmul.mubr.msk.f32.gmra.mrb[90].mxu0 %vm2741_vm4, %v15039_v11 }
0x1119   : > { %v15042_v61 = vpop.f32.mrb[188].mxu0  ;;  %16989 = vmatpush3.bf16.msra.mxu0 %v16986_v48  ;;  %v11733_v48 = vld [vmem:[%s23182_s7 + $0x5] ss:$0 sm:$0xff] }
0x111a   : > { %v6804_v32 = vpop.f32.mrb[189].mxu0  ;;  %16991 = vmatprep.subr.bf16.mxu0 %v16990_v2 }
0x111b   : > { %15072 = vmatprep.mubr.msk.f32.mxu0 %vm2741_vm4, %v6804_v32 }
0x111c   : > { %15073 = vmatmul.mubr.msk.f32.gmra.mrb[92].mxu0 %vm2741_vm4, %v15042_v61 }
0x111d   : > { %v15045_v40 = vpop.f32.mrb[190].mxu0  ;;  %16993 = vmatpush3.bf16.msra.mxu0 %v16990_v2 }
0x111e   : > { %v6814_v8 = vpop.f32.mrb[191].mxu0  ;;  %16995 = vmatprep.subr.bf16.mxu0 %v16994_v30 }
0x111f   : > { %15075 = vmatprep.mubr.msk.f32.mxu0 %vm2741_vm4, %v6814_v8 }
0x1120   : > { %15076 = vmatmul.mubr.msk.f32.gmra.mrb[94].mxu0 %vm2741_vm4, %v15045_v40 }
0x1121   : > { %16997 = vmatpush3.bf16.msra.mxu0 %v16994_v30  ;;  %15166 = vmatprep.mubr.f32.mxu0 %v18316_v47 }
0x1124   : > { %15167 = vmatmul.mubr.f32.vlgmr.msra.gmra.mrb[192].mxu0 %v18317_v59 }
0x1125   : > { %15169 = vmatprep.mubr.f32.mxu0 %v18318_v12 }
0x1128   : > { %15170 = vmatmul.mubr.f32.gmra.mrb[194].mxu0 %v18319_v38 }
0x1129   : > { %15172 = vmatprep.mubr.f32.mxu0 %v18320_v36 }
0x112c   : > { %15173 = vmatmul.mubr.f32.gmra.mrb[196].mxu0 %v18321_v10 }
0x112d   : > { %15175 = vmatprep.mubr.f32.mxu0 %v18322_v22 }
0x1130   : > { %15176 = vmatmul.mubr.f32.gmra.mrb[198].mxu0 %v18323_v35 }
0x1131   : > { %15178 = vmatprep.mubr.f32.mxu0 %v18324_v37 }
0x1134   : > { %15179 = vmatmul.mubr.f32.gmra.mrb[200].mxu0 %v18325_v25 }
0x1135   : > { %15181 = vmatprep.mubr.f32.mxu0 %v18326_v60 }
0x1138   : > { %15182 = vmatmul.mubr.f32.gmra.mrb[202].mxu0 %v18327_v42 }
0x1139   : > { %15184 = vmatprep.mubr.f32.mxu0 %v18328_v1 }
0x113b   : > { %v15112_v63 = vpop.f32.mrb[224].mxu1 }
0x113c   : > { %15185 = vmatmul.mubr.f32.gmra.mrb[204].mxu0 %v18329_v62  ;;  %v21653_v33 = vadd.f32 %v15112_v63, %v11715_v7  ;;  %v7128_v41 = vpop.f32.mrb[225].mxu1 }
0x113d   : > { %15187 = vmatprep.mubr.f32.mxu0 %v18330_v46  ;;  %v7129_v34 = vadd.f32 %v11715_v7, %v7128_v41 }
0x113f   : > { %v15115_v9 = vpop.f32.mrb[226].mxu1 }
0x1140   : > { %15188 = vmatmul.mubr.f32.gmra.mrb[206].mxu0 %v18331_v49  ;;  %v21655_v3 = vadd.f32 %v15115_v9, %v11715_v7  ;;  %v7138_v6 = vpop.f32.mrb[227].mxu1 }
0x1141   : > { %15278 = vmatprep.mubr.msk.f32.mxu0 %vm1057_vm0, %v7129_v34  ;;  %v21658_v31 = vadd.f32 %v11715_v7, %v7138_v6 }
0x1143   : > { %v15118_v45 = vpop.f32.mrb[228].mxu1 }
0x1144   : > { %v21660_v5 = vadd.f32 %v15118_v45, %v11715_v7  ;;  %v7148_v16 = vpop.f32.mrb[229].mxu1 }
0x1145   : > { %v21662_v18 = vadd.f32 %v11715_v7, %v7148_v16 }
0x1147   : > { %v15121_v39 = vpop.f32.mrb[230].mxu1 }
0x1148   : > { %v21664_v44 = vadd.f32 %v15121_v39, %v11715_v7  ;;  %v7158_v0 = vpop.f32.mrb[231].mxu1 }
0x1149   : > { %v21666_v27 = vadd.f32 %v11715_v7, %v7158_v0 }
0x114b   : > { %v15124_v21 = vpop.f32.mrb[232].mxu1 }
0x114c   : > { %v21668_v17 = vadd.f32 %v15124_v21, %v11715_v7  ;;  %v7168_v19 = vpop.f32.mrb[233].mxu1 }
0x114d   : > { %v21670_v26 = vadd.f32 %v11715_v7, %v7168_v19 }
0x114f   : > { %v15127_v23 = vpop.f32.mrb[234].mxu1 }
0x1150   : > { %v21672_v29 = vadd.f32 %v15127_v23, %v11715_v7  ;;  %v7178_v14 = vpop.f32.mrb[235].mxu1  ;;  %v11740_v23 = vld [vmem:[%s23183_s8 + $0x2b0] sm:$0xff] }
0x1151   : > { %v21674_v55 = vadd.f32 %v11715_v7, %v7178_v14 }
0x1153   : > { %v15130_v50 = vpop.f32.mrb[236].mxu1 }
0x1154   : > { %v21676_v24 = vadd.f32 %v15130_v50, %v11715_v7  ;;  %v7188_v52 = vpop.f32.mrb[237].mxu1  ;;  %v11743_v50 = vld [vmem:[%s23183_s8 + $0x2c8] sm:$0xff] }
0x1155   : > { %v21678_v20 = vadd.f32 %v11715_v7, %v7188_v52  ;;  %v11744_v52 = vld [vmem:[%s23183_s8 + $0x2d0] sm:$0xff] }
0x1157   : > { %v15133_v56 = vpop.f32.mrb[238].mxu1 }
0x1158   : > { %v21680_v15 = vadd.f32 %v15133_v56, %v11715_v7  ;;  %v7198_v4 = vpop.f32.mrb[239].mxu1 }
0x1159   : > { %v21682_v13 = vadd.f32 %v11715_v7, %v7198_v4  ;;  %v11747_v4 = vld [vmem:[%s23183_s8 + $0x2e8] sm:$0xff] }
0x11f7   : > { %v15168_v43 = vpop.f32.mrb[192].mxu0 }
0x11f8   : > { %v7304_v53 = vadd.f32 %v15168_v43, %v11733_v48  ;;  %v7298_v11 = vpop.f32.mrb[193].mxu0  ;;  %v11749_v43 = vld [vmem:[%s23183_s8 + $0x2f8] sm:$0xff] }
0x11f9   : > { %v7299_v51 = vadd.f32 %v11733_v48, %v7298_v11  ;;  %v18332_v11 = vld [vmem:[%s18984_s25 + $0x8] sm:$0xff] }
0x11fb   : > { %v17030_v2 = vpack.c.bf16 %v7304_v53, %v7299_v51  ;;  %v15171_v57 = vpop.f32.mrb[194].mxu0  ;;  %v18333_v51 = vld [vmem:[%s18984_s25 + $0x10] sm:$0xff] }
0x11fc   : > { %v7314_v28 = vadd.f32 %v15171_v57, %v11733_v48  ;;  %v7308_v61 = vpop.f32.mrb[195].mxu0  ;;  %v18335_v57 = vld [vmem:[%s18984_s25 + $0x20] sm:$0xff] }
0x11fd   : > { %17032 = vmatprep.subr.msk.bf16.mxu0 %vm18895_vm1, %v17030_v2  ;;  %v7309_v32 = vadd.f32 %v11733_v48, %v7308_v61  ;;  %v18337_v61 = vld [vmem:[%s18984_s25 + $0x30] sm:$0xff] }
0x11fe   : > { %17035 = vmatpush3.bf16.xpose.msk.msra.mxu0 %vm18895_vm1, %v17030_v2  ;;  %v18334_v2 = vld [vmem:[%s18984_s25 + $0x18] sm:$0xff] }
0x11ff   : > { %v17036_v30 = vpack.c.bf16 %v7314_v28, %v7309_v32  ;;  %v15174_v40 = vpop.f32.mrb[196].mxu0  ;;  %v18336_v28 = vld [vmem:[%s18984_s25 + $0x28] sm:$0xff]  ;;  %v18338_v32 = vld [vmem:[%s18984_s25 + $0x38] sm:$0xff] }
0x1200   : > { %v7324_v8 = vadd.f32 %v15174_v40, %v11733_v48  ;;  %v7318_v47 = vpop.f32.mrb[197].mxu0  ;;  %v18340_v40 = vld [vmem:[%s18984_s25 + $0x48] sm:$0xff] }
0x1201   : > { %17038 = vmatprep.subr.msk.bf16.mxu0 %vm18895_vm1, %v17036_v30  ;;  %v7319_v59 = vadd.f32 %v11733_v48, %v7318_v47  ;;  %v18342_v47 = vld [vmem:[%s18984_s25 + $0x58] sm:$0xff] }
0x1203   : > { %v17042_v12 = vpack.c.bf16 %v7324_v8, %v7319_v59  ;;  %v15177_v38 = vpop.f32.mrb[198].mxu0  ;;  %v18341_v8 = vld [vmem:[%s18984_s25 + $0x50] sm:$0xff]  ;;  %v18343_v59 = vld [vmem:[%s18984_s25 + $0x60] sm:$0xff] }
0x1204   : > { %v7334_v36 = vadd.f32 %v15177_v38, %v11733_v48  ;;  %v7328_v10 = vpop.f32.mrb[199].mxu0  ;;  %v18345_v38 = vld [vmem:[%s18984_s25 + $0x70] sm:$0xff] }
0x1205   : > { %v7329_v22 = vadd.f32 %v11733_v48, %v7328_v10 }
0x1206   : > { %17041 = vmatpush3.bf16.xpose.msk.msra.mxu0 %vm18895_vm1, %v17036_v30  ;;  %v18339_v30 = vld [vmem:[%s18984_s25 + $0x40] sm:$0xff] }
0x1207   : > { %17044 = vmatprep.subr.msk.bf16.mxu0 %vm18895_vm1, %v17042_v12  ;;  %v17048_v35 = vpack.c.bf16 %v7334_v36, %v7329_v22  ;;  %v15180_v37 = vpop.f32.mrb[200].mxu0  ;;  %v18346_v36 = vld [vmem:[%s18984_s25 + $0x78] sm:$0xff] }
0x1208   : > { %v7344_v25 = vadd.f32 %v15180_v37, %v11733_v48  ;;  %v7338_v60 = vpop.f32.mrb[201].mxu0 }
0x1209   : > { %v7339_v42 = vadd.f32 %v11733_v48, %v7338_v60 }
0x120b   : > { %v17054_v1 = vpack.c.bf16 %v7344_v25, %v7339_v42  ;;  %v15183_v62 = vpop.f32.mrb[202].mxu0 }
0x120c   : > { %v7354_v46 = vadd.f32 %v15183_v62, %v11733_v48  ;;  %v7348_v49 = vpop.f32.mrb[203].mxu0 }
0x120d   : > { %v7349_v63 = vadd.f32 %v11733_v48, %v7348_v49 }
0x120e   : > { %17047 = vmatpush3.bf16.xpose.msk.msra.mxu0 %vm18895_vm1, %v17042_v12  ;;  %v18344_v12 = vld [vmem:[%s18984_s25 + $0x68] sm:$0xff] }
0x120f   : > { %17050 = vmatprep.subr.msk.bf16.mxu0 %vm18895_vm1, %v17048_v35  ;;  %v17060_v7 = vpack.c.bf16 %v7354_v46, %v7349_v63  ;;  %v15186_v41 = vpop.f32.mrb[204].mxu0 }
0x1210   : > { %v7364_v34 = vadd.f32 %v15186_v41, %v11733_v48  ;;  %v7358_v9 = vpop.f32.mrb[205].mxu0 }
0x1211   : > { %v7359_v6 = vadd.f32 %v11733_v48, %v7358_v9 }
0x1213   : > { %v17066_v45 = vpack.c.bf16 %v7364_v34, %v7359_v6  ;;  %v15189_v16 = vpop.f32.mrb[206].mxu0 }
0x1214   : > { %v7374_v39 = vadd.f32 %v15189_v16, %v11733_v48  ;;  %v7368_v0 = vpop.f32.mrb[207].mxu0 }
0x1215   : > { %v7369_v21 = vadd.f32 %v11733_v48, %v7368_v0  ;;  %v11748_v48 = vld [vmem:[%s23183_s8 + $0x2f0] sm:$0xff] }
0x1216   : > { %17053 = vmatpush3.bf16.xpose.msk.msra.mxu0 %vm18895_vm1, %v17048_v35  ;;  %v17026_v53 = vpack.c.bf16 %v11749_v43, %v11748_v48 }
0x1217   : > { %17056 = vmatprep.subr.msk.bf16.mxu0 %vm18895_vm1, %v17054_v1  ;;  %v17072_v19 = vpack.c.bf16 %v7374_v39, %v7369_v21 }
0x121e   : > { %17059 = vmatpush3.bf16.xpose.msk.msra.mxu0 %vm18895_vm1, %v17054_v1 }
0x121f   : > { %17062 = vmatprep.subr.msk.bf16.mxu0 %vm18895_vm1, %v17060_v7 }
0x1226   : > { %17065 = vmatpush3.bf16.xpose.msk.msra.mxu0 %vm18895_vm1, %v17060_v7 }
0x1227   : > { %17068 = vmatprep.subr.msk.bf16.mxu0 %vm18895_vm1, %v17066_v45 }
0x122e   : > { %17071 = vmatpush3.bf16.xpose.msk.msra.mxu0 %vm18895_vm1, %v17066_v45 }
0x122f   : > { %17074 = vmatprep.subr.msk.bf16.mxu0 %vm18895_vm1, %v17072_v19 }
0x1236   : > { %17077 = vmatpush3.bf16.xpose.msk.msra.mxu0 %vm18895_vm1, %v17072_v19 }
0x123d   : > { %15279 = vmatmul.mubr.msk.f32.vlgmr.msra.gmra.mrb[208].mxu0 %vm1057_vm0, %v21653_v33  ;;  %v11734_v33 = vld [vmem:[%s23183_s8 + $0x280] sm:$0xff] }
0x123e   : > { %15281 = vmatprep.mubr.msk.f32.mxu0 %vm1057_vm0, %v21658_v31  ;;  %v11736_v31 = vld [vmem:[%s23183_s8 + $0x290] sm:$0xff] }
0x1241   : > { %15282 = vmatmul.mubr.msk.f32.gmra.mrb[210].mxu0 %vm1057_vm0, %v21655_v3  ;;  %v11735_v3 = vld [vmem:[%s23183_s8 + $0x288] sm:$0xff] }
0x1242   : > { %15284 = vmatprep.mubr.msk.f32.mxu0 %vm1057_vm0, %v21662_v18  ;;  %v11737_v18 = vld [vmem:[%s23183_s8 + $0x298] sm:$0xff] }
0x1245   : > { %15285 = vmatmul.mubr.msk.f32.gmra.mrb[212].mxu0 %vm1057_vm0, %v21660_v5  ;;  %v16998_v5 = vpack.c.bf16 %v11735_v3, %v11734_v33 }
0x1246   : > { %15287 = vmatprep.mubr.msk.f32.mxu0 %vm1057_vm0, %v21666_v27  ;;  %v11738_v27 = vld [vmem:[%s23183_s8 + $0x2a0] sm:$0xff] }
0x1247   : > { %16999 = vmatprep.subr.bf16.mxu1 %v16998_v5 }
0x1248   : > { %17001 = vmatpush3.bf16.msra.mxu1 %v16998_v5 }
0x1249   : > { %15288 = vmatmul.mubr.msk.f32.gmra.mrb[214].mxu0 %vm1057_vm0, %v21664_v44  ;;  %v17002_v44 = vpack.c.bf16 %v11737_v18, %v11736_v31 }
0x124a   : > { %15290 = vmatprep.mubr.msk.f32.mxu0 %vm1057_vm0, %v21670_v26 }
0x124b   : > { %17003 = vmatprep.subr.bf16.mxu1 %v17002_v44 }
0x124c   : > { %17005 = vmatpush3.bf16.msra.mxu1 %v17002_v44 }
0x124d   : > { %15291 = vmatmul.mubr.msk.f32.gmra.mrb[216].mxu0 %vm1057_vm0, %v21668_v17  ;;  %v11739_v17 = vld [vmem:[%s23183_s8 + $0x2a8] sm:$0xff] }
0x124e   : > { %15293 = vmatprep.mubr.msk.f32.mxu0 %vm1057_vm0, %v21674_v55  ;;  %v17006_v26 = vpack.c.bf16 %v11739_v17, %v11738_v27  ;;  %v11742_v55 = vld [vmem:[%s23183_s8 + $0x2c0] sm:$0xff] }
0x1250   : > { %17007 = vmatprep.subr.bf16.mxu1 %v17006_v26 }
0x1251   : > { %15294 = vmatmul.mubr.msk.f32.gmra.mrb[218].mxu0 %vm1057_vm0, %v21672_v29  ;;  %v11741_v29 = vld [vmem:[%s23183_s8 + $0x2b8] sm:$0xff]  ;;  %17009 = vmatpush3.bf16.msra.mxu1 %v17006_v26 }
0x1252   : > { %15296 = vmatprep.mubr.msk.f32.mxu0 %vm1057_vm0, %v21678_v20  ;;  %v17010_v14 = vpack.c.bf16 %v11741_v29, %v11740_v23  ;;  %v11745_v20 = vld [vmem:[%s23183_s8 + $0x2d8] sm:$0xff] }
0x1253   : > { %v17018_v56 = vpack.c.bf16 %v11745_v20, %v11744_v52 }
0x1254   : > { %17011 = vmatprep.subr.bf16.mxu1 %v17010_v14 }
0x1255   : > { %15297 = vmatmul.mubr.msk.f32.gmra.mrb[220].mxu0 %vm1057_vm0, %v21676_v24  ;;  %v17014_v24 = vpack.c.bf16 %v11743_v50, %v11742_v55  ;;  %17013 = vmatpush3.bf16.msra.mxu1 %v17010_v14 }
0x1256   : > { %15299 = vmatprep.mubr.msk.f32.mxu0 %vm1057_vm0, %v21682_v13 }
0x1257   : > { %17015 = vmatprep.subr.bf16.mxu1 %v17014_v24 }
0x1259   : > { %15300 = vmatmul.mubr.msk.f32.gmra.mrb[222].mxu0 %vm1057_vm0, %v21680_v15  ;;  %v11746_v15 = vld [vmem:[%s23183_s8 + $0x2e0] sm:$0xff]  ;;  %17017 = vmatpush3.bf16.msra.mxu1 %v17014_v24 }
0x125a   : > { %17019 = vmatprep.subr.bf16.mxu1 %v17018_v56  ;;  %v17022_v13 = vpack.c.bf16 %v11747_v4, %v11746_v15 }
0x125d   : > { %17021 = vmatpush3.bf16.msra.mxu1 %v17018_v56 }
0x125e   : > { %17023 = vmatprep.subr.bf16.mxu1 %v17022_v13 }
0x1261   : > { %17025 = vmatpush3.bf16.msra.mxu1 %v17022_v13 }
0x1262   : > { %17027 = vmatprep.subr.bf16.mxu1 %v17026_v53 }
0x1265   : > { %17029 = vmatpush3.bf16.msra.mxu1 %v17026_v53 }
0x1268   : > { %15223 = vmatmul.mubr.f32.vlgmr.msra.gmra.mrb[240].mxu1 %v18332_v11 }
0x1269   : > { %15225 = vmatprep.mubr.f32.mxu1 %v18333_v51 }
0x126c   : > { %15226 = vmatmul.mubr.f32.gmra.mrb[242].mxu1 %v18334_v2 }
0x126d   : > { %15228 = vmatprep.mubr.f32.mxu1 %v18335_v57 }
0x1270   : > { %15229 = vmatmul.mubr.f32.gmra.mrb[244].mxu1 %v18336_v28 }
0x1271   : > { %15231 = vmatprep.mubr.f32.mxu1 %v18337_v61 }
0x1274   : > { %15232 = vmatmul.mubr.f32.gmra.mrb[246].mxu1 %v18338_v32 }
0x1275   : > { %15234 = vmatprep.mubr.f32.mxu1 %v18339_v30 }
0x1278   : > { %15235 = vmatmul.mubr.f32.gmra.mrb[248].mxu1 %v18340_v40  ;;  %v21893_v40 = vld [vmem:[%s23184_s9 + $0x5] ss:$0 sm:$0xff] }
0x1279   : > { %15237 = vmatprep.mubr.f32.mxu1 %v18341_v8 }
0x127c   : > { %15238 = vmatmul.mubr.f32.gmra.mrb[250].mxu1 %v18342_v47 }
0x127d   : > { %15240 = vmatprep.mubr.f32.mxu1 %v18343_v59 }
0x1280   : > { %15241 = vmatmul.mubr.f32.gmra.mrb[252].mxu1 %v18344_v12 }
0x1281   : > { %15243 = vmatprep.mubr.f32.mxu1 %v18345_v38 }
0x1284   : > { %15244 = vmatmul.mubr.f32.gmra.mrb[254].mxu1 %v18346_v36 }
0x1310   : > { %v15280_v10 = vpop.f32.mrb[208].mxu0 }
0x1311   : > { %v7789_v22 = vmul.f32 0.28867513, %v15280_v10  ;;  %v7709_v35 = vpop.f32.mrb[209].mxu0 }
0x1312   : > { %v7788_v37 = vmul.f32 0.28867513, %v7709_v35 }
0x1313   : > { %v21814_v25 = vsel %vm1321_vm3, -1e+09, %v7789_v22 }
0x1314   : > { %7822 = vmax.xlane.f32.xlu1 %v21814_v25  ;;  %v15283_v60 = vpop.f32.mrb[210].mxu0  ;;  %v7804_v42 = vsel %vm1321_vm3, -1e+09, %v7788_v37 }
0x1315   : > { %v7791_v1 = vmul.f32 0.28867513, %v15283_v60  ;;  %7820 = vmax.xlane.f32.xlu0 %v7804_v42  ;;  %v7719_v62 = vpop.f32.mrb[211].mxu0 }
0x1316   : > { %v7790_v46 = vmul.f32 0.28867513, %v7719_v62 }
0x1317   : > { %v21821_v49 = vsel %vm1321_vm3, -1e+09, %v7791_v1 }
0x1318   : > { %7826 = vmax.xlane.f32.xlu1 %v21821_v49  ;;  %v15286_v63 = vpop.f32.mrb[212].mxu0  ;;  %v21826_v7 = vsel %vm1321_vm3, -1e+09, %v7790_v46 }
0x1319   : > { %v7793_v41 = vmul.f32 0.28867513, %v15286_v63  ;;  %7824 = vmax.xlane.f32.xlu0 %v21826_v7  ;;  %v7729_v34 = vpop.f32.mrb[213].mxu0 }
0x131a   : > { %v7792_v9 = vmul.f32 0.28867513, %v7729_v34 }
0x131b   : > { %v21831_v6 = vsel %vm1321_vm3, -1e+09, %v7793_v41 }
0x131c   : > { %7830 = vmax.xlane.f32.xlu1 %v21831_v6  ;;  %v15289_v45 = vpop.f32.mrb[214].mxu0  ;;  %v21836_v16 = vsel %vm1321_vm3, -1e+09, %v7792_v9 }
0x131d   : > { %v7795_v39 = vmul.f32 0.28867513, %v15289_v45  ;;  %7828 = vmax.xlane.f32.xlu0 %v21836_v16  ;;  %v7739_v0 = vpop.f32.mrb[215].mxu0 }
0x131e   : > { %v7794_v21 = vmul.f32 0.28867513, %v7739_v0 }
0x131f   : > { %v21841_v19 = vsel %vm1321_vm3, -1e+09, %v7795_v39 }
0x1320   : > { %7834 = vmax.xlane.f32.xlu1 %v21841_v19  ;;  %v15292_v33 = vpop.f32.mrb[216].mxu0  ;;  %v21846_v3 = vsel %vm1321_vm3, -1e+09, %v7794_v21 }
0x1321   : > { %v7797_v31 = vmul.f32 0.28867513, %v15292_v33  ;;  %7832 = vmax.xlane.f32.xlu0 %v21846_v3  ;;  %v7749_v5 = vpop.f32.mrb[217].mxu0 }
0x1322   : > { %v7796_v18 = vmul.f32 0.28867513, %v7749_v5 }
0x1323   : > { %v21851_v44 = vsel %vm1321_vm3, -1e+09, %v7797_v31 }
0x1324   : > { %7838 = vmax.xlane.f32.xlu1 %v21851_v44  ;;  %v15295_v27 = vpop.f32.mrb[218].mxu0  ;;  %v21856_v17 = vsel %vm1321_vm3, -1e+09, %v7796_v18 }
0x1325   : > { %v7799_v26 = vmul.f32 0.28867513, %v15295_v27  ;;  %7836 = vmax.xlane.f32.xlu0 %v21856_v17  ;;  %v7759_v23 = vpop.f32.mrb[219].mxu0 }
0x1326   : > { %v7798_v29 = vmul.f32 0.28867513, %v7759_v23 }
0x1327   : > { %v21861_v14 = vsel %vm1321_vm3, -1e+09, %v7799_v26 }
0x1328   : > { %7842 = vmax.xlane.f32.xlu1 %v21861_v14  ;;  %v15298_v55 = vpop.f32.mrb[220].mxu0  ;;  %v21866_v50 = vsel %vm1321_vm3, -1e+09, %v7798_v29 }
0x1329   : > { %v7801_v24 = vmul.f32 0.28867513, %v15298_v55  ;;  %7840 = vmax.xlane.f32.xlu0 %v21866_v50  ;;  %v7769_v52 = vpop.f32.mrb[221].mxu0 }
0x132a   : > { %v7800_v20 = vmul.f32 0.28867513, %v7769_v52 }
0x132b   : > { %v21871_v56 = vsel %vm1321_vm3, -1e+09, %v7801_v24 }
0x132c   : > { %7846 = vmax.xlane.f32.xlu1 %v21871_v56  ;;  %v15301_v15 = vpop.f32.mrb[222].mxu0  ;;  %v21876_v4 = vsel %vm1321_vm3, -1e+09, %v7800_v20 }
0x132d   : > { %v7803_v13 = vmul.f32 0.28867513, %v15301_v15  ;;  %7844 = vmax.xlane.f32.xlu0 %v21876_v4  ;;  %v7779_v48 = vpop.f32.mrb[223].mxu0 }
0x132e   : > { %v7802_v43 = vmul.f32 0.28867513, %v7779_v48 }
0x132f   : > { %v21881_v53 = vsel %vm1321_vm3, -1e+09, %v7803_v13 }
0x1330   : > { %7850 = vmax.xlane.f32.xlu1 %v21881_v53  ;;  %v21886_v11 = vsel %vm1321_vm3, -1e+09, %v7802_v43 }
0x1331   : > { %7848 = vmax.xlane.f32.xlu0 %v21886_v11 }
0x133b   : > { %v15224_v12 = vpop.f32.mrb[240].mxu1 }
0x133c   : > { %v7474_v36 = vadd.f32 %v15224_v12, %v21893_v40  ;;  %v7468_v10 = vpop.f32.mrb[241].mxu1 }
0x133d   : > { %v7469_v37 = vadd.f32 %v21893_v40, %v7468_v10 }
0x133f   : > { %v17078_v1 = vpack.c.bf16 %v7474_v36, %v7469_v37  ;;  %v15227_v62 = vpop.f32.mrb[242].mxu1 }
0x1340   : > { %v7478_v63 = vpop.f32.mrb[243].mxu1 }
0x1341   : > { %v7479_v34 = vadd.f32 %v21893_v40, %v7478_v63  ;;  %17079 = vmatprep.subr.bf16.mxu1 %v17078_v1 }
0x1342   : > { %17081 = vmatpush3.bf16.msra.mxu1 %v17078_v1 }
0x1343   : > { %v15230_v39 = vpop.f32.mrb[244].mxu1 }
0x1344   : > { %v7494_v33 = vadd.f32 %v15230_v39, %v21893_v40  ;;  %v7488_v31 = vpop.f32.mrb[245].mxu1 }
0x1347   : > { %v15233_v55 = vpop.f32.mrb[246].mxu1 }
0x1348   : > { %v7504_v20 = vadd.f32 %v15233_v55, %v21893_v40  ;;  %v7498_v15 = vpop.f32.mrb[247].mxu1 }
0x13a1   : > { %v7823_v51 = vpop.xlane.xlu1 %7822 }
0x13a2   : > { %v7853_v2 = vsub.f32 %v21814_v25, %v7823_v51  ;;  %v7821_v57 = vpop.xlane.xlu0 %7820 }
0x13a3   : > { %v7852_v28 = vsub.f32 %v7804_v42, %v7821_v57 }
0x13a4   : > { %v7870_v61 = vmul.f32 1.442695, %v7853_v2 }
0x13a5   : > { %v7868_v32 = vmul.f32 1.442695, %v7852_v28  ;;  %v7827_v30 = vpop.xlane.xlu1 %7826  ;;  %v15236_v28 = vpop.f32.mrb[248].mxu1 }
0x13a6   : > { %17965 = vpow2.f32 %v7870_v61  ;;  %v7855_v8 = vsub.f32 %v21821_v49, %v7827_v30  ;;  %v7825_v47 = vpop.xlane.xlu0 %7824  ;;  %v7484_v49 = vadd.f32 %v15227_v62, %v21893_v40  ;;  %v7514_v30 = vadd.f32 %v15236_v28, %v21893_v40 }
0x13a7   : > { %17967 = vpow2.f32 %v7868_v32  ;;  %v7854_v59 = vsub.f32 %v21826_v7, %v7825_v47 }
0x13a8   : > { %v7874_v38 = vmul.f32 1.442695, %v7855_v8  ;;  %v7508_v8 = vpop.f32.mrb[249].mxu1 }
0x13a9   : > { %v7872_v22 = vmul.f32 1.442695, %v7854_v59  ;;  %v7831_v35 = vpop.xlane.xlu1 %7830 }
0x13aa   : > { %17969 = vpow2.f32 %v7874_v38  ;;  %v7857_v25 = vsub.f32 %v21831_v6, %v7831_v35  ;;  %v7829_v60 = vpop.xlane.xlu0 %7828 }
0x13ab   : > { %17971 = vpow2.f32 %v7872_v22  ;;  %v7856_v42 = vsub.f32 %v21836_v16, %v7829_v60  ;;  %v17082_v16 = vpack.c.bf16 %v7484_v49, %v7479_v34  ;;  %v15239_v22 = vpop.f32.mrb[250].mxu1 }
0x13ac   : > { %v7878_v46 = vmul.f32 1.442695, %v7857_v25  ;;  %v7524_v25 = vadd.f32 %v15239_v22, %v21893_v40  ;;  %v7518_v60 = vpop.f32.mrb[251].mxu1 }
0x13ad   : > { %v7876_v7 = vmul.f32 1.442695, %v7856_v42  ;;  %v7835_v41 = vpop.xlane.xlu1 %7834  ;;  %17083 = vmatprep.subr.bf16.mxu1 %v17082_v16  ;;  %v7519_v62 = vadd.f32 %v21893_v40, %v7518_v60 }
0x13ae   : > { %17973 = vpow2.f32 %v7878_v46  ;;  %v7859_v9 = vsub.f32 %v21841_v19, %v7835_v41  ;;  %v7833_v45 = vpop.xlane.xlu0 %7832  ;;  %v7489_v19 = vadd.f32 %v21893_v40, %v7488_v31  ;;  %17085 = vmatpush3.bf16.msra.mxu1 %v17082_v16 }
0x13af   : > { %17975 = vpow2.f32 %v7876_v7  ;;  %v7858_v6 = vsub.f32 %v21846_v3, %v7833_v45  ;;  %v17098_v63 = vpack.c.bf16 %v7524_v25, %v7519_v62  ;;  %v15242_v7 = vpop.f32.mrb[252].mxu1  ;;  %v11824_v25 = vld [vmem:[%s23179_s4 + $0x320] sm:$0xff] }
0x13b0   : > { %v21905_v0 = vpop.eup %17965  ;;  %v7882_v21 = vmul.f32 1.442695, %v7859_v9  ;;  %v17086_v29 = vpack.c.bf16 %v7494_v33, %v7489_v19  ;;  %v7534_v9 = vadd.f32 %v15242_v7, %v21893_v40  ;;  %v7528_v45 = vpop.f32.mrb[253].mxu1 }
0x13b1   : > { %v21908_v5 = vpop.eup %17967  ;;  %v7880_v18 = vmul.f32 1.442695, %v7858_v6  ;;  %v7839_v27 = vpop.xlane.xlu1 %7838  ;;  %7902 = vadd.xlane.f32.xlu1 %v21905_v0 }
0x13b2   : > { %17977 = vpow2.f32 %v7882_v21  ;;  %v7861_v3 = vsub.f32 %v21851_v44, %v7839_v27  ;;  %v7837_v26 = vpop.xlane.xlu0 %7836  ;;  %7900 = vadd.xlane.f32.xlu0 %v21908_v5  ;;  %v7499_v44 = vadd.f32 %v21893_v40, %v7498_v15  ;;  %17087 = vmatprep.subr.bf16.mxu1 %v17086_v29  ;;  %v15245_v39 = vpop.f32.mrb[254].mxu1  ;;  %v11801_v15 = vld [vmem:[%s23185_s10 + $0xa8] sm:$0xff] }
0x13b3   : > { %17979 = vpow2.f32 %v7880_v18  ;;  %v7860_v23 = vsub.f32 %v21856_v17, %v7837_v26  ;;  %17089 = vmatpush3.bf16.msra.mxu1 %v17086_v29  ;;  %v7538_v33 = vpop.f32.mrb[255].mxu1  ;;  %v7544_v18 = vadd.f32 %v15245_v39, %v21893_v40  ;;  %v11821_v29 = vld [vmem:[%s23179_s4 + $0x308] sm:$0xff] }
0x13b4   : > { %v21915_v24 = vpop.eup %17969  ;;  %v7886_v52 = vmul.f32 1.442695, %v7861_v3  ;;  %v17090_v57 = vpack.c.bf16 %v7504_v20, %v7499_v44  ;;  %v7539_v27 = vadd.f32 %v21893_v40, %v7538_v33  ;;  %v11800_v20 = vld [vmem:[%s23185_s10 + $0xa0] sm:$0xff]  ;;  %v11803_v44 = vld [vmem:[%s23185_s10 + $0xb8] sm:$0xff] }
0x13b5   : > { %v21918_v13 = vpop.eup %17971  ;;  %v7884_v48 = vmul.f32 1.442695, %v7860_v23  ;;  %v7843_v43 = vpop.xlane.xlu1 %7842  ;;  %7906 = vadd.xlane.f32.xlu1 %v21915_v24 }
0x13b6   : > { %17981 = vpow2.f32 %v7886_v52  ;;  %v7863_v17 = vsub.f32 %v21861_v14, %v7843_v43  ;;  %v7841_v51 = vpop.xlane.xlu0 %7840  ;;  %7904 = vadd.xlane.f32.xlu0 %v21918_v13  ;;  %v7509_v14 = vadd.f32 %v21893_v40, %v7508_v8  ;;  %17091 = vmatprep.subr.bf16.mxu1 %v17090_v57  ;;  %v17106_v19 = vpack.c.bf16 %v7544_v18, %v7539_v27 }
0x13b7   : > { %17983 = vpow2.f32 %v7884_v48  ;;  %v7862_v2 = vsub.f32 %v21866_v50, %v7841_v51  ;;  %17093 = vmatpush3.bf16.msra.mxu1 %v17090_v57  ;;  %v11802_v48 = vld [vmem:[%s23185_s10 + $0xb0] sm:$0xff]  ;;  %v17110_v43 = vpack.c.bf16 %v11801_v15, %v11800_v20 }
0x13b8   : > { %v21925_v61 = vpop.eup %17973  ;;  %v7890_v32 = vmul.f32 1.442695, %v7863_v17  ;;  %v17094_v10 = vpack.c.bf16 %v7514_v30, %v7509_v14  ;;  %v17114_v17 = vpack.c.bf16 %v11803_v44, %v11802_v48  ;;  %v11833_v44 = vld [vmem:[%s23179_s4 + $0x368] sm:$0xff] }
0x13b9   : > { %v21928_v47 = vpop.eup %17975  ;;  %v7888_v59 = vmul.f32 1.442695, %v7862_v2  ;;  %v7847_v12 = vpop.xlane.xlu1 %7846  ;;  %7910 = vadd.xlane.f32.xlu1 %v21925_v61  ;;  %17111 = vmatprep.subr.bf16.mxu0 %v17110_v43 }
0x13ba   : > { %17985 = vpow2.f32 %v7890_v32  ;;  %v7865_v50 = vsub.f32 %v21871_v56, %v7847_v12  ;;  %v7845_v38 = vpop.xlane.xlu0 %7844  ;;  %7908 = vadd.xlane.f32.xlu0 %v21928_v47  ;;  %17095 = vmatprep.subr.bf16.mxu1 %v17094_v10  ;;  %v11823_v12 = vld [vmem:[%s23179_s4 + $0x318] sm:$0xff] }
0x13bb   : > { %17987 = vpow2.f32 %v7888_v59  ;;  %v7864_v36 = vsub.f32 %v21876_v4, %v7845_v38  ;;  %17097 = vmatpush3.bf16.msra.mxu1 %v17094_v10  ;;  %17113 = vmatpush3.bf16.msra.mxu0 %v17110_v43  ;;  %v11822_v59 = vld [vmem:[%s23179_s4 + $0x310] sm:$0xff] }
0x13bc   : > { %v21935_v35 = vpop.eup %17977  ;;  %v7894_v37 = vmul.f32 1.442695, %v7865_v50  ;;  %17099 = vmatprep.subr.bf16.mxu1 %v17098_v63  ;;  %17115 = vmatprep.subr.bf16.mxu0 %v17114_v17  ;;  %v17122_v22 = vpack.c.bf16 %v11823_v12, %v11822_v59  ;;  %v11838_v12 = vld [vmem:[%s23181_s6 + $0x300] sm:$0xff] }
0x13bd   : > { %v21938_v42 = vpop.eup %17979  ;;  %v7892_v1 = vmul.f32 1.442695, %v7864_v36  ;;  %7914 = vadd.xlane.f32.xlu1 %v21935_v35  ;;  %v7851_v56 = vpop.xlane.xlu1 %7850 }
0x13be   : > { %17989 = vpow2.f32 %v7894_v37  ;;  %v7867_v4 = vsub.f32 %v21881_v53, %v7851_v56  ;;  %7912 = vadd.xlane.f32.xlu0 %v21938_v42  ;;  %v7849_v46 = vpop.xlane.xlu0 %7848  ;;  %v7529_v53 = vadd.f32 %v21893_v40, %v7528_v45  ;;  %v11820_v40 = vld [vmem:[%s23179_s4 + $0x300] sm:$0xff] }
0x13bf   : > { %17991 = vpow2.f32 %v7892_v1  ;;  %v7866_v49 = vsub.f32 %v21886_v11, %v7849_v46  ;;  %17101 = vmatpush3.bf16.msra.mxu1 %v17098_v63  ;;  %v17118_v52 = vpack.c.bf16 %v11821_v29, %v11820_v40  ;;  %17117 = vmatpush3.bf16.msra.mxu0 %v17114_v17  ;;  %v11831_v40 = vld [vmem:[%s23179_s4 + $0x358] sm:$0xff] }
0x13c0   : > { %v21945_v41 = vpop.eup %17981  ;;  %v7898_v34 = vmul.f32 1.442695, %v7867_v4  ;;  %v17102_v11 = vpack.c.bf16 %v7534_v9, %v7529_v53  ;;  %v11829_v53 = vld [vmem:[%s23179_s4 + $0x348] sm:$0xff] }
0x13c1   : > { %v21948_v6 = vpop.eup %17983  ;;  %v7896_v16 = vmul.f32 1.442695, %v7866_v49  ;;  %7918 = vadd.xlane.f32.xlu1 %v21945_v41  ;;  %v11827_v49 = vld [vmem:[%s23179_s4 + $0x338] sm:$0xff] }
0x13c2   : > { %17993 = vpow2.f32 %v7898_v34  ;;  %7916 = vadd.xlane.f32.xlu0 %v21948_v6  ;;  %17103 = vmatprep.subr.bf16.mxu1 %v17102_v11 }
0x13c3   : > { %17995 = vpow2.f32 %v7896_v16  ;;  %17105 = vmatpush3.bf16.msra.mxu1 %v17102_v11 }
0x13c4   : > { %v21953_v21 = vpop.eup %17985  ;;  %17107 = vmatprep.subr.bf16.mxu1 %v17106_v19 }
0x13c5   : > { %v21955_v31 = vpop.eup %17987  ;;  %7922 = vadd.xlane.f32.xlu1 %v21953_v21 }
0x13c6   : > { %7920 = vadd.xlane.f32.xlu0 %v21955_v31 }
0x13c7   : > { %17109 = vmatpush3.bf16.msra.mxu1 %v17106_v19 }
0x13c8   : > { %v21961_v3 = vpop.eup %17989  ;;  %17119 = vmatprep.subr.bf16.mxu1 %v17118_v52 }
0x13c9   : > { %v21963_v26 = vpop.eup %17991  ;;  %7926 = vadd.xlane.f32.xlu1 %v21961_v3 }
0x13ca   : > { %7924 = vadd.xlane.f32.xlu0 %v21963_v26 }
0x13cc   : > { %v21967_v23 = vpop.eup %17993 }
0x13cd   : > { %v21975_v55 = vpop.eup %17995  ;;  %7930 = vadd.xlane.f32.xlu1 %v21967_v23 }
0x13ce   : > { %7928 = vadd.xlane.f32.xlu0 %v21975_v55 }
0x143e   : > { %v7903_v51 = vpop.xlane.xlu1 %7902 }
0x143f   : > { %17997 = vrcp.f32 %v7903_v51  ;;  %v7901_v2 = vpop.xlane.xlu0 %7900 }
0x1440   : > { %17999 = vrcp.f32 %v7901_v2 }
0x1442   : > { %v7907_v57 = vpop.xlane.xlu1 %7906 }
0x1443   : > { %18001 = vrcp.f32 %v7907_v57  ;;  %v7905_v28 = vpop.xlane.xlu0 %7904 }
0x1444   : > { %18003 = vrcp.f32 %v7905_v28  ;;  %v11834_v28 = vld [vmem:[%s23179_s4 + $0x370] sm:$0xff] }
0x1446   : > { %v7911_v32 = vpop.xlane.xlu1 %7910 }
0x1447   : > { %18005 = vrcp.f32 %v7911_v32  ;;  %v7909_v30 = vpop.xlane.xlu0 %7908 }
0x1448   : > { %18007 = vrcp.f32 %v7909_v30 }
0x1449   : > { %v17998_v8 = vpop.eup %17997 }
0x144a   : > { %v18000_v14 = vpop.eup %17999  ;;  %v7935_v50 = vmul.f32 %v17998_v8, %v21905_v0  ;;  %v7915_v38 = vpop.xlane.xlu1 %7914  ;;  %v11825_v0 = vld [vmem:[%s23179_s4 + $0x328] sm:$0xff] }
0x144b   : > { %18009 = vrcp.f32 %v7915_v38  ;;  %v7913_v36 = vpop.xlane.xlu0 %7912  ;;  %v7933_v10 = vmul.f32 %v18000_v14, %v21908_v5  ;;  %v17126_v4 = vpack.c.bf16 %v11825_v0, %v11824_v25  ;;  %v18348_v25 = vld [vmem:[%s18690_s15 + $0x8] sm:$0xff]  ;;  %v18349_v0 = vld [vmem:[%s18690_s15 + $0x10] sm:$0xff] }
0x144c   : > { %11785 = vst [vmem:[%s19291_s30 + $0x288] sm:$0xff] %v7935_v50  ;;  %18011 = vrcp.f32 %v7913_v36  ;;  %v11840_v36 = vld [vmem:[%s23181_s6 + $0x310] sm:$0xff] }
0x144d   : > { %v18002_v37 = vpop.eup %18001  ;;  %11784 = vst [vmem:[%s19291_s30 + $0x280] sm:$0xff] %v7933_v10  ;;  %15334 = vmatprep.mubr.f32.mxu1 %v7933_v10  ;;  %v11841_v10 = vld [vmem:[%s23181_s6 + $0x318] sm:$0xff] }
0x144e   : > { %v18004_v60 = vpop.eup %18003  ;;  %v7939_v1 = vmul.f32 %v18002_v37, %v21915_v24  ;;  %v7919_v5 = vpop.xlane.xlu1 %7918  ;;  %15335 = vmatmul.mubr.f32.vlgmr.msra.gmra.mrb[0].mxu1 %v7935_v50  ;;  %v11826_v24 = vld [vmem:[%s23179_s4 + $0x330] sm:$0xff]  ;;  %v11843_v37 = vld [vmem:[%s23181_s6 + $0x328] sm:$0xff] }
0x144f   : > { %18013 = vrcp.f32 %v7919_v5  ;;  %17121 = vmatpush3.bf16.msra.mxu1 %v17118_v52  ;;  %v7917_v56 = vpop.xlane.xlu0 %7916  ;;  %v7937_v62 = vmul.f32 %v18004_v60, %v21918_v13  ;;  %v17130_v45 = vpack.c.bf16 %v11827_v49, %v11826_v24  ;;  %v11845_v5 = vld [vmem:[%s23181_s6 + $0x338] sm:$0xff]  ;;  %v11847_v24 = vld [vmem:[%s23181_s6 + $0x348] sm:$0xff] }
0x1450   : > { %11787 = vst [vmem:[%s19291_s30 + $0x298] sm:$0xff] %v7939_v1  ;;  %18015 = vrcp.f32 %v7917_v56  ;;  %17123 = vmatprep.subr.bf16.mxu1 %v17122_v22  ;;  %v18350_v56 = vld [vmem:[%s18690_s15 + $0x18] sm:$0xff]  ;;  %v18352_v49 = vld [vmem:[%s18690_s15 + $0x28] sm:$0xff] }
0x1451   : > { %v18006_v46 = vpop.eup %18005  ;;  %11786 = vst [vmem:[%s19291_s30 + $0x290] sm:$0xff] %v7937_v62  ;;  %15337 = vmatprep.mubr.f32.mxu1 %v7937_v62  ;;  %v18351_v62 = vld [vmem:[%s18690_s15 + $0x20] sm:$0xff] }
0x1452   : > { %v18008_v63 = vpop.eup %18007  ;;  %v7943_v13 = vmul.f32 %v18006_v46, %v21925_v61  ;;  %v7923_v7 = vpop.xlane.xlu1 %7922  ;;  %15338 = vmatmul.mubr.f32.gmra.mrb[2].mxu1 %v7939_v1  ;;  %v11828_v61 = vld [vmem:[%s23179_s4 + $0x340] sm:$0xff]  ;;  %v11844_v1 = vld [vmem:[%s23181_s6 + $0x330] sm:$0xff] }
0x1453   : > { %18017 = vrcp.f32 %v7923_v7  ;;  %17125 = vmatpush3.bf16.msra.mxu1 %v17122_v22  ;;  %v7921_v34 = vpop.xlane.xlu0 %7920  ;;  %v7941_v9 = vmul.f32 %v18008_v63, %v21928_v47  ;;  %v17134_v27 = vpack.c.bf16 %v11829_v53, %v11828_v61  ;;  %v11842_v22 = vld [vmem:[%s23181_s6 + $0x320] sm:$0xff]  ;;  %v18353_v63 = vld [vmem:[%s18690_s15 + $0x30] sm:$0xff]  ;;  %v11851_v53 = vld [vmem:[%s23181_s6 + $0x368] sm:$0xff] }
0x1454   : > { %11789 = vst [vmem:[%s19291_s30 + $0x2a8] sm:$0xff] %v7943_v13  ;;  %18019 = vrcp.f32 %v7921_v34  ;;  %17127 = vmatprep.subr.bf16.mxu1 %v17126_v4  ;;  %v17158_v60 = vpack.c.bf16 %v11843_v37, %v11842_v22  ;;  %v11846_v46 = vld [vmem:[%s23181_s6 + $0x340] sm:$0xff]  ;;  %v11848_v7 = vld [vmem:[%s23181_s6 + $0x350] sm:$0xff]  ;;  %v11849_v34 = vld [vmem:[%s23181_s6 + $0x358] sm:$0xff] }
0x1455   : > { %v18010_v16 = vpop.eup %18009  ;;  %11788 = vst [vmem:[%s19291_s30 + $0x2a0] sm:$0xff] %v7941_v9  ;;  %15340 = vmatprep.mubr.f32.mxu1 %v7941_v9  ;;  %v18354_v9 = vld [vmem:[%s18690_s15 + $0x38] sm:$0xff]  ;;  %v11850_v61 = vld [vmem:[%s23181_s6 + $0x360] sm:$0xff] }
0x1456   : > { %v18012_v11 = vpop.eup %18011  ;;  %v7947_v47 = vmul.f32 %v18010_v16, %v21935_v35  ;;  %v7927_v39 = vpop.xlane.xlu1 %7926  ;;  %15341 = vmatmul.mubr.f32.gmra.mrb[4].mxu1 %v7943_v13  ;;  %v11830_v35 = vld [vmem:[%s23179_s4 + $0x350] sm:$0xff]  ;;  %v17166_v13 = vpack.c.bf16 %v11847_v24, %v11846_v46  ;;  %v17170_v16 = vpack.c.bf16 %v11849_v34, %v11848_v7 }
0x1457   : > { %18021 = vrcp.f32 %v7927_v39  ;;  %17129 = vmatpush3.bf16.msra.mxu1 %v17126_v4  ;;  %v7925_v33 = vpop.xlane.xlu0 %7924  ;;  %v7945_v18 = vmul.f32 %v18012_v11, %v21938_v42  ;;  %v17138_v48 = vpack.c.bf16 %v11831_v40, %v11830_v35  ;;  %v17162_v4 = vpack.c.bf16 %v11845_v5, %v11844_v1  ;;  %v18356_v11 = vld [vmem:[%s18690_s15 + $0x48] sm:$0xff]  ;;  %v18379_v5 = vld [vmem:[%s18984_s25] sm:$0xff] }
0x1458   : > { %11791 = vst [vmem:[%s19291_s30 + $0x2b8] sm:$0xff] %v7947_v47  ;;  %18023 = vrcp.f32 %v7925_v33  ;;  %17131 = vmatprep.subr.bf16.mxu1 %v17130_v45  ;;  %v17174_v39 = vpack.c.bf16 %v11851_v53, %v11850_v61  ;;  %v11852_v33 = vld [vmem:[%s23181_s6 + $0x370] sm:$0xff]  ;;  %v18360_v40 = vld [vmem:[%s18690_s15 + $0x68] sm:$0xff] }
0x1459   : > { %v18014_v19 = vpop.eup %18013  ;;  %11790 = vst [vmem:[%s19291_s30 + $0x2b0] sm:$0xff] %v7945_v18  ;;  %15343 = vmatprep.mubr.f32.mxu1 %v7945_v18  ;;  %v11853_v18 = vld [vmem:[%s23181_s6 + $0x378] sm:$0xff] }
0x145a   : > { %v18016_v29 = vpop.eup %18015  ;;  %v7951_v42 = vmul.f32 %v18014_v19, %v21945_v41  ;;  %v7931_v52 = vpop.xlane.xlu1 %7930  ;;  %15344 = vmatmul.mubr.f32.gmra.mrb[6].mxu1 %v7947_v47  ;;  %v11832_v41 = vld [vmem:[%s23179_s4 + $0x360] sm:$0xff]  ;;  %v18357_v47 = vld [vmem:[%s18690_s15 + $0x50] sm:$0xff]  ;;  %v17178_v35 = vpack.c.bf16 %v11853_v18, %v11852_v33 }
0x145b   : > { %18025 = vrcp.f32 %v7931_v52  ;;  %17133 = vmatpush3.bf16.msra.mxu1 %v17130_v45  ;;  %v7929_v20 = vpop.xlane.xlu0 %7928  ;;  %v7949_v15 = vmul.f32 %v18016_v29, %v21948_v6  ;;  %v17142_v2 = vpack.c.bf16 %v11833_v44, %v11832_v41  ;;  %v18355_v45 = vld [vmem:[%s18690_s15 + $0x40] sm:$0xff]  ;;  %v18361_v29 = vld [vmem:[%s18690_s15 + $0x70] sm:$0xff]  ;;  %v18368_v41 = vld [vmem:[%s18789_s24 + $0x28] sm:$0xff] }
0x145c   : > { %11793 = vst [vmem:[%s19291_s30 + $0x2c8] sm:$0xff] %v7951_v42  ;;  %18027 = vrcp.f32 %v7929_v20  ;;  %17135 = vmatprep.subr.bf16.mxu1 %v17134_v27  ;;  %v18359_v19 = vld [vmem:[%s18690_s15 + $0x60] sm:$0xff]  ;;  %v18364_v20 = vld [vmem:[%s18789_s24 + $0x8] sm:$0xff]  ;;  %v18369_v44 = vld [vmem:[%s18789_s24 + $0x30] sm:$0xff] }
0x145d   : > { %v18018_v43 = vpop.eup %18017  ;;  %11792 = vst [vmem:[%s19291_s30 + $0x2c0] sm:$0xff] %v7949_v15  ;;  %15346 = vmatprep.mubr.f32.mxu1 %v7949_v15  ;;  %v18363_v52 = vld [vmem:[%s18789_s24] sm:$0xff]  ;;  %v18365_v15 = vld [vmem:[%s18789_s24 + $0x10] sm:$0xff] }
0x145e   : > { %v18020_v17 = vpop.eup %18019  ;;  %v7955_v51 = vmul.f32 %v18018_v43, %v21953_v21  ;;  %15347 = vmatmul.mubr.f32.gmra.mrb[8].mxu1 %v7951_v42  ;;  %v11835_v21 = vld [vmem:[%s23179_s4 + $0x378] sm:$0xff]  ;;  %v18367_v43 = vld [vmem:[%s18789_s24 + $0x20] sm:$0xff] }
0x145f   : > { %17137 = vmatpush3.bf16.msra.mxu1 %v17134_v27  ;;  %v7953_v6 = vmul.f32 %v18020_v17, %v21955_v31  ;;  %v17146_v8 = vpack.c.bf16 %v11835_v21, %v11834_v28  ;;  %v18358_v27 = vld [vmem:[%s18690_s15 + $0x58] sm:$0xff]  ;;  %v18375_v28 = vld [vmem:[%s18789_s24 + $0x60] sm:$0xff]  ;;  %v18376_v21 = vld [vmem:[%s18789_s24 + $0x68] sm:$0xff] }
0x1460   : > { %11795 = vst [vmem:[%s19291_s30 + $0x2d8] sm:$0xff] %v7955_v51  ;;  %17139 = vmatprep.subr.bf16.mxu1 %v17138_v48  ;;  %v18362_v42 = vld [vmem:[%s18690_s15 + $0x78] sm:$0xff] }
0x1461   : > { %v18022_v57 = vpop.eup %18021  ;;  %11794 = vst [vmem:[%s19291_s30 + $0x2d0] sm:$0xff] %v7953_v6  ;;  %15349 = vmatprep.mubr.f32.mxu1 %v7953_v6  ;;  %v18370_v17 = vld [vmem:[%s18789_s24 + $0x38] sm:$0xff]  ;;  %v18372_v6 = vld [vmem:[%s18789_s24 + $0x48] sm:$0xff] }
0x1462   : > { %v18024_v32 = vpop.eup %18023  ;;  %v7959_v30 = vmul.f32 %v18022_v57, %v21961_v3  ;;  %15350 = vmatmul.mubr.f32.gmra.mrb[10].mxu1 %v7955_v51  ;;  %v11839_v3 = vld [vmem:[%s23181_s6 + $0x308] sm:$0xff]  ;;  %v18371_v51 = vld [vmem:[%s18789_s24 + $0x40] sm:$0xff]  ;;  %v18374_v57 = vld [vmem:[%s18789_s24 + $0x58] sm:$0xff] }
0x1463   : > { %17141 = vmatpush3.bf16.msra.mxu1 %v17138_v48  ;;  %v7957_v31 = vmul.f32 %v18024_v32, %v21963_v26  ;;  %v17150_v38 = vpack.c.bf16 %v11839_v3, %v11838_v12  ;;  %v18366_v48 = vld [vmem:[%s18789_s24 + $0x18] sm:$0xff]  ;;  %v18377_v32 = vld [vmem:[%s18789_s24 + $0x70] sm:$0xff] }
0x1464   : > { %11797 = vst [vmem:[%s19291_s30 + $0x2e8] sm:$0xff] %v7959_v30  ;;  %17143 = vmatprep.subr.bf16.mxu1 %v17142_v2 }
0x1465   : > { %v18026_v59 = vpop.eup %18025  ;;  %11796 = vst [vmem:[%s19291_s30 + $0x2e0] sm:$0xff] %v7957_v31  ;;  %15352 = vmatprep.mubr.f32.mxu1 %v7957_v31 }
0x1466   : > { %v18028_v14 = vpop.eup %18027  ;;  %v7963_v50 = vmul.f32 %v18026_v59, %v21967_v23  ;;  %15353 = vmatmul.mubr.f32.gmra.mrb[12].mxu1 %v7959_v30  ;;  %v22078_v23 = vld [vmem:[%s18690_s15] sm:$0xff]  ;;  %v18378_v30 = vld [vmem:[%s18789_s24 + $0x78] sm:$0xff] }
0x1467   : > { %17145 = vmatpush3.bf16.msra.mxu1 %v17142_v2  ;;  %v7961_v26 = vmul.f32 %v18028_v14, %v21975_v55  ;;  %v17154_v55 = vpack.c.bf16 %v11841_v10, %v11840_v36  ;;  %v18373_v2 = vld [vmem:[%s18789_s24 + $0x50] sm:$0xff] }
0x1468   : > { %11799 = vst [vmem:[%s19291_s30 + $0x2f8] sm:$0xff] %v7963_v50  ;;  %17147 = vmatprep.subr.bf16.mxu1 %v17146_v8 }
0x1469   : > { %11798 = vst [vmem:[%s19291_s30 + $0x2f0] sm:$0xff] %v7961_v26  ;;  %15355 = vmatprep.mubr.f32.mxu1 %v7961_v26 }
0x146a   : > { %15356 = vmatmul.mubr.f32.gmra.mrb[14].mxu1 %v7963_v50 }
0x146b   : > { %17149 = vmatpush3.bf16.msra.mxu1 %v17146_v8  ;;  %15422 = vmatprep.mubr.f32.mxu1 %v22078_v23 }
0x146c   : > { %17151 = vmatprep.subr.bf16.mxu1 %v17150_v38 }
0x146e   : > { %15423 = vmatmul.mubr.f32.vlgmr.msra.gmra.mrb[16].mxu1 %v18348_v25 }
0x146f   : > { %17153 = vmatpush3.bf16.msra.mxu1 %v17150_v38  ;;  %15425 = vmatprep.mubr.f32.mxu1 %v18349_v0 }
0x1470   : > { %17155 = vmatprep.subr.bf16.mxu1 %v17154_v55 }
0x1472   : > { %15426 = vmatmul.mubr.f32.gmra.mrb[18].mxu1 %v18350_v56 }
0x1473   : > { %17157 = vmatpush3.bf16.msra.mxu1 %v17154_v55  ;;  %15428 = vmatprep.mubr.f32.mxu1 %v18351_v62 }
0x1474   : > { %17159 = vmatprep.subr.bf16.mxu1 %v17158_v60 }
0x1476   : > { %15429 = vmatmul.mubr.f32.gmra.mrb[20].mxu1 %v18352_v49 }
0x1477   : > { %17161 = vmatpush3.bf16.msra.mxu1 %v17158_v60  ;;  %15431 = vmatprep.mubr.f32.mxu1 %v18353_v63  ;;  %v11837_v60 = vld [vmem:[%s23180_s5 + $0x6] ss:$0 sm:$0xff] }
0x1478   : > { %17163 = vmatprep.subr.bf16.mxu1 %v17162_v4 }
0x147a   : > { %15432 = vmatmul.mubr.f32.gmra.mrb[22].mxu1 %v18354_v9 }
0x147b   : > { %17165 = vmatpush3.bf16.msra.mxu1 %v17162_v4  ;;  %15434 = vmatprep.mubr.f32.mxu1 %v18355_v45 }
0x147c   : > { %17167 = vmatprep.subr.bf16.mxu1 %v17166_v13 }
0x147e   : > { %15435 = vmatmul.mubr.f32.gmra.mrb[24].mxu1 %v18356_v11 }
0x147f   : > { %17169 = vmatpush3.bf16.msra.mxu1 %v17166_v13  ;;  %15437 = vmatprep.mubr.f32.mxu1 %v18357_v47 }
0x1480   : > { %17171 = vmatprep.subr.bf16.mxu1 %v17170_v16 }
0x1482   : > { %15438 = vmatmul.mubr.f32.gmra.mrb[26].mxu1 %v18358_v27 }
0x1483   : > { %17173 = vmatpush3.bf16.msra.mxu1 %v17170_v16  ;;  %15440 = vmatprep.mubr.f32.mxu1 %v18359_v19 }
0x1484   : > { %17175 = vmatprep.subr.bf16.mxu1 %v17174_v39 }
0x1486   : > { %15441 = vmatmul.mubr.f32.gmra.mrb[28].mxu1 %v18360_v40 }
0x1487   : > { %17177 = vmatpush3.bf16.msra.mxu1 %v17174_v39  ;;  %15443 = vmatprep.mubr.f32.mxu1 %v18361_v29 }
0x1488   : > { %17179 = vmatprep.subr.bf16.mxu1 %v17178_v35 }
0x148a   : > { %15444 = vmatmul.mubr.f32.gmra.mrb[30].mxu1 %v18362_v42 }
0x148b   : > { %17181 = vmatpush3.bf16.msra.mxu1 %v17178_v35  ;;  %15478 = vmatprep.mubr.f32.mxu1 %v18363_v52 }
0x148e   : > { %15479 = vmatmul.mubr.f32.vlgmr.msra.gmra.mrb[32].mxu1 %v18364_v20 }
0x148f   : > { %15481 = vmatprep.mubr.f32.mxu1 %v18365_v15 }
0x1492   : > { %15482 = vmatmul.mubr.f32.gmra.mrb[34].mxu1 %v18366_v48 }
0x1493   : > { %15484 = vmatprep.mubr.f32.mxu1 %v18367_v43 }
0x1496   : > { %15485 = vmatmul.mubr.f32.gmra.mrb[36].mxu1 %v18368_v41  ;;  %v11855_v41 = vld [vmem:[%s23182_s7 + $0x6] ss:$0 sm:$0xff] }
0x1497   : > { %15487 = vmatprep.mubr.f32.mxu1 %v18369_v44 }
0x149a   : > { %15488 = vmatmul.mubr.f32.gmra.mrb[38].mxu1 %v18370_v17 }
0x149b   : > { %15490 = vmatprep.mubr.f32.mxu1 %v18371_v51 }
0x149e   : > { %15491 = vmatmul.mubr.f32.gmra.mrb[40].mxu1 %v18372_v6 }
0x149f   : > { %15493 = vmatprep.mubr.f32.mxu1 %v18373_v2 }
0x14a2   : > { %15494 = vmatmul.mubr.f32.gmra.mrb[42].mxu1 %v18374_v57 }
0x14a3   : > { %15496 = vmatprep.mubr.f32.mxu1 %v18375_v28 }
0x14a6   : > { %15497 = vmatmul.mubr.f32.gmra.mrb[44].mxu1 %v18376_v21 }
0x14a7   : > { %15499 = vmatprep.mubr.f32.mxu1 %v18377_v32 }
0x14aa   : > { %15500 = vmatmul.mubr.f32.gmra.mrb[46].mxu1 %v18378_v30 }
0x1521   : > { %v15336_v31 = vpop.f32.mrb[0].mxu1 }
0x1522   : > { %v8047_v8 = vpop.f32.mrb[1].mxu1 }
0x1523   : > { %15366 = vmatprep.mubr.msk.f32.mxu0 %vm2741_vm4, %v8047_v8 }
0x1524   : > { %15367 = vmatmul.mubr.msk.f32.vlgmr.msra.gmra.mrb[80].mxu0 %vm2741_vm4, %v15336_v31 }
0x1525   : > { %v15339_v59 = vpop.f32.mrb[2].mxu1 }
0x1526   : > { %v8057_v12 = vpop.f32.mrb[3].mxu1 }
0x1527   : > { %15369 = vmatprep.mubr.msk.f32.mxu0 %vm2741_vm4, %v8057_v12 }
0x1528   : > { %15370 = vmatmul.mubr.msk.f32.gmra.mrb[82].mxu0 %vm2741_vm4, %v15339_v59 }
0x1529   : > { %v15342_v3 = vpop.f32.mrb[4].mxu1 }
0x152a   : > { %v8067_v14 = vpop.f32.mrb[5].mxu1 }
0x152b   : > { %15372 = vmatprep.mubr.msk.f32.mxu0 %vm2741_vm4, %v8067_v14 }
0x152c   : > { %15373 = vmatmul.mubr.msk.f32.gmra.mrb[84].mxu0 %vm2741_vm4, %v15342_v3 }
0x152d   : > { %v15345_v50 = vpop.f32.mrb[6].mxu1 }
0x152e   : > { %v8077_v26 = vpop.f32.mrb[7].mxu1 }
0x152f   : > { %15375 = vmatprep.mubr.msk.f32.mxu0 %vm2741_vm4, %v8077_v26 }
0x1530   : > { %15376 = vmatmul.mubr.msk.f32.gmra.mrb[86].mxu0 %vm2741_vm4, %v15345_v50 }
0x1531   : > { %v15348_v38 = vpop.f32.mrb[8].mxu1 }
0x1532   : > { %v8087_v36 = vpop.f32.mrb[9].mxu1 }
0x1533   : > { %15378 = vmatprep.mubr.msk.f32.mxu0 %vm2741_vm4, %v8087_v36 }
0x1534   : > { %15379 = vmatmul.mubr.msk.f32.gmra.mrb[88].mxu0 %vm2741_vm4, %v15348_v38 }
0x1535   : > { %v15351_v10 = vpop.f32.mrb[10].mxu1 }
0x1536   : > { %v8097_v55 = vpop.f32.mrb[11].mxu1 }
0x1537   : > { %15381 = vmatprep.mubr.msk.f32.mxu0 %vm2741_vm4, %v8097_v55 }
0x1538   : > { %15382 = vmatmul.mubr.msk.f32.gmra.mrb[90].mxu0 %vm2741_vm4, %v15351_v10 }
0x1539   : > { %v15354_v22 = vpop.f32.mrb[12].mxu1 }
0x153a   : > { %v8107_v37 = vpop.f32.mrb[13].mxu1 }
0x153b   : > { %15384 = vmatprep.mubr.msk.f32.mxu0 %vm2741_vm4, %v8107_v37 }
0x153c   : > { %15385 = vmatmul.mubr.msk.f32.gmra.mrb[92].mxu0 %vm2741_vm4, %v15354_v22 }
0x153d   : > { %v15357_v25 = vpop.f32.mrb[14].mxu1 }
0x153e   : > { %v8117_v0 = vpop.f32.mrb[15].mxu1 }
0x153f   : > { %15387 = vmatprep.mubr.msk.f32.mxu0 %vm2741_vm4, %v8117_v0 }
0x1540   : > { %15388 = vmatmul.mubr.msk.f32.gmra.mrb[94].mxu0 %vm2741_vm4, %v15357_v25 }
0x1541   : > { %v15424_v1 = vpop.f32.mrb[16].mxu1  ;;  %15534 = vmatprep.mubr.f32.mxu0 %v18379_v5 }
0x1542   : > { %v22168_v56 = vadd.f32 %v15424_v1, %v11837_v60  ;;  %v8431_v62 = vpop.f32.mrb[17].mxu1 }
0x1543   : > { %v8432_v4 = vadd.f32 %v11837_v60, %v8431_v62 }
0x1545   : > { %v15427_v46 = vpop.f32.mrb[18].mxu1  ;;  %15590 = vmatprep.mubr.msk.f32.mxu1 %vm1057_vm0, %v8432_v4 }
0x1546   : > { %v22171_v24 = vadd.f32 %v15427_v46, %v11837_v60  ;;  %v8441_v49 = vpop.f32.mrb[19].mxu1 }
0x1547   : > { %v22173_v63 = vadd.f32 %v11837_v60, %v8441_v49 }
0x1549   : > { %v15430_v13 = vpop.f32.mrb[20].mxu1 }
0x154a   : > { %v22175_v7 = vadd.f32 %v15430_v13, %v11837_v60  ;;  %v8451_v34 = vpop.f32.mrb[21].mxu1 }
0x154b   : > { %v22177_v9 = vadd.f32 %v11837_v60, %v8451_v34 }
0x154d   : > { %v15433_v45 = vpop.f32.mrb[22].mxu1 }
0x154e   : > { %v22179_v16 = vadd.f32 %v15433_v45, %v11837_v60  ;;  %v8461_v61 = vpop.f32.mrb[23].mxu1 }
0x154f   : > { %v22181_v53 = vadd.f32 %v11837_v60, %v8461_v61 }
0x1551   : > { %v15436_v11 = vpop.f32.mrb[24].mxu1 }
0x1552   : > { %v22183_v47 = vadd.f32 %v15436_v11, %v11837_v60  ;;  %v8471_v39 = vpop.f32.mrb[25].mxu1 }
0x1553   : > { %v22185_v33 = vadd.f32 %v11837_v60, %v8471_v39 }
0x1555   : > { %v15439_v18 = vpop.f32.mrb[26].mxu1 }
0x1556   : > { %v22187_v27 = vadd.f32 %v15439_v18, %v11837_v60  ;;  %v8481_v19 = vpop.f32.mrb[27].mxu1 }
0x1557   : > { %v22189_v35 = vadd.f32 %v11837_v60, %v8481_v19 }
0x1559   : > { %v15442_v40 = vpop.f32.mrb[28].mxu1 }
0x155a   : > { %v22191_v29 = vadd.f32 %v15442_v40, %v11837_v60  ;;  %v8491_v42 = vpop.f32.mrb[29].mxu1  ;;  %v11865_v40 = vld [vmem:[%s23183_s8 + $0x348] sm:$0xff] }
0x155b   : > { %v22193_v52 = vadd.f32 %v11837_v60, %v8491_v42  ;;  %v11866_v42 = vld [vmem:[%s23183_s8 + $0x350] sm:$0xff] }
0x155d   : > { %v15445_v20 = vpop.f32.mrb[30].mxu1 }
0x155e   : > { %v22195_v15 = vadd.f32 %v15445_v20, %v11837_v60  ;;  %v8501_v48 = vpop.f32.mrb[31].mxu1 }
0x155f   : > { %v22197_v43 = vadd.f32 %v11837_v60, %v8501_v48  ;;  %v11869_v48 = vld [vmem:[%s23183_s8 + $0x368] sm:$0xff] }
0x1561   : > { %v15480_v44 = vpop.f32.mrb[32].mxu1 }
0x1562   : > { %v8607_v17 = vadd.f32 %v15480_v44, %v11855_v41  ;;  %v8601_v51 = vpop.f32.mrb[33].mxu1  ;;  %v11871_v44 = vld [vmem:[%s23183_s8 + $0x378] sm:$0xff] }
0x1563   : > { %v8602_v6 = vadd.f32 %v11855_v41, %v8601_v51  ;;  %v18380_v51 = vld [vmem:[%s18984_s25 + $0x8] sm:$0xff] }
0x1565   : > { %v17214_v2 = vpack.c.bf16 %v8607_v17, %v8602_v6  ;;  %v15483_v57 = vpop.f32.mrb[34].mxu1  ;;  %v18381_v6 = vld [vmem:[%s18984_s25 + $0x10] sm:$0xff] }
0x1566   : > { %v8617_v28 = vadd.f32 %v15483_v57, %v11855_v41  ;;  %v8611_v21 = vpop.f32.mrb[35].mxu1  ;;  %v18383_v57 = vld [vmem:[%s18984_s25 + $0x20] sm:$0xff] }
0x1567   : > { %17216 = vmatprep.subr.msk.bf16.mxu1 %vm18895_vm1, %v17214_v2  ;;  %v8612_v32 = vadd.f32 %v11855_v41, %v8611_v21  ;;  %v18385_v21 = vld [vmem:[%s18984_s25 + $0x30] sm:$0xff] }
0x1568   : > { %17219 = vmatpush3.bf16.xpose.msk.msra.mxu1 %vm18895_vm1, %v17214_v2  ;;  %v18382_v2 = vld [vmem:[%s18984_s25 + $0x18] sm:$0xff] }
0x1569   : > { %v17220_v30 = vpack.c.bf16 %v8617_v28, %v8612_v32  ;;  %v15486_v31 = vpop.f32.mrb[36].mxu1  ;;  %v18384_v28 = vld [vmem:[%s18984_s25 + $0x28] sm:$0xff]  ;;  %v18386_v32 = vld [vmem:[%s18984_s25 + $0x38] sm:$0xff] }
0x156a   : > { %v8627_v8 = vadd.f32 %v15486_v31, %v11855_v41  ;;  %v8621_v59 = vpop.f32.mrb[37].mxu1  ;;  %v18388_v31 = vld [vmem:[%s18984_s25 + $0x48] sm:$0xff] }
0x156b   : > { %17222 = vmatprep.subr.msk.bf16.mxu1 %vm18895_vm1, %v17220_v30  ;;  %v8622_v12 = vadd.f32 %v11855_v41, %v8621_v59  ;;  %v18390_v59 = vld [vmem:[%s18984_s25 + $0x58] sm:$0xff] }
0x156d   : > { %v17226_v3 = vpack.c.bf16 %v8627_v8, %v8622_v12  ;;  %v15489_v14 = vpop.f32.mrb[38].mxu1  ;;  %v18389_v8 = vld [vmem:[%s18984_s25 + $0x50] sm:$0xff]  ;;  %v18391_v12 = vld [vmem:[%s18984_s25 + $0x60] sm:$0xff] }
0x156e   : > { %v8637_v50 = vadd.f32 %v15489_v14, %v11855_v41  ;;  %v8631_v26 = vpop.f32.mrb[39].mxu1  ;;  %v18393_v14 = vld [vmem:[%s18984_s25 + $0x70] sm:$0xff] }
0x156f   : > { %v8632_v38 = vadd.f32 %v11855_v41, %v8631_v26 }
0x1570   : > { %17225 = vmatpush3.bf16.xpose.msk.msra.mxu1 %vm18895_vm1, %v17220_v30  ;;  %v18387_v30 = vld [vmem:[%s18984_s25 + $0x40] sm:$0xff] }
0x1571   : > { %17228 = vmatprep.subr.msk.bf16.mxu1 %vm18895_vm1, %v17226_v3  ;;  %v17232_v36 = vpack.c.bf16 %v8637_v50, %v8632_v38  ;;  %v15492_v10 = vpop.f32.mrb[40].mxu1  ;;  %v18394_v50 = vld [vmem:[%s18984_s25 + $0x78] sm:$0xff] }
0x1572   : > { %v8647_v55 = vadd.f32 %v15492_v10, %v11855_v41  ;;  %v8641_v22 = vpop.f32.mrb[41].mxu1 }
0x1573   : > { %v8642_v37 = vadd.f32 %v11855_v41, %v8641_v22 }
0x1575   : > { %v17238_v25 = vpack.c.bf16 %v8647_v55, %v8642_v37  ;;  %v15495_v0 = vpop.f32.mrb[42].mxu1 }
0x1576   : > { %v8657_v60 = vadd.f32 %v15495_v0, %v11855_v41  ;;  %v8651_v1 = vpop.f32.mrb[43].mxu1 }
0x1577   : > { %v8652_v5 = vadd.f32 %v11855_v41, %v8651_v1 }
0x1578   : > { %17231 = vmatpush3.bf16.xpose.msk.msra.mxu1 %vm18895_vm1, %v17226_v3  ;;  %v18392_v3 = vld [vmem:[%s18984_s25 + $0x68] sm:$0xff] }
0x1579   : > { %17234 = vmatprep.subr.msk.bf16.mxu1 %vm18895_vm1, %v17232_v36  ;;  %v17244_v62 = vpack.c.bf16 %v8657_v60, %v8652_v5  ;;  %v15498_v4 = vpop.f32.mrb[44].mxu1 }
0x157a   : > { %v8667_v46 = vadd.f32 %v15498_v4, %v11855_v41  ;;  %v8661_v49 = vpop.f32.mrb[45].mxu1 }
0x157b   : > { %v8662_v13 = vadd.f32 %v11855_v41, %v8661_v49 }
0x157d   : > { %v17250_v34 = vpack.c.bf16 %v8667_v46, %v8662_v13  ;;  %v15501_v45 = vpop.f32.mrb[46].mxu1 }
0x157e   : > { %v8677_v61 = vadd.f32 %v15501_v45, %v11855_v41  ;;  %v8671_v11 = vpop.f32.mrb[47].mxu1 }
0x157f   : > { %v8672_v39 = vadd.f32 %v11855_v41, %v8671_v11  ;;  %v11870_v41 = vld [vmem:[%s23183_s8 + $0x370] sm:$0xff] }
0x1580   : > { %17237 = vmatpush3.bf16.xpose.msk.msra.mxu1 %vm18895_vm1, %v17232_v36  ;;  %v17210_v17 = vpack.c.bf16 %v11871_v44, %v11870_v41 }
0x1581   : > { %17240 = vmatprep.subr.msk.bf16.mxu1 %vm18895_vm1, %v17238_v25  ;;  %v17256_v18 = vpack.c.bf16 %v8677_v61, %v8672_v39 }
0x1588   : > { %17243 = vmatpush3.bf16.xpose.msk.msra.mxu1 %vm18895_vm1, %v17238_v25 }
0x1589   : > { %17246 = vmatprep.subr.msk.bf16.mxu1 %vm18895_vm1, %v17244_v62 }
0x1590   : > { %17249 = vmatpush3.bf16.xpose.msk.msra.mxu1 %vm18895_vm1, %v17244_v62 }
0x1591   : > { %17252 = vmatprep.subr.msk.bf16.mxu1 %vm18895_vm1, %v17250_v34 }
0x1598   : > { %17255 = vmatpush3.bf16.xpose.msk.msra.mxu1 %vm18895_vm1, %v17250_v34 }
0x1599   : > { %17258 = vmatprep.subr.msk.bf16.mxu1 %vm18895_vm1, %v17256_v18 }
0x15a0   : > { %17261 = vmatpush3.bf16.xpose.msk.msra.mxu1 %vm18895_vm1, %v17256_v18 }
0x15a7   : > { %15591 = vmatmul.mubr.msk.f32.vlgmr.msra.gmra.mrb[48].mxu1 %vm1057_vm0, %v22168_v56  ;;  %v11856_v56 = vld [vmem:[%s23183_s8 + $0x300] sm:$0xff] }
0x15a8   : > { %15593 = vmatprep.mubr.msk.f32.mxu1 %vm1057_vm0, %v22173_v63  ;;  %v11858_v63 = vld [vmem:[%s23183_s8 + $0x310] sm:$0xff] }
0x15ab   : > { %15594 = vmatmul.mubr.msk.f32.gmra.mrb[50].mxu1 %vm1057_vm0, %v22171_v24  ;;  %v11857_v24 = vld [vmem:[%s23183_s8 + $0x308] sm:$0xff] }
0x15ac   : > { %15596 = vmatprep.mubr.msk.f32.mxu1 %vm1057_vm0, %v22177_v9  ;;  %v11859_v9 = vld [vmem:[%s23183_s8 + $0x318] sm:$0xff] }
0x15af   : > { %15597 = vmatmul.mubr.msk.f32.gmra.mrb[52].mxu1 %vm1057_vm0, %v22175_v7  ;;  %v17182_v7 = vpack.c.bf16 %v11857_v24, %v11856_v56 }
0x15b0   : > { %15599 = vmatprep.mubr.msk.f32.mxu1 %vm1057_vm0, %v22181_v53  ;;  %v11861_v53 = vld [vmem:[%s23183_s8 + $0x328] sm:$0xff] }
0x15b1   : > { %17183 = vmatprep.subr.bf16.mxu0 %v17182_v7 }
0x15b2   : > { %17185 = vmatpush3.bf16.msra.mxu0 %v17182_v7 }
0x15b3   : > { %15600 = vmatmul.mubr.msk.f32.gmra.mrb[54].mxu1 %vm1057_vm0, %v22179_v16  ;;  %v17186_v16 = vpack.c.bf16 %v11859_v9, %v11858_v63 }
0x15b4   : > { %15602 = vmatprep.mubr.msk.f32.mxu1 %vm1057_vm0, %v22185_v33  ;;  %v11862_v33 = vld [vmem:[%s23183_s8 + $0x330] sm:$0xff] }
0x15b5   : > { %17187 = vmatprep.subr.bf16.mxu0 %v17186_v16 }
0x15b6   : > { %17189 = vmatpush3.bf16.msra.mxu0 %v17186_v16 }
0x15b7   : > { %15603 = vmatmul.mubr.msk.f32.gmra.mrb[56].mxu1 %vm1057_vm0, %v22183_v47 }
0x15b8   : > { %15605 = vmatprep.mubr.msk.f32.mxu1 %vm1057_vm0, %v22189_v35  ;;  %v11864_v35 = vld [vmem:[%s23183_s8 + $0x340] sm:$0xff] }
0x15bb   : > { %15606 = vmatmul.mubr.msk.f32.gmra.mrb[58].mxu1 %vm1057_vm0, %v22187_v27  ;;  %v11863_v27 = vld [vmem:[%s23183_s8 + $0x338] sm:$0xff] }
0x15bc   : > { %15608 = vmatprep.mubr.msk.f32.mxu1 %vm1057_vm0, %v22193_v52  ;;  %v17194_v19 = vpack.c.bf16 %v11863_v27, %v11862_v33  ;;  %v11867_v52 = vld [vmem:[%s23183_s8 + $0x358] sm:$0xff] }
0x15bd   : > { %v17202_v20 = vpack.c.bf16 %v11867_v52, %v11866_v42 }
0x15bf   : > { %15609 = vmatmul.mubr.msk.f32.gmra.mrb[60].mxu1 %vm1057_vm0, %v22191_v29  ;;  %v17198_v29 = vpack.c.bf16 %v11865_v40, %v11864_v35 }
0x15c0   : > { %15611 = vmatprep.mubr.msk.f32.mxu1 %vm1057_vm0, %v22197_v43 }
0x15c3   : > { %15612 = vmatmul.mubr.msk.f32.gmra.mrb[62].mxu1 %vm1057_vm0, %v22195_v15  ;;  %v11868_v15 = vld [vmem:[%s23183_s8 + $0x360] sm:$0xff] }
0x15c4   : > { %15734 = vmatprep.mubr.f32.mxu1 %v22078_v23  ;;  %v11860_v23 = vld [vmem:[%s23183_s8 + $0x320] sm:$0xff]  ;;  %v17206_v43 = vpack.c.bf16 %v11869_v48, %v11868_v15 }
0x15c5   : > { %v17190_v47 = vpack.c.bf16 %v11861_v53, %v11860_v23 }
0x15c7   : > { %17191 = vmatprep.subr.bf16.mxu0 %v17190_v47 }
0x15c8   : > { %17193 = vmatpush3.bf16.msra.mxu0 %v17190_v47 }
0x15c9   : > { %17195 = vmatprep.subr.bf16.mxu0 %v17194_v19 }
0x15cc   : > { %17197 = vmatpush3.bf16.msra.mxu0 %v17194_v19 }
0x15cd   : > { %17199 = vmatprep.subr.bf16.mxu0 %v17198_v29 }
0x15d0   : > { %17201 = vmatpush3.bf16.msra.mxu0 %v17198_v29 }
0x15d1   : > { %17203 = vmatprep.subr.bf16.mxu0 %v17202_v20 }
0x15d4   : > { %17205 = vmatpush3.bf16.msra.mxu0 %v17202_v20 }
0x15d5   : > { %17207 = vmatprep.subr.bf16.mxu0 %v17206_v43 }
0x15d8   : > { %17209 = vmatpush3.bf16.msra.mxu0 %v17206_v43 }
0x15d9   : > { %17211 = vmatprep.subr.bf16.mxu0 %v17210_v17 }
0x15dc   : > { %17213 = vmatpush3.bf16.msra.mxu0 %v17210_v17 }
0x15df   : > { %15535 = vmatmul.mubr.f32.vlgmr.msra.gmra.mrb[224].mxu0 %v18380_v51 }
0x15e0   : > { %15537 = vmatprep.mubr.f32.mxu0 %v18381_v6 }
0x15e3   : > { %15538 = vmatmul.mubr.f32.gmra.mrb[226].mxu0 %v18382_v2 }
0x15e4   : > { %15540 = vmatprep.mubr.f32.mxu0 %v18383_v57 }
0x15e7   : > { %15541 = vmatmul.mubr.f32.gmra.mrb[228].mxu0 %v18384_v28 }
0x15e8   : > { %15543 = vmatprep.mubr.f32.mxu0 %v18385_v21 }
0x15eb   : > { %15544 = vmatmul.mubr.f32.gmra.mrb[230].mxu0 %v18386_v32 }
0x15ec   : > { %15546 = vmatprep.mubr.f32.mxu0 %v18387_v30 }
0x15ef   : > { %15547 = vmatmul.mubr.f32.gmra.mrb[232].mxu0 %v18388_v31  ;;  %v22409_v31 = vld [vmem:[%s23184_s9 + $0x6] ss:$0 sm:$0xff] }
0x15f0   : > { %15549 = vmatprep.mubr.f32.mxu0 %v18389_v8 }
0x15f3   : > { %15550 = vmatmul.mubr.f32.gmra.mrb[234].mxu0 %v18390_v59 }
0x15f4   : > { %15552 = vmatprep.mubr.f32.mxu0 %v18391_v12 }
0x15f7   : > { %15553 = vmatmul.mubr.f32.gmra.mrb[236].mxu0 %v18392_v3 }
0x15f8   : > { %15555 = vmatprep.mubr.f32.mxu0 %v18393_v14 }
0x15fb   : > { %15556 = vmatmul.mubr.f32.gmra.mrb[238].mxu0 %v18394_v50 }
0x167a   : > { %v15592_v26 = vpop.f32.mrb[48].mxu1 }
0x167b   : > { %v9092_v38 = vmul.f32 0.28867513, %v15592_v26  ;;  %v9012_v36 = vpop.f32.mrb[49].mxu1 }
0x167c   : > { %v9091_v10 = vmul.f32 0.28867513, %v9012_v36 }
0x167d   : > { %v22330_v55 = vsel %vm1321_vm3, -1e+09, %v9092_v38 }
0x167e   : > { %9125 = vmax.xlane.f32.xlu1 %v22330_v55  ;;  %v15595_v22 = vpop.f32.mrb[50].mxu1  ;;  %v9107_v37 = vsel %vm1321_vm3, -1e+09, %v9091_v10 }
0x167f   : > { %v9094_v25 = vmul.f32 0.28867513, %v15595_v22  ;;  %9123 = vmax.xlane.f32.xlu0 %v9107_v37  ;;  %v9022_v0 = vpop.f32.mrb[51].mxu1 }
0x1680   : > { %v9093_v60 = vmul.f32 0.28867513, %v9022_v0 }
0x1681   : > { %v22337_v1 = vsel %vm1321_vm3, -1e+09, %v9094_v25 }
0x1682   : > { %9129 = vmax.xlane.f32.xlu1 %v22337_v1  ;;  %v15598_v5 = vpop.f32.mrb[52].mxu1  ;;  %v22342_v62 = vsel %vm1321_vm3, -1e+09, %v9093_v60 }
0x1683   : > { %v9096_v4 = vmul.f32 0.28867513, %v15598_v5  ;;  %9127 = vmax.xlane.f32.xlu0 %v22342_v62  ;;  %v9032_v46 = vpop.f32.mrb[53].mxu1 }
0x1684   : > { %v9095_v49 = vmul.f32 0.28867513, %v9032_v46 }
0x1685   : > { %v22347_v13 = vsel %vm1321_vm3, -1e+09, %v9096_v4 }
0x1686   : > { %9133 = vmax.xlane.f32.xlu1 %v22347_v13  ;;  %v15601_v34 = vpop.f32.mrb[54].mxu1  ;;  %v22352_v45 = vsel %vm1321_vm3, -1e+09, %v9095_v49 }
0x1687   : > { %v9098_v61 = vmul.f32 0.28867513, %v15601_v34  ;;  %9131 = vmax.xlane.f32.xlu0 %v22352_v45  ;;  %v9042_v11 = vpop.f32.mrb[55].mxu1 }
0x1688   : > { %v9097_v39 = vmul.f32 0.28867513, %v9042_v11 }
0x1689   : > { %v22357_v18 = vsel %vm1321_vm3, -1e+09, %v9098_v61 }
0x168a   : > { %9137 = vmax.xlane.f32.xlu1 %v22357_v18  ;;  %v15604_v56 = vpop.f32.mrb[56].mxu1  ;;  %v22362_v24 = vsel %vm1321_vm3, -1e+09, %v9097_v39 }
0x168b   : > { %v9100_v63 = vmul.f32 0.28867513, %v15604_v56  ;;  %9135 = vmax.xlane.f32.xlu0 %v22362_v24  ;;  %v9052_v7 = vpop.f32.mrb[57].mxu1 }
0x168c   : > { %v9099_v9 = vmul.f32 0.28867513, %v9052_v7 }
0x168d   : > { %v22367_v16 = vsel %vm1321_vm3, -1e+09, %v9100_v63 }
0x168e   : > { %9141 = vmax.xlane.f32.xlu1 %v22367_v16  ;;  %v15607_v23 = vpop.f32.mrb[58].mxu1  ;;  %v22372_v53 = vsel %vm1321_vm3, -1e+09, %v9099_v9 }
0x168f   : > { %v9102_v47 = vmul.f32 0.28867513, %v15607_v23  ;;  %9139 = vmax.xlane.f32.xlu0 %v22372_v53  ;;  %v9062_v33 = vpop.f32.mrb[59].mxu1 }
0x1690   : > { %v9101_v27 = vmul.f32 0.28867513, %v9062_v33 }
0x1691   : > { %v22377_v19 = vsel %vm1321_vm3, -1e+09, %v9102_v47 }
0x1692   : > { %9145 = vmax.xlane.f32.xlu1 %v22377_v19  ;;  %v15610_v35 = vpop.f32.mrb[60].mxu1  ;;  %v22382_v40 = vsel %vm1321_vm3, -1e+09, %v9101_v27 }
0x1693   : > { %v9104_v29 = vmul.f32 0.28867513, %v15610_v35  ;;  %9143 = vmax.xlane.f32.xlu0 %v22382_v40  ;;  %v9072_v42 = vpop.f32.mrb[61].mxu1 }
0x1694   : > { %v9103_v52 = vmul.f32 0.28867513, %v9072_v42 }
0x1695   : > { %v22387_v20 = vsel %vm1321_vm3, -1e+09, %v9104_v29 }
0x1696   : > { %9149 = vmax.xlane.f32.xlu1 %v22387_v20  ;;  %v15613_v15 = vpop.f32.mrb[62].mxu1  ;;  %v22392_v48 = vsel %vm1321_vm3, -1e+09, %v9103_v52 }
0x1697   : > { %v9106_v43 = vmul.f32 0.28867513, %v15613_v15  ;;  %9147 = vmax.xlane.f32.xlu0 %v22392_v48  ;;  %v9082_v41 = vpop.f32.mrb[63].mxu1 }
0x1698   : > { %v9105_v44 = vmul.f32 0.28867513, %v9082_v41 }
0x1699   : > { %v22397_v17 = vsel %vm1321_vm3, -1e+09, %v9106_v43 }
0x169a   : > { %9153 = vmax.xlane.f32.xlu1 %v22397_v17  ;;  %v22402_v51 = vsel %vm1321_vm3, -1e+09, %v9105_v44 }
0x169b   : > { %9151 = vmax.xlane.f32.xlu0 %v22402_v51 }
0x16b2   : > { %v15536_v3 = vpop.f32.mrb[224].mxu0 }
0x16b3   : > { %v8777_v50 = vadd.f32 %v15536_v3, %v22409_v31  ;;  %v8771_v26 = vpop.f32.mrb[225].mxu0 }
0x16b4   : > { %v8772_v10 = vadd.f32 %v22409_v31, %v8771_v26 }
0x16b6   : > { %v17262_v25 = vpack.c.bf16 %v8777_v50, %v8772_v10  ;;  %v15539_v0 = vpop.f32.mrb[226].mxu0 }
0x16b7   : > { %v8781_v5 = vpop.f32.mrb[227].mxu0 }
0x16b8   : > { %v8782_v46 = vadd.f32 %v22409_v31, %v8781_v5  ;;  %17263 = vmatprep.subr.bf16.mxu0 %v17262_v25 }
0x16b9   : > { %17265 = vmatpush3.bf16.msra.mxu0 %v17262_v25 }
0x16ba   : > { %v15542_v61 = vpop.f32.mrb[228].mxu0 }
0x16bb   : > { %v8797_v56 = vadd.f32 %v15542_v61, %v22409_v31  ;;  %v8791_v63 = vpop.f32.mrb[229].mxu0 }
0x16be   : > { %v15545_v35 = vpop.f32.mrb[230].mxu0 }
0x16bf   : > { %v8807_v52 = vadd.f32 %v15545_v35, %v22409_v31  ;;  %v8801_v15 = vpop.f32.mrb[231].mxu0  ;;  %v11923_v35 = vld [vmem:[%s23185_s10 + $0xc8] sm:$0xff] }
0x170b   : > { %v9126_v6 = vpop.xlane.xlu1 %9125 }
0x170c   : > { %v9156_v2 = vsub.f32 %v22330_v55, %v9126_v6  ;;  %v9124_v57 = vpop.xlane.xlu0 %9123 }
0x170d   : > { %v9155_v28 = vsub.f32 %v9107_v37, %v9124_v57 }
0x170e   : > { %v9173_v21 = vmul.f32 1.442695, %v9156_v2 }
0x170f   : > { %v9171_v32 = vmul.f32 1.442695, %v9155_v28  ;;  %v9130_v30 = vpop.xlane.xlu1 %9129  ;;  %v15548_v28 = vpop.f32.mrb[232].mxu0 }
0x1710   : > { %18029 = vpow2.f32 %v9173_v21  ;;  %v9158_v8 = vsub.f32 %v22337_v1, %v9130_v30  ;;  %v9128_v59 = vpop.xlane.xlu0 %9127  ;;  %v8787_v1 = vadd.f32 %v15539_v0, %v22409_v31  ;;  %v8817_v30 = vadd.f32 %v15548_v28, %v22409_v31 }
0x1711   : > { %18031 = vpow2.f32 %v9171_v32  ;;  %v9157_v12 = vsub.f32 %v22342_v62, %v9128_v59 }
0x1712   : > { %v9177_v14 = vmul.f32 1.442695, %v9158_v8  ;;  %v8811_v8 = vpop.f32.mrb[233].mxu0 }
0x1713   : > { %v9175_v38 = vmul.f32 1.442695, %v9157_v12  ;;  %v9134_v36 = vpop.xlane.xlu1 %9133 }
0x1714   : > { %18033 = vpow2.f32 %v9177_v14  ;;  %v9160_v55 = vsub.f32 %v22347_v13, %v9134_v36  ;;  %v9132_v22 = vpop.xlane.xlu0 %9131 }
0x1715   : > { %18035 = vpow2.f32 %v9175_v38  ;;  %v9159_v37 = vsub.f32 %v22352_v45, %v9132_v22  ;;  %v17266_v45 = vpack.c.bf16 %v8787_v1, %v8782_v46  ;;  %v15551_v38 = vpop.f32.mrb[234].mxu0 }
0x1716   : > { %v9181_v60 = vmul.f32 1.442695, %v9160_v55  ;;  %v8827_v55 = vadd.f32 %v15551_v38, %v22409_v31  ;;  %v8821_v22 = vpop.f32.mrb[235].mxu0 }
0x1717   : > { %v9179_v62 = vmul.f32 1.442695, %v9159_v37  ;;  %v9138_v4 = vpop.xlane.xlu1 %9137  ;;  %17267 = vmatprep.subr.bf16.mxu0 %v17266_v45  ;;  %v8822_v0 = vadd.f32 %v22409_v31, %v8821_v22 }
0x1718   : > { %18037 = vpow2.f32 %v9181_v60  ;;  %v9162_v49 = vsub.f32 %v22357_v18, %v9138_v4  ;;  %v9136_v34 = vpop.xlane.xlu0 %9135  ;;  %v8792_v18 = vadd.f32 %v22409_v31, %v8791_v63  ;;  %17269 = vmatpush3.bf16.msra.mxu0 %v17266_v45 }
0x1719   : > { %18039 = vpow2.f32 %v9179_v62  ;;  %v9161_v13 = vsub.f32 %v22362_v24, %v9136_v34  ;;  %v17282_v5 = vpack.c.bf16 %v8827_v55, %v8822_v0  ;;  %v15554_v62 = vpop.f32.mrb[236].mxu0 }
0x171a   : > { %v22421_v11 = vpop.eup %18029  ;;  %v9185_v39 = vmul.f32 1.442695, %v9162_v49  ;;  %v17270_v27 = vpack.c.bf16 %v8797_v56, %v8792_v18  ;;  %v8831_v49 = vpop.f32.mrb[237].mxu0 }
0x171b   : > { %v22424_v7 = vpop.eup %18031  ;;  %v9183_v9 = vmul.f32 1.442695, %v9161_v13  ;;  %v9142_v23 = vpop.xlane.xlu1 %9141  ;;  %9205 = vadd.xlane.f32.xlu1 %v22421_v11  ;;  %v8832_v45 = vadd.f32 %v22409_v31, %v8831_v49 }
0x171c   : > { %18041 = vpow2.f32 %v9185_v39  ;;  %v9164_v24 = vsub.f32 %v22367_v16, %v9142_v23  ;;  %v9140_v47 = vpop.xlane.xlu0 %9139  ;;  %9203 = vadd.xlane.f32.xlu0 %v22424_v7  ;;  %v8802_v16 = vadd.f32 %v22409_v31, %v8801_v15  ;;  %17271 = vmatprep.subr.bf16.mxu0 %v17270_v27  ;;  %v15557_v61 = vpop.f32.mrb[238].mxu0 }
0x171d   : > { %18043 = vpow2.f32 %v9183_v9  ;;  %v9163_v33 = vsub.f32 %v22372_v53, %v9140_v47  ;;  %17273 = vmatpush3.bf16.msra.mxu0 %v17270_v27  ;;  %v8841_v56 = vpop.f32.mrb[239].mxu0  ;;  %v8847_v9 = vadd.f32 %v15557_v61, %v22409_v31 }
0x171e   : > { %v22431_v29 = vpop.eup %18033  ;;  %v9189_v42 = vmul.f32 1.442695, %v9164_v24  ;;  %v17274_v57 = vpack.c.bf16 %v8807_v52, %v8802_v16  ;;  %v8842_v23 = vadd.f32 %v22409_v31, %v8841_v56 }
0x171f   : > { %v22434_v43 = vpop.eup %18035  ;;  %v9187_v41 = vmul.f32 1.442695, %v9163_v33  ;;  %v9146_v44 = vpop.xlane.xlu1 %9145  ;;  %9209 = vadd.xlane.f32.xlu1 %v22431_v29 }
0x1720   : > { %18045 = vpow2.f32 %v9189_v42  ;;  %v9166_v53 = vsub.f32 %v22377_v19, %v9146_v44  ;;  %v9144_v6 = vpop.xlane.xlu0 %9143  ;;  %9207 = vadd.xlane.f32.xlu0 %v22434_v43  ;;  %v8812_v19 = vadd.f32 %v22409_v31, %v8811_v8  ;;  %17275 = vmatprep.subr.bf16.mxu0 %v17274_v57  ;;  %v17290_v18 = vpack.c.bf16 %v8847_v9, %v8842_v23  ;;  %v11961_v9 = vld [vmem:[%s23181_s6 + $0x388] sm:$0xff] }
0x1721   : > { %18047 = vpow2.f32 %v9187_v41  ;;  %v9165_v2 = vsub.f32 %v22382_v40, %v9144_v6  ;;  %17277 = vmatpush3.bf16.msra.mxu0 %v17274_v57  ;;  %v11925_v57 = vld [vmem:[%s23185_s10 + $0xd8] sm:$0xff] }
0x1722   : > { %v22441_v21 = vpop.eup %18037  ;;  %v9193_v32 = vmul.f32 1.442695, %v9166_v53  ;;  %v17278_v26 = vpack.c.bf16 %v8817_v30, %v8812_v19 }
0x1723   : > { %v22444_v59 = vpop.eup %18039  ;;  %v9191_v12 = vmul.f32 1.442695, %v9165_v2  ;;  %v9150_v3 = vpop.xlane.xlu1 %9149  ;;  %9213 = vadd.xlane.f32.xlu1 %v22441_v21  ;;  %v11924_v2 = vld [vmem:[%s23185_s10 + $0xd0] sm:$0xff] }
0x1724   : > { %18049 = vpow2.f32 %v9193_v32  ;;  %v9168_v40 = vsub.f32 %v22387_v20, %v9150_v3  ;;  %v9148_v14 = vpop.xlane.xlu0 %9147  ;;  %9211 = vadd.xlane.f32.xlu0 %v22444_v59  ;;  %17279 = vmatprep.subr.bf16.mxu0 %v17278_v26  ;;  %v17298_v3 = vpack.c.bf16 %v11925_v57, %v11924_v2  ;;  %v11952_v2 = vld [vmem:[%s23179_s4 + $0x3d0] sm:$0xff]  ;;  %v11953_v57 = vld [vmem:[%s23179_s4 + $0x3d8] sm:$0xff] }
0x1725   : > { %18051 = vpow2.f32 %v9191_v12  ;;  %v9167_v50 = vsub.f32 %v22392_v48, %v9148_v14  ;;  %17281 = vmatpush3.bf16.msra.mxu0 %v17278_v26 }
0x1726   : > { %v22451_v36 = vpop.eup %18041  ;;  %v9197_v10 = vmul.f32 1.442695, %v9168_v40  ;;  %17283 = vmatprep.subr.bf16.mxu0 %v17282_v5 }
0x1727   : > { %v22454_v37 = vpop.eup %18043  ;;  %v9195_v25 = vmul.f32 1.442695, %v9167_v50  ;;  %9217 = vadd.xlane.f32.xlu1 %v22451_v36  ;;  %v9154_v20 = vpop.xlane.xlu1 %9153 }
0x1728   : > { %18053 = vpow2.f32 %v9197_v10  ;;  %v9170_v48 = vsub.f32 %v22397_v17, %v9154_v20  ;;  %9215 = vadd.xlane.f32.xlu0 %v22454_v37  ;;  %v9152_v60 = vpop.xlane.xlu0 %9151  ;;  %v8837_v17 = vadd.f32 %v15554_v62, %v22409_v31  ;;  %v11922_v31 = vld [vmem:[%s23185_s10 + $0xc0] sm:$0xff] }
0x1729   : > { %18055 = vpow2.f32 %v9195_v25  ;;  %v9169_v1 = vsub.f32 %v22402_v51, %v9152_v60  ;;  %17285 = vmatpush3.bf16.msra.mxu0 %v17282_v5  ;;  %v17294_v42 = vpack.c.bf16 %v11923_v35, %v11922_v31  ;;  %v11946_v35 = vld [vmem:[%s23179_s4 + $0x3a0] sm:$0xff] }
0x172a   : > { %v22461_v4 = vpop.eup %18045  ;;  %v9201_v46 = vmul.f32 1.442695, %v9170_v48  ;;  %v17286_v51 = vpack.c.bf16 %v8837_v17, %v8832_v45 }
0x172b   : > { %v22463_v34 = vpop.eup %18047  ;;  %v9199_v13 = vmul.f32 1.442695, %v9169_v1  ;;  %9221 = vadd.xlane.f32.xlu1 %v22461_v4 }
0x172c   : > { %18057 = vpow2.f32 %v9201_v46  ;;  %9219 = vadd.xlane.f32.xlu0 %v22463_v34  ;;  %17287 = vmatprep.subr.bf16.mxu0 %v17286_v51 }
0x172d   : > { %18059 = vpow2.f32 %v9199_v13  ;;  %17289 = vmatpush3.bf16.msra.mxu0 %v17286_v51 }
0x172e   : > { %v22469_v39 = vpop.eup %18049  ;;  %17291 = vmatprep.subr.bf16.mxu0 %v17290_v18 }
0x172f   : > { %v22471_v63 = vpop.eup %18051  ;;  %9225 = vadd.xlane.f32.xlu1 %v22469_v39 }
0x1730   : > { %9223 = vadd.xlane.f32.xlu0 %v22471_v63 }
0x1731   : > { %17293 = vmatpush3.bf16.msra.mxu0 %v17290_v18  ;;  %v11942_v18 = vld [vmem:[%s23179_s4 + $0x380] sm:$0xff] }
0x1732   : > { %v22477_v24 = vpop.eup %18053  ;;  %17295 = vmatprep.subr.bf16.mxu0 %v17294_v42 }
0x1733   : > { %v22479_v47 = vpop.eup %18055  ;;  %9229 = vadd.xlane.f32.xlu1 %v22477_v24 }
0x1734   : > { %9227 = vadd.xlane.f32.xlu0 %v22479_v47 }
0x1736   : > { %v22483_v33 = vpop.eup %18057 }
0x1737   : > { %v22485_v27 = vpop.eup %18059  ;;  %9233 = vadd.xlane.f32.xlu1 %v22483_v33 }
0x1738   : > { %9231 = vadd.xlane.f32.xlu0 %v22485_v27 }
0x17a8   : > { %v9206_v52 = vpop.xlane.xlu1 %9205 }
0x17a9   : > { %18061 = vrcp.f32 %v9206_v52  ;;  %v9204_v15 = vpop.xlane.xlu0 %9203 }
0x17aa   : > { %18063 = vrcp.f32 %v9204_v15  ;;  %v11948_v15 = vld [vmem:[%s23179_s4 + $0x3b0] sm:$0xff] }
0x17ac   : > { %v9210_v41 = vpop.xlane.xlu1 %9209 }
0x17ad   : > { %18065 = vrcp.f32 %v9210_v41  ;;  %v9208_v44 = vpop.xlane.xlu0 %9207  ;;  %v11949_v41 = vld [vmem:[%s23179_s4 + $0x3b8] sm:$0xff] }
0x17ae   : > { %18067 = vrcp.f32 %v9208_v44  ;;  %v17314_v44 = vpack.c.bf16 %v11949_v41, %v11948_v15  ;;  %v11975_v15 = vld [vmem:[%s23181_s6 + $0x3f8] sm:$0xff] }
0x17b0   : > { %v9214_v16 = vpop.xlane.xlu1 %9213 }
0x17b1   : > { %18069 = vrcp.f32 %v9214_v16  ;;  %v9212_v53 = vpop.xlane.xlu0 %9211  ;;  %v11950_v16 = vld [vmem:[%s23179_s4 + $0x3c0] sm:$0xff] }
0x17b2   : > { %18071 = vrcp.f32 %v9212_v53  ;;  %v11951_v53 = vld [vmem:[%s23179_s4 + $0x3c8] sm:$0xff] }
0x17b3   : > { %v18062_v6 = vpop.eup %18061 }
0x17b4   : > { %v18064_v28 = vpop.eup %18063  ;;  %v9238_v32 = vmul.f32 %v18062_v6, %v22421_v11  ;;  %v9218_v30 = vpop.xlane.xlu1 %9217  ;;  %v17318_v6 = vpack.c.bf16 %v11951_v53, %v11950_v16 }
0x17b5   : > { %18073 = vrcp.f32 %v9218_v30  ;;  %v9216_v8 = vpop.xlane.xlu0 %9215  ;;  %v9236_v12 = vmul.f32 %v18064_v28, %v22424_v7  ;;  %v17322_v28 = vpack.c.bf16 %v11953_v57, %v11952_v2  ;;  %v11955_v30 = vld [vmem:[%s23179_s4 + $0x3e8] sm:$0xff]  ;;  %v18411_v2 = vld [vmem:[%s18789_s24] sm:$0xff] }
0x17b6   : > { %11907 = vst [vmem:[%s19291_s30 + $0x308] sm:$0xff] %v9238_v32  ;;  %18075 = vrcp.f32 %v9216_v8  ;;  %v18412_v57 = vld [vmem:[%s18789_s24 + $0x8] sm:$0xff] }
0x17b7   : > { %v18066_v19 = vpop.eup %18065  ;;  %11906 = vst [vmem:[%s19291_s30 + $0x300] sm:$0xff] %v9236_v12  ;;  %15646 = vmatprep.mubr.f32.mxu0 %v9236_v12  ;;  %v11956_v12 = vld [vmem:[%s23179_s4 + $0x3f0] sm:$0xff] }
0x17b8   : > { %v18068_v40 = vpop.eup %18067  ;;  %v9222_v14 = vpop.xlane.xlu1 %9221  ;;  %15647 = vmatmul.mubr.f32.vlgmr.msra.gmra.mrb[240].mxu0 %v9238_v32  ;;  %v9242_v50 = vmul.f32 %v18066_v19, %v22431_v29  ;;  %v11954_v32 = vld [vmem:[%s23179_s4 + $0x3e0] sm:$0xff] }
0x17b9   : > { %18077 = vrcp.f32 %v9222_v14  ;;  %v9220_v11 = vpop.xlane.xlu0 %9219  ;;  %v9240_v26 = vmul.f32 %v18068_v40, %v22434_v43  ;;  %17297 = vmatpush3.bf16.msra.mxu0 %v17294_v42  ;;  %v11947_v42 = vld [vmem:[%s23179_s4 + $0x3a8] sm:$0xff]  ;;  %v17326_v8 = vpack.c.bf16 %v11955_v30, %v11954_v32  ;;  %v18396_v14 = vld [vmem:[%s18690_s15 + $0x10] sm:$0xff]  ;;  %v18414_v32 = vld [vmem:[%s18789_s24 + $0x18] sm:$0xff] }
0x17ba   : > { %18079 = vrcp.f32 %v9220_v11  ;;  %11909 = vst [vmem:[%s19291_s30 + $0x318] sm:$0xff] %v9242_v50  ;;  %17299 = vmatprep.subr.bf16.mxu0 %v17298_v3  ;;  %v17310_v52 = vpack.c.bf16 %v11947_v42, %v11946_v35  ;;  %v18395_v40 = vld [vmem:[%s18690_s15 + $0x8] sm:$0xff]  ;;  %v18398_v11 = vld [vmem:[%s18690_s15 + $0x20] sm:$0xff] }
0x17bb   : > { %v18070_v7 = vpop.eup %18069  ;;  %11908 = vst [vmem:[%s19291_s30 + $0x310] sm:$0xff] %v9240_v26  ;;  %15649 = vmatprep.mubr.f32.mxu0 %v9240_v26  ;;  %v18399_v26 = vld [vmem:[%s18690_s15 + $0x28] sm:$0xff]  ;;  %v18415_v30 = vld [vmem:[%s18789_s24 + $0x20] sm:$0xff] }
0x17bc   : > { %v18072_v38 = vpop.eup %18071  ;;  %v9226_v10 = vpop.xlane.xlu1 %9225  ;;  %15650 = vmatmul.mubr.f32.gmra.mrb[242].mxu0 %v9242_v50  ;;  %v9246_v55 = vmul.f32 %v18070_v7, %v22441_v21  ;;  %v18397_v50 = vld [vmem:[%s18690_s15 + $0x18] sm:$0xff]  ;;  %v18400_v7 = vld [vmem:[%s18690_s15 + $0x30] sm:$0xff] }
0x17bd   : > { %18081 = vrcp.f32 %v9226_v10  ;;  %v9224_v29 = vpop.xlane.xlu0 %9223  ;;  %v9244_v22 = vmul.f32 %v18072_v38, %v22444_v59  ;;  %17301 = vmatpush3.bf16.msra.mxu0 %v17298_v3  ;;  %v11957_v3 = vld [vmem:[%s23179_s4 + $0x3f8] sm:$0xff]  ;;  %v18402_v10 = vld [vmem:[%s18690_s15 + $0x40] sm:$0xff] }
0x17be   : > { %18083 = vrcp.f32 %v9224_v29  ;;  %11911 = vst [vmem:[%s19291_s30 + $0x328] sm:$0xff] %v9246_v55  ;;  %v17330_v19 = vpack.c.bf16 %v11957_v3, %v11956_v12  ;;  %v18401_v38 = vld [vmem:[%s18690_s15 + $0x38] sm:$0xff]  ;;  %v18404_v29 = vld [vmem:[%s18690_s15 + $0x50] sm:$0xff] }
0x17bf   : > { %v18074_v43 = vpop.eup %18073  ;;  %11910 = vst [vmem:[%s19291_s30 + $0x320] sm:$0xff] %v9244_v22  ;;  %15652 = vmatprep.mubr.f32.mxu0 %v9244_v22  ;;  %v18405_v22 = vld [vmem:[%s18690_s15 + $0x58] sm:$0xff]  ;;  %v18417_v12 = vld [vmem:[%s18789_s24 + $0x30] sm:$0xff] }
0x17c0   : > { %v18076_v25 = vpop.eup %18075  ;;  %v9230_v20 = vpop.xlane.xlu1 %9229  ;;  %15653 = vmatmul.mubr.f32.gmra.mrb[244].mxu0 %v9246_v55  ;;  %v9250_v0 = vmul.f32 %v18074_v43, %v22451_v36  ;;  %v18403_v55 = vld [vmem:[%s18690_s15 + $0x48] sm:$0xff]  ;;  %v18406_v43 = vld [vmem:[%s18690_s15 + $0x60] sm:$0xff]  ;;  %v18418_v3 = vld [vmem:[%s18789_s24 + $0x38] sm:$0xff] }
0x17c1   : > { %18085 = vrcp.f32 %v9230_v20  ;;  %v9228_v21 = vpop.xlane.xlu0 %9227  ;;  %v9248_v48 = vmul.f32 %v18076_v25, %v22454_v37  ;;  %v18407_v25 = vld [vmem:[%s18690_s15 + $0x68] sm:$0xff]  ;;  %v18408_v20 = vld [vmem:[%s18690_s15 + $0x70] sm:$0xff] }
0x17c2   : > { %18087 = vrcp.f32 %v9228_v21  ;;  %11913 = vst [vmem:[%s19291_s30 + $0x338] sm:$0xff] %v9250_v0  ;;  %v18410_v21 = vld [vmem:[%s18984_s25] sm:$0xff] }
0x17c3   : > { %v18078_v59 = vpop.eup %18077  ;;  %11912 = vst [vmem:[%s19291_s30 + $0x330] sm:$0xff] %v9248_v48  ;;  %15655 = vmatprep.mubr.f32.mxu0 %v9248_v48  ;;  %v11962_v48 = vld [vmem:[%s23181_s6 + $0x390] sm:$0xff] }
0x17c4   : > { %v18080_v60 = vpop.eup %18079  ;;  %v9234_v1 = vpop.xlane.xlu1 %9233  ;;  %15656 = vmatmul.mubr.f32.gmra.mrb[246].mxu0 %v9250_v0  ;;  %v9254_v5 = vmul.f32 %v18078_v59, %v22461_v4  ;;  %v18409_v0 = vld [vmem:[%s18690_s15 + $0x78] sm:$0xff]  ;;  %s23069_s15 = scalar_lea.hbm %s23188_s13, %s12077_s23 }
0x17c5   : > { %18089 = vrcp.f32 %v9234_v1  ;;  %v9232_v36 = vpop.xlane.xlu0 %9231  ;;  %v9252_v62 = vmul.f32 %v18080_v60, %v22463_v34  ;;  %v11963_v59 = vld [vmem:[%s23181_s6 + $0x398] sm:$0xff] }
0x17c6   : > { %18091 = vrcp.f32 %v9232_v36  ;;  %11915 = vst [vmem:[%s19291_s30 + $0x348] sm:$0xff] %v9254_v5  ;;  %v11964_v36 = vld [vmem:[%s23181_s6 + $0x3a0] sm:$0xff] }
0x17c7   : > { %v18082_v37 = vpop.eup %18081  ;;  %11914 = vst [vmem:[%s19291_s30 + $0x340] sm:$0xff] %v9252_v62  ;;  %15658 = vmatprep.mubr.f32.mxu0 %v9252_v62  ;;  %v11965_v62 = vld [vmem:[%s23181_s6 + $0x3a8] sm:$0xff] }
0x17c8   : > { %v18084_v46 = vpop.eup %18083  ;;  %15659 = vmatmul.mubr.f32.gmra.mrb[248].mxu0 %v9254_v5  ;;  %v9258_v49 = vmul.f32 %v18082_v37, %v22469_v39  ;;  %v17338_v5 = vpack.c.bf16 %v11963_v59, %v11962_v48 }
0x17c9   : > { %v9256_v13 = vmul.f32 %v18084_v46, %v22471_v63  ;;  %v11960_v63 = vld [vmem:[%s23181_s6 + $0x380] sm:$0xff] }
0x17ca   : > { %11917 = vst [vmem:[%s19291_s30 + $0x358] sm:$0xff] %v9258_v49  ;;  %v22539_v23 = vpack.c.bf16 %v11961_v9, %v11960_v63  ;;  %v11970_v9 = vld [vmem:[%s23181_s6 + $0x3d0] sm:$0xff] }
0x17cb   : > { %v18086_v4 = vpop.eup %18085  ;;  %11916 = vst [vmem:[%s19291_s30 + $0x350] sm:$0xff] %v9256_v13  ;;  %15661 = vmatprep.mubr.f32.mxu0 %v9256_v13  ;;  %v11966_v13 = vld [vmem:[%s23181_s6 + $0x3b0] sm:$0xff] }
0x17cc   : > { %v18088_v34 = vpop.eup %18087  ;;  %15662 = vmatmul.mubr.f32.gmra.mrb[250].mxu0 %v9258_v49  ;;  %v9262_v17 = vmul.f32 %v18086_v4, %v22477_v24  ;;  %17335 = vmatprep.subr.bf16.mxu0 %v22539_v23  ;;  %v11943_v24 = vld [vmem:[%s23179_s4 + $0x388] sm:$0xff]  ;;  %v17342_v49 = vpack.c.bf16 %v11965_v62, %v11964_v36  ;;  %v11967_v4 = vld [vmem:[%s23181_s6 + $0x3b8] sm:$0xff] }
0x17cd   : > { %v9260_v45 = vmul.f32 %v18088_v34, %v22479_v47  ;;  %v11944_v47 = vld [vmem:[%s23179_s4 + $0x390] sm:$0xff] }
0x17ce   : > { %11919 = vst [vmem:[%s19291_s30 + $0x368] sm:$0xff] %v9262_v17 }
0x17cf   : > { %v18090_v51 = vpop.eup %18089  ;;  %11918 = vst [vmem:[%s19291_s30 + $0x360] sm:$0xff] %v9260_v45  ;;  %15664 = vmatprep.mubr.f32.mxu0 %v9260_v45  ;;  %v17346_v45 = vpack.c.bf16 %v11967_v4, %v11966_v13 }
0x17d0   : > { %v18092_v61 = vpop.eup %18091  ;;  %15665 = vmatmul.mubr.f32.gmra.mrb[252].mxu0 %v9262_v17  ;;  %v9266_v39 = vmul.f32 %v18090_v51, %v22483_v33  ;;  %v17302_v33 = vpack.c.bf16 %v11943_v24, %v11942_v18  ;;  %v11968_v51 = vld [vmem:[%s23181_s6 + $0x3c0] sm:$0xff] }
0x17d1   : > { %v9264_v56 = vmul.f32 %v18092_v61, %v22485_v27  ;;  %v11945_v27 = vld [vmem:[%s23179_s4 + $0x398] sm:$0xff]  ;;  %v11969_v61 = vld [vmem:[%s23181_s6 + $0x3c8] sm:$0xff] }
0x17d2   : > { %11921 = vst [vmem:[%s19291_s30 + $0x378] sm:$0xff] %v9266_v39  ;;  %v17306_v31 = vpack.c.bf16 %v11945_v27, %v11944_v47  ;;  %17303 = vmatprep.subr.bf16.mxu1 %v17302_v33  ;;  %v17350_v63 = vpack.c.bf16 %v11969_v61, %v11968_v51  ;;  %v11973_v27 = vld [vmem:[%s23181_s6 + $0x3e8] sm:$0xff] }
0x17d3   : > { %11920 = vst [vmem:[%s19291_s30 + $0x370] sm:$0xff] %v9264_v56  ;;  %15667 = vmatprep.mubr.f32.mxu0 %v9264_v56  ;;  %17305 = vmatpush3.bf16.msra.mxu1 %v17302_v33  ;;  %v11972_v33 = vld [vmem:[%s23181_s6 + $0x3e0] sm:$0xff] }
0x17d4   : > { %15668 = vmatmul.mubr.f32.gmra.mrb[254].mxu0 %v9266_v39  ;;  %17307 = vmatprep.subr.bf16.mxu1 %v17306_v31  ;;  %v17358_v42 = vpack.c.bf16 %v11973_v27, %v11972_v33 }
0x17d7   : > { %17309 = vmatpush3.bf16.msra.mxu1 %v17306_v31 }
0x17d8   : > { %17311 = vmatprep.subr.bf16.mxu1 %v17310_v52 }
0x17db   : > { %17313 = vmatpush3.bf16.msra.mxu1 %v17310_v52  ;;  %v11974_v52 = vld [vmem:[%s23181_s6 + $0x3f0] sm:$0xff] }
0x17dc   : > { %17315 = vmatprep.subr.bf16.mxu1 %v17314_v44  ;;  %v17362_v16 = vpack.c.bf16 %v11975_v15, %v11974_v52 }
0x17df   : > { %17317 = vmatpush3.bf16.msra.mxu1 %v17314_v44 }
0x17e0   : > { %17319 = vmatprep.subr.bf16.mxu1 %v17318_v6 }
0x17e3   : > { %17321 = vmatpush3.bf16.msra.mxu1 %v17318_v6 }
0x17e4   : > { %17323 = vmatprep.subr.bf16.mxu1 %v17322_v28 }
0x17e7   : > { %17325 = vmatpush3.bf16.msra.mxu1 %v17322_v28  ;;  %v18413_v28 = vld [vmem:[%s18789_s24 + $0x10] sm:$0xff] }
0x17e8   : > { %17327 = vmatprep.subr.bf16.mxu1 %v17326_v8 }
0x17eb   : > { %17329 = vmatpush3.bf16.msra.mxu1 %v17326_v8  ;;  %v18416_v8 = vld [vmem:[%s18789_s24 + $0x28] sm:$0xff] }
0x17ec   : > { %17331 = vmatprep.subr.bf16.mxu1 %v17330_v19 }
0x17ef   : > { %17333 = vmatpush3.bf16.msra.mxu1 %v17330_v19  ;;  %v18419_v19 = vld [vmem:[%s18789_s24 + $0x40] sm:$0xff] }
0x17f2   : > { %15735 = vmatmul.mubr.f32.vlgmr.msra.gmra.mrb[64].mxu1 %v18395_v40  ;;  %v18420_v40 = vld [vmem:[%s18789_s24 + $0x48] sm:$0xff] }
0x17f3   : > { %15737 = vmatprep.mubr.f32.mxu1 %v18396_v14  ;;  %v18421_v14 = vld [vmem:[%s18789_s24 + $0x50] sm:$0xff] }
0x17f6   : > { %15738 = vmatmul.mubr.f32.gmra.mrb[66].mxu1 %v18397_v50  ;;  %v18422_v50 = vld [vmem:[%s18789_s24 + $0x58] sm:$0xff] }
0x17f7   : > { %15740 = vmatprep.mubr.f32.mxu1 %v18398_v11  ;;  %v18423_v11 = vld [vmem:[%s18789_s24 + $0x60] sm:$0xff] }
0x17fa   : > { %15741 = vmatmul.mubr.f32.gmra.mrb[68].mxu1 %v18399_v26  ;;  %v18424_v26 = vld [vmem:[%s18789_s24 + $0x68] sm:$0xff] }
0x17fb   : > { %15743 = vmatprep.mubr.f32.mxu1 %v18400_v7  ;;  %v18425_v7 = vld [vmem:[%s18789_s24 + $0x70] sm:$0xff] }
0x17fe   : > { %15744 = vmatmul.mubr.f32.gmra.mrb[70].mxu1 %v18401_v38  ;;  %v18426_v38 = vld [vmem:[%s18789_s24 + $0x78] sm:$0xff]  ;;  %s18442_s24 = scalar_lea.vmem %s23071_s27, 16384 }
0x17ff   : > { %15746 = vmatprep.mubr.f32.mxu1 %v18402_v10  ;;  %p18443_p11 = scmp.ne.s32.totalorder %s23071_s27, %s18442_s24 }
0x1801   : > { %p18444_p12 = pnand %p18443_p11, %p18651_p5 }
0x1802   : > { %15747 = vmatmul.mubr.f32.gmra.mrb[72].mxu1 %v18403_v55  ;;  %v11959_v55 = vld [vmem:[%s23180_s5 + $0x7] ss:$0 sm:$0xff] }
0x1803   : > { %15749 = vmatprep.mubr.f32.mxu1 %v18404_v29  ;;  %p18445_p13 = pneg %p18444_p12 }
0x1806   : > { %15750 = vmatmul.mubr.f32.gmra.mrb[74].mxu1 %v18405_v22 }
0x1807   : > { %15752 = vmatprep.mubr.f32.mxu1 %v18406_v43 }
0x180a   : > { %15753 = vmatmul.mubr.f32.gmra.mrb[76].mxu1 %v18407_v25 }
0x180b   : > { %15755 = vmatprep.mubr.f32.mxu1 %v18408_v20 }
0x180e   : > { %15756 = vmatmul.mubr.f32.gmra.mrb[78].mxu1 %v18409_v0 }
0x180f   : > { %15846 = vmatprep.mubr.f32.mxu1 %v18410_v21 }
0x188b   : > { %v15648_v60 = vpop.f32.mrb[240].mxu0 }
0x188c   : > { %v9350_v1 = vpop.f32.mrb[241].mxu0 }
0x188d   : > { %15678 = vmatprep.mubr.msk.f32.mxu0 %vm2741_vm4, %v9350_v1 }
0x188e   : > { %15679 = vmatmul.mubr.msk.f32.vlgmr.msra.gmra.mrb[80].mxu0 %vm2741_vm4, %v15648_v60 }
0x188f   : > { %v15651_v37 = vpop.f32.mrb[242].mxu0  ;;  %17337 = vmatpush3.bf16.msra.mxu0 %v22539_v23  ;;  %v11971_v23 = vld [vmem:[%s23181_s6 + $0x3d8] sm:$0xff] }
0x1890   : > { %v9360_v46 = vpop.f32.mrb[243].mxu0  ;;  %17339 = vmatprep.subr.bf16.mxu0 %v17338_v5  ;;  %v17354_v47 = vpack.c.bf16 %v11971_v23, %v11970_v9 }
0x1891   : > { %15681 = vmatprep.mubr.msk.f32.mxu0 %vm2741_vm4, %v9360_v46 }
0x1892   : > { %15682 = vmatmul.mubr.msk.f32.gmra.mrb[82].mxu0 %vm2741_vm4, %v15651_v37 }
0x1893   : > { %v15654_v34 = vpop.f32.mrb[244].mxu0  ;;  %17341 = vmatpush3.bf16.msra.mxu0 %v17338_v5 }
0x1894   : > { %v9370_v17 = vpop.f32.mrb[245].mxu0  ;;  %17343 = vmatprep.subr.bf16.mxu0 %v17342_v49 }
0x1895   : > { %15684 = vmatprep.mubr.msk.f32.mxu0 %vm2741_vm4, %v9370_v17 }
0x1896   : > { %15685 = vmatmul.mubr.msk.f32.gmra.mrb[84].mxu0 %vm2741_vm4, %v15654_v34 }
0x1897   : > { %v15657_v39 = vpop.f32.mrb[246].mxu0  ;;  %17345 = vmatpush3.bf16.msra.mxu0 %v17342_v49 }
0x1898   : > { %v9380_v56 = vpop.f32.mrb[247].mxu0  ;;  %17347 = vmatprep.subr.bf16.mxu0 %v17346_v45 }
0x1899   : > { %15687 = vmatprep.mubr.msk.f32.mxu0 %vm2741_vm4, %v9380_v56 }
0x189a   : > { %15688 = vmatmul.mubr.msk.f32.gmra.mrb[86].mxu0 %vm2741_vm4, %v15657_v39 }
0x189b   : > { %v15660_v18 = vpop.f32.mrb[248].mxu0  ;;  %17349 = vmatpush3.bf16.msra.mxu0 %v17346_v45 }
0x189c   : > { %v9390_v24 = vpop.f32.mrb[249].mxu0  ;;  %17351 = vmatprep.subr.bf16.mxu0 %v17350_v63 }
0x189d   : > { %15690 = vmatprep.mubr.msk.f32.mxu0 %vm2741_vm4, %v9390_v24 }
0x189e   : > { %15691 = vmatmul.mubr.msk.f32.gmra.mrb[88].mxu0 %vm2741_vm4, %v15660_v18 }
0x189f   : > { %v15663_v31 = vpop.f32.mrb[250].mxu0  ;;  %17353 = vmatpush3.bf16.msra.mxu0 %v17350_v63 }
0x18a0   : > { %v9400_v35 = vpop.f32.mrb[251].mxu0  ;;  %17355 = vmatprep.subr.bf16.mxu0 %v17354_v47 }
0x18a1   : > { %15693 = vmatprep.mubr.msk.f32.mxu0 %vm2741_vm4, %v9400_v35 }
0x18a2   : > { %15694 = vmatmul.mubr.msk.f32.gmra.mrb[90].mxu0 %vm2741_vm4, %v15663_v31 }
0x18a3   : > { %v15666_v41 = vpop.f32.mrb[252].mxu0  ;;  %17357 = vmatpush3.bf16.msra.mxu0 %v17354_v47  ;;  %v11977_v47 = vld [vmem:[%s23182_s7 + $0x7] ss:$0 sm:$0xff] }
0x18a4   : > { %v9410_v44 = vpop.f32.mrb[253].mxu0  ;;  %17359 = vmatprep.subr.bf16.mxu0 %v17358_v42 }
0x18a5   : > { %15696 = vmatprep.mubr.msk.f32.mxu0 %vm2741_vm4, %v9410_v44 }
0x18a6   : > { %15697 = vmatmul.mubr.msk.f32.gmra.mrb[92].mxu0 %vm2741_vm4, %v15666_v41 }
0x18a7   : > { %v15669_v53 = vpop.f32.mrb[254].mxu0  ;;  %17361 = vmatpush3.bf16.msra.mxu0 %v17358_v42 }
0x18a8   : > { %v9420_v6 = vpop.f32.mrb[255].mxu0  ;;  %17363 = vmatprep.subr.bf16.mxu0 %v17362_v16 }
0x18a9   : > { %15699 = vmatprep.mubr.msk.f32.mxu0 %vm2741_vm4, %v9420_v6 }
0x18aa   : > { %15700 = vmatmul.mubr.msk.f32.gmra.mrb[94].mxu0 %vm2741_vm4, %v15669_v53 }
0x18ab   : > { %17365 = vmatpush3.bf16.msra.mxu0 %v17362_v16  ;;  %15790 = vmatprep.mubr.f32.mxu0 %v18411_v2 }
0x18ae   : > { %15791 = vmatmul.mubr.f32.vlgmr.msra.gmra.mrb[0].mxu0 %v18412_v57 }
0x18af   : > { %15793 = vmatprep.mubr.f32.mxu0 %v18413_v28 }
0x18b2   : > { %15794 = vmatmul.mubr.f32.gmra.mrb[2].mxu0 %v18414_v32 }
0x18b3   : > { %15796 = vmatprep.mubr.f32.mxu0 %v18415_v30 }
0x18b6   : > { %15797 = vmatmul.mubr.f32.gmra.mrb[4].mxu0 %v18416_v8 }
0x18b7   : > { %15799 = vmatprep.mubr.f32.mxu0 %v18417_v12 }
0x18ba   : > { %15800 = vmatmul.mubr.f32.gmra.mrb[6].mxu0 %v18418_v3 }
0x18bb   : > { %15802 = vmatprep.mubr.f32.mxu0 %v18419_v19 }
0x18be   : > { %15803 = vmatmul.mubr.f32.gmra.mrb[8].mxu0 %v18420_v40 }
0x18bf   : > { %15805 = vmatprep.mubr.f32.mxu0 %v18421_v14 }
0x18c2   : > { %15806 = vmatmul.mubr.f32.gmra.mrb[10].mxu0 %v18422_v50 }
0x18c3   : > { %15808 = vmatprep.mubr.f32.mxu0 %v18423_v11 }
0x18c5   : > { %v15736_v10 = vpop.f32.mrb[64].mxu1 }
0x18c6   : > { %15809 = vmatmul.mubr.f32.gmra.mrb[12].mxu0 %v18424_v26  ;;  %v22684_v29 = vadd.f32 %v15736_v10, %v11959_v55  ;;  %v9734_v22 = vpop.f32.mrb[65].mxu1 }
0x18c7   : > { %15811 = vmatprep.mubr.f32.mxu0 %v18425_v7  ;;  %v9735_v43 = vadd.f32 %v11959_v55, %v9734_v22 }
0x18c9   : > { %v15739_v25 = vpop.f32.mrb[66].mxu1 }
0x18ca   : > { %15812 = vmatmul.mubr.f32.gmra.mrb[14].mxu0 %v18426_v38  ;;  %v22686_v20 = vadd.f32 %v15739_v25, %v11959_v55  ;;  %v9744_v0 = vpop.f32.mrb[67].mxu1 }
0x18cb   : > { %15902 = vmatprep.mubr.msk.f32.mxu0 %vm1057_vm0, %v9735_v43  ;;  %v22689_v21 = vadd.f32 %v11959_v55, %v9744_v0 }
0x18cd   : > { %v15742_v48 = vpop.f32.mrb[68].mxu1 }
0x18ce   : > { %v22691_v59 = vadd.f32 %v15742_v48, %v11959_v55  ;;  %v9754_v60 = vpop.f32.mrb[69].mxu1 }
0x18cf   : > { %v22693_v1 = vadd.f32 %v11959_v55, %v9754_v60 }
0x18d1   : > { %v15745_v5 = vpop.f32.mrb[70].mxu1 }
0x18d2   : > { %v22695_v36 = vadd.f32 %v15745_v5, %v11959_v55  ;;  %v9764_v62 = vpop.f32.mrb[71].mxu1 }
0x18d3   : > { %v22697_v37 = vadd.f32 %v11959_v55, %v9764_v62 }
0x18d5   : > { %v15748_v46 = vpop.f32.mrb[72].mxu1 }
0x18d6   : > { %v22699_v49 = vadd.f32 %v15748_v46, %v11959_v55  ;;  %v9774_v13 = vpop.f32.mrb[73].mxu1 }
0x18d7   : > { %v22701_v4 = vadd.f32 %v11959_v55, %v9774_v13 }
0x18d9   : > { %v15751_v34 = vpop.f32.mrb[74].mxu1 }
0x18da   : > { %v22703_v17 = vadd.f32 %v15751_v34, %v11959_v55  ;;  %v9784_v45 = vpop.f32.mrb[75].mxu1  ;;  %v11985_v34 = vld [vmem:[%s23183_s8 + $0x3b8] sm:$0xff] }
0x18db   : > { %v22705_v51 = vadd.f32 %v11959_v55, %v9784_v45  ;;  %v11986_v45 = vld [vmem:[%s23183_s8 + $0x3c0] sm:$0xff] }
0x18dd   : > { %v15754_v61 = vpop.f32.mrb[76].mxu1 }
0x18de   : > { %v22707_v39 = vadd.f32 %v15754_v61, %v11959_v55  ;;  %v9794_v56 = vpop.f32.mrb[77].mxu1 }
0x18df   : > { %v22709_v63 = vadd.f32 %v11959_v55, %v9794_v56  ;;  %v11989_v56 = vld [vmem:[%s23183_s8 + $0x3d8] sm:$0xff] }
0x18e1   : > { %v15757_v9 = vpop.f32.mrb[78].mxu1 }
0x18e2   : > { %v22711_v23 = vadd.f32 %v15757_v9, %v11959_v55  ;;  %v9804_v18 = vpop.f32.mrb[79].mxu1  ;;  %v11990_v9 = vld [vmem:[%s23183_s8 + $0x3e0] sm:$0xff] }
0x18e3   : > { %v22713_v24 = vadd.f32 %v11959_v55, %v9804_v18 }
0x1981   : > { %v15792_v33 = vpop.f32.mrb[0].mxu0 }
0x1982   : > { %v9910_v27 = vadd.f32 %v15792_v33, %v11977_v47  ;;  %v9904_v31 = vpop.f32.mrb[1].mxu0 }
0x1983   : > { %v9905_v35 = vadd.f32 %v11977_v47, %v9904_v31  ;;  %v18428_v31 = vld [vmem:[%s18984_s25 + $0x10] sm:$0xff] }
0x1985   : > { %v17398_v42 = vpack.c.bf16 %v9910_v27, %v9905_v35  ;;  %v15795_v52 = vpop.f32.mrb[2].mxu0  ;;  %v18427_v27 = vld [vmem:[%s18984_s25 + $0x8] sm:$0xff]  ;;  %v18429_v35 = vld [vmem:[%s18984_s25 + $0x18] sm:$0xff] }
0x1986   : > { %v9920_v15 = vadd.f32 %v15795_v52, %v11977_v47  ;;  %v9914_v41 = vpop.f32.mrb[3].mxu0  ;;  %v18431_v52 = vld [vmem:[%s18984_s25 + $0x28] sm:$0xff] }
0x1987   : > { %17400 = vmatprep.subr.msk.bf16.mxu0 %vm18895_vm1, %v17398_v42  ;;  %v9915_v44 = vadd.f32 %v11977_v47, %v9914_v41  ;;  %v18433_v41 = vld [vmem:[%s18984_s25 + $0x38] sm:$0xff] }
0x1988   : > { %17403 = vmatpush3.bf16.xpose.msk.msra.mxu0 %vm18895_vm1, %v17398_v42  ;;  %v18430_v42 = vld [vmem:[%s18984_s25 + $0x20] sm:$0xff] }
0x1989   : > { %v17404_v16 = vpack.c.bf16 %v9920_v15, %v9915_v44  ;;  %v15798_v53 = vpop.f32.mrb[4].mxu0  ;;  %v18432_v15 = vld [vmem:[%s18984_s25 + $0x30] sm:$0xff]  ;;  %v18434_v44 = vld [vmem:[%s18984_s25 + $0x40] sm:$0xff] }
0x198a   : > { %v9930_v6 = vadd.f32 %v15798_v53, %v11977_v47  ;;  %v9924_v2 = vpop.f32.mrb[5].mxu0  ;;  %v18436_v53 = vld [vmem:[%s18984_s25 + $0x50] sm:$0xff] }
0x198b   : > { %17406 = vmatprep.subr.msk.bf16.mxu0 %vm18895_vm1, %v17404_v16  ;;  %v9925_v57 = vadd.f32 %v11977_v47, %v9924_v2  ;;  %v18438_v2 = vld [vmem:[%s18984_s25 + $0x60] sm:$0xff] }
0x198d   : > { %v17410_v28 = vpack.c.bf16 %v9930_v6, %v9925_v57  ;;  %v15801_v32 = vpop.f32.mrb[6].mxu0  ;;  %v18437_v6 = vld [vmem:[%s18984_s25 + $0x58] sm:$0xff]  ;;  %v18439_v57 = vld [vmem:[%s18984_s25 + $0x68] sm:$0xff] }
0x198e   : > { %v9940_v30 = vadd.f32 %v15801_v32, %v11977_v47  ;;  %v9934_v8 = vpop.f32.mrb[7].mxu0  ;;  %v18441_v32 = vld [vmem:[%s18984_s25 + $0x78] sm:$0xff] }
0x198f   : > { %v9935_v12 = vadd.f32 %v11977_v47, %v9934_v8 }
0x1990   : > { %17409 = vmatpush3.bf16.xpose.msk.msra.mxu0 %vm18895_vm1, %v17404_v16  ;;  %v18435_v16 = vld [vmem:[%s18984_s25 + $0x48] sm:$0xff] }
0x1991   : > { %17412 = vmatprep.subr.msk.bf16.mxu0 %vm18895_vm1, %v17410_v28  ;;  %v17416_v3 = vpack.c.bf16 %v9940_v30, %v9935_v12  ;;  %v15804_v19 = vpop.f32.mrb[8].mxu0 }
0x1992   : > { %v9950_v40 = vadd.f32 %v15804_v19, %v11977_v47  ;;  %v9944_v14 = vpop.f32.mrb[9].mxu0 }
0x1993   : > { %v9945_v50 = vadd.f32 %v11977_v47, %v9944_v14 }
0x1995   : > { %v17422_v11 = vpack.c.bf16 %v9950_v40, %v9945_v50  ;;  %v15807_v26 = vpop.f32.mrb[10].mxu0 }
0x1996   : > { %v9960_v7 = vadd.f32 %v15807_v26, %v11977_v47  ;;  %v9954_v38 = vpop.f32.mrb[11].mxu0 }
0x1997   : > { %v9955_v10 = vadd.f32 %v11977_v47, %v9954_v38 }
0x1998   : > { %17415 = vmatpush3.bf16.xpose.msk.msra.mxu0 %vm18895_vm1, %v17410_v28  ;;  %v18440_v28 = vld [vmem:[%s18984_s25 + $0x70] sm:$0xff] }
0x1999   : > { %17418 = vmatprep.subr.msk.bf16.mxu0 %vm18895_vm1, %v17416_v3  ;;  %v17428_v55 = vpack.c.bf16 %v9960_v7, %v9955_v10  ;;  %v15810_v22 = vpop.f32.mrb[12].mxu0 }
0x199a   : > { %v9970_v43 = vadd.f32 %v15810_v22, %v11977_v47  ;;  %v9964_v25 = vpop.f32.mrb[13].mxu0 }
0x199b   : > { %v9965_v0 = vadd.f32 %v11977_v47, %v9964_v25 }
0x199d   : > { %v17434_v48 = vpack.c.bf16 %v9970_v43, %v9965_v0  ;;  %v15813_v60 = vpop.f32.mrb[14].mxu0 }
0x199e   : > { %v9980_v5 = vadd.f32 %v15813_v60, %v11977_v47  ;;  %v9974_v62 = vpop.f32.mrb[15].mxu0 }
0x199f   : > { %v9975_v46 = vadd.f32 %v11977_v47, %v9974_v62  ;;  %v11993_v47 = vld [vmem:[%s23183_s8 + $0x3f8] sm:$0xff] }
0x19a0   : > { %17421 = vmatpush3.bf16.xpose.msk.msra.mxu0 %vm18895_vm1, %v17416_v3 }
0x19a1   : > { %17424 = vmatprep.subr.msk.bf16.mxu0 %vm18895_vm1, %v17422_v11  ;;  %v17440_v13 = vpack.c.bf16 %v9980_v5, %v9975_v46 }
0x19a8   : > { %17427 = vmatpush3.bf16.xpose.msk.msra.mxu0 %vm18895_vm1, %v17422_v11 }
0x19a9   : > { %17430 = vmatprep.subr.msk.bf16.mxu0 %vm18895_vm1, %v17428_v55 }
0x19b0   : > { %17433 = vmatpush3.bf16.xpose.msk.msra.mxu0 %vm18895_vm1, %v17428_v55 }
0x19b1   : > { %17436 = vmatprep.subr.msk.bf16.mxu0 %vm18895_vm1, %v17434_v48 }
0x19b8   : > { %17439 = vmatpush3.bf16.xpose.msk.msra.mxu0 %vm18895_vm1, %v17434_v48 }
0x19b9   : > { %17442 = vmatprep.subr.msk.bf16.mxu0 %vm18895_vm1, %v17440_v13 }
0x19c0   : > { %17445 = vmatpush3.bf16.xpose.msk.msra.mxu0 %vm18895_vm1, %v17440_v13 }
0x19c7   : > { %15903 = vmatmul.mubr.msk.f32.vlgmr.msra.gmra.mrb[16].mxu0 %vm1057_vm0, %v22684_v29  ;;  %v11979_v29 = vld [vmem:[%s23183_s8 + $0x388] sm:$0xff] }
0x19c8   : > { %15905 = vmatprep.mubr.msk.f32.mxu0 %vm1057_vm0, %v22689_v21  ;;  %v17366_v21 = vpack.c.bf16 %v11979_v29, %v11978_v54 }
0x19ca   : > { %17367 = vmatprep.subr.bf16.mxu1 %v17366_v21 }
0x19cb   : > { %15906 = vmatmul.mubr.msk.f32.gmra.mrb[18].mxu0 %vm1057_vm0, %v22686_v20  ;;  %v11980_v20 = vld [vmem:[%s23183_s8 + $0x390] sm:$0xff]  ;;  %17369 = vmatpush3.bf16.msra.mxu1 %v17366_v21 }
0x19cc   : > { %15908 = vmatprep.mubr.msk.f32.mxu0 %vm1057_vm0, %v22693_v1 }
0x19cf   : > { %15909 = vmatmul.mubr.msk.f32.gmra.mrb[20].mxu0 %vm1057_vm0, %v22691_v59  ;;  %v11981_v59 = vld [vmem:[%s23183_s8 + $0x398] sm:$0xff] }
0x19d0   : > { %15911 = vmatprep.mubr.msk.f32.mxu0 %vm1057_vm0, %v22697_v37  ;;  %v17370_v1 = vpack.c.bf16 %v11981_v59, %v11980_v20  ;;  %v11983_v37 = vld [vmem:[%s23183_s8 + $0x3a8] sm:$0xff] }
0x19d2   : > { %17371 = vmatprep.subr.bf16.mxu1 %v17370_v1 }
0x19d3   : > { %15912 = vmatmul.mubr.msk.f32.gmra.mrb[22].mxu0 %vm1057_vm0, %v22695_v36  ;;  %v11982_v36 = vld [vmem:[%s23183_s8 + $0x3a0] sm:$0xff]  ;;  %17373 = vmatpush3.bf16.msra.mxu1 %v17370_v1 }
0x19d4   : > { %15914 = vmatprep.mubr.msk.f32.mxu0 %vm1057_vm0, %v22701_v4  ;;  %v11984_v4 = vld [vmem:[%s23183_s8 + $0x3b0] sm:$0xff] }
0x19d7   : > { %15915 = vmatmul.mubr.msk.f32.gmra.mrb[24].mxu0 %vm1057_vm0, %v22699_v49  ;;  %v17374_v49 = vpack.c.bf16 %v11983_v37, %v11982_v36 }
0x19d8   : > { %15917 = vmatprep.mubr.msk.f32.mxu0 %vm1057_vm0, %v22705_v51  ;;  %v11987_v51 = vld [vmem:[%s23183_s8 + $0x3c8] sm:$0xff] }
0x19d9   : > { %17375 = vmatprep.subr.bf16.mxu1 %v17374_v49  ;;  %v17382_v61 = vpack.c.bf16 %v11987_v51, %v11986_v45 }
0x19da   : > { %17377 = vmatpush3.bf16.msra.mxu1 %v17374_v49 }
0x19db   : > { %15918 = vmatmul.mubr.msk.f32.gmra.mrb[26].mxu0 %vm1057_vm0, %v22703_v17  ;;  %v17378_v17 = vpack.c.bf16 %v11985_v34, %v11984_v4 }
0x19dc   : > { %15920 = vmatprep.mubr.msk.f32.mxu0 %vm1057_vm0, %v22709_v63 }
0x19dd   : > { %17379 = vmatprep.subr.bf16.mxu1 %v17378_v17 }
0x19de   : > { %17381 = vmatpush3.bf16.msra.mxu1 %v17378_v17 }
0x19df   : > { %15921 = vmatmul.mubr.msk.f32.gmra.mrb[28].mxu0 %vm1057_vm0, %v22707_v39  ;;  %v11988_v39 = vld [vmem:[%s23183_s8 + $0x3d0] sm:$0xff]  ;;  %17383 = vmatprep.subr.bf16.mxu1 %v17382_v61 }
0x19e0   : > { %15923 = vmatprep.mubr.msk.f32.mxu0 %vm1057_vm0, %v22713_v24  ;;  %v17386_v63 = vpack.c.bf16 %v11989_v56, %v11988_v39  ;;  %v11992_v24 = vld [vmem:[%s23183_s8 + $0x3f0] sm:$0xff] }
0x19e1   : > { %v17394_v33 = vpack.c.bf16 %v11993_v47, %v11992_v24 }
0x19e2   : > { %17385 = vmatpush3.bf16.msra.mxu1 %v17382_v61 }
0x19e3   : > { %15924 = vmatmul.mubr.msk.f32.gmra.mrb[30].mxu0 %vm1057_vm0, %v22711_v23  ;;  %v11991_v23 = vld [vmem:[%s23183_s8 + $0x3e8] sm:$0xff]  ;;  %17387 = vmatprep.subr.bf16.mxu1 %v17386_v63 }
0x19e4   : > { %v17390_v18 = vpack.c.bf16 %v11991_v23, %v11990_v9 }
0x19e6   : > { %17389 = vmatpush3.bf16.msra.mxu1 %v17386_v63 }
0x19e7   : > { %17391 = vmatprep.subr.bf16.mxu1 %v17390_v18 }
0x19ea   : > { %17393 = vmatpush3.bf16.msra.mxu1 %v17390_v18 }
0x19eb   : > { %17395 = vmatprep.subr.bf16.mxu1 %v17394_v33 }
0x19ee   : > { %17397 = vmatpush3.bf16.msra.mxu1 %v17394_v33 }
0x19f1   : > { %15847 = vmatmul.mubr.f32.vlgmr.msra.gmra.mrb[80].mxu1 %v18427_v27 }
0x19f2   : > { %15849 = vmatprep.mubr.f32.mxu1 %v18428_v31 }
0x19f5   : > { %15850 = vmatmul.mubr.f32.gmra.mrb[82].mxu1 %v18429_v35 }
0x19f6   : > { %15852 = vmatprep.mubr.f32.mxu1 %v18430_v42 }
0x19f9   : > { %15853 = vmatmul.mubr.f32.gmra.mrb[84].mxu1 %v18431_v52 }
0x19fa   : > { %15855 = vmatprep.mubr.f32.mxu1 %v18432_v15 }
0x19fd   : > { %15856 = vmatmul.mubr.f32.gmra.mrb[86].mxu1 %v18433_v41 }
0x19fe   : > { %15858 = vmatprep.mubr.f32.mxu1 %v18434_v44  ;;  %v22924_v44 = vld [vmem:[%s23184_s9 + $0x7] ss:$0 sm:$0xff] }
0x1a01   : > { %15859 = vmatmul.mubr.f32.gmra.mrb[88].mxu1 %v18435_v16 }
0x1a02   : > { %15861 = vmatprep.mubr.f32.mxu1 %v18436_v53 }
0x1a05   : > { %15862 = vmatmul.mubr.f32.gmra.mrb[90].mxu1 %v18437_v6 }
0x1a06   : > { %15864 = vmatprep.mubr.f32.mxu1 %v18438_v2 }
0x1a09   : > { %15865 = vmatmul.mubr.f32.gmra.mrb[92].mxu1 %v18439_v57 }
0x1a0a   : > { %15867 = vmatprep.mubr.f32.mxu1 %v18440_v28 }
0x1a0d   : > { %15868 = vmatmul.mubr.f32.gmra.mrb[94].mxu1 %v18441_v32 }
0x1a9a   : > { %v15904_v30 = vpop.f32.mrb[16].mxu0 }
0x1a9b   : > { %v10395_v8 = vmul.f32 0.28867513, %v15904_v30  ;;  %v10315_v12 = vpop.f32.mrb[17].mxu0 }
0x1a9c   : > { %v10394_v3 = vmul.f32 0.28867513, %v10315_v12 }
0x1a9d   : > { %v22845_v19 = vsel %vm1321_vm3, -1e+09, %v10395_v8 }
0x1a9e   : > { %10428 = vmax.xlane.f32.xlu1 %v22845_v19  ;;  %v15907_v40 = vpop.f32.mrb[18].mxu0  ;;  %v10410_v14 = vsel %vm1321_vm3, -1e+09, %v10394_v3 }
0x1a9f   : > { %v10397_v50 = vmul.f32 0.28867513, %v15907_v40  ;;  %10426 = vmax.xlane.f32.xlu0 %v10410_v14  ;;  %v10325_v11 = vpop.f32.mrb[19].mxu0 }
0x1aa0   : > { %v10396_v26 = vmul.f32 0.28867513, %v10325_v11 }
0x1aa1   : > { %v22852_v7 = vsel %vm1321_vm3, -1e+09, %v10397_v50 }
0x1aa2   : > { %10432 = vmax.xlane.f32.xlu1 %v22852_v7  ;;  %v15910_v38 = vpop.f32.mrb[20].mxu0  ;;  %v22857_v10 = vsel %vm1321_vm3, -1e+09, %v10396_v26 }
0x1aa3   : > { %v10399_v55 = vmul.f32 0.28867513, %v15910_v38  ;;  %10430 = vmax.xlane.f32.xlu0 %v22857_v10  ;;  %v10335_v22 = vpop.f32.mrb[21].mxu0 }
0x1aa4   : > { %v10398_v43 = vmul.f32 0.28867513, %v10335_v22 }
0x1aa5   : > { %v22862_v25 = vsel %vm1321_vm3, -1e+09, %v10399_v55 }
0x1aa6   : > { %10436 = vmax.xlane.f32.xlu1 %v22862_v25  ;;  %v15913_v0 = vpop.f32.mrb[22].mxu0  ;;  %v22867_v48 = vsel %vm1321_vm3, -1e+09, %v10398_v43 }
0x1aa7   : > { %v10401_v60 = vmul.f32 0.28867513, %v15913_v0  ;;  %10434 = vmax.xlane.f32.xlu0 %v22867_v48  ;;  %v10345_v5 = vpop.f32.mrb[23].mxu0 }
0x1aa8   : > { %v10400_v62 = vmul.f32 0.28867513, %v10345_v5 }
0x1aa9   : > { %v22872_v46 = vsel %vm1321_vm3, -1e+09, %v10401_v60 }
0x1aaa   : > { %10440 = vmax.xlane.f32.xlu1 %v22872_v46  ;;  %v15916_v13 = vpop.f32.mrb[24].mxu0  ;;  %v22877_v54 = vsel %vm1321_vm3, -1e+09, %v10400_v62 }
0x1aab   : > { %v10403_v29 = vmul.f32 0.28867513, %v15916_v13  ;;  %10438 = vmax.xlane.f32.xlu0 %v22877_v54  ;;  %v10355_v20 = vpop.f32.mrb[25].mxu0 }
0x1aac   : > { %v10402_v21 = vmul.f32 0.28867513, %v10355_v20 }
0x1aad   : > { %v22882_v59 = vsel %vm1321_vm3, -1e+09, %v10403_v29 }
0x1aae   : > { %10444 = vmax.xlane.f32.xlu1 %v22882_v59  ;;  %v15919_v1 = vpop.f32.mrb[26].mxu0  ;;  %v22887_v36 = vsel %vm1321_vm3, -1e+09, %v10402_v21 }
0x1aaf   : > { %v10405_v37 = vmul.f32 0.28867513, %v15919_v1  ;;  %10442 = vmax.xlane.f32.xlu0 %v22887_v36  ;;  %v10365_v49 = vpop.f32.mrb[27].mxu0 }
0x1ab0   : > { %v10404_v4 = vmul.f32 0.28867513, %v10365_v49 }
0x1ab1   : > { %v22892_v34 = vsel %vm1321_vm3, -1e+09, %v10405_v37 }
0x1ab2   : > { %10448 = vmax.xlane.f32.xlu1 %v22892_v34  ;;  %v15922_v17 = vpop.f32.mrb[28].mxu0  ;;  %v22897_v45 = vsel %vm1321_vm3, -1e+09, %v10404_v4 }
0x1ab3   : > { %v10407_v51 = vmul.f32 0.28867513, %v15922_v17  ;;  %10446 = vmax.xlane.f32.xlu0 %v22897_v45  ;;  %v10375_v61 = vpop.f32.mrb[29].mxu0 }
0x1ab4   : > { %v10406_v39 = vmul.f32 0.28867513, %v10375_v61 }
0x1ab5   : > { %v22902_v56 = vsel %vm1321_vm3, -1e+09, %v10407_v51 }
0x1ab6   : > { %10452 = vmax.xlane.f32.xlu1 %v22902_v56  ;;  %v15925_v63 = vpop.f32.mrb[30].mxu0  ;;  %v22907_v9 = vsel %vm1321_vm3, -1e+09, %v10406_v39 }
0x1ab7   : > { %v10409_v23 = vmul.f32 0.28867513, %v15925_v63  ;;  %10450 = vmax.xlane.f32.xlu0 %v22907_v9  ;;  %v10385_v18 = vpop.f32.mrb[31].mxu0 }
0x1ab8   : > { %v10408_v24 = vmul.f32 0.28867513, %v10385_v18 }
0x1ab9   : > { %v22912_v47 = vsel %vm1321_vm3, -1e+09, %v10409_v23 }
0x1aba   : > { %10456 = vmax.xlane.f32.xlu1 %v22912_v47  ;;  %v22917_v33 = vsel %vm1321_vm3, -1e+09, %v10408_v24 }
0x1abb   : > { %10454 = vmax.xlane.f32.xlu0 %v22917_v33 }
0x1ac4   : > { %v15848_v6 = vpop.f32.mrb[80].mxu1 }
0x1ac5   : > { %v10080_v57 = vadd.f32 %v15848_v6, %v22924_v44  ;;  %v10074_v28 = vpop.f32.mrb[81].mxu1 }
0x1ac6   : > { %v10075_v8 = vadd.f32 %v22924_v44, %v10074_v28 }
0x1ac8   : > { %v17446_v40 = vpack.c.bf16 %v10080_v57, %v10075_v8 }
0x1aca   : > { %17447 = vmatprep.subr.bf16.mxu1 %v17446_v40 }
0x1acb   : > { %17449 = vmatpush3.bf16.msra.mxu1 %v17446_v40 }
0x1b2b   : > { %v10429_v27 = vpop.xlane.xlu1 %10428 }
0x1b2c   : > { %v10459_v31 = vsub.f32 %v22845_v19, %v10429_v27  ;;  %v10427_v35 = vpop.xlane.xlu0 %10426 }
0x1b2d   : > { %v10458_v42 = vsub.f32 %v10410_v14, %v10427_v35  ;;  %v15851_v14 = vpop.f32.mrb[82].mxu1 }
0x1b2e   : > { %v10476_v52 = vmul.f32 1.442695, %v10459_v31  ;;  %v10090_v11 = vadd.f32 %v15851_v14, %v22924_v44  ;;  %v10084_v26 = vpop.f32.mrb[83].mxu1 }
0x1b2f   : > { %v10474_v15 = vmul.f32 1.442695, %v10458_v42  ;;  %v10433_v41 = vpop.xlane.xlu1 %10432  ;;  %v15854_v0 = vpop.f32.mrb[84].mxu1 }
0x1b30   : > { %18093 = vpow2.f32 %v10476_v52  ;;  %v10461_v58 = vsub.f32 %v22852_v7, %v10433_v41  ;;  %v10431_v16 = vpop.xlane.xlu0 %10430  ;;  %v10100_v5 = vadd.f32 %v15854_v0, %v22924_v44  ;;  %v10094_v62 = vpop.f32.mrb[85].mxu1 }
0x1b31   : > { %18095 = vpow2.f32 %v10474_v15  ;;  %v10460_v53 = vsub.f32 %v22857_v10, %v10431_v16  ;;  %v10085_v10 = vadd.f32 %v22924_v44, %v10084_v26  ;;  %v15857_v49 = vpop.f32.mrb[86].mxu1 }
0x1b32   : > { %v10480_v2 = vmul.f32 1.442695, %v10461_v58  ;;  %v10110_v51 = vadd.f32 %v15857_v49, %v22924_v44  ;;  %v10104_v61 = vpop.f32.mrb[87].mxu1 }
0x1b33   : > { %v10478_v32 = vmul.f32 1.442695, %v10460_v53  ;;  %v10437_v30 = vpop.xlane.xlu1 %10436  ;;  %v15860_v31 = vpop.f32.mrb[88].mxu1 }
0x1b34   : > { %18097 = vpow2.f32 %v10480_v2  ;;  %v10463_v12 = vsub.f32 %v22862_v25, %v10437_v30  ;;  %v10435_v3 = vpop.xlane.xlu0 %10434  ;;  %v17450_v25 = vpack.c.bf16 %v10090_v11, %v10085_v10  ;;  %v10120_v52 = vadd.f32 %v15860_v31, %v22924_v44  ;;  %v10114_v15 = vpop.f32.mrb[89].mxu1 }
0x1b35   : > { %18099 = vpow2.f32 %v10478_v32  ;;  %v10462_v19 = vsub.f32 %v22867_v48, %v10435_v3  ;;  %v15863_v57 = vpop.f32.mrb[90].mxu1 }
0x1b36   : > { %v10484_v50 = vmul.f32 1.442695, %v10463_v12  ;;  %17451 = vmatprep.subr.bf16.mxu1 %v17450_v25  ;;  %v10130_v30 = vadd.f32 %v15863_v57, %v22924_v44  ;;  %v10124_v8 = vpop.f32.mrb[91].mxu1 }
0x1b37   : > { %v10482_v7 = vmul.f32 1.442695, %v10462_v19  ;;  %v10441_v38 = vpop.xlane.xlu1 %10440  ;;  %17453 = vmatpush3.bf16.msra.mxu1 %v17450_v25  ;;  %v10125_v19 = vadd.f32 %v22924_v44, %v10124_v8  ;;  %v15866_v11 = vpop.f32.mrb[92].mxu1 }
0x1b38   : > { %18101 = vpow2.f32 %v10484_v50  ;;  %v10465_v55 = vsub.f32 %v22872_v46, %v10441_v38  ;;  %v10439_v22 = vpop.xlane.xlu0 %10438  ;;  %v10095_v46 = vadd.f32 %v22924_v44, %v10094_v62  ;;  %v10140_v38 = vadd.f32 %v15866_v11, %v22924_v44  ;;  %v10134_v10 = vpop.f32.mrb[93].mxu1 }
0x1b39   : > { %18103 = vpow2.f32 %v10482_v7  ;;  %v10464_v43 = vsub.f32 %v22877_v54, %v10439_v22  ;;  %v17466_v50 = vpack.c.bf16 %v10130_v30, %v10125_v19 }
0x1b3a   : > { %v22936_v48 = vpop.eup %18093  ;;  %v10488_v60 = vmul.f32 1.442695, %v10465_v55  ;;  %v17454_v37 = vpack.c.bf16 %v10100_v5, %v10095_v46 }
0x1b3b   : > { %v22939_v13 = vpop.eup %18095  ;;  %v10486_v29 = vmul.f32 1.442695, %v10464_v43  ;;  %v10445_v20 = vpop.xlane.xlu1 %10444  ;;  %10508 = vadd.xlane.f32.xlu1 %v22936_v48 }
0x1b3c   : > { %18105 = vpow2.f32 %v10488_v60  ;;  %v10467_v54 = vsub.f32 %v22882_v59, %v10445_v20  ;;  %v10443_v21 = vpop.xlane.xlu0 %10442  ;;  %10506 = vadd.xlane.f32.xlu0 %v22939_v13  ;;  %v10105_v59 = vadd.f32 %v22924_v44, %v10104_v61  ;;  %17455 = vmatprep.subr.bf16.mxu1 %v17454_v37  ;;  %v15869_v43 = vpop.f32.mrb[94].mxu1 }
0x1b3d   : > { %18107 = vpow2.f32 %v10486_v29  ;;  %v10466_v1 = vsub.f32 %v22887_v36, %v10443_v21  ;;  %17457 = vmatpush3.bf16.msra.mxu1 %v17454_v37  ;;  %v10144_v0 = vpop.f32.mrb[95].mxu1  ;;  %v10150_v5 = vadd.f32 %v15869_v43, %v22924_v44  ;;  %v12046_v37 = vld [vmem:[%s23185_s10 + $0xf0] sm:$0xff] }
0x1b3e   : > { %v22946_v4 = vpop.eup %18097  ;;  %v10492_v17 = vmul.f32 1.442695, %v10467_v54  ;;  %v17458_v27 = vpack.c.bf16 %v10110_v51, %v10105_v59  ;;  %v10145_v62 = vadd.f32 %v22924_v44, %v10144_v0 }
0x1b3f   : > { %v22949_v39 = vpop.eup %18099  ;;  %v10490_v63 = vmul.f32 1.442695, %v10466_v1  ;;  %v10449_v23 = vpop.xlane.xlu1 %10448  ;;  %10512 = vadd.xlane.f32.xlu1 %v22946_v4  ;;  %v12045_v1 = vld [vmem:[%s23185_s10 + $0xe8] sm:$0xff] }
0x1b40   : > { %18109 = vpow2.f32 %v10492_v17  ;;  %v10469_v36 = vsub.f32 %v22892_v34, %v10449_v23  ;;  %v10447_v18 = vpop.xlane.xlu0 %10446  ;;  %10510 = vadd.xlane.f32.xlu0 %v22949_v39  ;;  %v10115_v34 = vadd.f32 %v22924_v44, %v10114_v15  ;;  %17459 = vmatprep.subr.bf16.mxu1 %v17458_v27  ;;  %v17474_v29 = vpack.c.bf16 %v10150_v5, %v10145_v62  ;;  %v12047_v17 = vld [vmem:[%s23185_s10 + $0xf8] sm:$0xff] }
0x1b41   : > { %18111 = vpow2.f32 %v10490_v63  ;;  %v10468_v24 = vsub.f32 %v22897_v45, %v10447_v18  ;;  %17461 = vmatpush3.bf16.msra.mxu1 %v17458_v27  ;;  %v17482_v51 = vpack.c.bf16 %v12047_v17, %v12046_v37 }
0x1b42   : > { %v22956_v35 = vpop.eup %18101  ;;  %v10496_v42 = vmul.f32 1.442695, %v10469_v36  ;;  %v17462_v2 = vpack.c.bf16 %v10120_v52, %v10115_v34 }
0x1b43   : > { %v22959_v41 = vpop.eup %18103  ;;  %v10494_v58 = vmul.f32 1.442695, %v10468_v24  ;;  %v10453_v16 = vpop.xlane.xlu1 %10452  ;;  %10516 = vadd.xlane.f32.xlu1 %v22956_v35 }
0x1b44   : > { %18113 = vpow2.f32 %v10496_v42  ;;  %v10471_v45 = vsub.f32 %v22902_v56, %v10453_v16  ;;  %v10451_v53 = vpop.xlane.xlu0 %10450  ;;  %10514 = vadd.xlane.f32.xlu0 %v22959_v41  ;;  %17463 = vmatprep.subr.bf16.mxu1 %v17462_v2 }
0x1b45   : > { %18115 = vpow2.f32 %v10494_v58  ;;  %v10470_v6 = vsub.f32 %v22907_v9, %v10451_v53  ;;  %17465 = vmatpush3.bf16.msra.mxu1 %v17462_v2 }
0x1b46   : > { %v22966_v28 = vpop.eup %18105  ;;  %v10500_v32 = vmul.f32 1.442695, %v10471_v45  ;;  %17467 = vmatprep.subr.bf16.mxu1 %v17466_v50 }
0x1b47   : > { %v22969_v12 = vpop.eup %18107  ;;  %v10498_v3 = vmul.f32 1.442695, %v10470_v6  ;;  %10520 = vadd.xlane.f32.xlu1 %v22966_v28  ;;  %v10457_v56 = vpop.xlane.xlu1 %10456 }
0x1b48   : > { %18117 = vpow2.f32 %v10500_v32  ;;  %v10473_v9 = vsub.f32 %v22912_v47, %v10457_v56  ;;  %10518 = vadd.xlane.f32.xlu0 %v22969_v12  ;;  %v10455_v40 = vpop.xlane.xlu0 %10454  ;;  %v10135_v47 = vadd.f32 %v22924_v44, %v10134_v10  ;;  %v12044_v44 = vld [vmem:[%s23185_s10 + $0xe0] sm:$0xff] }
0x1b49   : > { %18119 = vpow2.f32 %v10498_v3  ;;  %v10472_v14 = vsub.f32 %v22917_v33, %v10455_v40  ;;  %17469 = vmatpush3.bf16.msra.mxu1 %v17466_v50  ;;  %v17478_v49 = vpack.c.bf16 %v12045_v1, %v12044_v44 }
0x1b4a   : > { %v22976_v26 = vpop.eup %18109  ;;  %v10504_v7 = vmul.f32 1.442695, %v10473_v9  ;;  %v17470_v33 = vpack.c.bf16 %v10140_v38, %v10135_v47 }
0x1b4b   : > { %v22979_v55 = vpop.eup %18111  ;;  %v10502_v22 = vmul.f32 1.442695, %v10472_v14  ;;  %10524 = vadd.xlane.f32.xlu1 %v22976_v26  ;;  %17479 = vmatprep.subr.bf16.mxu0 %v17478_v49 }
0x1b4c   : > { %18121 = vpow2.f32 %v10504_v7  ;;  %10522 = vadd.xlane.f32.xlu0 %v22979_v55  ;;  %17471 = vmatprep.subr.bf16.mxu1 %v17470_v33 }
0x1b4d   : > { %18123 = vpow2.f32 %v10502_v22  ;;  %17473 = vmatpush3.bf16.msra.mxu1 %v17470_v33  ;;  %17481 = vmatpush3.bf16.msra.mxu0 %v17478_v49 }
0x1b4e   : > { %v22984_v25 = vpop.eup %18113  ;;  %17475 = vmatprep.subr.bf16.mxu1 %v17474_v29  ;;  %17483 = vmatprep.subr.bf16.mxu0 %v17482_v51 }
0x1b4f   : > { %v22986_v60 = vpop.eup %18115  ;;  %10528 = vadd.xlane.f32.xlu1 %v22984_v25 }
0x1b50   : > { %10526 = vadd.xlane.f32.xlu0 %v22986_v60 }
0x1b51   : > { %17477 = vmatpush3.bf16.msra.mxu1 %v17474_v29  ;;  %17485 = vmatpush3.bf16.msra.mxu0 %v17482_v51 }
0x1b52   : > { %v22992_v20 = vpop.eup %18117 }
0x1b53   : > { %v22994_v46 = vpop.eup %18119  ;;  %10532 = vadd.xlane.f32.xlu1 %v22992_v20 }
0x1b54   : > { %10530 = vadd.xlane.f32.xlu0 %v22994_v46 }
0x1b56   : > { %v22998_v54 = vpop.eup %18121 }
0x1b57   : > { %v23000_v21 = vpop.eup %18123  ;;  %10536 = vadd.xlane.f32.xlu1 %v22998_v54 }
0x1b58   : > { %10534 = vadd.xlane.f32.xlu0 %v23000_v21 }
0x1bc8   : > { %v10509_v61 = vpop.xlane.xlu1 %10508 }
0x1bc9   : > { %18125 = vrcp.f32 %v10509_v61  ;;  %v10507_v63 = vpop.xlane.xlu0 %10506 }
0x1bca   : > { %18127 = vrcp.f32 %v10507_v63 }
0x1bcc   : > { %v10513_v23 = vpop.xlane.xlu1 %10512 }
0x1bcd   : > { %18129 = vrcp.f32 %v10513_v23  ;;  %v10511_v59 = vpop.xlane.xlu0 %10510 }
0x1bce   : > { %18131 = vrcp.f32 %v10511_v59 }
0x1bd0   : > { %v10517_v36 = vpop.xlane.xlu1 %10516 }
0x1bd1   : > { %18133 = vrcp.f32 %v10517_v36  ;;  %v10515_v18 = vpop.xlane.xlu0 %10514 }
0x1bd2   : > { %18135 = vrcp.f32 %v10515_v18 }
0x1bd3   : > { %v18126_v24 = vpop.eup %18125 }
0x1bd4   : > { %v18128_v27 = vpop.eup %18127  ;;  %v10541_v31 = vmul.f32 %v18126_v24, %v22936_v48  ;;  %v10521_v42 = vpop.xlane.xlu1 %10520 }
0x1bd5   : > { %18137 = vrcp.f32 %v10521_v42  ;;  %v10519_v52 = vpop.xlane.xlu0 %10518  ;;  %v10539_v15 = vmul.f32 %v18128_v27, %v22939_v13 }
0x1bd6   : > { %12029 = vst [vmem:[%s19291_s30 + $0x388] sm:$0xff] %v10541_v31  ;;  %18139 = vrcp.f32 %v10519_v52 }
0x1bd7   : > { %v18130_v58 = vpop.eup %18129  ;;  %12028 = vst [vmem:[%s19291_s30 + $0x380] sm:$0xff] %v10539_v15  ;;  %15958 = vmatprep.mubr.f32.mxu1 %v10539_v15 }
0x1bd8   : > { %v18132_v16 = vpop.eup %18131  ;;  %v10545_v34 = vmul.f32 %v18130_v58, %v22946_v4  ;;  %v10525_v45 = vpop.xlane.xlu1 %10524  ;;  %15959 = vmatmul.mubr.f32.vlgmr.msra.gmra.mrb[96].mxu1 %v10541_v31 }
0x1bd9   : > { %18141 = vrcp.f32 %v10525_v45  ;;  %v10523_v48 = vpop.xlane.xlu0 %10522  ;;  %v10543_v53 = vmul.f32 %v18132_v16, %v22949_v39 }
0x1bda   : > { %12031 = vst [vmem:[%s19291_s30 + $0x398] sm:$0xff] %v10545_v34  ;;  %18143 = vrcp.f32 %v10523_v48 }
0x1bdb   : > { %v18134_v13 = vpop.eup %18133  ;;  %12030 = vst [vmem:[%s19291_s30 + $0x390] sm:$0xff] %v10543_v53  ;;  %15961 = vmatprep.mubr.f32.mxu1 %v10543_v53 }
0x1bdc   : > { %v18136_v6 = vpop.eup %18135  ;;  %v10549_v2 = vmul.f32 %v18134_v13, %v22956_v35  ;;  %v10529_v57 = vpop.xlane.xlu1 %10528  ;;  %15962 = vmatmul.mubr.f32.gmra.mrb[98].mxu1 %v10545_v34 }
0x1bdd   : > { %18145 = vrcp.f32 %v10529_v57  ;;  %v10527_v4 = vpop.xlane.xlu0 %10526  ;;  %v10547_v32 = vmul.f32 %v18136_v6, %v22959_v41 }
0x1bde   : > { %12033 = vst [vmem:[%s19291_s30 + $0x3a8] sm:$0xff] %v10549_v2  ;;  %18147 = vrcp.f32 %v10527_v4 }
0x1bdf   : > { %v18138_v39 = vpop.eup %18137  ;;  %12032 = vst [vmem:[%s19291_s30 + $0x3a0] sm:$0xff] %v10547_v32  ;;  %15964 = vmatprep.mubr.f32.mxu1 %v10547_v32 }
0x1be0   : > { %v18140_v30 = vpop.eup %18139  ;;  %v10553_v8 = vmul.f32 %v18138_v39, %v22966_v28  ;;  %v10533_v3 = vpop.xlane.xlu1 %10532  ;;  %15965 = vmatmul.mubr.f32.gmra.mrb[100].mxu1 %v10549_v2 }
0x1be1   : > { %18149 = vrcp.f32 %v10533_v3  ;;  %v10531_v35 = vpop.xlane.xlu0 %10530  ;;  %v10551_v56 = vmul.f32 %v18140_v30, %v22969_v12 }
0x1be2   : > { %12035 = vst [vmem:[%s19291_s30 + $0x3b8] sm:$0xff] %v10553_v8  ;;  %18151 = vrcp.f32 %v10531_v35 }
0x1be3   : > { %v18142_v41 = vpop.eup %18141  ;;  %12034 = vst [vmem:[%s19291_s30 + $0x3b0] sm:$0xff] %v10551_v56  ;;  %15967 = vmatprep.mubr.f32.mxu1 %v10551_v56 }
0x1be4   : > { %v18144_v19 = vpop.eup %18143  ;;  %v10557_v9 = vmul.f32 %v18142_v41, %v22976_v26  ;;  %v10537_v40 = vpop.xlane.xlu1 %10536  ;;  %15968 = vmatmul.mubr.f32.gmra.mrb[102].mxu1 %v10553_v8 }
0x1be5   : > { %18153 = vrcp.f32 %v10537_v40  ;;  %v10535_v28 = vpop.xlane.xlu0 %10534  ;;  %v10555_v14 = vmul.f32 %v18144_v19, %v22979_v55 }
0x1be6   : > { %12037 = vst [vmem:[%s19291_s30 + $0x3c8] sm:$0xff] %v10557_v9  ;;  %18155 = vrcp.f32 %v10535_v28 }
0x1be7   : > { %v18146_v12 = vpop.eup %18145  ;;  %12036 = vst [vmem:[%s19291_s30 + $0x3c0] sm:$0xff] %v10555_v14  ;;  %15970 = vmatprep.mubr.f32.mxu1 %v10555_v14 }
0x1be8   : > { %v18148_v50 = vpop.eup %18147  ;;  %v10561_v11 = vmul.f32 %v18146_v12, %v22984_v25  ;;  %15971 = vmatmul.mubr.f32.gmra.mrb[104].mxu1 %v10557_v9 }
0x1be9   : > { %v10559_v26 = vmul.f32 %v18148_v50, %v22986_v60 }
0x1bea   : > { %12039 = vst [vmem:[%s19291_s30 + $0x3d8] sm:$0xff] %v10561_v11 }
0x1beb   : > { %v18150_v7 = vpop.eup %18149  ;;  %12038 = vst [vmem:[%s19291_s30 + $0x3d0] sm:$0xff] %v10559_v26  ;;  %15973 = vmatprep.mubr.f32.mxu1 %v10559_v26 }
0x1bec   : > { %v18152_v38 = vpop.eup %18151  ;;  %v10565_v10 = vmul.f32 %v18150_v7, %v22992_v20  ;;  %15974 = vmatmul.mubr.f32.gmra.mrb[106].mxu1 %v10561_v11 }
0x1bed   : > { %v10563_v55 = vmul.f32 %v18152_v38, %v22994_v46 }
0x1bee   : > { %12041 = vst [vmem:[%s19291_s30 + $0x3e8] sm:$0xff] %v10565_v10 }
0x1bef   : > { %v18154_v22 = vpop.eup %18153  ;;  %12040 = vst [vmem:[%s19291_s30 + $0x3e0] sm:$0xff] %v10563_v55  ;;  %15976 = vmatprep.mubr.f32.mxu1 %v10563_v55 }
0x1bf0   : > { %v18156_v47 = vpop.eup %18155  ;;  %v10569_v33 = vmul.f32 %v18154_v22, %v22998_v54  ;;  %15977 = vmatmul.mubr.f32.gmra.mrb[108].mxu1 %v10565_v10 }
0x1bf1   : > { %v10567_v43 = vmul.f32 %v18156_v47, %v23000_v21 }
0x1bf2   : > { %12043 = vst [vmem:[%s19291_s30 + $0x3f8] sm:$0xff] %v10569_v33 }
0x1bf3   : > { %12042 = vst [vmem:[%s19291_s30 + $0x3f0] sm:$0xff] %v10567_v43  ;;  %15979 = vmatprep.mubr.f32.mxu1 %v10567_v43  ;;  %s18448_s30 = scalar_lea.vmem %s18447_s0, 32768 }
0x1bf4   : > { %15980 = vmatmul.mubr.f32.gmra.mrb[110].mxu1 %v10569_v33  ;;  %p18450_p1 = scmp.lt.s32.totalorder %s18448_s30, %s18442_s24 }
0x1bf6   : > { %p18451_p2 = por %p18450_p1, %p18449_p0 }
0x1bf8   : > { %p18452_p3 = pnand %p18451_p2, %p18445_p13 }
0x1cab   : > { %v15960_v25 = vpop.f32.mrb[96].mxu1 }
0x1cac   : > { %v10653_v0 = vpop.f32.mrb[97].mxu1 }
0x1cad   : > { %15990 = vmatprep.mubr.msk.f32.mxu0 %vm2741_vm4, %v10653_v0 }
0x1cae   : > { %15991 = vmatmul.mubr.msk.f32.vlgmr.msra.gmra.mrb[80].mxu0 %vm2741_vm4, %v15960_v25 }
0x1caf   : > { %v15963_v60 = vpop.f32.mrb[98].mxu1 }
0x1cb0   : > { %v10663_v5 = vpop.f32.mrb[99].mxu1 }
0x1cb1   : > { %15993 = vmatprep.mubr.msk.f32.mxu0 %vm2741_vm4, %v10663_v5 }
0x1cb2   : > { %15994 = vmatmul.mubr.msk.f32.gmra.mrb[82].mxu0 %vm2741_vm4, %v15963_v60 }
0x1cb3   : > { %v15966_v62 = vpop.f32.mrb[100].mxu1 }
0x1cb4   : > { %v10673_v29 = vpop.f32.mrb[101].mxu1 }
0x1cb5   : > { %15996 = vmatprep.mubr.msk.f32.mxu0 %vm2741_vm4, %v10673_v29 }
0x1cb6   : > { %15997 = vmatmul.mubr.msk.f32.gmra.mrb[84].mxu0 %vm2741_vm4, %v15966_v62 }
0x1cb7   : > { %v15969_v20 = vpop.f32.mrb[102].mxu1 }
0x1cb8   : > { %v10683_v46 = vpop.f32.mrb[103].mxu1 }
0x1cb9   : > { %15999 = vmatprep.mubr.msk.f32.mxu0 %vm2741_vm4, %v10683_v46 }
0x1cba   : > { %16000 = vmatmul.mubr.msk.f32.gmra.mrb[86].mxu0 %vm2741_vm4, %v15969_v20 }
0x1cbb   : > { %v15972_v54 = vpop.f32.mrb[104].mxu1 }
0x1cbc   : > { %v10693_v21 = vpop.f32.mrb[105].mxu1 }
0x1cbd   : > { %16002 = vmatprep.mubr.msk.f32.mxu0 %vm2741_vm4, %v10693_v21 }
0x1cbe   : > { %16003 = vmatmul.mubr.msk.f32.gmra.mrb[88].mxu0 %vm2741_vm4, %v15972_v54 }
0x1cbf   : > { %v15975_v44 = vpop.f32.mrb[106].mxu1 }
0x1cc0   : > { %v10703_v1 = vpop.f32.mrb[107].mxu1 }
0x1cc1   : > { %16005 = vmatprep.mubr.msk.f32.mxu0 %vm2741_vm4, %v10703_v1 }
0x1cc2   : > { %16006 = vmatmul.mubr.msk.f32.gmra.mrb[90].mxu0 %vm2741_vm4, %v15975_v44 }
0x1cc3   : > { %v15978_v37 = vpop.f32.mrb[108].mxu1 }
0x1cc4   : > { %v10713_v49 = vpop.f32.mrb[109].mxu1 }
0x1cc5   : > { %16008 = vmatprep.mubr.msk.f32.mxu0 %vm2741_vm4, %v10713_v49 }
0x1cc6   : > { %16009 = vmatmul.mubr.msk.f32.gmra.mrb[92].mxu0 %vm2741_vm4, %v15978_v37 }
0x1cc7   : > { %v15981_v17 = vpop.f32.mrb[110].mxu1 }
0x1cc8   : > { %v10723_v51 = vpop.f32.mrb[111].mxu1 }
0x1cc9   : > { %16011 = vmatprep.mubr.msk.f32.mxu0 %vm2741_vm4, %v10723_v51 }
0x1cca   : > { %16012 = vmatmul.mubr.msk.f32.gmra.mrb[94].mxu0 %vm2741_vm4, %v15981_v17 }
0x1ccb   : > { %18455 = shalt.err (!%p18452_p3)
}
0x1ccc   : > { %s18456_s22 = scalar_lea.hbm %s23069_s15, 16384  ;;  %s18460_s16 = scalar_lea.hbm %s23188_s13, 32768 }
0x1ccd   : > { %p18457_p4 = scmp.ne.s32.totalorder %s23069_s15, %s18456_s22  ;;  %p18461_p9 = scmp.lt.u32.totalorder %s23069_s15, %s23188_s13 }
0x1cce   : > { %p18462_p10 = scmp.lt.u32.totalorder %s18460_s16, %s18456_s22  ;;  %p18464_p12 = scmp.lt.u32.totalorder %s18456_s22, %s23069_s15 }
0x1ccf   : > { %p18458_p7 = pnand %p18457_p4, %p18651_p5 }
0x1cd0   : > { %p18463_p11 = por %p18462_p10, %p18461_p9 }
0x1cd1   : > { %p18459_p8 = pneg %p18458_p7 }
0x1cd2   : > { %p18465_p13 = por %p18464_p12, %p18463_p11 }
0x1cd4   : > { %p18466_p0 = pnand %p18465_p13, %p18459_p8 }
0x1cd6   : > { %18469 = shalt.err (!%p18466_p0)
}
0x1cd7   : > { %s18540_s25 = smov 128   ;;  %s18541_s24 = smov 8   ;;  %v12064_v61 = vld [vmem:[%s23186_s11] ss:$0 sm:$0xff] }
0x1cd8   : > { %17599 = dma.vmem_to_hbm [thread:$0]  (%p18651_p5), %s23071_s27, 16384, %s23069_s15, %s10991_s14, %s18540_s25, %s18540_s25, %s18541_s24  }
0x1cd9   : > { %s11151_s21 = sshll.u32 %s19274_s1, 7  ;;  %s12076_s27 = sshll.u32 %s18634_s29, 11 }
0x1cda   : > { %s23104_s22 = scalar_lea.vmem [#allocation2], %s11151_s21  ;;  %s23125_s19 = scalar_lea.hbm %s23187_s12, %s12076_s27 }
0x1cdb   : > { %s11004_s15 = sshll.u32 %s23104_s22, 4  ;;  %s10986_s16 = scalar_lea.sflag [#allocation3], %s19274_s1  ;;  %s23127_s15 = int_to_ptr.vmem [resolvable:$true] %s11004_s15 }
0x1cdc   : > { %s18470_s29 = scalar_lea.vmem %s23127_s15, 2048  ;;  %s18542_s23 = smov [#allocation2]  }
0x1cdd   : > { %p18471_p1 = scmp.ne.s32.totalorder %s23127_s15, %s18470_s29  ;;  %s18474_s20 = sshll.u32 %s18542_s23, 4  ;;  %s18475_s20 = int_to_ptr.vmem [resolvable:$false] %s18474_s20 }
0x1cde   : > { %s18476_s21 = scalar_lea.vmem %s18475_s20, 4096  ;;  %p18477_p4 = scmp.lt.s32.totalorder %s23127_s15, %s18475_s20 }
0x1cdf   : > { %p18472_p2 = pnand %p18471_p1, %p18651_p5  ;;  %p18478_p7 = scmp.lt.s32.totalorder %s18476_s21, %s18470_s29 }
0x1ce1   : > { %p18473_p3 = pneg %p18472_p2  ;;  %p18479_p8 = por %p18478_p7, %p18477_p4 }
0x1ce3   : > { %p18480_p9 = pnand %p18479_p8, %p18473_p3 }
0x1d81   : > { %v15992_v63 = vpop.f32.mrb[80].mxu0 }
0x1d82   : > { %v10954_v23 = vadd.f32 %v15992_v63, %v12064_v61  ;;  %v10851_v59 = vpop.f32.mrb[81].mxu0 }
0x1d83   : > { %v10953_v36 = vadd.f32 %v12064_v61, %v10851_v59 }
0x1d84   : > { %10970 = vst [vmem:[%s23104_s22 + $0x8] sm:$0xff] %v10954_v23 }
0x1d85   : > { %10969 = vst [vmem:[%s23104_s22] sm:$0xff] %v10953_v36  ;;  %v15995_v18 = vpop.f32.mrb[82].mxu0 }
0x1d86   : > { %v10956_v24 = vadd.f32 %v15995_v18, %v12064_v61  ;;  %v10861_v27 = vpop.f32.mrb[83].mxu0 }
0x1d87   : > { %v10955_v31 = vadd.f32 %v12064_v61, %v10861_v27 }
0x1d88   : > { %10972 = vst [vmem:[%s23104_s22 + $0x18] sm:$0xff] %v10956_v24 }
0x1d89   : > { %10971 = vst [vmem:[%s23104_s22 + $0x10] sm:$0xff] %v10955_v31  ;;  %v15998_v42 = vpop.f32.mrb[84].mxu0 }
0x1d8a   : > { %v10958_v52 = vadd.f32 %v15998_v42, %v12064_v61  ;;  %v10871_v15 = vpop.f32.mrb[85].mxu0 }
0x1d8b   : > { %v10957_v58 = vadd.f32 %v12064_v61, %v10871_v15 }
0x1d8c   : > { %10974 = vst [vmem:[%s23104_s22 + $0x28] sm:$0xff] %v10958_v52 }
0x1d8d   : > { %10973 = vst [vmem:[%s23104_s22 + $0x20] sm:$0xff] %v10957_v58  ;;  %v16001_v16 = vpop.f32.mrb[86].mxu0 }
0x1d8e   : > { %v10960_v34 = vadd.f32 %v16001_v16, %v12064_v61  ;;  %v10881_v45 = vpop.f32.mrb[87].mxu0 }
0x1d8f   : > { %v10959_v48 = vadd.f32 %v12064_v61, %v10881_v45 }
0x1d90   : > { %10976 = vst [vmem:[%s23104_s22 + $0x38] sm:$0xff] %v10960_v34 }
0x1d91   : > { %10975 = vst [vmem:[%s23104_s22 + $0x30] sm:$0xff] %v10959_v48  ;;  %v16004_v53 = vpop.f32.mrb[88].mxu0 }
0x1d92   : > { %v10962_v13 = vadd.f32 %v16004_v53, %v12064_v61  ;;  %v10891_v6 = vpop.f32.mrb[89].mxu0 }
0x1d93   : > { %v10961_v2 = vadd.f32 %v12064_v61, %v10891_v6 }
0x1d94   : > { %10978 = vst [vmem:[%s23104_s22 + $0x48] sm:$0xff] %v10962_v13 }
0x1d95   : > { %10977 = vst [vmem:[%s23104_s22 + $0x40] sm:$0xff] %v10961_v2  ;;  %v16007_v57 = vpop.f32.mrb[90].mxu0 }
0x1d96   : > { %v10964_v4 = vadd.f32 %v16007_v57, %v12064_v61  ;;  %v10901_v32 = vpop.f32.mrb[91].mxu0 }
0x1d97   : > { %v10963_v39 = vadd.f32 %v12064_v61, %v10901_v32 }
0x1d98   : > { %10980 = vst [vmem:[%s23104_s22 + $0x58] sm:$0xff] %v10964_v4 }
0x1d99   : > { %10979 = vst [vmem:[%s23104_s22 + $0x50] sm:$0xff] %v10963_v39  ;;  %v16010_v30 = vpop.f32.mrb[92].mxu0 }
0x1d9a   : > { %v10966_v8 = vadd.f32 %v16010_v30, %v12064_v61  ;;  %v10911_v3 = vpop.f32.mrb[93].mxu0 }
0x1d9b   : > { %v10965_v35 = vadd.f32 %v12064_v61, %v10911_v3 }
0x1d9c   : > { %10982 = vst [vmem:[%s23104_s22 + $0x68] sm:$0xff] %v10966_v8 }
0x1d9d   : > { %10981 = vst [vmem:[%s23104_s22 + $0x60] sm:$0xff] %v10965_v35  ;;  %v16013_v56 = vpop.f32.mrb[94].mxu0 }
0x1d9e   : > { %v10968_v41 = vadd.f32 %v16013_v56, %v12064_v61  ;;  %v10921_v19 = vpop.f32.mrb[95].mxu0 }
0x1d9f   : > { %v10967_v9 = vadd.f32 %v12064_v61, %v10921_v19 }
0x1da0   : > { %10984 = vst [vmem:[%s23104_s22 + $0x78] sm:$0xff] %v10968_v41 }
0x1da1   : > { %10983 = vst [vmem:[%s23104_s22 + $0x70] sm:$0xff] %v10967_v9 }
0x1da2   : > { %18483 = shalt.err (!%p18480_p9)
}
0x1da3   : > { %s18484_s0 = scalar_lea.hbm %s23125_s19, 2048  ;;  %s18488_s27 = scalar_lea.hbm %s23187_s12, 4096 }
0x1da4   : > { %p18485_p10 = scmp.ne.s32.totalorder %s23125_s19, %s18484_s0  ;;  %p18489_p13 = scmp.lt.u32.totalorder %s23125_s19, %s23187_s12 }
0x1da5   : > { %p18490_p0 = scmp.lt.u32.totalorder %s18488_s27, %s18484_s0  ;;  %p18492_p2 = scmp.lt.u32.totalorder %s18484_s0, %s23125_s19 }
0x1da6   : > { %p18486_p11 = pnand %p18485_p10, %p18651_p5 }
0x1da7   : > { %p18491_p1 = por %p18490_p0, %p18489_p13 }
0x1da8   : > { %p18487_p12 = pneg %p18486_p11 }
0x1da9   : > { %p18493_p3 = por %p18492_p2, %p18491_p1 }
0x1dab   : > { %p18494_p4 = pnand %p18493_p3, %p18487_p12 }
0x1dad   : > { %18497 = shalt.err (!%p18494_p4)
}
0x1dae   : > { %17598 = dma.vmem_to_hbm [thread:$0]  (%p18651_p5), %s23127_s15, 2048, %s23125_s19, %s10986_s16, %s18540_s25, %s18540_s25, %s18541_s24  }
0x1daf PF: > { %s23217_s29 = sld [smem:[#allocation8_spill]]  ;;  %p17609_p7 = scmp.ge.s32.totalorder %s18536_s28, 2 }
0x1db1   : > { %p17603_p8 = pnand %p17609_p7, %p18655_p6 }
0x1db5   : > { %s11035_s20 = sand.u32 1, %s23217_s29  }
0x1db6   : > { %s11036_s21 = scalar_lea.sflag [#allocation3], %s11035_s20 }
0x1db7   : > { %18515 = dma.done.wait (!%p17603_p8), %s11036_s21, 2048  }
0x1db8   : > { %18517 = vsyncadd (!%p17603_p8), %s11036_s21, 4294965248  ;;  %s11045_s18 = scalar_lea.sflag [#allocation5], %s11035_s20 }
0x1db9   : > { %18519 = dma.done.wait (!%p17603_p8), %s11045_s18, 16384  }
0x1dba   : > { %18521 = vsyncadd (!%p17603_p8), %s11045_s18, 4294950912  ;;  %s23219_s28 = sld [smem:[#allocation10_spill]]  ;;  %s23220_s1 = sld [smem:[#allocation9_spill]] }
0x1dbb   : > { %s23221_s27 = sld [smem:[#allocation11_spill]]  ;;  %s23222_s25 = smov %s18528_s26 }
0x1dc0   : > { %p27_p5 = scmp.ge.s32.totalorder %s23219_s28, 4   ;;  %s23223_s26 = smov %s23220_s1 }
0x1dc2   :  { %29 = sbr.rel (!%p27_p5) target bundleno = 8 (0x8), region = 185 }
0x1dc9   :  { %11050 = vsyncpa [#allocation3], 1 }
0x1dca   :  { %11052 = vsyncpa [#allocation3 + $0x1], 1 }
0x1dcb   :  { %11053 = vsyncpa [#allocation5], 1 }
0x1dcc   :  { %11055 = vsyncpa [#allocation5 + $0x1], 1 }

</bundles_post_ra>
